<compile_context>
chip_gen: v6e
topology: v6e:2x2x1
jax: 0.10.0
libtpu: 0.0.40
codegen_flags: <defaults>
</compile_context>

<pallas_src>
import functools

import numpy as np
import jax
import jax.numpy as jnp
from jax.experimental import pallas as pl
from jax.experimental.pallas import tpu as pltpu

IN_SIZE = 3
HID1 = 16
HID2 = 32
KCONV = 5
OUT1 = 400
OUT2 = 10

# Spatial sizes implied by the module (fc1 in-features = 32*5*5  ->  32x32 input).
H0 = W0 = 32
HO1, WO1 = H0 - KCONV + 1, W0 - KCONV + 1        # 28, 28
HP1, WP1 = HO1 // 2, WO1 // 2                    # 14, 14
HO2, WO2 = HP1 - KCONV + 1, WP1 - KCONV + 1      # 10, 10
HP2, WP2 = HO2 // 2, WO2 // 2                    # 5, 5

ROWS4 = H0 // 4                                  # 8 rows per mod-4 plane (= one sublane tile)
NOUT_PAD = 128                                   # lane-dense padded logits width
B_BLK = 16                                       # images per grid step (conv matmul M = 8*B_BLK)


# ----------------------------- fused Pallas kernel (bb images per grid step) -----------------------------

def _convnet_kernel(x_ref, wb1_ref, b1_ref, wb2_ref, b2_ref,
                    wfc1_ref, bfc1_ref, wfc2_ref, bfc2_ref, o_ref, a1_scr, *, bb):
    f32, bf16 = jnp.float32, jnp.bfloat16
    n1 = WO1 * HID1            # 448  conv1 lane width (pre width-pool)
    half1 = WP1 * HID1         # 224
    n2 = WO2 * HID2            # 320  conv2 lane width (pre width-pool)
    half2 = WP2 * HID2         # 160

    # Keep the per-image padding row (row 8b+7) of the conv2-input scratch finite/deterministic.
    a1_scr[...] = jnp.zeros(a1_scr.shape, a1_scr.dtype)

    # -------- layer 1: conv5x5 (folded BN) + ReLU + maxpool2x2, batched over bb images --------
    # x_ref block: (4, bb*8, 96) bf16; plane m, row 8b+j holds image-b row  m + 4j  (NHWC, W*C flat).
    planes = [x_ref[m] for m in range(4)]                                  # 4 x (bb*8, 96) bf16

    def conv1_group(a):
        # conv-output rows a, a+4, ..., a+24 of every image  ->  (bb, 7, 448) f32
        acc = None
        for kh in range(KCONV):
            m, off = (a + kh) % 4, (a + kh) // 4                           # off in {0, 1}
            y = jnp.dot(planes[m], wb1_ref[kh], preferred_element_type=f32)  # (bb*8, 448)
            y = y.reshape(bb, ROWS4, n1)[:, off:off + 7, :]                # tile-aligned split
            acc = y if acc is None else acc + y
        return acc

    r0, r1, r2, r3 = conv1_group(0), conv1_group(1), conv1_group(2), conv1_group(3)

    def pool1(lo, hi):
        m_ = jnp.maximum(lo, hi)                                           # height pool  (bb, 7, 448)
        m_ = jnp.maximum(m_[:, :, :half1], m_[:, :, half1:])               # width pool   (bb, 7, 224)
        return jnp.maximum(m_ + b1_ref[...], 0.0)                          # folded-BN bias + ReLU

    a_even = pool1(r0, r1)                                                 # pooled rows 0,2,...,12
    a_odd = pool1(r2, r3)                                                  # pooled rows 1,3,...,13

    # Stage pooled maps with 8 rows per image (row 7 stays zero) so conv2's LHS is a dense 2-D slab.
    for b in range(bb):
        a1_scr[0, 8 * b:8 * b + 7, :] = a_even[b]
        a1_scr[1, 8 * b:8 * b + 7, :] = a_odd[b]

    # -------- layer 2: conv5x5 (folded BN) + ReLU + maxpool2x2 --------
    p_planes = [a1_scr[0].astype(bf16), a1_scr[1].astype(bf16)]            # 2 x (bb*8, 224) bf16

    def conv2_group(a):
        # conv-output rows a, a+2, ..., a+8 of every image  ->  (bb, 5, 320) f32
        acc = None
        for kh in range(KCONV):
            m, off = (a + kh) % 2, (a + kh) // 2                           # off in {0, 1, 2}
            z = jnp.dot(p_planes[m], wb2_ref[kh], preferred_element_type=f32)  # (bb*8, 320)
            z = z.reshape(bb, 8, n2)[:, off:off + 5, :]                    # never touches pad row 7
            acc = z if acc is None else acc + z
        return acc

    m2 = jnp.maximum(conv2_group(0), conv2_group(1))                       # height pool (bb, 5, 320)
    m2 = jnp.maximum(m2[:, :, :half2], m2[:, :, half2:])                   # width pool  (bb, 5, 160)
    a2 = jnp.maximum(m2 + b2_ref[...], 0.0)                                # (bb, 5, 160) f32

    # -------- FC head: fc1 + ReLU + (Dropout eval = identity) + fc2 (lane-padded) + log_softmax --------
    h = None
    for r in range(HP2):
        row = jnp.sum(a2[:, r:r + 1, :], axis=1).astype(bf16)              # (bb, 160)
        t = jnp.dot(row, wfc1_ref[r], preferred_element_type=f32)          # (bb, 400)
        h = t if h is None else h + t
    h = jnp.maximum(h + bfc1_ref[...], 0.0)                                # (bb, 400) f32
    z = jnp.dot(h.astype(bf16), wfc2_ref[...], preferred_element_type=f32) + bfc2_ref[...]  # (bb, 128)
    zmax = jnp.max(z, axis=-1, keepdims=True)
    lse = jnp.log(jnp.sum(jnp.exp(z - zmax), axis=-1, keepdims=True)) + zmax
    o_ref[...] = z - lse                                                   # pad lanes ~ -1e30, sliced off outside


# ----------------------------- one-time parameter preparation -----------------------------

def _banded_conv_weight(w_oihw, scale, w_in):
    """(Cout,Cin,KH,KW) conv weight -> (KH, w_in*Cin, Wo*Cout) banded matmul weights.

    Row index = input_w*Cin + ci.  Output-column blocks are permuted to [even w | odd w] so the
    fused 2x2 width-pool is a max of the two contiguous column halves.  BN scale folded in; bf16.
    """
    cout, cin, kh_, kw_ = w_oihw.shape
    wo = w_in - kw_ + 1
    wp = wo // 2
    w = jnp.transpose(w_oihw, (2, 3, 1, 0)) * scale[None, None, None, :]   # (KH, KW, Cin, Cout)
    place = np.zeros((kw_, wo, w_in), np.float32)       # place[kw, j, j+kw] = 1
    for kw in range(kw_):
        for j in range(wo):
            place[kw, j, j + kw] = 1.0
    perm = np.zeros((wo, wo), np.float32)               # column-block permutation: even j first
    for j in range(wo):
        q = j // 2 if j % 2 == 0 else wp + j // 2
        perm[j, q] = 1.0
    wb = jnp.einsum("ajr,jq,haio->hriqo", jnp.asarray(place), jnp.asarray(perm), w)
    return wb.reshape(kh_, w_in * cin, wo * cout).astype(jnp.bfloat16)


def prepare_params(p, eps=1e-5):
    """Fold BatchNorm, build banded conv weights, permute fc1 rows, pad fc2 to 128 lanes.  Done once."""
    s1 = p["g1"] / jnp.sqrt(p["v1"] + eps)
    s2 = p["g2"] / jnp.sqrt(p["v2"] + eps)
    wfc1 = jnp.transpose(p["w_fc1"].reshape(HID2, HP2, WP2, OUT1), (1, 2, 0, 3))
    wfc2 = jnp.zeros((OUT1, NOUT_PAD), jnp.float32).at[:, :OUT2].set(p["w_fc2"])
    bfc2 = jnp.full((1, NOUT_PAD), -1e30, jnp.float32).at[0, :OUT2].set(p["b_fc2"])
    return {
        "wb1": _banded_conv_weight(p["w1"], s1, W0),                        # (5, 96, 448) bf16
        "b1": jnp.tile((p["b1"] - p["m1"]) * s1 + p["be1"], WP1)[None, :].astype(jnp.float32),   # (1, 224)
        "wb2": _banded_conv_weight(p["w2"], s2, WP1),                       # (5, 224, 320) bf16
        "b2": jnp.tile((p["b2"] - p["m2"]) * s2 + p["be2"], WP2)[None, :].astype(jnp.float32),   # (1, 160)
        # fc1 rows re-ordered from PyTorch NCHW-flatten order (c*25+h*5+w) to (h, w*C+c):
        "wfc1": wfc1.reshape(HP2, WP2 * HID2, OUT1).astype(jnp.bfloat16),   # (5, 160, 400) bf16
        "bfc1": p["b_fc1"][None, :].astype(jnp.float32),                    # (1, 400)
        "wfc2": wfc2.astype(jnp.bfloat16),                                  # (400, 128) bf16, cols >=10 are 0
        "bfc2": bfc2,                                                       # (1, 128) f32, lanes >=10 are -1e30
    }


# ----------------------------- forward -----------------------------

def _round_up(x, m):
    return (x + m - 1) // m * m


def convnet_forward(x_nchw, kp):
    n = x_nchw.shape[0]
    assert x_nchw.shape[1:] == (IN_SIZE, H0, W0)

    bb = min(B_BLK, _round_up(n, 8))                 # images per grid step
    n_pad = _round_up(n, bb)                         # pad batch so the last step stays in bounds
    x = x_nchw
    if n_pad != n:
        x = jnp.pad(x, ((0, n_pad - n), (0, 0), (0, 0), (0, 0)))

    # NCHW -> NHWC -> (N, H, W*C) -> split rows by (row mod 4) -> (4, N*8, W*C), cast to bf16 once.
    x = jnp.transpose(x, (0, 2, 3, 1)).reshape(n_pad, H0, W0 * IN_SIZE)
    x = jnp.transpose(x.reshape(n_pad, ROWS4, 4, W0 * IN_SIZE), (2, 0, 1, 3))
    x = x.reshape(4, n_pad * ROWS4, W0 * IN_SIZE).astype(jnp.bfloat16)

    def const_spec(shape):
        return pl.BlockSpec(shape, lambda i, _n=len(shape): (0,) * _n)

    # Advisory cost estimate (banded-matmul FLOPs; helps XLA schedule around the custom call).
    flops_per_img = (4 * KCONV * ROWS4 * (W0 * IN_SIZE) * (WO1 * HID1) * 2
                     + 2 * KCONV * ROWS4 * (WP1 * HID1) * (WO2 * HID2) * 2
                     + HP2 * (WP2 * HID2) * OUT1 * 2
                     + OUT1 * NOUT_PAD * 2)
    weight_bytes = sum(int(v.size) * v.dtype.itemsize for v in kp.values())
    cost = pl.CostEstimate(
        flops=int(flops_per_img * n_pad),
        transcendentals=int(n_pad * (NOUT_PAD + 2)),
        bytes_accessed=int(x.size) * 2 + n_pad * NOUT_PAD * 4 + weight_bytes)

    kernel = functools.partial(_convnet_kernel, bb=bb)
    out = pl.pallas_call(
        kernel,
        out_shape=jax.ShapeDtypeStruct((n_pad, NOUT_PAD), jnp.float32),
        grid=(n_pad // bb,),
        in_specs=[
            pl.BlockSpec((4, bb * ROWS4, W0 * IN_SIZE), lambda i: (0, i, 0)),  # x (bf16)
            const_spec((KCONV, W0 * IN_SIZE, WO1 * HID1)),   # wb1
            const_spec((1, WP1 * HID1)),                     # b1
            const_spec((KCONV, WP1 * HID1, WO2 * HID2)),     # wb2
            const_spec((1, WP2 * HID2)),                     # b2
            const_spec((HP2, WP2 * HID2, OUT1)),             # wfc1
            const_spec((1, OUT1)),                           # bfc1
            const_spec((OUT1, NOUT_PAD)),                    # wfc2 (lane-padded)
            const_spec((1, NOUT_PAD)),                       # bfc2 (lane-padded)
        ],
        out_specs=pl.BlockSpec((bb, NOUT_PAD), lambda i: (i, 0)),
        scratch_shapes=[pltpu.VMEM((2, bb * ROWS4, WP1 * HID1), jnp.float32)],
        compiler_params=pltpu.CompilerParams(
            dimension_semantics=("parallel",),
            vmem_limit_bytes=32 * 1024 * 1024),
        cost_estimate=cost,
    )(x, kp["wb1"], kp["b1"], kp["wb2"], kp["b2"],
      kp["wfc1"], kp["bfc1"], kp["wfc2"], kp["bfc2"])
    return out[:n, :OUT2]


# ----------------------------- pure-JAX reference (eval-mode) -----------------------------

def convnet_reference(x_nchw, p, eps=1e-5):
    x = jnp.transpose(x_nchw, (0, 2, 3, 1))

    def conv_block(x, w, b, g, be, m, v):
        y = jax.lax.conv_general_dilated(
            x, jnp.transpose(w, (2, 3, 1, 0)), (1, 1), "VALID",
            dimension_numbers=("NHWC", "HWIO", "NHWC")) + b
        y = (y - m) * (g / jnp.sqrt(v + eps)) + be
        y = jnp.maximum(y, 0.0)
        n, hh, ww, c = y.shape
        return y.reshape(n, hh // 2, 2, ww // 2, 2, c).max(axis=(2, 4))

    y = conv_block(x, p["w1"], p["b1"], p["g1"], p["be1"], p["m1"], p["v1"])
    y = conv_block(y, p["w2"], p["b2"], p["g2"], p["be2"], p["m2"], p["v2"])
    n = y.shape[0]
    y = jnp.transpose(y, (0, 3, 1, 2)).reshape(n, -1)
    y = jnp.maximum(y @ p["w_fc1"] + p["b_fc1"], 0.0)
    z = y @ p["w_fc2"] + p["b_fc2"]
    return jax.nn.log_softmax(z, axis=-1)


# ----------------------------- params / main -----------------------------

def init_params(key):
    ks = jax.random.split(key, 16)
    f32 = jnp.float32
    return {
        "w1": jax.random.normal(ks[0], (HID1, IN_SIZE, KCONV, KCONV), f32) * (IN_SIZE * KCONV * KCONV) ** -0.5,
        "b1": jax.random.normal(ks[1], (HID1,), f32) * 0.1,
        "g1": 1.0 + 0.1 * jax.random.normal(ks[8], (HID1,), f32),
        "be1": 0.1 * jax.random.normal(ks[9], (HID1,), f32),
        "m1": 0.1 * jax.random.normal(ks[10], (HID1,), f32),
        "v1": jax.random.uniform(ks[11], (HID1,), f32, 0.5, 1.5),
        "w2": jax.random.normal(ks[2], (HID2, HID1, KCONV, KCONV), f32) * (HID1 * KCONV * KCONV) ** -0.5,
        "b2": jax.random.normal(ks[3], (HID2,), f32) * 0.1,
        "g2": 1.0 + 0.1 * jax.random.normal(ks[12], (HID2,), f32),
        "be2": 0.1 * jax.random.normal(ks[13], (HID2,), f32),
        "m2": 0.1 * jax.random.normal(ks[14], (HID2,), f32),
        "v2": jax.random.uniform(ks[15], (HID2,), f32, 0.5, 1.5),
        "w_fc1": jax.random.normal(ks[4], (HID2 * KCONV * KCONV, OUT1), f32) * (HID2 * KCONV * KCONV) ** -0.5,
        "b_fc1": jax.random.normal(ks[5], (OUT1,), f32) * 0.1,
        "w_fc2": jax.random.normal(ks[6], (OUT1, OUT2), f32) * OUT1 ** -0.5,
        "b_fc2": jax.random.normal(ks[7], (OUT2,), f32) * 0.1,
    }


if __name__ == "__main__":
    key = jax.random.PRNGKey(0)
    k_x, k_p = jax.random.split(key)
    # input spatial must be 32x32 so that hid2_size * 5 * 5 = 800 matches the flatten
    x = jax.random.normal(k_x, (2, IN_SIZE, H0, W0), jnp.float32)
    params = init_params(k_p)
    kparams = prepare_params(params)        # one-time weight prep, outside the hot path

    fwd = jax.jit(convnet_forward)
    logp = fwd(x, kparams)
    jax.block_until_ready(logp)

    assert logp.shape == (2, OUT2)
    assert bool(jnp.all(jnp.isfinite(logp)))
    # rows of log_softmax must sum (in prob space) to ~1
    assert bool(jnp.allclose(jnp.sum(jnp.exp(logp), axis=-1), 1.0, atol=1e-4))
    # loose tolerance: kernel uses bf16 MXU inputs with f32 accumulation
    ref = convnet_reference(x, params)
    assert bool(jnp.allclose(logp, ref, atol=2e-1)), "kernel output diverges from reference"
    print("KERNEL_OK")
</pallas_src>

<mosaic_0001>
module attributes {stable_mosaic.version = 11 : i64} {
  func.func @_convnet_kernel(%arg0: i32, %arg1: memref<4x64x96xbf16, #tpu.memory_space<vmem>>, %arg2: memref<5x96x448xbf16, #tpu.memory_space<vmem>>, %arg3: memref<1x224xf32, #tpu.memory_space<vmem>>, %arg4: memref<5x224x320xbf16, #tpu.memory_space<vmem>>, %arg5: memref<1x160xf32, #tpu.memory_space<vmem>>, %arg6: memref<5x160x400xbf16, #tpu.memory_space<vmem>>, %arg7: memref<1x400xf32, #tpu.memory_space<vmem>>, %arg8: memref<400x128xbf16, #tpu.memory_space<vmem>>, %arg9: memref<1x128xf32, #tpu.memory_space<vmem>>, %arg10: memref<8x128xf32, #tpu.memory_space<vmem>>, %arg11: memref<2x64x224xf32, #tpu.memory_space<vmem>>) attributes {dimension_semantics = [#tpu.dimension_semantics<parallel>], iteration_bounds = array<i64: 1>, scalar_prefetch = 0 : i64, scratch_operands = 1 : i64, tpu.core_type = #tpu.core_type<tc>, window_params = [{transform_indices = @transform_0, window_bounds = array<i64: 4, 64, 96>}, {pipeline_mode = #tpu.pipeline_mode<synchronous>, transform_indices = @transform_1, window_bounds = array<i64: 5, 96, 448>}, {pipeline_mode = #tpu.pipeline_mode<synchronous>, transform_indices = @transform_2, window_bounds = array<i64: 1, 224>}, {pipeline_mode = #tpu.pipeline_mode<synchronous>, transform_indices = @transform_3, window_bounds = array<i64: 5, 224, 320>}, {pipeline_mode = #tpu.pipeline_mode<synchronous>, transform_indices = @transform_4, window_bounds = array<i64: 1, 160>}, {pipeline_mode = #tpu.pipeline_mode<synchronous>, transform_indices = @transform_5, window_bounds = array<i64: 5, 160, 400>}, {pipeline_mode = #tpu.pipeline_mode<synchronous>, transform_indices = @transform_6, window_bounds = array<i64: 1, 400>}, {pipeline_mode = #tpu.pipeline_mode<synchronous>, transform_indices = @transform_7, window_bounds = array<i64: 400, 128>}, {pipeline_mode = #tpu.pipeline_mode<synchronous>, transform_indices = @transform_8, window_bounds = array<i64: 1, 128>}, {transform_indices = @transform_9, window_bounds = array<i64: 8, 128>}]} {
    %cst = arith.constant 0.000000e+00 : f32
    %0 = vector.broadcast %cst : f32 to vector<2x64x224xf32>
    %c0 = arith.constant 0 : index
    %c0_0 = arith.constant 0 : index
    %c0_1 = arith.constant 0 : index
    %1 = vector.load %arg11[%c0, %c0_0, %c0_1] : memref<2x64x224xf32, #tpu.memory_space<vmem>>, vector<2x64x224xf32>
    tpu.vector_store %arg11[%c0, %c0_0, %c0_1], %0 {strides = array<i32>} : memref<2x64x224xf32, #tpu.memory_space<vmem>>, vector<2x64x224xf32>,
    %c0_2 = arith.constant 0 : index
    %c0_3 = arith.constant 0 : index
    %c0_4 = arith.constant 0 : index
    %2 = vector.load %arg1[%c0_2, %c0_3, %c0_4] : memref<4x64x96xbf16, #tpu.memory_space<vmem>>, vector<1x64x96xbf16>
    %3 = vector.shape_cast %2 : vector<1x64x96xbf16> to vector<64x96xbf16>
    %c1 = arith.constant 1 : index
    %c0_5 = arith.constant 0 : index
    %c0_6 = arith.constant 0 : index
    %4 = vector.load %arg1[%c1, %c0_5, %c0_6] : memref<4x64x96xbf16, #tpu.memory_space<vmem>>, vector<1x64x96xbf16>
    %5 = vector.shape_cast %4 : vector<1x64x96xbf16> to vector<64x96xbf16>
    %c2 = arith.constant 2 : index
    %c0_7 = arith.constant 0 : index
    %c0_8 = arith.constant 0 : index
    %6 = vector.load %arg1[%c2, %c0_7, %c0_8] : memref<4x64x96xbf16, #tpu.memory_space<vmem>>, vector<1x64x96xbf16>
    %7 = vector.shape_cast %6 : vector<1x64x96xbf16> to vector<64x96xbf16>
    %c3 = arith.constant 3 : index
    %c0_9 = arith.constant 0 : index
    %c0_10 = arith.constant 0 : index
    %8 = vector.load %arg1[%c3, %c0_9, %c0_10] : memref<4x64x96xbf16, #tpu.memory_space<vmem>>, vector<1x64x96xbf16>
    %9 = vector.shape_cast %8 : vector<1x64x96xbf16> to vector<64x96xbf16>
    %c0_11 = arith.constant 0 : index
    %c0_12 = arith.constant 0 : index
    %c0_13 = arith.constant 0 : index
    %10 = vector.load %arg2[%c0_11, %c0_12, %c0_13] : memref<5x96x448xbf16, #tpu.memory_space<vmem>>, vector<1x96x448xbf16>
    %11 = vector.shape_cast %10 : vector<1x96x448xbf16> to vector<96x448xbf16>
    %cst_14 = arith.constant dense<0.000000e+00> : vector<64x448xf32>
    %12 = tpu.matmul %3, %11, %cst_14 {dimension_numbers = #tpu.dot_dimension_numbers<[1], [0], [0], [1], [0, 0, 1, 1], [], []>} : vector<64x96xbf16>, vector<96x448xbf16>, vector<64x448xf32> -> vector<64x448xf32>
    %13 = vector.shape_cast %12 : vector<64x448xf32> to vector<8x8x448xf32>
    %14 = vector.extract_strided_slice %13 {offsets = [0, 0, 0], sizes = [8, 7, 448], strides = [1, 1, 1]} : vector<8x8x448xf32> to vector<8x7x448xf32>
    %c1_15 = arith.constant 1 : index
    %c0_16 = arith.constant 0 : index
    %c0_17 = arith.constant 0 : index
    %15 = vector.load %arg2[%c1_15, %c0_16, %c0_17] : memref<5x96x448xbf16, #tpu.memory_space<vmem>>, vector<1x96x448xbf16>
    %16 = vector.shape_cast %15 : vector<1x96x448xbf16> to vector<96x448xbf16>
    %cst_18 = arith.constant dense<0.000000e+00> : vector<64x448xf32>
    %17 = tpu.matmul %5, %16, %cst_18 {dimension_numbers = #tpu.dot_dimension_numbers<[1], [0], [0], [1], [0, 0, 1, 1], [], []>} : vector<64x96xbf16>, vector<96x448xbf16>, vector<64x448xf32> -> vector<64x448xf32>
    %18 = vector.shape_cast %17 : vector<64x448xf32> to vector<8x8x448xf32>
    %19 = vector.extract_strided_slice %18 {offsets = [0, 0, 0], sizes = [8, 7, 448], strides = [1, 1, 1]} : vector<8x8x448xf32> to vector<8x7x448xf32>
    %20 = arith.addf %14, %19 : vector<8x7x448xf32>
    %c2_19 = arith.constant 2 : index
    %c0_20 = arith.constant 0 : index
    %c0_21 = arith.constant 0 : index
    %21 = vector.load %arg2[%c2_19, %c0_20, %c0_21] : memref<5x96x448xbf16, #tpu.memory_space<vmem>>, vector<1x96x448xbf16>
    %22 = vector.shape_cast %21 : vector<1x96x448xbf16> to vector<96x448xbf16>
    %cst_22 = arith.constant dense<0.000000e+00> : vector<64x448xf32>
    %23 = tpu.matmul %7, %22, %cst_22 {dimension_numbers = #tpu.dot_dimension_numbers<[1], [0], [0], [1], [0, 0, 1, 1], [], []>} : vector<64x96xbf16>, vector<96x448xbf16>, vector<64x448xf32> -> vector<64x448xf32>
    %24 = vector.shape_cast %23 : vector<64x448xf32> to vector<8x8x448xf32>
    %25 = vector.extract_strided_slice %24 {offsets = [0, 0, 0], sizes = [8, 7, 448], strides = [1, 1, 1]} : vector<8x8x448xf32> to vector<8x7x448xf32>
    %26 = arith.addf %20, %25 : vector<8x7x448xf32>
    %c3_23 = arith.constant 3 : index
    %c0_24 = arith.constant 0 : index
    %c0_25 = arith.constant 0 : index
    %27 = vector.load %arg2[%c3_23, %c0_24, %c0_25] : memref<5x96x448xbf16, #tpu.memory_space<vmem>>, vector<1x96x448xbf16>
    %28 = vector.shape_cast %27 : vector<1x96x448xbf16> to vector<96x448xbf16>
    %cst_26 = arith.constant dense<0.000000e+00> : vector<64x448xf32>
    %29 = tpu.matmul %9, %28, %cst_26 {dimension_numbers = #tpu.dot_dimension_numbers<[1], [0], [0], [1], [0, 0, 1, 1], [], []>} : vector<64x96xbf16>, vector<96x448xbf16>, vector<64x448xf32> -> vector<64x448xf32>
    %30 = vector.shape_cast %29 : vector<64x448xf32> to vector<8x8x448xf32>
    %31 = vector.extract_strided_slice %30 {offsets = [0, 0, 0], sizes = [8, 7, 448], strides = [1, 1, 1]} : vector<8x8x448xf32> to vector<8x7x448xf32>
    %32 = arith.addf %26, %31 : vector<8x7x448xf32>
    %c4 = arith.constant 4 : index
    %c0_27 = arith.constant 0 : index
    %c0_28 = arith.constant 0 : index
    %33 = vector.load %arg2[%c4, %c0_27, %c0_28] : memref<5x96x448xbf16, #tpu.memory_space<vmem>>, vector<1x96x448xbf16>
    %34 = vector.shape_cast %33 : vector<1x96x448xbf16> to vector<96x448xbf16>
    %cst_29 = arith.constant dense<0.000000e+00> : vector<64x448xf32>
    %35 = tpu.matmul %3, %34, %cst_29 {dimension_numbers = #tpu.dot_dimension_numbers<[1], [0], [0], [1], [0, 0, 1, 1], [], []>} : vector<64x96xbf16>, vector<96x448xbf16>, vector<64x448xf32> -> vector<64x448xf32>
    %36 = vector.shape_cast %35 : vector<64x448xf32> to vector<8x8x448xf32>
    %37 = vector.extract_strided_slice %36 {offsets = [0, 1, 0], sizes = [8, 7, 448], strides = [1, 1, 1]} : vector<8x8x448xf32> to vector<8x7x448xf32>
    %38 = arith.addf %32, %37 : vector<8x7x448xf32>
    %c0_30 = arith.constant 0 : index
    %c0_31 = arith.constant 0 : index
    %c0_32 = arith.constant 0 : index
    %39 = vector.load %arg2[%c0_30, %c0_31, %c0_32] : memref<5x96x448xbf16, #tpu.memory_space<vmem>>, vector<1x96x448xbf16>
    %40 = vector.shape_cast %39 : vector<1x96x448xbf16> to vector<96x448xbf16>
    %cst_33 = arith.constant dense<0.000000e+00> : vector<64x448xf32>
    %41 = tpu.matmul %5, %40, %cst_33 {dimension_numbers = #tpu.dot_dimension_numbers<[1], [0], [0], [1], [0, 0, 1, 1], [], []>} : vector<64x96xbf16>, vector<96x448xbf16>, vector<64x448xf32> -> vector<64x448xf32>
    %42 = vector.shape_cast %41 : vector<64x448xf32> to vector<8x8x448xf32>
    %43 = vector.extract_strided_slice %42 {offsets = [0, 0, 0], sizes = [8, 7, 448], strides = [1, 1, 1]} : vector<8x8x448xf32> to vector<8x7x448xf32>
    %c1_34 = arith.constant 1 : index
    %c0_35 = arith.constant 0 : index
    %c0_36 = arith.constant 0 : index
    %44 = vector.load %arg2[%c1_34, %c0_35, %c0_36] : memref<5x96x448xbf16, #tpu.memory_space<vmem>>, vector<1x96x448xbf16>
    %45 = vector.shape_cast %44 : vector<1x96x448xbf16> to vector<96x448xbf16>
    %cst_37 = arith.constant dense<0.000000e+00> : vector<64x448xf32>
    %46 = tpu.matmul %7, %45, %cst_37 {dimension_numbers = #tpu.dot_dimension_numbers<[1], [0], [0], [1], [0, 0, 1, 1], [], []>} : vector<64x96xbf16>, vector<96x448xbf16>, vector<64x448xf32> -> vector<64x448xf32>
    %47 = vector.shape_cast %46 : vector<64x448xf32> to vector<8x8x448xf32>
    %48 = vector.extract_strided_slice %47 {offsets = [0, 0, 0], sizes = [8, 7, 448], strides = [1, 1, 1]} : vector<8x8x448xf32> to vector<8x7x448xf32>
    %49 = arith.addf %43, %48 : vector<8x7x448xf32>
    %c2_38 = arith.constant 2 : index
    %c0_39 = arith.constant 0 : index
    %c0_40 = arith.constant 0 : index
    %50 = vector.load %arg2[%c2_38, %c0_39, %c0_40] : memref<5x96x448xbf16, #tpu.memory_space<vmem>>, vector<1x96x448xbf16>
    %51 = vector.shape_cast %50 : vector<1x96x448xbf16> to vector<96x448xbf16>
    %cst_41 = arith.constant dense<0.000000e+00> : vector<64x448xf32>
    %52 = tpu.matmul %9, %51, %cst_41 {dimension_numbers = #tpu.dot_dimension_numbers<[1], [0], [0], [1], [0, 0, 1, 1], [], []>} : vector<64x96xbf16>, vector<96x448xbf16>, vector<64x448xf32> -> vector<64x448xf32>
    %53 = vector.shape_cast %52 : vector<64x448xf32> to vector<8x8x448xf32>
    %54 = vector.extract_strided_slice %53 {offsets = [0, 0, 0], sizes = [8, 7, 448], strides = [1, 1, 1]} : vector<8x8x448xf32> to vector<8x7x448xf32>
    %55 = arith.addf %49, %54 : vector<8x7x448xf32>
    %c3_42 = arith.constant 3 : index
    %c0_43 = arith.constant 0 : index
    %c0_44 = arith.constant 0 : index
    %56 = vector.load %arg2[%c3_42, %c0_43, %c0_44] : memref<5x96x448xbf16, #tpu.memory_space<vmem>>, vector<1x96x448xbf16>
    %57 = vector.shape_cast %56 : vector<1x96x448xbf16> to vector<96x448xbf16>
    %cst_45 = arith.constant dense<0.000000e+00> : vector<64x448xf32>
    %58 = tpu.matmul %3, %57, %cst_45 {dimension_numbers = #tpu.dot_dimension_numbers<[1], [0], [0], [1], [0, 0, 1, 1], [], []>} : vector<64x96xbf16>, vector<96x448xbf16>, vector<64x448xf32> -> vector<64x448xf32>
    %59 = vector.shape_cast %58 : vector<64x448xf32> to vector<8x8x448xf32>
    %60 = vector.extract_strided_slice %59 {offsets = [0, 1, 0], sizes = [8, 7, 448], strides = [1, 1, 1]} : vector<8x8x448xf32> to vector<8x7x448xf32>
    %61 = arith.addf %55, %60 : vector<8x7x448xf32>
    %c4_46 = arith.constant 4 : index
    %c0_47 = arith.constant 0 : index
    %c0_48 = arith.constant 0 : index
    %62 = vector.load %arg2[%c4_46, %c0_47, %c0_48] : memref<5x96x448xbf16, #tpu.memory_space<vmem>>, vector<1x96x448xbf16>
    %63 = vector.shape_cast %62 : vector<1x96x448xbf16> to vector<96x448xbf16>
    %cst_49 = arith.constant dense<0.000000e+00> : vector<64x448xf32>
    %64 = tpu.matmul %5, %63, %cst_49 {dimension_numbers = #tpu.dot_dimension_numbers<[1], [0], [0], [1], [0, 0, 1, 1], [], []>} : vector<64x96xbf16>, vector<96x448xbf16>, vector<64x448xf32> -> vector<64x448xf32>
    %65 = vector.shape_cast %64 : vector<64x448xf32> to vector<8x8x448xf32>
    %66 = vector.extract_strided_slice %65 {offsets = [0, 1, 0], sizes = [8, 7, 448], strides = [1, 1, 1]} : vector<8x8x448xf32> to vector<8x7x448xf32>
    %67 = arith.addf %61, %66 : vector<8x7x448xf32>
    %c0_50 = arith.constant 0 : index
    %c0_51 = arith.constant 0 : index
    %c0_52 = arith.constant 0 : index
    %68 = vector.load %arg2[%c0_50, %c0_51, %c0_52] : memref<5x96x448xbf16, #tpu.memory_space<vmem>>, vector<1x96x448xbf16>
    %69 = vector.shape_cast %68 : vector<1x96x448xbf16> to vector<96x448xbf16>
    %cst_53 = arith.constant dense<0.000000e+00> : vector<64x448xf32>
    %70 = tpu.matmul %7, %69, %cst_53 {dimension_numbers = #tpu.dot_dimension_numbers<[1], [0], [0], [1], [0, 0, 1, 1], [], []>} : vector<64x96xbf16>, vector<96x448xbf16>, vector<64x448xf32> -> vector<64x448xf32>
    %71 = vector.shape_cast %70 : vector<64x448xf32> to vector<8x8x448xf32>
    %72 = vector.extract_strided_slice %71 {offsets = [0, 0, 0], sizes = [8, 7, 448], strides = [1, 1, 1]} : vector<8x8x448xf32> to vector<8x7x448xf32>
    %c1_54 = arith.constant 1 : index
    %c0_55 = arith.constant 0 : index
    %c0_56 = arith.constant 0 : index
    %73 = vector.load %arg2[%c1_54, %c0_55, %c0_56] : memref<5x96x448xbf16, #tpu.memory_space<vmem>>, vector<1x96x448xbf16>
    %74 = vector.shape_cast %73 : vector<1x96x448xbf16> to vector<96x448xbf16>
    %cst_57 = arith.constant dense<0.000000e+00> : vector<64x448xf32>
    %75 = tpu.matmul %9, %74, %cst_57 {dimension_numbers = #tpu.dot_dimension_numbers<[1], [0], [0], [1], [0, 0, 1, 1], [], []>} : vector<64x96xbf16>, vector<96x448xbf16>, vector<64x448xf32> -> vector<64x448xf32>
    %76 = vector.shape_cast %75 : vector<64x448xf32> to vector<8x8x448xf32>
    %77 = vector.extract_strided_slice %76 {offsets = [0, 0, 0], sizes = [8, 7, 448], strides = [1, 1, 1]} : vector<8x8x448xf32> to vector<8x7x448xf32>
    %78 = arith.addf %72, %77 : vector<8x7x448xf32>
    %c2_58 = arith.constant 2 : index
    %c0_59 = arith.constant 0 : index
    %c0_60 = arith.constant 0 : index
    %79 = vector.load %arg2[%c2_58, %c0_59, %c0_60] : memref<5x96x448xbf16, #tpu.memory_space<vmem>>, vector<1x96x448xbf16>
    %80 = vector.shape_cast %79 : vector<1x96x448xbf16> to vector<96x448xbf16>
    %cst_61 = arith.constant dense<0.000000e+00> : vector<64x448xf32>
    %81 = tpu.matmul %3, %80, %cst_61 {dimension_numbers = #tpu.dot_dimension_numbers<[1], [0], [0], [1], [0, 0, 1, 1], [], []>} : vector<64x96xbf16>, vector<96x448xbf16>, vector<64x448xf32> -> vector<64x448xf32>
    %82 = vector.shape_cast %81 : vector<64x448xf32> to vector<8x8x448xf32>
    %83 = vector.extract_strided_slice %82 {offsets = [0, 1, 0], sizes = [8, 7, 448], strides = [1, 1, 1]} : vector<8x8x448xf32> to vector<8x7x448xf32>
    %84 = arith.addf %78, %83 : vector<8x7x448xf32>
    %c3_62 = arith.constant 3 : index
    %c0_63 = arith.constant 0 : index
    %c0_64 = arith.constant 0 : index
    %85 = vector.load %arg2[%c3_62, %c0_63, %c0_64] : memref<5x96x448xbf16, #tpu.memory_space<vmem>>, vector<1x96x448xbf16>
    %86 = vector.shape_cast %85 : vector<1x96x448xbf16> to vector<96x448xbf16>
    %cst_65 = arith.constant dense<0.000000e+00> : vector<64x448xf32>
    %87 = tpu.matmul %5, %86, %cst_65 {dimension_numbers = #tpu.dot_dimension_numbers<[1], [0], [0], [1], [0, 0, 1, 1], [], []>} : vector<64x96xbf16>, vector<96x448xbf16>, vector<64x448xf32> -> vector<64x448xf32>
    %88 = vector.shape_cast %87 : vector<64x448xf32> to vector<8x8x448xf32>
    %89 = vector.extract_strided_slice %88 {offsets = [0, 1, 0], sizes = [8, 7, 448], strides = [1, 1, 1]} : vector<8x8x448xf32> to vector<8x7x448xf32>
    %90 = arith.addf %84, %89 : vector<8x7x448xf32>
    %c4_66 = arith.constant 4 : index
    %c0_67 = arith.constant 0 : index
    %c0_68 = arith.constant 0 : index
    %91 = vector.load %arg2[%c4_66, %c0_67, %c0_68] : memref<5x96x448xbf16, #tpu.memory_space<vmem>>, vector<1x96x448xbf16>
    %92 = vector.shape_cast %91 : vector<1x96x448xbf16> to vector<96x448xbf16>
    %cst_69 = arith.constant dense<0.000000e+00> : vector<64x448xf32>
    %93 = tpu.matmul %7, %92, %cst_69 {dimension_numbers = #tpu.dot_dimension_numbers<[1], [0], [0], [1], [0, 0, 1, 1], [], []>} : vector<64x96xbf16>, vector<96x448xbf16>, vector<64x448xf32> -> vector<64x448xf32>
    %94 = vector.shape_cast %93 : vector<64x448xf32> to vector<8x8x448xf32>
    %95 = vector.extract_strided_slice %94 {offsets = [0, 1, 0], sizes = [8, 7, 448], strides = [1, 1, 1]} : vector<8x8x448xf32> to vector<8x7x448xf32>
    %96 = arith.addf %90, %95 : vector<8x7x448xf32>
    %c0_70 = arith.constant 0 : index
    %c0_71 = arith.constant 0 : index
    %c0_72 = arith.constant 0 : index
    %97 = vector.load %arg2[%c0_70, %c0_71, %c0_72] : memref<5x96x448xbf16, #tpu.memory_space<vmem>>, vector<1x96x448xbf16>
    %98 = vector.shape_cast %97 : vector<1x96x448xbf16> to vector<96x448xbf16>
    %cst_73 = arith.constant dense<0.000000e+00> : vector<64x448xf32>
    %99 = tpu.matmul %9, %98, %cst_73 {dimension_numbers = #tpu.dot_dimension_numbers<[1], [0], [0], [1], [0, 0, 1, 1], [], []>} : vector<64x96xbf16>, vector<96x448xbf16>, vector<64x448xf32> -> vector<64x448xf32>
    %100 = vector.shape_cast %99 : vector<64x448xf32> to vector<8x8x448xf32>
    %101 = vector.extract_strided_slice %100 {offsets = [0, 0, 0], sizes = [8, 7, 448], strides = [1, 1, 1]} : vector<8x8x448xf32> to vector<8x7x448xf32>
    %c1_74 = arith.constant 1 : index
    %c0_75 = arith.constant 0 : index
    %c0_76 = arith.constant 0 : index
    %102 = vector.load %arg2[%c1_74, %c0_75, %c0_76] : memref<5x96x448xbf16, #tpu.memory_space<vmem>>, vector<1x96x448xbf16>
    %103 = vector.shape_cast %102 : vector<1x96x448xbf16> to vector<96x448xbf16>
    %cst_77 = arith.constant dense<0.000000e+00> : vector<64x448xf32>
    %104 = tpu.matmul %3, %103, %cst_77 {dimension_numbers = #tpu.dot_dimension_numbers<[1], [0], [0], [1], [0, 0, 1, 1], [], []>} : vector<64x96xbf16>, vector<96x448xbf16>, vector<64x448xf32> -> vector<64x448xf32>
    %105 = vector.shape_cast %104 : vector<64x448xf32> to vector<8x8x448xf32>
    %106 = vector.extract_strided_slice %105 {offsets = [0, 1, 0], sizes = [8, 7, 448], strides = [1, 1, 1]} : vector<8x8x448xf32> to vector<8x7x448xf32>
    %107 = arith.addf %101, %106 : vector<8x7x448xf32>
    %c2_78 = arith.constant 2 : index
    %c0_79 = arith.constant 0 : index
    %c0_80 = arith.constant 0 : index
    %108 = vector.load %arg2[%c2_78, %c0_79, %c0_80] : memref<5x96x448xbf16, #tpu.memory_space<vmem>>, vector<1x96x448xbf16>
    %109 = vector.shape_cast %108 : vector<1x96x448xbf16> to vector<96x448xbf16>
    %cst_81 = arith.constant dense<0.000000e+00> : vector<64x448xf32>
    %110 = tpu.matmul %5, %109, %cst_81 {dimension_numbers = #tpu.dot_dimension_numbers<[1], [0], [0], [1], [0, 0, 1, 1], [], []>} : vector<64x96xbf16>, vector<96x448xbf16>, vector<64x448xf32> -> vector<64x448xf32>
    %111 = vector.shape_cast %110 : vector<64x448xf32> to vector<8x8x448xf32>
    %112 = vector.extract_strided_slice %111 {offsets = [0, 1, 0], sizes = [8, 7, 448], strides = [1, 1, 1]} : vector<8x8x448xf32> to vector<8x7x448xf32>
    %113 = arith.addf %107, %112 : vector<8x7x448xf32>
    %c3_82 = arith.constant 3 : index
    %c0_83 = arith.constant 0 : index
    %c0_84 = arith.constant 0 : index
    %114 = vector.load %arg2[%c3_82, %c0_83, %c0_84] : memref<5x96x448xbf16, #tpu.memory_space<vmem>>, vector<1x96x448xbf16>
    %115 = vector.shape_cast %114 : vector<1x96x448xbf16> to vector<96x448xbf16>
    %cst_85 = arith.constant dense<0.000000e+00> : vector<64x448xf32>
    %116 = tpu.matmul %7, %115, %cst_85 {dimension_numbers = #tpu.dot_dimension_numbers<[1], [0], [0], [1], [0, 0, 1, 1], [], []>} : vector<64x96xbf16>, vector<96x448xbf16>, vector<64x448xf32> -> vector<64x448xf32>
    %117 = vector.shape_cast %116 : vector<64x448xf32> to vector<8x8x448xf32>
    %118 = vector.extract_strided_slice %117 {offsets = [0, 1, 0], sizes = [8, 7, 448], strides = [1, 1, 1]} : vector<8x8x448xf32> to vector<8x7x448xf32>
    %119 = arith.addf %113, %118 : vector<8x7x448xf32>
    %c4_86 = arith.constant 4 : index
    %c0_87 = arith.constant 0 : index
    %c0_88 = arith.constant 0 : index
    %120 = vector.load %arg2[%c4_86, %c0_87, %c0_88] : memref<5x96x448xbf16, #tpu.memory_space<vmem>>, vector<1x96x448xbf16>
    %121 = vector.shape_cast %120 : vector<1x96x448xbf16> to vector<96x448xbf16>
    %cst_89 = arith.constant dense<0.000000e+00> : vector<64x448xf32>
    %122 = tpu.matmul %9, %121, %cst_89 {dimension_numbers = #tpu.dot_dimension_numbers<[1], [0], [0], [1], [0, 0, 1, 1], [], []>} : vector<64x96xbf16>, vector<96x448xbf16>, vector<64x448xf32> -> vector<64x448xf32>
    %123 = vector.shape_cast %122 : vector<64x448xf32> to vector<8x8x448xf32>
    %124 = vector.extract_strided_slice %123 {offsets = [0, 1, 0], sizes = [8, 7, 448], strides = [1, 1, 1]} : vector<8x8x448xf32> to vector<8x7x448xf32>
    %125 = arith.addf %119, %124 : vector<8x7x448xf32>
    %126 = arith.maximumf %38, %67 : vector<8x7x448xf32>
    %127 = vector.extract_strided_slice %126 {offsets = [0, 0, 0], sizes = [8, 7, 224], strides = [1, 1, 1]} : vector<8x7x448xf32> to vector<8x7x224xf32>
    %128 = vector.extract_strided_slice %126 {offsets = [0, 0, 224], sizes = [8, 7, 224], strides = [1, 1, 1]} : vector<8x7x448xf32> to vector<8x7x224xf32>
    %129 = arith.maximumf %127, %128 : vector<8x7x224xf32>
    %c0_90 = arith.constant 0 : index
    %c0_91 = arith.constant 0 : index
    %130 = vector.load %arg3[%c0_90, %c0_91] : memref<1x224xf32, #tpu.memory_space<vmem>>, vector<1x224xf32>
    %131 = vector.shape_cast %130 : vector<1x224xf32> to vector<1x1x224xf32>
    %132 = vector.broadcast %131 : vector<1x1x224xf32> to vector<8x7x224xf32>
    %133 = arith.addf %129, %132 : vector<8x7x224xf32>
    %cst_92 = arith.constant 0.000000e+00 : f32
    %134 = vector.broadcast %cst_92 : f32 to vector<8x7x224xf32>
    %135 = arith.maximumf %133, %134 : vector<8x7x224xf32>
    %136 = arith.maximumf %96, %125 : vector<8x7x448xf32>
    %137 = vector.extract_strided_slice %136 {offsets = [0, 0, 0], sizes = [8, 7, 224], strides = [1, 1, 1]} : vector<8x7x448xf32> to vector<8x7x224xf32>
    %138 = vector.extract_strided_slice %136 {offsets = [0, 0, 224], sizes = [8, 7, 224], strides = [1, 1, 1]} : vector<8x7x448xf32> to vector<8x7x224xf32>
    %139 = arith.maximumf %137, %138 : vector<8x7x224xf32>
    %c0_93 = arith.constant 0 : index
    %c0_94 = arith.constant 0 : index
    %140 = vector.load %arg3[%c0_93, %c0_94] : memref<1x224xf32, #tpu.memory_space<vmem>>, vector<1x224xf32>
    %141 = vector.shape_cast %140 : vector<1x224xf32> to vector<1x1x224xf32>
    %142 = vector.broadcast %141 : vector<1x1x224xf32> to vector<8x7x224xf32>
    %143 = arith.addf %139, %142 : vector<8x7x224xf32>
    %cst_95 = arith.constant 0.000000e+00 : f32
    %144 = vector.broadcast %cst_95 : f32 to vector<8x7x224xf32>
    %145 = arith.maximumf %143, %144 : vector<8x7x224xf32>
    %146 = vector.extract_strided_slice %135 {offsets = [0, 0, 0], sizes = [1, 7, 224], strides = [1, 1, 1]} : vector<8x7x224xf32> to vector<1x7x224xf32>
    %147 = vector.shape_cast %146 : vector<1x7x224xf32> to vector<7x224xf32>
    %c0_96 = arith.constant 0 : index
    %c0_97 = arith.constant 0 : index
    %c0_98 = arith.constant 0 : index
    %148 = vector.load %arg11[%c0_96, %c0_97, %c0_98] : memref<2x64x224xf32, #tpu.memory_space<vmem>>, vector<1x7x224xf32>
    %149 = vector.shape_cast %148 : vector<1x7x224xf32> to vector<7x224xf32>
    %150 = vector.shape_cast %147 : vector<7x224xf32> to vector<1x7x224xf32>
    tpu.vector_store %arg11[%c0_96, %c0_97, %c0_98], %150 {strides = array<i32>} : memref<2x64x224xf32, #tpu.memory_space<vmem>>, vector<1x7x224xf32>,
    %151 = vector.extract_strided_slice %145 {offsets = [0, 0, 0], sizes = [1, 7, 224], strides = [1, 1, 1]} : vector<8x7x224xf32> to vector<1x7x224xf32>
    %152 = vector.shape_cast %151 : vector<1x7x224xf32> to vector<7x224xf32>
    %c1_99 = arith.constant 1 : index
    %c0_100 = arith.constant 0 : index
    %c0_101 = arith.constant 0 : index
    %153 = vector.load %arg11[%c1_99, %c0_100, %c0_101] : memref<2x64x224xf32, #tpu.memory_space<vmem>>, vector<1x7x224xf32>
    %154 = vector.shape_cast %153 : vector<1x7x224xf32> to vector<7x224xf32>
    %155 = vector.shape_cast %152 : vector<7x224xf32> to vector<1x7x224xf32>
    tpu.vector_store %arg11[%c1_99, %c0_100, %c0_101], %155 {strides = array<i32>} : memref<2x64x224xf32, #tpu.memory_space<vmem>>, vector<1x7x224xf32>,
    %156 = vector.extract_strided_slice %135 {offsets = [1, 0, 0], sizes = [1, 7, 224], strides = [1, 1, 1]} : vector<8x7x224xf32> to vector<1x7x224xf32>
    %157 = vector.shape_cast %156 : vector<1x7x224xf32> to vector<7x224xf32>
    %c0_102 = arith.constant 0 : index
    %c8 = arith.constant 8 : index
    %c0_103 = arith.constant 0 : index
    %158 = vector.load %arg11[%c0_102, %c8, %c0_103] : memref<2x64x224xf32, #tpu.memory_space<vmem>>, vector<1x7x224xf32>
    %159 = vector.shape_cast %158 : vector<1x7x224xf32> to vector<7x224xf32>
    %160 = vector.shape_cast %157 : vector<7x224xf32> to vector<1x7x224xf32>
    tpu.vector_store %arg11[%c0_102, %c8, %c0_103], %160 {strides = array<i32>} : memref<2x64x224xf32, #tpu.memory_space<vmem>>, vector<1x7x224xf32>,
    %161 = vector.extract_strided_slice %145 {offsets = [1, 0, 0], sizes = [1, 7, 224], strides = [1, 1, 1]} : vector<8x7x224xf32> to vector<1x7x224xf32>
    %162 = vector.shape_cast %161 : vector<1x7x224xf32> to vector<7x224xf32>
    %c1_104 = arith.constant 1 : index
    %c8_105 = arith.constant 8 : index
    %c0_106 = arith.constant 0 : index
    %163 = vector.load %arg11[%c1_104, %c8_105, %c0_106] : memref<2x64x224xf32, #tpu.memory_space<vmem>>, vector<1x7x224xf32>
    %164 = vector.shape_cast %163 : vector<1x7x224xf32> to vector<7x224xf32>
    %165 = vector.shape_cast %162 : vector<7x224xf32> to vector<1x7x224xf32>
    tpu.vector_store %arg11[%c1_104, %c8_105, %c0_106], %165 {strides = array<i32>} : memref<2x64x224xf32, #tpu.memory_space<vmem>>, vector<1x7x224xf32>,
    %166 = vector.extract_strided_slice %135 {offsets = [2, 0, 0], sizes = [1, 7, 224], strides = [1, 1, 1]} : vector<8x7x224xf32> to vector<1x7x224xf32>
    %167 = vector.shape_cast %166 : vector<1x7x224xf32> to vector<7x224xf32>
    %c0_107 = arith.constant 0 : index
    %c16 = arith.constant 16 : index
    %c0_108 = arith.constant 0 : index
    %168 = vector.load %arg11[%c0_107, %c16, %c0_108] : memref<2x64x224xf32, #tpu.memory_space<vmem>>, vector<1x7x224xf32>
    %169 = vector.shape_cast %168 : vector<1x7x224xf32> to vector<7x224xf32>
    %170 = vector.shape_cast %167 : vector<7x224xf32> to vector<1x7x224xf32>
    tpu.vector_store %arg11[%c0_107, %c16, %c0_108], %170 {strides = array<i32>} : memref<2x64x224xf32, #tpu.memory_space<vmem>>, vector<1x7x224xf32>,
    %171 = vector.extract_strided_slice %145 {offsets = [2, 0, 0], sizes = [1, 7, 224], strides = [1, 1, 1]} : vector<8x7x224xf32> to vector<1x7x224xf32>
    %172 = vector.shape_cast %171 : vector<1x7x224xf32> to vector<7x224xf32>
    %c1_109 = arith.constant 1 : index
    %c16_110 = arith.constant 16 : index
    %c0_111 = arith.constant 0 : index
    %173 = vector.load %arg11[%c1_109, %c16_110, %c0_111] : memref<2x64x224xf32, #tpu.memory_space<vmem>>, vector<1x7x224xf32>
    %174 = vector.shape_cast %173 : vector<1x7x224xf32> to vector<7x224xf32>
    %175 = vector.shape_cast %172 : vector<7x224xf32> to vector<1x7x224xf32>
    tpu.vector_store %arg11[%c1_109, %c16_110, %c0_111], %175 {strides = array<i32>} : memref<2x64x224xf32, #tpu.memory_space<vmem>>, vector<1x7x224xf32>,
    %176 = vector.extract_strided_slice %135 {offsets = [3, 0, 0], sizes = [1, 7, 224], strides = [1, 1, 1]} : vector<8x7x224xf32> to vector<1x7x224xf32>
    %177 = vector.shape_cast %176 : vector<1x7x224xf32> to vector<7x224xf32>
    %c0_112 = arith.constant 0 : index
    %c24 = arith.constant 24 : index
    %c0_113 = arith.constant 0 : index
    %178 = vector.load %arg11[%c0_112, %c24, %c0_113] : memref<2x64x224xf32, #tpu.memory_space<vmem>>, vector<1x7x224xf32>
    %179 = vector.shape_cast %178 : vector<1x7x224xf32> to vector<7x224xf32>
    %180 = vector.shape_cast %177 : vector<7x224xf32> to vector<1x7x224xf32>
    tpu.vector_store %arg11[%c0_112, %c24, %c0_113], %180 {strides = array<i32>} : memref<2x64x224xf32, #tpu.memory_space<vmem>>, vector<1x7x224xf32>,
    %181 = vector.extract_strided_slice %145 {offsets = [3, 0, 0], sizes = [1, 7, 224], strides = [1, 1, 1]} : vector<8x7x224xf32> to vector<1x7x224xf32>
    %182 = vector.shape_cast %181 : vector<1x7x224xf32> to vector<7x224xf32>
    %c1_114 = arith.constant 1 : index
    %c24_115 = arith.constant 24 : index
    %c0_116 = arith.constant 0 : index
    %183 = vector.load %arg11[%c1_114, %c24_115, %c0_116] : memref<2x64x224xf32, #tpu.memory_space<vmem>>, vector<1x7x224xf32>
    %184 = vector.shape_cast %183 : vector<1x7x224xf32> to vector<7x224xf32>
    %185 = vector.shape_cast %182 : vector<7x224xf32> to vector<1x7x224xf32>
    tpu.vector_store %arg11[%c1_114, %c24_115, %c0_116], %185 {strides = array<i32>} : memref<2x64x224xf32, #tpu.memory_space<vmem>>, vector<1x7x224xf32>,
    %186 = vector.extract_strided_slice %135 {offsets = [4, 0, 0], sizes = [1, 7, 224], strides = [1, 1, 1]} : vector<8x7x224xf32> to vector<1x7x224xf32>
    %187 = vector.shape_cast %186 : vector<1x7x224xf32> to vector<7x224xf32>
    %c0_117 = arith.constant 0 : index
    %c32 = arith.constant 32 : index
    %c0_118 = arith.constant 0 : index
    %188 = vector.load %arg11[%c0_117, %c32, %c0_118] : memref<2x64x224xf32, #tpu.memory_space<vmem>>, vector<1x7x224xf32>
    %189 = vector.shape_cast %188 : vector<1x7x224xf32> to vector<7x224xf32>
    %190 = vector.shape_cast %187 : vector<7x224xf32> to vector<1x7x224xf32>
    tpu.vector_store %arg11[%c0_117, %c32, %c0_118], %190 {strides = array<i32>} : memref<2x64x224xf32, #tpu.memory_space<vmem>>, vector<1x7x224xf32>,
    %191 = vector.extract_strided_slice %145 {offsets = [4, 0, 0], sizes = [1, 7, 224], strides = [1, 1, 1]} : vector<8x7x224xf32> to vector<1x7x224xf32>
    %192 = vector.shape_cast %191 : vector<1x7x224xf32> to vector<7x224xf32>
    %c1_119 = arith.constant 1 : index
    %c32_120 = arith.constant 32 : index
    %c0_121 = arith.constant 0 : index
    %193 = vector.load %arg11[%c1_119, %c32_120, %c0_121] : memref<2x64x224xf32, #tpu.memory_space<vmem>>, vector<1x7x224xf32>
    %194 = vector.shape_cast %193 : vector<1x7x224xf32> to vector<7x224xf32>
    %195 = vector.shape_cast %192 : vector<7x224xf32> to vector<1x7x224xf32>
    tpu.vector_store %arg11[%c1_119, %c32_120, %c0_121], %195 {strides = array<i32>} : memref<2x64x224xf32, #tpu.memory_space<vmem>>, vector<1x7x224xf32>,
    %196 = vector.extract_strided_slice %135 {offsets = [5, 0, 0], sizes = [1, 7, 224], strides = [1, 1, 1]} : vector<8x7x224xf32> to vector<1x7x224xf32>
    %197 = vector.shape_cast %196 : vector<1x7x224xf32> to vector<7x224xf32>
    %c0_122 = arith.constant 0 : index
    %c40 = arith.constant 40 : index
    %c0_123 = arith.constant 0 : index
    %198 = vector.load %arg11[%c0_122, %c40, %c0_123] : memref<2x64x224xf32, #tpu.memory_space<vmem>>, vector<1x7x224xf32>
    %199 = vector.shape_cast %198 : vector<1x7x224xf32> to vector<7x224xf32>
    %200 = vector.shape_cast %197 : vector<7x224xf32> to vector<1x7x224xf32>
    tpu.vector_store %arg11[%c0_122, %c40, %c0_123], %200 {strides = array<i32>} : memref<2x64x224xf32, #tpu.memory_space<vmem>>, vector<1x7x224xf32>,
    %201 = vector.extract_strided_slice %145 {offsets = [5, 0, 0], sizes = [1, 7, 224], strides = [1, 1, 1]} : vector<8x7x224xf32> to vector<1x7x224xf32>
    %202 = vector.shape_cast %201 : vector<1x7x224xf32> to vector<7x224xf32>
    %c1_124 = arith.constant 1 : index
    %c40_125 = arith.constant 40 : index
    %c0_126 = arith.constant 0 : index
    %203 = vector.load %arg11[%c1_124, %c40_125, %c0_126] : memref<2x64x224xf32, #tpu.memory_space<vmem>>, vector<1x7x224xf32>
    %204 = vector.shape_cast %203 : vector<1x7x224xf32> to vector<7x224xf32>
    %205 = vector.shape_cast %202 : vector<7x224xf32> to vector<1x7x224xf32>
    tpu.vector_store %arg11[%c1_124, %c40_125, %c0_126], %205 {strides = array<i32>} : memref<2x64x224xf32, #tpu.memory_space<vmem>>, vector<1x7x224xf32>,
    %206 = vector.extract_strided_slice %135 {offsets = [6, 0, 0], sizes = [1, 7, 224], strides = [1, 1, 1]} : vector<8x7x224xf32> to vector<1x7x224xf32>
    %207 = vector.shape_cast %206 : vector<1x7x224xf32> to vector<7x224xf32>
    %c0_127 = arith.constant 0 : index
    %c48 = arith.constant 48 : index
    %c0_128 = arith.constant 0 : index
    %208 = vector.load %arg11[%c0_127, %c48, %c0_128] : memref<2x64x224xf32, #tpu.memory_space<vmem>>, vector<1x7x224xf32>
    %209 = vector.shape_cast %208 : vector<1x7x224xf32> to vector<7x224xf32>
    %210 = vector.shape_cast %207 : vector<7x224xf32> to vector<1x7x224xf32>
    tpu.vector_store %arg11[%c0_127, %c48, %c0_128], %210 {strides = array<i32>} : memref<2x64x224xf32, #tpu.memory_space<vmem>>, vector<1x7x224xf32>,
    %211 = vector.extract_strided_slice %145 {offsets = [6, 0, 0], sizes = [1, 7, 224], strides = [1, 1, 1]} : vector<8x7x224xf32> to vector<1x7x224xf32>
    %212 = vector.shape_cast %211 : vector<1x7x224xf32> to vector<7x224xf32>
    %c1_129 = arith.constant 1 : index
    %c48_130 = arith.constant 48 : index
    %c0_131 = arith.constant 0 : index
    %213 = vector.load %arg11[%c1_129, %c48_130, %c0_131] : memref<2x64x224xf32, #tpu.memory_space<vmem>>, vector<1x7x224xf32>
    %214 = vector.shape_cast %213 : vector<1x7x224xf32> to vector<7x224xf32>
    %215 = vector.shape_cast %212 : vector<7x224xf32> to vector<1x7x224xf32>
    tpu.vector_store %arg11[%c1_129, %c48_130, %c0_131], %215 {strides = array<i32>} : memref<2x64x224xf32, #tpu.memory_space<vmem>>, vector<1x7x224xf32>,
    %216 = vector.extract_strided_slice %135 {offsets = [7, 0, 0], sizes = [1, 7, 224], strides = [1, 1, 1]} : vector<8x7x224xf32> to vector<1x7x224xf32>
    %217 = vector.shape_cast %216 : vector<1x7x224xf32> to vector<7x224xf32>
    %c0_132 = arith.constant 0 : index
    %c56 = arith.constant 56 : index
    %c0_133 = arith.constant 0 : index
    %218 = vector.load %arg11[%c0_132, %c56, %c0_133] : memref<2x64x224xf32, #tpu.memory_space<vmem>>, vector<1x7x224xf32>
    %219 = vector.shape_cast %218 : vector<1x7x224xf32> to vector<7x224xf32>
    %220 = vector.shape_cast %217 : vector<7x224xf32> to vector<1x7x224xf32>
    tpu.vector_store %arg11[%c0_132, %c56, %c0_133], %220 {strides = array<i32>} : memref<2x64x224xf32, #tpu.memory_space<vmem>>, vector<1x7x224xf32>,
    %221 = vector.extract_strided_slice %145 {offsets = [7, 0, 0], sizes = [1, 7, 224], strides = [1, 1, 1]} : vector<8x7x224xf32> to vector<1x7x224xf32>
    %222 = vector.shape_cast %221 : vector<1x7x224xf32> to vector<7x224xf32>
    %c1_134 = arith.constant 1 : index
    %c56_135 = arith.constant 56 : index
    %c0_136 = arith.constant 0 : index
    %223 = vector.load %arg11[%c1_134, %c56_135, %c0_136] : memref<2x64x224xf32, #tpu.memory_space<vmem>>, vector<1x7x224xf32>
    %224 = vector.shape_cast %223 : vector<1x7x224xf32> to vector<7x224xf32>
    %225 = vector.shape_cast %222 : vector<7x224xf32> to vector<1x7x224xf32>
    tpu.vector_store %arg11[%c1_134, %c56_135, %c0_136], %225 {strides = array<i32>} : memref<2x64x224xf32, #tpu.memory_space<vmem>>, vector<1x7x224xf32>,
    %c0_137 = arith.constant 0 : index
    %c0_138 = arith.constant 0 : index
    %c0_139 = arith.constant 0 : index
    %226 = vector.load %arg11[%c0_137, %c0_138, %c0_139] : memref<2x64x224xf32, #tpu.memory_space<vmem>>, vector<1x64x224xf32>
    %227 = vector.shape_cast %226 : vector<1x64x224xf32> to vector<64x224xf32>
    %228 = arith.truncf %227 : vector<64x224xf32> to vector<64x224xbf16>
    %c1_140 = arith.constant 1 : index
    %c0_141 = arith.constant 0 : index
    %c0_142 = arith.constant 0 : index
    %229 = vector.load %arg11[%c1_140, %c0_141, %c0_142] : memref<2x64x224xf32, #tpu.memory_space<vmem>>, vector<1x64x224xf32>
    %230 = vector.shape_cast %229 : vector<1x64x224xf32> to vector<64x224xf32>
    %231 = arith.truncf %230 : vector<64x224xf32> to vector<64x224xbf16>
    %c0_143 = arith.constant 0 : index
    %c0_144 = arith.constant 0 : index
    %c0_145 = arith.constant 0 : index
    %232 = vector.load %arg4[%c0_143, %c0_144, %c0_145] : memref<5x224x320xbf16, #tpu.memory_space<vmem>>, vector<1x224x320xbf16>
    %233 = vector.shape_cast %232 : vector<1x224x320xbf16> to vector<224x320xbf16>
    %cst_146 = arith.constant dense<0.000000e+00> : vector<64x320xf32>
    %234 = tpu.matmul %228, %233, %cst_146 {dimension_numbers = #tpu.dot_dimension_numbers<[1], [0], [0], [1], [0, 0, 1, 1], [], []>} : vector<64x224xbf16>, vector<224x320xbf16>, vector<64x320xf32> -> vector<64x320xf32>
    %235 = vector.shape_cast %234 : vector<64x320xf32> to vector<8x8x320xf32>
    %236 = vector.extract_strided_slice %235 {offsets = [0, 0, 0], sizes = [8, 5, 320], strides = [1, 1, 1]} : vector<8x8x320xf32> to vector<8x5x320xf32>
    %c1_147 = arith.constant 1 : index
    %c0_148 = arith.constant 0 : index
    %c0_149 = arith.constant 0 : index
    %237 = vector.load %arg4[%c1_147, %c0_148, %c0_149] : memref<5x224x320xbf16, #tpu.memory_space<vmem>>, vector<1x224x320xbf16>
    %238 = vector.shape_cast %237 : vector<1x224x320xbf16> to vector<224x320xbf16>
    %cst_150 = arith.constant dense<0.000000e+00> : vector<64x320xf32>
    %239 = tpu.matmul %231, %238, %cst_150 {dimension_numbers = #tpu.dot_dimension_numbers<[1], [0], [0], [1], [0, 0, 1, 1], [], []>} : vector<64x224xbf16>, vector<224x320xbf16>, vector<64x320xf32> -> vector<64x320xf32>
    %240 = vector.shape_cast %239 : vector<64x320xf32> to vector<8x8x320xf32>
    %241 = vector.extract_strided_slice %240 {offsets = [0, 0, 0], sizes = [8, 5, 320], strides = [1, 1, 1]} : vector<8x8x320xf32> to vector<8x5x320xf32>
    %242 = arith.addf %236, %241 : vector<8x5x320xf32>
    %c2_151 = arith.constant 2 : index
    %c0_152 = arith.constant 0 : index
    %c0_153 = arith.constant 0 : index
    %243 = vector.load %arg4[%c2_151, %c0_152, %c0_153] : memref<5x224x320xbf16, #tpu.memory_space<vmem>>, vector<1x224x320xbf16>
    %244 = vector.shape_cast %243 : vector<1x224x320xbf16> to vector<224x320xbf16>
    %cst_154 = arith.constant dense<0.000000e+00> : vector<64x320xf32>
    %245 = tpu.matmul %228, %244, %cst_154 {dimension_numbers = #tpu.dot_dimension_numbers<[1], [0], [0], [1], [0, 0, 1, 1], [], []>} : vector<64x224xbf16>, vector<224x320xbf16>, vector<64x320xf32> -> vector<64x320xf32>
    %246 = vector.shape_cast %245 : vector<64x320xf32> to vector<8x8x320xf32>
    %247 = vector.extract_strided_slice %246 {offsets = [0, 1, 0], sizes = [8, 5, 320], strides = [1, 1, 1]} : vector<8x8x320xf32> to vector<8x5x320xf32>
    %248 = arith.addf %242, %247 : vector<8x5x320xf32>
    %c3_155 = arith.constant 3 : index
    %c0_156 = arith.constant 0 : index
    %c0_157 = arith.constant 0 : index
    %249 = vector.load %arg4[%c3_155, %c0_156, %c0_157] : memref<5x224x320xbf16, #tpu.memory_space<vmem>>, vector<1x224x320xbf16>
    %250 = vector.shape_cast %249 : vector<1x224x320xbf16> to vector<224x320xbf16>
    %cst_158 = arith.constant dense<0.000000e+00> : vector<64x320xf32>
    %251 = tpu.matmul %231, %250, %cst_158 {dimension_numbers = #tpu.dot_dimension_numbers<[1], [0], [0], [1], [0, 0, 1, 1], [], []>} : vector<64x224xbf16>, vector<224x320xbf16>, vector<64x320xf32> -> vector<64x320xf32>
    %252 = vector.shape_cast %251 : vector<64x320xf32> to vector<8x8x320xf32>
    %253 = vector.extract_strided_slice %252 {offsets = [0, 1, 0], sizes = [8, 5, 320], strides = [1, 1, 1]} : vector<8x8x320xf32> to vector<8x5x320xf32>
    %254 = arith.addf %248, %253 : vector<8x5x320xf32>
    %c4_159 = arith.constant 4 : index
    %c0_160 = arith.constant 0 : index
    %c0_161 = arith.constant 0 : index
    %255 = vector.load %arg4[%c4_159, %c0_160, %c0_161] : memref<5x224x320xbf16, #tpu.memory_space<vmem>>, vector<1x224x320xbf16>
    %256 = vector.shape_cast %255 : vector<1x224x320xbf16> to vector<224x320xbf16>
    %cst_162 = arith.constant dense<0.000000e+00> : vector<64x320xf32>
    %257 = tpu.matmul %228, %256, %cst_162 {dimension_numbers = #tpu.dot_dimension_numbers<[1], [0], [0], [1], [0, 0, 1, 1], [], []>} : vector<64x224xbf16>, vector<224x320xbf16>, vector<64x320xf32> -> vector<64x320xf32>
    %258 = vector.shape_cast %257 : vector<64x320xf32> to vector<8x8x320xf32>
    %259 = vector.extract_strided_slice %258 {offsets = [0, 2, 0], sizes = [8, 5, 320], strides = [1, 1, 1]} : vector<8x8x320xf32> to vector<8x5x320xf32>
    %260 = arith.addf %254, %259 : vector<8x5x320xf32>
    %c0_163 = arith.constant 0 : index
    %c0_164 = arith.constant 0 : index
    %c0_165 = arith.constant 0 : index
    %261 = vector.load %arg4[%c0_163, %c0_164, %c0_165] : memref<5x224x320xbf16, #tpu.memory_space<vmem>>, vector<1x224x320xbf16>
    %262 = vector.shape_cast %261 : vector<1x224x320xbf16> to vector<224x320xbf16>
    %cst_166 = arith.constant dense<0.000000e+00> : vector<64x320xf32>
    %263 = tpu.matmul %231, %262, %cst_166 {dimension_numbers = #tpu.dot_dimension_numbers<[1], [0], [0], [1], [0, 0, 1, 1], [], []>} : vector<64x224xbf16>, vector<224x320xbf16>, vector<64x320xf32> -> vector<64x320xf32>
    %264 = vector.shape_cast %263 : vector<64x320xf32> to vector<8x8x320xf32>
    %265 = vector.extract_strided_slice %264 {offsets = [0, 0, 0], sizes = [8, 5, 320], strides = [1, 1, 1]} : vector<8x8x320xf32> to vector<8x5x320xf32>
    %c1_167 = arith.constant 1 : index
    %c0_168 = arith.constant 0 : index
    %c0_169 = arith.constant 0 : index
    %266 = vector.load %arg4[%c1_167, %c0_168, %c0_169] : memref<5x224x320xbf16, #tpu.memory_space<vmem>>, vector<1x224x320xbf16>
    %267 = vector.shape_cast %266 : vector<1x224x320xbf16> to vector<224x320xbf16>
    %cst_170 = arith.constant dense<0.000000e+00> : vector<64x320xf32>
    %268 = tpu.matmul %228, %267, %cst_170 {dimension_numbers = #tpu.dot_dimension_numbers<[1], [0], [0], [1], [0, 0, 1, 1], [], []>} : vector<64x224xbf16>, vector<224x320xbf16>, vector<64x320xf32> -> vector<64x320xf32>
    %269 = vector.shape_cast %268 : vector<64x320xf32> to vector<8x8x320xf32>
    %270 = vector.extract_strided_slice %269 {offsets = [0, 1, 0], sizes = [8, 5, 320], strides = [1, 1, 1]} : vector<8x8x320xf32> to vector<8x5x320xf32>
    %271 = arith.addf %265, %270 : vector<8x5x320xf32>
    %c2_171 = arith.constant 2 : index
    %c0_172 = arith.constant 0 : index
    %c0_173 = arith.constant 0 : index
    %272 = vector.load %arg4[%c2_171, %c0_172, %c0_173] : memref<5x224x320xbf16, #tpu.memory_space<vmem>>, vector<1x224x320xbf16>
    %273 = vector.shape_cast %272 : vector<1x224x320xbf16> to vector<224x320xbf16>
    %cst_174 = arith.constant dense<0.000000e+00> : vector<64x320xf32>
    %274 = tpu.matmul %231, %273, %cst_174 {dimension_numbers = #tpu.dot_dimension_numbers<[1], [0], [0], [1], [0, 0, 1, 1], [], []>} : vector<64x224xbf16>, vector<224x320xbf16>, vector<64x320xf32> -> vector<64x320xf32>
    %275 = vector.shape_cast %274 : vector<64x320xf32> to vector<8x8x320xf32>
    %276 = vector.extract_strided_slice %275 {offsets = [0, 1, 0], sizes = [8, 5, 320], strides = [1, 1, 1]} : vector<8x8x320xf32> to vector<8x5x320xf32>
    %277 = arith.addf %271, %276 : vector<8x5x320xf32>
    %c3_175 = arith.constant 3 : index
    %c0_176 = arith.constant 0 : index
    %c0_177 = arith.constant 0 : index
    %278 = vector.load %arg4[%c3_175, %c0_176, %c0_177] : memref<5x224x320xbf16, #tpu.memory_space<vmem>>, vector<1x224x320xbf16>
    %279 = vector.shape_cast %278 : vector<1x224x320xbf16> to vector<224x320xbf16>
    %cst_178 = arith.constant dense<0.000000e+00> : vector<64x320xf32>
    %280 = tpu.matmul %228, %279, %cst_178 {dimension_numbers = #tpu.dot_dimension_numbers<[1], [0], [0], [1], [0, 0, 1, 1], [], []>} : vector<64x224xbf16>, vector<224x320xbf16>, vector<64x320xf32> -> vector<64x320xf32>
    %281 = vector.shape_cast %280 : vector<64x320xf32> to vector<8x8x320xf32>
    %282 = vector.extract_strided_slice %281 {offsets = [0, 2, 0], sizes = [8, 5, 320], strides = [1, 1, 1]} : vector<8x8x320xf32> to vector<8x5x320xf32>
    %283 = arith.addf %277, %282 : vector<8x5x320xf32>
    %c4_179 = arith.constant 4 : index
    %c0_180 = arith.constant 0 : index
    %c0_181 = arith.constant 0 : index
    %284 = vector.load %arg4[%c4_179, %c0_180, %c0_181] : memref<5x224x320xbf16, #tpu.memory_space<vmem>>, vector<1x224x320xbf16>
    %285 = vector.shape_cast %284 : vector<1x224x320xbf16> to vector<224x320xbf16>
    %cst_182 = arith.constant dense<0.000000e+00> : vector<64x320xf32>
    %286 = tpu.matmul %231, %285, %cst_182 {dimension_numbers = #tpu.dot_dimension_numbers<[1], [0], [0], [1], [0, 0, 1, 1], [], []>} : vector<64x224xbf16>, vector<224x320xbf16>, vector<64x320xf32> -> vector<64x320xf32>
    %287 = vector.shape_cast %286 : vector<64x320xf32> to vector<8x8x320xf32>
    %288 = vector.extract_strided_slice %287 {offsets = [0, 2, 0], sizes = [8, 5, 320], strides = [1, 1, 1]} : vector<8x8x320xf32> to vector<8x5x320xf32>
    %289 = arith.addf %283, %288 : vector<8x5x320xf32>
    %290 = arith.maximumf %260, %289 : vector<8x5x320xf32>
    %291 = vector.extract_strided_slice %290 {offsets = [0, 0, 0], sizes = [8, 5, 160], strides = [1, 1, 1]} : vector<8x5x320xf32> to vector<8x5x160xf32>
    %292 = vector.extract_strided_slice %290 {offsets = [0, 0, 160], sizes = [8, 5, 160], strides = [1, 1, 1]} : vector<8x5x320xf32> to vector<8x5x160xf32>
    %293 = arith.maximumf %291, %292 : vector<8x5x160xf32>
    %c0_183 = arith.constant 0 : index
    %c0_184 = arith.constant 0 : index
    %294 = vector.load %arg5[%c0_183, %c0_184] : memref<1x160xf32, #tpu.memory_space<vmem>>, vector<1x160xf32>
    %295 = vector.shape_cast %294 : vector<1x160xf32> to vector<1x1x160xf32>
    %296 = vector.broadcast %295 : vector<1x1x160xf32> to vector<8x5x160xf32>
    %297 = arith.addf %293, %296 : vector<8x5x160xf32>
    %cst_185 = arith.constant 0.000000e+00 : f32
    %298 = vector.broadcast %cst_185 : f32 to vector<8x5x160xf32>
    %299 = arith.maximumf %297, %298 : vector<8x5x160xf32>
    %300 = vector.extract_strided_slice %299 {offsets = [0, 0, 0], sizes = [8, 1, 160], strides = [1, 1, 1]} : vector<8x5x160xf32> to vector<8x1x160xf32>
    %cst_186 = arith.constant dense<0.000000e+00> : vector<8x160xf32>
    %301 = vector.multi_reduction <add>, %300, %cst_186 [1] : vector<8x1x160xf32> to vector<8x160xf32>
    %302 = arith.truncf %301 : vector<8x160xf32> to vector<8x160xbf16>
    %c0_187 = arith.constant 0 : index
    %c0_188 = arith.constant 0 : index
    %c0_189 = arith.constant 0 : index
    %303 = vector.load %arg6[%c0_187, %c0_188, %c0_189] : memref<5x160x400xbf16, #tpu.memory_space<vmem>>, vector<1x160x400xbf16>
    %304 = vector.shape_cast %303 : vector<1x160x400xbf16> to vector<160x400xbf16>
    %cst_190 = arith.constant dense<0.000000e+00> : vector<8x400xf32>
    %305 = tpu.matmul %302, %304, %cst_190 {dimension_numbers = #tpu.dot_dimension_numbers<[1], [0], [0], [1], [0, 0, 1, 1], [], []>} : vector<8x160xbf16>, vector<160x400xbf16>, vector<8x400xf32> -> vector<8x400xf32>
    %306 = vector.extract_strided_slice %299 {offsets = [0, 1, 0], sizes = [8, 1, 160], strides = [1, 1, 1]} : vector<8x5x160xf32> to vector<8x1x160xf32>
    %cst_191 = arith.constant dense<0.000000e+00> : vector<8x160xf32>
    %307 = vector.multi_reduction <add>, %306, %cst_191 [1] : vector<8x1x160xf32> to vector<8x160xf32>
    %308 = arith.truncf %307 : vector<8x160xf32> to vector<8x160xbf16>
    %c1_192 = arith.constant 1 : index
    %c0_193 = arith.constant 0 : index
    %c0_194 = arith.constant 0 : index
    %309 = vector.load %arg6[%c1_192, %c0_193, %c0_194] : memref<5x160x400xbf16, #tpu.memory_space<vmem>>, vector<1x160x400xbf16>
    %310 = vector.shape_cast %309 : vector<1x160x400xbf16> to vector<160x400xbf16>
    %cst_195 = arith.constant dense<0.000000e+00> : vector<8x400xf32>
    %311 = tpu.matmul %308, %310, %cst_195 {dimension_numbers = #tpu.dot_dimension_numbers<[1], [0], [0], [1], [0, 0, 1, 1], [], []>} : vector<8x160xbf16>, vector<160x400xbf16>, vector<8x400xf32> -> vector<8x400xf32>
    %312 = arith.addf %305, %311 : vector<8x400xf32>
    %313 = vector.extract_strided_slice %299 {offsets = [0, 2, 0], sizes = [8, 1, 160], strides = [1, 1, 1]} : vector<8x5x160xf32> to vector<8x1x160xf32>
    %cst_196 = arith.constant dense<0.000000e+00> : vector<8x160xf32>
    %314 = vector.multi_reduction <add>, %313, %cst_196 [1] : vector<8x1x160xf32> to vector<8x160xf32>
    %315 = arith.truncf %314 : vector<8x160xf32> to vector<8x160xbf16>
    %c2_197 = arith.constant 2 : index
    %c0_198 = arith.constant 0 : index
    %c0_199 = arith.constant 0 : index
    %316 = vector.load %arg6[%c2_197, %c0_198, %c0_199] : memref<5x160x400xbf16, #tpu.memory_space<vmem>>, vector<1x160x400xbf16>
    %317 = vector.shape_cast %316 : vector<1x160x400xbf16> to vector<160x400xbf16>
    %cst_200 = arith.constant dense<0.000000e+00> : vector<8x400xf32>
    %318 = tpu.matmul %315, %317, %cst_200 {dimension_numbers = #tpu.dot_dimension_numbers<[1], [0], [0], [1], [0, 0, 1, 1], [], []>} : vector<8x160xbf16>, vector<160x400xbf16>, vector<8x400xf32> -> vector<8x400xf32>
    %319 = arith.addf %312, %318 : vector<8x400xf32>
    %320 = vector.extract_strided_slice %299 {offsets = [0, 3, 0], sizes = [8, 1, 160], strides = [1, 1, 1]} : vector<8x5x160xf32> to vector<8x1x160xf32>
    %cst_201 = arith.constant dense<0.000000e+00> : vector<8x160xf32>
    %321 = vector.multi_reduction <add>, %320, %cst_201 [1] : vector<8x1x160xf32> to vector<8x160xf32>
    %322 = arith.truncf %321 : vector<8x160xf32> to vector<8x160xbf16>
    %c3_202 = arith.constant 3 : index
    %c0_203 = arith.constant 0 : index
    %c0_204 = arith.constant 0 : index
    %323 = vector.load %arg6[%c3_202, %c0_203, %c0_204] : memref<5x160x400xbf16, #tpu.memory_space<vmem>>, vector<1x160x400xbf16>
    %324 = vector.shape_cast %323 : vector<1x160x400xbf16> to vector<160x400xbf16>
    %cst_205 = arith.constant dense<0.000000e+00> : vector<8x400xf32>
    %325 = tpu.matmul %322, %324, %cst_205 {dimension_numbers = #tpu.dot_dimension_numbers<[1], [0], [0], [1], [0, 0, 1, 1], [], []>} : vector<8x160xbf16>, vector<160x400xbf16>, vector<8x400xf32> -> vector<8x400xf32>
    %326 = arith.addf %319, %325 : vector<8x400xf32>
    %327 = vector.extract_strided_slice %299 {offsets = [0, 4, 0], sizes = [8, 1, 160], strides = [1, 1, 1]} : vector<8x5x160xf32> to vector<8x1x160xf32>
    %cst_206 = arith.constant dense<0.000000e+00> : vector<8x160xf32>
    %328 = vector.multi_reduction <add>, %327, %cst_206 [1] : vector<8x1x160xf32> to vector<8x160xf32>
    %329 = arith.truncf %328 : vector<8x160xf32> to vector<8x160xbf16>
    %c4_207 = arith.constant 4 : index
    %c0_208 = arith.constant 0 : index
    %c0_209 = arith.constant 0 : index
    %330 = vector.load %arg6[%c4_207, %c0_208, %c0_209] : memref<5x160x400xbf16, #tpu.memory_space<vmem>>, vector<1x160x400xbf16>
    %331 = vector.shape_cast %330 : vector<1x160x400xbf16> to vector<160x400xbf16>
    %cst_210 = arith.constant dense<0.000000e+00> : vector<8x400xf32>
    %332 = tpu.matmul %329, %331, %cst_210 {dimension_numbers = #tpu.dot_dimension_numbers<[1], [0], [0], [1], [0, 0, 1, 1], [], []>} : vector<8x160xbf16>, vector<160x400xbf16>, vector<8x400xf32> -> vector<8x400xf32>
    %333 = arith.addf %326, %332 : vector<8x400xf32>
    %c0_211 = arith.constant 0 : index
    %c0_212 = arith.constant 0 : index
    %334 = vector.load %arg7[%c0_211, %c0_212] : memref<1x400xf32, #tpu.memory_space<vmem>>, vector<1x400xf32>
    %335 = vector.broadcast %334 : vector<1x400xf32> to vector<8x400xf32>
    %336 = arith.addf %333, %335 : vector<8x400xf32>
    %cst_213 = arith.constant 0.000000e+00 : f32
    %337 = vector.broadcast %cst_213 : f32 to vector<8x400xf32>
    %338 = arith.maximumf %336, %337 : vector<8x400xf32>
    %339 = arith.truncf %338 : vector<8x400xf32> to vector<8x400xbf16>
    %c0_214 = arith.constant 0 : index
    %c0_215 = arith.constant 0 : index
    %340 = vector.load %arg8[%c0_214, %c0_215] : memref<400x128xbf16, #tpu.memory_space<vmem>>, vector<400x128xbf16>
    %cst_216 = arith.constant dense<0.000000e+00> : vector<8x128xf32>
    %341 = tpu.matmul %339, %340, %cst_216 {dimension_numbers = #tpu.dot_dimension_numbers<[1], [0], [0], [1], [0, 0, 1, 1], [], []>} : vector<8x400xbf16>, vector<400x128xbf16>, vector<8x128xf32> -> vector<8x128xf32>
    %c0_217 = arith.constant 0 : index
    %c0_218 = arith.constant 0 : index
    %342 = vector.load %arg9[%c0_217, %c0_218] : memref<1x128xf32, #tpu.memory_space<vmem>>, vector<1x128xf32>
    %343 = vector.broadcast %342 : vector<1x128xf32> to vector<8x128xf32>
    %344 = arith.addf %341, %343 : vector<8x128xf32>
    %cst_219 = arith.constant dense<0xFF800000> : vector<8xf32>
    %345 = vector.multi_reduction <maximumf>, %344, %cst_219 [1] : vector<8x128xf32> to vector<8xf32>
    %346 = vector.shape_cast %345 : vector<8xf32> to vector<8x1xf32>
    %347 = vector.broadcast %346 : vector<8x1xf32> to vector<8x128xf32>
    %348 = arith.subf %344, %347 : vector<8x128xf32>
    %349 = math.exp %348 : vector<8x128xf32>
    %cst_220 = arith.constant dense<0.000000e+00> : vector<8xf32>
    %350 = vector.multi_reduction <add>, %349, %cst_220 [1] : vector<8x128xf32> to vector<8xf32>
    %351 = vector.shape_cast %350 : vector<8xf32> to vector<8x1xf32>
    %352 = math.log %351 : vector<8x1xf32>
    %353 = arith.addf %352, %346 : vector<8x1xf32>
    %354 = vector.broadcast %353 : vector<8x1xf32> to vector<8x128xf32>
    %355 = arith.subf %344, %354 : vector<8x128xf32>
    %c0_221 = arith.constant 0 : index
    %c0_222 = arith.constant 0 : index
    %356 = vector.load %arg10[%c0_221, %c0_222] : memref<8x128xf32, #tpu.memory_space<vmem>>, vector<8x128xf32>
    tpu.vector_store %arg10[%c0_221, %c0_222], %355 {strides = array<i32>} : memref<8x128xf32, #tpu.memory_space<vmem>>, vector<8x128xf32>,
    return
  }
  func.func @transform_0(%arg0: i32) -> (i32, i32, i32) {
    %c0_i32 = arith.constant 0 : i32
    %c0_i32_0 = arith.constant 0 : i32
    %c0_i32_1 = arith.constant 0 : i32
    return %c0_i32, %arg0, %c0_i32_0 : i32, i32, i32
  }
  func.func @transform_1(%arg0: i32) -> (i32, i32, i32) {
    %c0_i32 = arith.constant 0 : i32
    %c0_i32_0 = arith.constant 0 : i32
    %c0_i32_1 = arith.constant 0 : i32
    %c0_i32_2 = arith.constant 0 : i32
    return %c0_i32, %c0_i32_0, %c0_i32_1 : i32, i32, i32
  }
  func.func @transform_2(%arg0: i32) -> (i32, i32) {
    %c0_i32 = arith.constant 0 : i32
    %c0_i32_0 = arith.constant 0 : i32
    %c0_i32_1 = arith.constant 0 : i32
    return %c0_i32, %c0_i32_0 : i32, i32
  }
  func.func @transform_3(%arg0: i32) -> (i32, i32, i32) {
    %c0_i32 = arith.constant 0 : i32
    %c0_i32_0 = arith.constant 0 : i32
    %c0_i32_1 = arith.constant 0 : i32
    %c0_i32_2 = arith.constant 0 : i32
    return %c0_i32, %c0_i32_0, %c0_i32_1 : i32, i32, i32
  }
  func.func @transform_4(%arg0: i32) -> (i32, i32) {
    %c0_i32 = arith.constant 0 : i32
    %c0_i32_0 = arith.constant 0 : i32
    %c0_i32_1 = arith.constant 0 : i32
    return %c0_i32, %c0_i32_0 : i32, i32
  }
  func.func @transform_5(%arg0: i32) -> (i32, i32, i32) {
    %c0_i32 = arith.constant 0 : i32
    %c0_i32_0 = arith.constant 0 : i32
    %c0_i32_1 = arith.constant 0 : i32
    %c0_i32_2 = arith.constant 0 : i32
    return %c0_i32, %c0_i32_0, %c0_i32_1 : i32, i32, i32
  }
  func.func @transform_6(%arg0: i32) -> (i32, i32) {
    %c0_i32 = arith.constant 0 : i32
    %c0_i32_0 = arith.constant 0 : i32
    %c0_i32_1 = arith.constant 0 : i32
    return %c0_i32, %c0_i32_0 : i32, i32
  }
  func.func @transform_7(%arg0: i32) -> (i32, i32) {
    %c0_i32 = arith.constant 0 : i32
    %c0_i32_0 = arith.constant 0 : i32
    %c0_i32_1 = arith.constant 0 : i32
    return %c0_i32, %c0_i32_0 : i32, i32
  }
  func.func @transform_8(%arg0: i32) -> (i32, i32) {
    %c0_i32 = arith.constant 0 : i32
    %c0_i32_0 = arith.constant 0 : i32
    %c0_i32_1 = arith.constant 0 : i32
    return %c0_i32, %c0_i32_0 : i32, i32
  }
  func.func @transform_9(%arg0: i32) -> (i32, i32) {
    %c0_i32 = arith.constant 0 : i32
    %c0_i32_0 = arith.constant 0 : i32
    return %arg0, %c0_i32 : i32, i32
  }
}

</mosaic_0001>

<bundles_post_ra>
// kernel: convnet_forward.1
= control target key start
LH: loop header
LB: loop body
LE: loop exit
PB: predicated region body
PF: predicated region fallthrough
CT: control target
= control target key end

     0   :  { %v22107_v1 = vmov 0   ;;  %vm34_vm0 = vcmask 785408   ;;  %s14308_s30 = smov 32   ;;  %vm5449_vm1 = vcmask 261120   ;;  %vm5727_vm2 = vcmask 784384   ;;  %s14309_s14 = smov 96   ;;  %s22095_s1 = inlined_call_operand.vmem [shape: bf16[5,96,448], index: 1, kind: input, shape index: {}]   ;;  %s22096_s0 = inlined_call_operand.vmem [shape: bf16[4,64,96], index: 0, kind: input, shape index: {}]   ;;  %s22097_s3 = inlined_call_operand.vmem [shape: bf16[5,224,320], index: 3, kind: input, shape index: {}]   ;;  %s22098_s2 = inlined_call_operand.vmem [shape: f32[1,224], index: 2, kind: input, shape index: {}]   ;;  %s22099_s5 = inlined_call_operand.vmem [shape: bf16[5,160,400], index: 5, kind: input, shape index: {}]   ;;  %s22100_s4 = inlined_call_operand.vmem [shape: f32[1,160], index: 4, kind: input, shape index: {}]   ;;  %s22101_s7 = inlined_call_operand.vmem [shape: bf16[400,128], index: 7, kind: input, shape index: {}]   ;;  %s22102_s6 = inlined_call_operand.vmem [shape: f32[1,400], index: 6, kind: input, shape index: {}]   ;;  %s22103_s8 = inlined_call_operand.vmem [shape: f32[1,128], index: 8, kind: input, shape index: {}]   ;;  %s22104_s9 = inlined_call_operand.vmem [shape: f32[8,128], index: 9, kind: output, shape index: {}]  }
   0x1   :  { %v14363_v0 = vld [vmem:[%s22095_s1 + $0xa4] ss:$16 sps:$4 sm:$0xff]   ;;  %309 = vmatprep.mubr.bf16.mxu0 %v22107_v1  ;;  %382 = vmatprep.mubr.bf16.mxu1 %v22107_v1  ;;  %v14370_v2 = vld [vmem:[%s22095_s1 + $0xac] ss:$16 sps:$4 sm:$0xff]   ;;  %v14376_v3 = vld [vmem:[%s22095_s1 + $0xa0] ss:$16 sps:$4 sm:$0xff]  }
   0x2   :  { %281 = vmatprep.subr.bf16.mxu0 %v14363_v0  ;;  %v14381_v4 = vld [vmem:[%s22095_s1 + $0xa8] ss:$16 sps:$4 sm:$0xff]   ;;  %354 = vmatprep.subr.bf16.mxu1 %v14370_v2  ;;  %v14387_v5 = vld [vmem:[%s22095_s1 + $0x84] ss:$16 sps:$4 sm:$0xff]   ;;  %v14394_v6 = vld [vmem:[%s22095_s1 + $0x8c] ss:$16 sps:$4 sm:$0xff]  }
   0x3   :  { %282 = vmatpush1.bf16.msra.mxu0 %v14376_v3  ;;  %355 = vmatpush1.bf16.msra.mxu1 %v14381_v4  ;;  %v14399_v7 = vld [vmem:[%s22095_s1 + $0x80] ss:$16 sps:$4 sm:$0xff]   ;;  %v14405_v8 = vld [vmem:[%s22095_s1 + $0x88] ss:$16 sps:$4 sm:$0xff]   ;;  %v14411_v9 = vld [vmem:[%s22095_s1 + $0x64] ss:$16 sps:$4 sm:$0xff]  }
   0x4   :  { %283 = vmatprep.subr.bf16.mxu0 %v14387_v5  ;;  %356 = vmatprep.subr.bf16.mxu1 %v14394_v6  ;;  %v14416_v10 = vld [vmem:[%s22095_s1 + $0x6c] ss:$16 sps:$4 sm:$0xff]   ;;  %v14421_v11 = vld [vmem:[%s22095_s1 + $0x60] ss:$16 sps:$4 sm:$0xff]   ;;  %v14426_v12 = vld [vmem:[%s22095_s1 + $0x68] ss:$16 sps:$4 sm:$0xff]  }
   0x5   :  { %v14433_v13 = vld [vmem:[%s22095_s1 + $0x44] ss:$16 sps:$4 sm:$0xff]   ;;  %v14440_v14 = vld [vmem:[%s22095_s1 + $0x4c] ss:$16 sps:$4 sm:$0xff]   ;;  %v14445_v15 = vld [vmem:[%s22095_s1 + $0x40] ss:$16 sps:$4 sm:$0xff]  }
   0x6   :  { %v14452_v16 = vld [vmem:[%s22095_s1 + $0x48] ss:$16 sps:$4 sm:$0xff]   ;;  %v14457_v17 = vld [vmem:[%s22095_s1 + $0x24] ss:$16 sps:$4 sm:$0xff]   ;;  %v14464_v18 = vld [vmem:[%s22095_s1 + $0x2c] ss:$16 sps:$4 sm:$0xff]  }
   0x7   :  { %284 = vmatpush1.bf16.msra.mxu0 %v14399_v7  ;;  %357 = vmatpush1.bf16.msra.mxu1 %v14405_v8  ;;  %v14469_v19 = vld [vmem:[%s22095_s1 + $0x20] ss:$16 sps:$4 sm:$0xff]   ;;  %v14474_v20 = vld [vmem:[%s22095_s1 + $0x28] ss:$16 sps:$4 sm:$0xff]   ;;  %v14481_v21 = vld [vmem:[%s22095_s1 + $0x4] ss:$16 sps:$4 sm:$0xff]  }
   0x8   :  { %285 = vmatprep.subr.bf16.mxu0 %v14411_v9  ;;  %358 = vmatprep.subr.bf16.mxu1 %v14416_v10  ;;  %v14488_v22 = vld [vmem:[%s22095_s1 + $0xc] ss:$16 sps:$4 sm:$0xff]   ;;  %v14493_v23 = vld [vmem:[%s22095_s1] ss:$16 sps:$4 sm:$0xff]   ;;  %v14500_v24 = vld [vmem:[%s22095_s1 + $0x8] ss:$16 sps:$4 sm:$0xff]  }
   0x9   :  { %v14505_v25 = vld [vmem:[%s22095_s1 + $0x16c] ss:$16 sps:$4 sm:$0xff]   ;;  %v14512_v26 = vld [vmem:[%s22095_s1 + $0x164] ss:$16 sps:$4 sm:$0xff]   ;;  %v14524_v28 = vld [vmem:[%s22095_s1 + $0x168] ss:$16 sps:$4 sm:$0xff]  }
   0xa   :  { %v14517_v27 = vld [vmem:[%s22096_s0] sm:$0xff]   ;;  %v14536_v30 = vld [vmem:[%s22095_s1 + $0x14c] ss:$16 sps:$4 sm:$0xff]   ;;  %v14550_v32 = vld [vmem:[%s22095_s1 + $0x148] ss:$16 sps:$4 sm:$0xff]   ;;  %vm9614_vm3 = vcmask 1041409  }
   0xb   :  { %286 = vmatpush1.bf16.msra.mxu0 %v14421_v11  ;;  %359 = vmatpush1.bf16.msra.mxu1 %v14426_v12  ;;  %v14529_v29 = vld [vmem:[%s22095_s1 + $0x160] ss:$16 sps:$4 sm:$0xff]   ;;  %v14541_v31 = vld [vmem:[%s22095_s1 + $0x144] ss:$16 sps:$4 sm:$0xff]   ;;  %v14564_v34 = vld [vmem:[%s22095_s1 + $0x12c] ss:$16 sps:$4 sm:$0xff]  }
   0xc   :  { %287 = vmatprep.subr.bf16.mxu0 %v14433_v13  ;;  %360 = vmatprep.subr.bf16.mxu1 %v14440_v14  ;;  %v14557_v33 = vld [vmem:[%s22095_s1 + $0x140] ss:$16 sps:$4 sm:$0xff]   ;;  %v14569_v35 = vld [vmem:[%s22095_s1 + $0x124] ss:$16 sps:$4 sm:$0xff]   ;;  %v14575_v36 = vld [vmem:[%s22096_s0 + $0x8] sm:$0xff]   ;;  %vm9617_vm4 = vcmask 1042434  }
   0xd   :  { %v14581_v37 = vld [vmem:[%s22095_s1 + $0x128] ss:$16 sps:$4 sm:$0xff]   ;;  %v14588_v38 = vld [vmem:[%s22095_s1 + $0x120] ss:$16 sps:$4 sm:$0xff]   ;;  %v14595_v39 = vld [vmem:[%s22095_s1 + $0x10c] ss:$16 sps:$4 sm:$0xff]  }
   0xe   :  { %v14600_v40 = vld [vmem:[%s22095_s1 + $0x104] ss:$16 sps:$4 sm:$0xff]   ;;  %v14609_v41 = vld [vmem:[%s22095_s1 + $0x108] ss:$16 sps:$4 sm:$0xff]   ;;  %v14616_v42 = vld [vmem:[%s22095_s1 + $0x100] ss:$16 sps:$4 sm:$0xff]  }
   0xf   :  { %288 = vmatpush1.bf16.msra.mxu0 %v14445_v15  ;;  %361 = vmatpush1.bf16.msra.mxu1 %v14452_v16  ;;  %v14623_v43 = vld [vmem:[%s22095_s1 + $0xec] ss:$16 sps:$4 sm:$0xff]   ;;  %v14630_v44 = vld [vmem:[%s22095_s1 + $0xe4] ss:$16 sps:$4 sm:$0xff]   ;;  %v14641_v46 = vld [vmem:[%s22095_s1 + $0xe8] ss:$16 sps:$4 sm:$0xff]  }
  0x10   :  { %289 = vmatprep.subr.bf16.mxu0 %v14457_v17  ;;  %362 = vmatprep.subr.bf16.mxu1 %v14464_v18  ;;  %v14635_v45 = vld [vmem:[%s22096_s0 + $0x10] sm:$0xff]   ;;  %v14653_v48 = vld [vmem:[%s22095_s1 + $0xcc] ss:$16 sps:$4 sm:$0xff]   ;;  %v14670_v50 = vld [vmem:[%s22095_s1 + $0xc8] ss:$16 sps:$4 sm:$0xff]   ;;  %vm9620_vm5 = vcmask 1043459  }
  0x11   :  { %v14646_v47 = vld [vmem:[%s22095_s1 + $0xe0] ss:$16 sps:$4 sm:$0xff]   ;;  %v14659_v49 = vld [vmem:[%s22095_s1 + $0xc4] ss:$16 sps:$4 sm:$0xff]   ;;  %v14684_v52 = vld [vmem:[%s22095_s1 + $0x22c] ss:$16 sps:$4 sm:$0xff]  }
  0x12   :  { %v14677_v51 = vld [vmem:[%s22095_s1 + $0xc0] ss:$16 sps:$4 sm:$0xff]   ;;  %22259 = vst [vmem:[#allocation3_spill] sm:$0xff] %v14684_v52  ;;  %v14689_v53 = vld [vmem:[%s22095_s1 + $0x224] ss:$16 sps:$4 sm:$0xff]   ;;  %v14694_v54 = vld [vmem:[%s22096_s0 + $0x18] sm:$0xff]  }
  0x13   :  { %290 = vmatpush1.bf16.msra.mxu0 %v14469_v19  ;;  %363 = vmatpush1.bf16.msra.mxu1 %v14474_v20  ;;  %22260 = vst [vmem:[#allocation4_spill] sm:$0xff] %v14689_v53  ;;  %v14709_v55 = vld [vmem:[%s22096_s0 + $0x20] sm:$0xff]   ;;  %v14714_v56 = vld [vmem:[%s22095_s1 + $0x228] ss:$16 sps:$4 sm:$0xff]   ;;  %v14724_v58 = vld [vmem:[%s22095_s1 + $0x20c] ss:$16 sps:$4 sm:$0xff]  }
  0x14   :  { %291 = vmatprep.subr.bf16.mxu0 %v14481_v21  ;;  %364 = vmatprep.subr.bf16.mxu1 %v14488_v22  ;;  %22261 = vst [vmem:[#allocation5_spill] sm:$0xff] %v14714_v56  ;;  %v14719_v57 = vld [vmem:[%s22095_s1 + $0x220] ss:$16 sps:$4 sm:$0xff]   ;;  %22263 = vst [vmem:[#allocation7_spill] sm:$0xff] %v14724_v58  ;;  %v14729_v59 = vld [vmem:[%s22095_s1 + $0x204] ss:$16 sps:$4 sm:$0xff]  }
  0x15   :  { %22262 = vst [vmem:[#allocation6_spill] sm:$0xff] %v14719_v57  ;;  %22264 = vst [vmem:[#allocation8_spill] sm:$0xff] %v14729_v59  ;;  %v14738_v60 = vld [vmem:[%s22095_s1 + $0x208] ss:$16 sps:$4 sm:$0xff]   ;;  %v14745_v61 = vld [vmem:[%s22095_s1 + $0x200] ss:$16 sps:$4 sm:$0xff]  }
  0x16   :  { %22265 = vst [vmem:[#allocation9_spill] sm:$0xff] %v14738_v60  ;;  %22266 = vst [vmem:[#allocation10_spill] sm:$0xff] %v14745_v61  ;;  %v14750_v62 = vld [vmem:[%s22095_s1 + $0x1ec] ss:$16 sps:$4 sm:$0xff]   ;;  %v14757_v63 = vld [vmem:[%s22095_s1 + $0x1e4] ss:$16 sps:$4 sm:$0xff]  }
  0x17   :  { %292 = vmatpush1.bf16.msra.mxu0 %v14493_v23  ;;  %365 = vmatpush1.bf16.msra.mxu1 %v14500_v24  ;;  %22267 = vst [vmem:[#allocation11_spill] sm:$0xff] %v14750_v62  ;;  %22268 = vst [vmem:[#allocation12_spill] sm:$0xff] %v14757_v63  ;;  %vm9623_vm6 = vcmask 1044484   ;;  %vm9626_vm7 = vcmask 1045509   ;;  %vm9629_vm8 = vcmask 1046534   ;;  %vm9632_vm9 = vcmask 1047559  }
  0x18   :  { %677 = vmatprep.subr.bf16.mxu1 %v14505_v25  ;;  %604 = vmatprep.subr.bf16.mxu0 %v14512_v26  ;;  %vm11576_vm10 = vcmask 130048  }
  0x1a   :  { %11728 = vmatmul.mubr.msk.bf16.vlgmr.msra.gmra.mxu0 %vm34_vm0, %v14517_v27  ;;  %11732 = vmatmul.mubr.msk.bf16.vlgmr.msra.gmra.mxu1 %vm34_vm0, %v14517_v27 }
  0x1b   :  { %678 = vmatpush1.bf16.msra.mxu1 %v14524_v28  ;;  %605 = vmatpush1.bf16.msra.mxu0 %v14529_v29 }
  0x1c   :  { %679 = vmatprep.subr.bf16.mxu1 %v14536_v30  ;;  %319 = vmatprep.mubr.bf16.mxu0 %v22107_v1 }
  0x1d   :  { %392 = vmatprep.mubr.bf16.mxu1 %v22107_v1  ;;  %606 = vmatprep.subr.bf16.mxu0 %v14541_v31 }
  0x1f   :  { %680 = vmatpush1.bf16.msra.mxu1 %v14550_v32  ;;  %607 = vmatpush1.bf16.msra.mxu0 %v14557_v33 }
  0x20   :  { %681 = vmatprep.subr.bf16.mxu1 %v14564_v34  ;;  %608 = vmatprep.subr.bf16.mxu0 %v14569_v35 }
  0x22   :  { %11729 = vmatmul.mubr.msk.bf16.gmra.mxu0 %vm34_vm0, %v14575_v36  ;;  %11733 = vmatmul.mubr.msk.bf16.gmra.mxu1 %vm34_vm0, %v14575_v36 }
  0x23   :  { %682 = vmatpush1.bf16.msra.mxu1 %v14581_v37  ;;  %329 = vmatprep.mubr.bf16.mxu0 %v22107_v1 }
  0x24   :  { %402 = vmatprep.mubr.bf16.mxu1 %v22107_v1  ;;  %609 = vmatpush1.bf16.msra.mxu0 %v14588_v38 }
  0x25   :  { %683 = vmatprep.subr.bf16.mxu1 %v14595_v39  ;;  %610 = vmatprep.subr.bf16.mxu0 %v14600_v40 }
  0x27   :  { %684 = vmatpush1.bf16.msra.mxu1 %v14609_v41 }
  0x28   :  { %611 = vmatpush1.bf16.msra.mxu0 %v14616_v42  ;;  %685 = vmatprep.subr.bf16.mxu1 %v14623_v43 }
  0x29   :  { %612 = vmatprep.subr.bf16.mxu0 %v14630_v44 }
  0x2a   :  { %11730 = vmatmul.mubr.msk.bf16.gmra.mxu0 %vm34_vm0, %v14635_v45  ;;  %11734 = vmatmul.mubr.msk.bf16.gmra.mxu1 %vm34_vm0, %v14635_v45 }
  0x2b   :  { %339 = vmatprep.mubr.bf16.mxu0 %v22107_v1  ;;  %412 = vmatprep.mubr.bf16.mxu1 %v22107_v1 }
  0x2c   :  { %686 = vmatpush1.bf16.msra.mxu1 %v14641_v46  ;;  %613 = vmatpush1.bf16.msra.mxu0 %v14646_v47 }
  0x2d   :  { %687 = vmatprep.subr.bf16.mxu1 %v14653_v48  ;;  %614 = vmatprep.subr.bf16.mxu0 %v14659_v49 }
  0x30   :  { %688 = vmatpush1.bf16.msra.mxu1 %v14670_v50  ;;  %615 = vmatpush1.bf16.msra.mxu0 %v14677_v51 }
  0x31   :  { %1032 = vmatprep.subr.bf16.mxu1 %v14684_v52  ;;  %959 = vmatprep.subr.bf16.mxu0 %v14689_v53  ;;  %v14828_v53 = vld [vmem:[%s22095_s1 + $0x1a8] ss:$16 sps:$4 sm:$0xff]   ;;  %v14834_v52 = vld [vmem:[%s22095_s1 + $0x1a0] ss:$16 sps:$4 sm:$0xff]  }
  0x32   :  { %11731 = vmatmul.mubr.msk.bf16.gmra.mxu0 %vm34_vm0, %v14694_v54  ;;  %11735 = vmatmul.mubr.msk.bf16.gmra.mxu1 %vm34_vm0, %v14694_v54  ;;  %22278 = vst [vmem:[#allocation21_spill] sm:$0xff] %v14828_v53  ;;  %22279 = vst [vmem:[#allocation22_spill] sm:$0xff] %v14834_v52 }
  0x33   :  { %632 = vmatprep.mubr.bf16.mxu0 %v22107_v1  ;;  %705 = vmatprep.mubr.bf16.mxu1 %v22107_v1 }
  0x3a   :  { %11788 = vmatmul.mubr.msk.bf16.vlgmr.msra.gmra.mxu0 %vm34_vm0, %v14709_v55  ;;  %11792 = vmatmul.mubr.msk.bf16.vlgmr.msra.gmra.mxu1 %vm34_vm0, %v14709_v55 }
  0x3b   :  { %1033 = vmatpush1.bf16.msra.mxu1 %v14714_v56  ;;  %960 = vmatpush1.bf16.msra.mxu0 %v14719_v57  ;;  %v14764_v57 = vld [vmem:[%s22096_s0 + $0x28] sm:$0xff]   ;;  %v14816_v56 = vld [vmem:[%s22096_s0 + $0x30] sm:$0xff]  }
  0x3c   :  { %1034 = vmatprep.subr.bf16.mxu1 %v14724_v58  ;;  %642 = vmatprep.mubr.bf16.mxu0 %v22107_v1  ;;  %v14771_v58 = vld [vmem:[%s22095_s1 + $0x1e8] ss:$16 sps:$4 sm:$0xff]  }
  0x3d   :  { %715 = vmatprep.mubr.bf16.mxu1 %v22107_v1  ;;  %961 = vmatprep.subr.bf16.mxu0 %v14729_v59  ;;  %22269 = vst [vmem:[#allocation13_spill] sm:$0xff] %v14771_v58  ;;  %v14778_v1 = vld [vmem:[%s22095_s1 + $0x1e0] ss:$16 sps:$4 sm:$0xff]  }
  0x3e   :  { %22270 = vst [vmem:[#allocation14_spill] sm:$0xff] %v14778_v1  ;;  %v14806_v59 = vld [vmem:[%s22095_s1 + $0x1c0] ss:$16 sps:$4 sm:$0xff]  }
  0x3f   :  { %1035 = vmatpush1.bf16.msra.mxu1 %v14738_v60  ;;  %962 = vmatpush1.bf16.msra.mxu0 %v14745_v61  ;;  %v14783_v60 = vld [vmem:[%s22095_s1 + $0x1cc] ss:$16 sps:$4 sm:$0xff]   ;;  %v14788_v61 = vld [vmem:[%s22095_s1 + $0x1c4] ss:$16 sps:$4 sm:$0xff]   ;;  %22275 = vst [vmem:[#allocation18_spill] sm:$0xff] %v14806_v59 }
  0x40   :  { %1036 = vmatprep.subr.bf16.mxu1 %v14750_v62  ;;  %963 = vmatprep.subr.bf16.mxu0 %v14757_v63  ;;  %22271 = vst [vmem:[#allocation15_spill] sm:$0xff] %v14783_v60  ;;  %22272 = vst [vmem:[#allocation16_spill] sm:$0xff] %v14788_v61  ;;  %v22273_v63 = vmov 0   ;;  %v14799_v62 = vld [vmem:[%s22095_s1 + $0x1c8] ss:$16 sps:$4 sm:$0xff]  }
  0x41   :  { %22274 = vst [vmem:[#allocation17_spill] sm:$0xff] %v14799_v62 }
  0x42   :  { %11789 = vmatmul.mubr.msk.bf16.gmra.mxu0 %vm34_vm0, %v14764_v57  ;;  %11793 = vmatmul.mubr.msk.bf16.gmra.mxu1 %vm34_vm0, %v14764_v57 }
  0x43   :  { %1037 = vmatpush1.bf16.msra.mxu1 %v14771_v58  ;;  %652 = vmatprep.mubr.bf16.mxu0 %v22273_v63  ;;  %v14811_v58 = vld [vmem:[%s22095_s1 + $0x1ac] ss:$16 sps:$4 sm:$0xff]  }
  0x44   :  { %725 = vmatprep.mubr.bf16.mxu1 %v22273_v63  ;;  %964 = vmatpush1.bf16.msra.mxu0 %v14778_v1  ;;  %22276 = vst [vmem:[#allocation19_spill] sm:$0xff] %v14811_v58  ;;  %v14823_v1 = vld [vmem:[%s22095_s1 + $0x1a4] ss:$16 sps:$4 sm:$0xff]  }
  0x45   :  { %1038 = vmatprep.subr.bf16.mxu1 %v14783_v60  ;;  %965 = vmatprep.subr.bf16.mxu0 %v14788_v61  ;;  %22277 = vst [vmem:[#allocation20_spill] sm:$0xff] %v14823_v1  ;;  %v14841_v61 = vld [vmem:[%s22095_s1 + $0x18c] ss:$16 sps:$4 sm:$0xff]   ;;  %v14877_v60 = vld [vmem:[%s22095_s1 + $0x2e4] ss:$16 sps:$4 sm:$0xff]  }
  0x46   :  { %22280 = vst [vmem:[#allocation23_spill] sm:$0xff] %v14841_v61  ;;  %22285 = vst [vmem:[#allocation28_spill] sm:$0xff] %v14877_v60 }
  0x47   :  { %1039 = vmatpush1.bf16.msra.mxu1 %v14799_v62  ;;  %v14847_v62 = vld [vmem:[%s22095_s1 + $0x184] ss:$16 sps:$4 sm:$0xff]  }
  0x48   :  { %966 = vmatpush1.bf16.msra.mxu0 %v14806_v59  ;;  %1040 = vmatprep.subr.bf16.mxu1 %v14811_v58  ;;  %22281 = vst [vmem:[#allocation24_spill] sm:$0xff] %v14847_v62  ;;  %v14856_v58 = vld [vmem:[%s22095_s1 + $0x188] ss:$16 sps:$4 sm:$0xff]   ;;  %v14870_v59 = vld [vmem:[%s22095_s1 + $0x2ec] ss:$16 sps:$4 sm:$0xff]  }
  0x49   :  { %967 = vmatprep.subr.bf16.mxu0 %v14823_v1  ;;  %22282 = vst [vmem:[#allocation25_spill] sm:$0xff] %v14856_v58  ;;  %v14863_v1 = vld [vmem:[%s22095_s1 + $0x180] ss:$16 sps:$4 sm:$0xff]   ;;  %22284 = vst [vmem:[#allocation27_spill] sm:$0xff] %v14870_v59 }
  0x4a   :  { %11790 = vmatmul.mubr.msk.bf16.gmra.mxu0 %vm34_vm0, %v14816_v56  ;;  %11794 = vmatmul.mubr.msk.bf16.gmra.mxu1 %vm34_vm0, %v14816_v56  ;;  %22283 = vst [vmem:[#allocation26_spill] sm:$0xff] %v14863_v1 }
  0x4b   :  { %662 = vmatprep.mubr.bf16.mxu0 %v22273_v63  ;;  %735 = vmatprep.mubr.bf16.mxu1 %v22273_v63 }
  0x4c   :  { %1041 = vmatpush1.bf16.msra.mxu1 %v14828_v53  ;;  %968 = vmatpush1.bf16.msra.mxu0 %v14834_v52  ;;  %v14882_v53 = vld [vmem:[%s22096_s0 + $0x38] sm:$0xff]   ;;  %v14931_v52 = vld [vmem:[%s22095_s1 + $0x2c0] ss:$16 sps:$4 sm:$0xff]  }
  0x4d   :  { %1042 = vmatprep.subr.bf16.mxu1 %v14841_v61  ;;  %969 = vmatprep.subr.bf16.mxu0 %v14847_v62  ;;  %22286 = vst [vmem:[#allocation29_spill] sm:$0xff] %v14882_v53  ;;  %v14917_v62 = vld [vmem:[%s22095_s1 + $0x2c8] ss:$16 sps:$4 sm:$0xff]   ;;  %v14922_v61 = vld [vmem:[%s22095_s1 + $0x2c4] ss:$16 sps:$4 sm:$0xff]   ;;  %22293 = vst [vmem:[#allocation36_spill] sm:$0xff] %v14931_v52 }
  0x4e   :  { %22291 = vst [vmem:[#allocation34_spill] sm:$0xff] %v14917_v62  ;;  %22292 = vst [vmem:[#allocation35_spill] sm:$0xff] %v14922_v61 }
  0x50   :  { %1043 = vmatpush1.bf16.msra.mxu1 %v14856_v58  ;;  %970 = vmatpush1.bf16.msra.mxu0 %v14863_v1  ;;  %v14897_v58 = vld [vmem:[%s22096_s0 + $0x40] sm:$0xff]   ;;  %v14912_v1 = vld [vmem:[%s22095_s1 + $0x2cc] ss:$16 sps:$4 sm:$0xff]  }
  0x51   :  { %1387 = vmatprep.subr.bf16.mxu1 %v14870_v59  ;;  %1314 = vmatprep.subr.bf16.mxu0 %v14877_v60  ;;  %22287 = vst [vmem:[#allocation30_spill] sm:$0xff] %v14897_v58  ;;  %v14902_v59 = vld [vmem:[%s22095_s1 + $0x2e8] ss:$16 sps:$4 sm:$0xff]   ;;  %v14907_v60 = vld [vmem:[%s22095_s1 + $0x2e0] ss:$16 sps:$4 sm:$0xff]   ;;  %22290 = vst [vmem:[#allocation33_spill] sm:$0xff] %v14912_v1 }
  0x52   :  { %11791 = vmatmul.mubr.msk.bf16.gmra.mxu0 %vm34_vm0, %v14882_v53  ;;  %11795 = vmatmul.mubr.msk.bf16.gmra.mxu1 %vm34_vm0, %v14882_v53  ;;  %22288 = vst [vmem:[#allocation31_spill] sm:$0xff] %v14902_v59  ;;  %22289 = vst [vmem:[#allocation32_spill] sm:$0xff] %v14907_v60  ;;  %v14938_v53 = vld [vmem:[%s22095_s1 + $0x2ac] ss:$16 sps:$4 sm:$0xff]  }
  0x53   :  { %987 = vmatprep.mubr.bf16.mxu0 %v22273_v63  ;;  %1060 = vmatprep.mubr.bf16.mxu1 %v22273_v63  ;;  %22294 = vst [vmem:[#allocation37_spill] sm:$0xff] %v14938_v53 }
  0x5a   :  { %11848 = vmatmul.mubr.msk.bf16.vlgmr.msra.gmra.mxu0 %vm34_vm0, %v14897_v58  ;;  %11852 = vmatmul.mubr.msk.bf16.vlgmr.msra.gmra.mxu1 %vm34_vm0, %v14897_v58  ;;  %v14945_v58 = vld [vmem:[%s22095_s1 + $0x2a4] ss:$16 sps:$4 sm:$0xff]  }
  0x5b   :  { %1388 = vmatpush1.bf16.msra.mxu1 %v14902_v59  ;;  %1315 = vmatpush1.bf16.msra.mxu0 %v14907_v60  ;;  %22295 = vst [vmem:[#allocation38_spill] sm:$0xff] %v14945_v58  ;;  %v14952_v60 = vld [vmem:[%s22096_s0 + $0x48] sm:$0xff]   ;;  %v15006_v59 = vld [vmem:[%s22095_s1 + $0x264] ss:$16 sps:$4 sm:$0xff]  }
  0x5c   :  { %1389 = vmatprep.subr.bf16.mxu1 %v14912_v1  ;;  %997 = vmatprep.mubr.bf16.mxu0 %v22273_v63  ;;  %v14959_v1 = vld [vmem:[%s22095_s1 + $0x2a8] ss:$16 sps:$4 sm:$0xff]   ;;  %22303 = vst [vmem:[#allocation46_spill] sm:$0xff] %v15006_v59 }
  0x5d   :  { %1070 = vmatprep.mubr.bf16.mxu1 %v22273_v63  ;;  %1316 = vmatprep.subr.bf16.mxu0 %v14922_v61  ;;  %22296 = vst [vmem:[#allocation39_spill] sm:$0xff] %v14959_v1  ;;  %v14966_v61 = vld [vmem:[%s22095_s1 + $0x2a0] ss:$16 sps:$4 sm:$0xff]  }
  0x5e   :  { %22297 = vst [vmem:[#allocation40_spill] sm:$0xff] %v14966_v61 }
  0x5f   :  { %1390 = vmatpush1.bf16.msra.mxu1 %v14917_v62  ;;  %1317 = vmatpush1.bf16.msra.mxu0 %v14931_v52  ;;  %v14971_v62 = vld [vmem:[%s22095_s1 + $0x28c] ss:$16 sps:$4 sm:$0xff]   ;;  %v14976_v52 = vld [vmem:[%s22095_s1 + $0x284] ss:$16 sps:$4 sm:$0xff]  }
  0x60   :  { %1391 = vmatprep.subr.bf16.mxu1 %v14938_v53  ;;  %1318 = vmatprep.subr.bf16.mxu0 %v14945_v58  ;;  %22298 = vst [vmem:[#allocation41_spill] sm:$0xff] %v14971_v62  ;;  %22299 = vst [vmem:[#allocation42_spill] sm:$0xff] %v14976_v52  ;;  %v14987_v58 = vld [vmem:[%s22095_s1 + $0x288] ss:$16 sps:$4 sm:$0xff]   ;;  %v14994_v53 = vld [vmem:[%s22095_s1 + $0x280] ss:$16 sps:$4 sm:$0xff]  }
  0x61   :  { %22300 = vst [vmem:[#allocation43_spill] sm:$0xff] %v14987_v58  ;;  %22301 = vst [vmem:[#allocation44_spill] sm:$0xff] %v14994_v53 }
  0x62   :  { %11849 = vmatmul.mubr.msk.bf16.gmra.mxu0 %vm34_vm0, %v14952_v60  ;;  %11853 = vmatmul.mubr.msk.bf16.gmra.mxu1 %vm34_vm0, %v14952_v60 }
  0x63   :  { %1392 = vmatpush1.bf16.msra.mxu1 %v14959_v1  ;;  %1007 = vmatprep.mubr.bf16.mxu0 %v22273_v63  ;;  %v14999_v1 = vld [vmem:[%s22095_s1 + $0x26c] ss:$16 sps:$4 sm:$0xff]  }
  0x64   :  { %1080 = vmatprep.mubr.bf16.mxu1 %v22273_v63  ;;  %1319 = vmatpush1.bf16.msra.mxu0 %v14966_v61  ;;  %22302 = vst [vmem:[#allocation45_spill] sm:$0xff] %v14999_v1  ;;  %v15011_v61 = vld [vmem:[%s22096_s0 + $0x50] sm:$0xff]  }
  0x65   :  { %1393 = vmatprep.subr.bf16.mxu1 %v14971_v62  ;;  %1320 = vmatprep.subr.bf16.mxu0 %v14976_v52  ;;  %22304 = vst [vmem:[#allocation47_spill] sm:$0xff] %v15011_v61  ;;  %v15019_v52 = vld [vmem:[%s22095_s1 + $0x268] ss:$16 sps:$4 sm:$0xff]   ;;  %v15024_v62 = vld [vmem:[%s22095_s1 + $0x260] ss:$16 sps:$4 sm:$0xff]  }
  0x66   :  { %22305 = vst [vmem:[#allocation48_spill] sm:$0xff] %v15019_v52  ;;  %22306 = vst [vmem:[#allocation49_spill] sm:$0xff] %v15024_v62 }
  0x67   :  { %1394 = vmatpush1.bf16.msra.mxu1 %v14987_v58  ;;  %v15030_v58 = vld [vmem:[%s22095_s1 + $0x24c] ss:$16 sps:$4 sm:$0xff]  }
  0x68   :  { %1321 = vmatpush1.bf16.msra.mxu0 %v14994_v53  ;;  %1395 = vmatprep.subr.bf16.mxu1 %v14999_v1  ;;  %22307 = vst [vmem:[#allocation50_spill] sm:$0xff] %v15030_v58  ;;  %v15035_v1 = vld [vmem:[%s22095_s1 + $0x244] ss:$16 sps:$4 sm:$0xff]   ;;  %v15053_v53 = vld [vmem:[%s22095_s1 + $0x240] ss:$16 sps:$4 sm:$0xff]  }
  0x69   :  { %1322 = vmatprep.subr.bf16.mxu0 %v15006_v59  ;;  %22308 = vst [vmem:[#allocation51_spill] sm:$0xff] %v15035_v1  ;;  %v15048_v59 = vld [vmem:[%s22095_s1 + $0x248] ss:$16 sps:$4 sm:$0xff]   ;;  %22310 = vst [vmem:[#allocation53_spill] sm:$0xff] %v15053_v53 }
  0x6a   :  { %11850 = vmatmul.mubr.msk.bf16.gmra.mxu0 %vm34_vm0, %v15011_v61  ;;  %11854 = vmatmul.mubr.msk.bf16.gmra.mxu1 %vm34_vm0, %v15011_v61  ;;  %22309 = vst [vmem:[#allocation52_spill] sm:$0xff] %v15048_v59  ;;  %v15070_v61 = vld [vmem:[%s22096_s0 + $0x58] sm:$0xff]  }
  0x6b   :  { %1017 = vmatprep.mubr.bf16.mxu0 %v22273_v63  ;;  %1090 = vmatprep.mubr.bf16.mxu1 %v22273_v63  ;;  %22313 = vst [vmem:[#allocation56_spill] sm:$0xff] %v15070_v61 }
  0x6c   :  { %1396 = vmatpush1.bf16.msra.mxu1 %v15019_v52  ;;  %1323 = vmatpush1.bf16.msra.mxu0 %v15024_v62  ;;  %v15060_v52 = vld [vmem:[%s22095_s1 + $0x3ac] ss:$16 sps:$4 sm:$0xff]   ;;  %v15065_v62 = vld [vmem:[%s22095_s1 + $0x3a4] ss:$16 sps:$4 sm:$0xff]  }
  0x6d   :  { %1397 = vmatprep.subr.bf16.mxu1 %v15030_v58  ;;  %1324 = vmatprep.subr.bf16.mxu0 %v15035_v1  ;;  %22311 = vst [vmem:[#allocation54_spill] sm:$0xff] %v15060_v52  ;;  %22312 = vst [vmem:[#allocation55_spill] sm:$0xff] %v15065_v62  ;;  %v15105_v1 = vld [vmem:[%s22095_s1 + $0x384] ss:$16 sps:$4 sm:$0xff]   ;;  %v15116_v58 = vld [vmem:[%s22095_s1 + $0x388] ss:$16 sps:$4 sm:$0xff]  }
  0x6e   :  { %22318 = vst [vmem:[#allocation61_spill] sm:$0xff] %v15105_v1  ;;  %22319 = vst [vmem:[#allocation62_spill] sm:$0xff] %v15116_v58 }
  0x70   :  { %1398 = vmatpush1.bf16.msra.mxu1 %v15048_v59  ;;  %1325 = vmatpush1.bf16.msra.mxu0 %v15053_v53  ;;  %v15085_v59 = vld [vmem:[%s22096_s0 + $0x60] sm:$0xff]   ;;  %v15100_v53 = vld [vmem:[%s22095_s1 + $0x38c] ss:$16 sps:$4 sm:$0xff]  }
  0x71   :  { %1710 = vmatprep.subr.bf16.mxu1 %v15060_v52  ;;  %1637 = vmatprep.subr.bf16.mxu0 %v15065_v62  ;;  %22314 = vst [vmem:[#allocation57_spill] sm:$0xff] %v15085_v59  ;;  %v15090_v52 = vld [vmem:[%s22095_s1 + $0x3a8] ss:$16 sps:$4 sm:$0xff]   ;;  %v15095_v62 = vld [vmem:[%s22095_s1 + $0x3a0] ss:$16 sps:$4 sm:$0xff]   ;;  %22317 = vst [vmem:[#allocation60_spill] sm:$0xff] %v15100_v53 }
  0x72   :  { %11851 = vmatmul.mubr.msk.bf16.gmra.mxu0 %vm34_vm0, %v15070_v61  ;;  %11855 = vmatmul.mubr.msk.bf16.gmra.mxu1 %vm34_vm0, %v15070_v61  ;;  %22315 = vst [vmem:[#allocation58_spill] sm:$0xff] %v15090_v52  ;;  %22316 = vst [vmem:[#allocation59_spill] sm:$0xff] %v15095_v62  ;;  %v15121_v61 = vld [vmem:[%s22095_s1 + $0x380] ss:$16 sps:$4 sm:$0xff]  }
  0x73   :  { %1342 = vmatprep.mubr.bf16.mxu0 %v22273_v63  ;;  %1415 = vmatprep.mubr.bf16.mxu1 %v22273_v63  ;;  %22320 = vst [vmem:[#allocation63_spill] sm:$0xff] %v15121_v61 }
  0x7a   :  { %11908 = vmatmul.mubr.msk.bf16.vlgmr.msra.gmra.mxu0 %vm34_vm0, %v15085_v59  ;;  %11912 = vmatmul.mubr.msk.bf16.vlgmr.msra.gmra.mxu1 %vm34_vm0, %v15085_v59  ;;  %v15147_v59 = vld [vmem:[%s22095_s1 + $0x368] ss:$16 sps:$4 sm:$0xff]  }
  0x7b   :  { %1711 = vmatpush1.bf16.msra.mxu1 %v15090_v52  ;;  %1638 = vmatpush1.bf16.msra.mxu0 %v15095_v62  ;;  %v15128_v52 = vld [vmem:[%s22095_s1 + $0x36c] ss:$16 sps:$4 sm:$0xff]   ;;  %v15133_v62 = vld [vmem:[%s22095_s1 + $0x364] ss:$16 sps:$4 sm:$0xff]   ;;  %22324 = vst [vmem:[#allocation67_spill] sm:$0xff] %v15147_v59 }
  0x7c   :  { %1712 = vmatprep.subr.bf16.mxu1 %v15100_v53  ;;  %1352 = vmatprep.mubr.bf16.mxu0 %v22273_v63  ;;  %22321 = vst [vmem:[#allocation64_spill] sm:$0xff] %v15128_v52  ;;  %22322 = vst [vmem:[#allocation65_spill] sm:$0xff] %v15133_v62  ;;  %v15140_v53 = vld [vmem:[%s22096_s0 + $0x68] sm:$0xff]  }
  0x7d   :  { %1425 = vmatprep.mubr.bf16.mxu1 %v22273_v63  ;;  %1639 = vmatprep.subr.bf16.mxu0 %v15105_v1  ;;  %22323 = vst [vmem:[#allocation66_spill] sm:$0xff] %v15140_v53  ;;  %v15154_v1 = vld [vmem:[%s22095_s1 + $0x360] ss:$16 sps:$4 sm:$0xff]  }
  0x7e   :  { %22325 = vst [vmem:[#allocation68_spill] sm:$0xff] %v15154_v1 }
  0x7f   :  { %1713 = vmatpush1.bf16.msra.mxu1 %v15116_v58  ;;  %1640 = vmatpush1.bf16.msra.mxu0 %v15121_v61  ;;  %v15159_v58 = vld [vmem:[%s22095_s1 + $0x34c] ss:$16 sps:$4 sm:$0xff]   ;;  %v15164_v61 = vld [vmem:[%s22095_s1 + $0x344] ss:$16 sps:$4 sm:$0xff]  }
  0x80   :  { %1714 = vmatprep.subr.bf16.mxu1 %v15128_v52  ;;  %1641 = vmatprep.subr.bf16.mxu0 %v15133_v62  ;;  %22326 = vst [vmem:[#allocation69_spill] sm:$0xff] %v15159_v58  ;;  %22327 = vst [vmem:[#allocation70_spill] sm:$0xff] %v15164_v61  ;;  %v15175_v62 = vld [vmem:[%s22095_s1 + $0x348] ss:$16 sps:$4 sm:$0xff]   ;;  %v15182_v52 = vld [vmem:[%s22095_s1 + $0x340] ss:$16 sps:$4 sm:$0xff]  }
  0x81   :  { %22328 = vst [vmem:[#allocation71_spill] sm:$0xff] %v15175_v62  ;;  %22329 = vst [vmem:[#allocation72_spill] sm:$0xff] %v15182_v52 }
  0x82   :  { %11909 = vmatmul.mubr.msk.bf16.gmra.mxu0 %vm34_vm0, %v15140_v53  ;;  %11913 = vmatmul.mubr.msk.bf16.gmra.mxu1 %vm34_vm0, %v15140_v53  ;;  %v15194_v53 = vld [vmem:[%s22095_s1 + $0x324] ss:$16 sps:$4 sm:$0xff]  }
  0x83   :  { %1715 = vmatpush1.bf16.msra.mxu1 %v15147_v59  ;;  %1362 = vmatprep.mubr.bf16.mxu0 %v22273_v63  ;;  %v15187_v59 = vld [vmem:[%s22095_s1 + $0x32c] ss:$16 sps:$4 sm:$0xff]   ;;  %22331 = vst [vmem:[#allocation74_spill] sm:$0xff] %v15194_v53 }
  0x84   :  { %1435 = vmatprep.mubr.bf16.mxu1 %v22273_v63  ;;  %1642 = vmatpush1.bf16.msra.mxu0 %v15154_v1  ;;  %22330 = vst [vmem:[#allocation73_spill] sm:$0xff] %v15187_v59  ;;  %v15199_v1 = vld [vmem:[%s22096_s0 + $0x70] sm:$0xff]  }
  0x85   :  { %1716 = vmatprep.subr.bf16.mxu1 %v15159_v58  ;;  %1643 = vmatprep.subr.bf16.mxu0 %v15164_v61  ;;  %v15207_v61 = vld [vmem:[%s22095_s1 + $0x328] ss:$16 sps:$4 sm:$0xff]   ;;  %v15212_v58 = vld [vmem:[%s22095_s1 + $0x320] ss:$16 sps:$4 sm:$0xff]  }
  0x86   :  { %22332 = vst [vmem:[#allocation75_spill] sm:$0xff] %v15207_v61 }
  0x87   :  { %1717 = vmatpush1.bf16.msra.mxu1 %v15175_v62  ;;  %v15218_v62 = vld [vmem:[%s22095_s1 + $0x30c] ss:$16 sps:$4 sm:$0xff]  }
  0x88   :  { %1644 = vmatpush1.bf16.msra.mxu0 %v15182_v52  ;;  %1718 = vmatprep.subr.bf16.mxu1 %v15187_v59  ;;  %v15223_v59 = vld [vmem:[%s22095_s1 + $0x304] ss:$16 sps:$4 sm:$0xff]   ;;  %v15241_v52 = vld [vmem:[%s22095_s1 + $0x300] ss:$16 sps:$4 sm:$0xff]  }
  0x89   :  { %1645 = vmatprep.subr.bf16.mxu0 %v15194_v53  ;;  %v15236_v53 = vld [vmem:[%s22095_s1 + $0x308] ss:$16 sps:$4 sm:$0xff]  }
  0x8a   :  { %11910 = vmatmul.mubr.msk.bf16.gmra.mxu0 %vm34_vm0, %v15199_v1  ;;  %11914 = vmatmul.mubr.msk.bf16.gmra.mxu1 %vm34_vm0, %v15199_v1 }
  0x8b   :  { %1372 = vmatprep.mubr.bf16.mxu0 %v22273_v63  ;;  %1445 = vmatprep.mubr.bf16.mxu1 %v22273_v63 }
  0x8c   :  { %1719 = vmatpush1.bf16.msra.mxu1 %v15207_v61  ;;  %1646 = vmatpush1.bf16.msra.mxu0 %v15212_v58  ;;  %v15248_v61 = vld [vmem:[%s22096_s0 + $0x78] sm:$0xff]  }
  0x8d   :  { %1720 = vmatprep.subr.bf16.mxu1 %v15218_v62  ;;  %1647 = vmatprep.subr.bf16.mxu0 %v15223_v59 }
  0x90   :  { %1721 = vmatpush1.bf16.msra.mxu1 %v15236_v53  ;;  %1648 = vmatpush1.bf16.msra.mxu0 %v15241_v52 }
  0x91   :  { %1984 = vmatprep.subr.bf16.mxu1 %v14370_v2  ;;  %1911 = vmatprep.subr.bf16.mxu0 %v14363_v0  ;;  %v22333_v0 = vld [vmem:[#allocation3_spill] sm:$0xff]  ;;  %v22334_v2 = vld [vmem:[#allocation4_spill] sm:$0xff] }
  0x92   :  { %11911 = vmatmul.mubr.msk.bf16.gmra.mxu0 %vm34_vm0, %v15248_v61  ;;  %11915 = vmatmul.mubr.msk.bf16.gmra.mxu1 %vm34_vm0, %v15248_v61 }
  0x93   :  { %1665 = vmatprep.mubr.bf16.mxu0 %v22273_v63  ;;  %1738 = vmatprep.mubr.bf16.mxu1 %v22273_v63 }
  0x9a   :  { %11964 = vmatmul.mubr.msk.bf16.vlgmr.msra.gmra.mxu0 %vm34_vm0, %v14517_v27  ;;  %11968 = vmatmul.mubr.msk.bf16.vlgmr.msra.gmra.mxu1 %vm34_vm0, %v14517_v27  ;;  %v22347_v27 = vld [vmem:[#allocation15_spill] sm:$0xff] }
  0x9b   :  { %1985 = vmatpush1.bf16.msra.mxu1 %v14381_v4  ;;  %1912 = vmatpush1.bf16.msra.mxu0 %v14376_v3  ;;  %v22335_v3 = vld [vmem:[#allocation29_spill] sm:$0xff] }
  0x9c   :  { %1986 = vmatprep.subr.bf16.mxu1 %v14394_v6  ;;  %1675 = vmatprep.mubr.bf16.mxu0 %v22273_v63  ;;  %v22336_v6 = vld [vmem:[#allocation30_spill] sm:$0xff] }
  0x9d   :  { %1748 = vmatprep.mubr.bf16.mxu1 %v22273_v63  ;;  %1913 = vmatprep.subr.bf16.mxu0 %v14387_v5 }
  0x9f   :  { %1987 = vmatpush1.bf16.msra.mxu1 %v14405_v8  ;;  %1914 = vmatpush1.bf16.msra.mxu0 %v14399_v7  ;;  %v22337_v7 = vld [vmem:[#allocation5_spill] sm:$0xff]  ;;  %v22338_v8 = vld [vmem:[#allocation6_spill] sm:$0xff] }
  0xa0   :  { %1988 = vmatprep.subr.bf16.mxu1 %v14416_v10  ;;  %1915 = vmatprep.subr.bf16.mxu0 %v14411_v9 }
  0xa2   :  { %11965 = vmatmul.mubr.msk.bf16.gmra.mxu0 %vm34_vm0, %v14575_v36  ;;  %11969 = vmatmul.mubr.msk.bf16.gmra.mxu1 %vm34_vm0, %v14575_v36  ;;  %v22352_v36 = vld [vmem:[#allocation20_spill] sm:$0xff] }
  0xa3   :  { %1989 = vmatpush1.bf16.msra.mxu1 %v14426_v12  ;;  %1685 = vmatprep.mubr.bf16.mxu0 %v22273_v63  ;;  %v22340_v12 = vld [vmem:[#allocation8_spill] sm:$0xff] }
  0xa4   :  { %1758 = vmatprep.mubr.bf16.mxu1 %v22273_v63  ;;  %1916 = vmatpush1.bf16.msra.mxu0 %v14421_v11  ;;  %v22339_v11 = vld [vmem:[#allocation7_spill] sm:$0xff] }
  0xa5   :  { %1990 = vmatprep.subr.bf16.mxu1 %v14440_v14  ;;  %1917 = vmatprep.subr.bf16.mxu0 %v14433_v13 }
  0xa7   :  { %1991 = vmatpush1.bf16.msra.mxu1 %v14452_v16  ;;  %v22342_v16 = vld [vmem:[#allocation10_spill] sm:$0xff] }
  0xa8   :  { %1918 = vmatpush1.bf16.msra.mxu0 %v14445_v15  ;;  %1992 = vmatprep.subr.bf16.mxu1 %v14464_v18  ;;  %v22341_v15 = vld [vmem:[#allocation9_spill] sm:$0xff] }
  0xa9   :  { %1919 = vmatprep.subr.bf16.mxu0 %v14457_v17 }
  0xaa   :  { %11966 = vmatmul.mubr.msk.bf16.gmra.mxu0 %vm34_vm0, %v14635_v45  ;;  %11970 = vmatmul.mubr.msk.bf16.gmra.mxu1 %vm34_vm0, %v14635_v45  ;;  %v22357_v45 = vld [vmem:[#allocation24_spill] sm:$0xff] }
  0xab   :  { %1695 = vmatprep.mubr.bf16.mxu0 %v22273_v63  ;;  %1768 = vmatprep.mubr.bf16.mxu1 %v22273_v63 }
  0xac   :  { %1993 = vmatpush1.bf16.msra.mxu1 %v14474_v20  ;;  %1920 = vmatpush1.bf16.msra.mxu0 %v14469_v19  ;;  %v22343_v19 = vld [vmem:[#allocation11_spill] sm:$0xff]  ;;  %v22344_v20 = vld [vmem:[#allocation12_spill] sm:$0xff] }
  0xad   :  { %1994 = vmatprep.subr.bf16.mxu1 %v14488_v22  ;;  %1921 = vmatprep.subr.bf16.mxu0 %v14481_v21 }
  0xb0   :  { %1995 = vmatpush1.bf16.msra.mxu1 %v14500_v24  ;;  %1922 = vmatpush1.bf16.msra.mxu0 %v14493_v23  ;;  %v22345_v23 = vld [vmem:[#allocation13_spill] sm:$0xff] }
  0xb1   :  { %2130 = vmatprep.subr.bf16.mxu1 %v14505_v25  ;;  %2057 = vmatprep.subr.bf16.mxu0 %v14512_v26  ;;  %v22346_v26 = vld [vmem:[#allocation14_spill] sm:$0xff] }
  0xb2   :  { %11967 = vmatmul.mubr.msk.bf16.gmra.mxu0 %vm34_vm0, %v14694_v54  ;;  %11971 = vmatmul.mubr.msk.bf16.gmra.mxu1 %vm34_vm0, %v14694_v54  ;;  %v22360_v54 = vld [vmem:[#allocation27_spill] sm:$0xff] }
  0xb3   :  { %1939 = vmatprep.mubr.bf16.mxu0 %v22273_v63  ;;  %2012 = vmatprep.mubr.bf16.mxu1 %v22273_v63 }
  0xba   :  { %11972 = vmatmul.mubr.msk.bf16.vlgmr.msra.gmra.mxu0 %vm34_vm0, %v14709_v55  ;;  %11976 = vmatmul.mubr.msk.bf16.vlgmr.msra.gmra.mxu1 %vm34_vm0, %v14709_v55  ;;  %v22361_v55 = vld [vmem:[#allocation28_spill] sm:$0xff] }
  0xbb   :  { %2131 = vmatpush1.bf16.msra.mxu1 %v14524_v28  ;;  %2058 = vmatpush1.bf16.msra.mxu0 %v14529_v29  ;;  %v22348_v28 = vld [vmem:[#allocation16_spill] sm:$0xff] }
  0xbc   :  { %2132 = vmatprep.subr.bf16.mxu1 %v14536_v30  ;;  %1949 = vmatprep.mubr.bf16.mxu0 %v22273_v63 }
  0xbd   :  { %2022 = vmatprep.mubr.bf16.mxu1 %v22273_v63  ;;  %2059 = vmatprep.subr.bf16.mxu0 %v14541_v31  ;;  %v22349_v31 = vld [vmem:[#allocation17_spill] sm:$0xff] }
  0xbf   :  { %2133 = vmatpush1.bf16.msra.mxu1 %v14550_v32  ;;  %2060 = vmatpush1.bf16.msra.mxu0 %v14557_v33 }
  0xc0   :  { %2134 = vmatprep.subr.bf16.mxu1 %v14564_v34  ;;  %2061 = vmatprep.subr.bf16.mxu0 %v14569_v35  ;;  %v22350_v34 = vld [vmem:[#allocation18_spill] sm:$0xff]  ;;  %v22351_v35 = vld [vmem:[#allocation19_spill] sm:$0xff] }
  0xc2   :  { %11973 = vmatmul.mubr.msk.bf16.gmra.mxu0 %vm34_vm0, %v14764_v57  ;;  %11977 = vmatmul.mubr.msk.bf16.gmra.mxu1 %vm34_vm0, %v14764_v57 }
  0xc3   :  { %2135 = vmatpush1.bf16.msra.mxu1 %v14581_v37  ;;  %1959 = vmatprep.mubr.bf16.mxu0 %v22273_v63 }
  0xc4   :  { %2032 = vmatprep.mubr.bf16.mxu1 %v22273_v63  ;;  %2062 = vmatpush1.bf16.msra.mxu0 %v14588_v38 }
  0xc5   :  { %2136 = vmatprep.subr.bf16.mxu1 %v14595_v39  ;;  %2063 = vmatprep.subr.bf16.mxu0 %v14600_v40  ;;  %v22353_v39 = vld [vmem:[#allocation47_spill] sm:$0xff] }
  0xc7   :  { %2137 = vmatpush1.bf16.msra.mxu1 %v14609_v41 }
  0xc8   :  { %2064 = vmatpush1.bf16.msra.mxu0 %v14616_v42  ;;  %2138 = vmatprep.subr.bf16.mxu1 %v14623_v43  ;;  %v22354_v42 = vld [vmem:[#allocation21_spill] sm:$0xff]  ;;  %v22355_v43 = vld [vmem:[#allocation22_spill] sm:$0xff] }
  0xc9   :  { %2065 = vmatprep.subr.bf16.mxu0 %v14630_v44  ;;  %v22356_v44 = vld [vmem:[#allocation23_spill] sm:$0xff] }
  0xca   :  { %11974 = vmatmul.mubr.msk.bf16.gmra.mxu0 %vm34_vm0, %v14816_v56  ;;  %11978 = vmatmul.mubr.msk.bf16.gmra.mxu1 %vm34_vm0, %v14816_v56 }
  0xcb   :  { %1969 = vmatprep.mubr.bf16.mxu0 %v22273_v63  ;;  %2042 = vmatprep.mubr.bf16.mxu1 %v22273_v63 }
  0xcc   :  { %2139 = vmatpush1.bf16.msra.mxu1 %v14641_v46  ;;  %2066 = vmatpush1.bf16.msra.mxu0 %v14646_v47 }
  0xcd   :  { %2140 = vmatprep.subr.bf16.mxu1 %v14653_v48  ;;  %2067 = vmatprep.subr.bf16.mxu0 %v14659_v49 }
  0xd0   :  { %2141 = vmatpush1.bf16.msra.mxu1 %v14670_v50  ;;  %2068 = vmatpush1.bf16.msra.mxu0 %v14677_v51  ;;  %v22358_v50 = vld [vmem:[#allocation25_spill] sm:$0xff]  ;;  %v22359_v51 = vld [vmem:[#allocation26_spill] sm:$0xff] }
  0xd1   :  { %2308 = vmatprep.subr.bf16.mxu1 %v22333_v0  ;;  %2235 = vmatprep.subr.bf16.mxu0 %v22334_v2 }
  0xd2   :  { %11975 = vmatmul.mubr.msk.bf16.gmra.mxu0 %vm34_vm0, %v22335_v3  ;;  %11979 = vmatmul.mubr.msk.bf16.gmra.mxu1 %vm34_vm0, %v22335_v3 }
  0xd3   :  { %2085 = vmatprep.mubr.bf16.mxu0 %v22273_v63  ;;  %2158 = vmatprep.mubr.bf16.mxu1 %v22273_v63 }
  0xda   :  { %v15356_v4 = vpop.f32.mrf.mxu0  ;;  %v15358_v5 = vpop.f32.mrf.mxu1  ;;  %11980 = vmatmul.mubr.msk.bf16.vlgmr.msra.gmra.mxu0 %vm34_vm0, %v22336_v6  ;;  %11984 = vmatmul.mubr.msk.bf16.vlgmr.msra.gmra.mxu1 %vm34_vm0, %v22336_v6 }
  0xdb   :  { %2309 = vmatpush1.bf16.msra.mxu1 %v22337_v7  ;;  %2236 = vmatpush1.bf16.msra.mxu0 %v22338_v8 }
  0xdc   :  { %v15366_v9 = vpop.f32.mrf.mxu0  ;;  %v15368_v10 = vpop.f32.mrf.mxu1  ;;  %2310 = vmatprep.subr.bf16.mxu1 %v22339_v11  ;;  %2095 = vmatprep.mubr.bf16.mxu0 %v22273_v63 }
  0xdd   :  { %2168 = vmatprep.mubr.bf16.mxu1 %v22273_v63  ;;  %2237 = vmatprep.subr.bf16.mxu0 %v22340_v12 }
  0xde   :  { %v15374_v13 = vpop.f32.mrf.mxu0  ;;  %v15376_v14 = vpop.f32.mrf.mxu1 }
  0xdf   :  { %2311 = vmatpush1.bf16.msra.mxu1 %v22341_v15  ;;  %2238 = vmatpush1.bf16.msra.mxu0 %v22342_v16  ;;  %v22363_v15 = vld [vmem:[#allocation57_spill] sm:$0xff] }
  0xe0   :  { %v15380_v17 = vpop.f32.mrf.mxu0  ;;  %v15382_v18 = vpop.f32.mrf.mxu1  ;;  %2312 = vmatprep.subr.bf16.mxu1 %v22343_v19  ;;  %2239 = vmatprep.subr.bf16.mxu0 %v22344_v20  ;;  %v22364_v20 = vld [vmem:[#allocation31_spill] sm:$0xff] }
  0xe2   :  { %v15386_v21 = vpop.f32.mrf.mxu0  ;;  %v15388_v22 = vpop.f32.mrf.mxu1  ;;  %11981 = vmatmul.mubr.msk.bf16.gmra.mxu0 %vm34_vm0, %v14952_v60  ;;  %11985 = vmatmul.mubr.msk.bf16.gmra.mxu1 %vm34_vm0, %v14952_v60  ;;  %v22362_v60 = vld [vmem:[#allocation56_spill] sm:$0xff] }
  0xe3   :  { %2313 = vmatpush1.bf16.msra.mxu1 %v22345_v23  ;;  %2105 = vmatprep.mubr.bf16.mxu0 %v22273_v63  ;;  %v22365_v23 = vld [vmem:[#allocation32_spill] sm:$0xff] }
  0xe4   :  { %v15396_v24 = vpop.f32.mrf.mxu0  ;;  %v15398_v25 = vpop.f32.mrf.mxu1  ;;  %2178 = vmatprep.mubr.bf16.mxu1 %v22273_v63  ;;  %2240 = vmatpush1.bf16.msra.mxu0 %v22346_v26 }
  0xe5   :  { %2314 = vmatprep.subr.bf16.mxu1 %v22347_v27  ;;  %2241 = vmatprep.subr.bf16.mxu0 %v22348_v28  ;;  %v22366_v28 = vld [vmem:[#allocation33_spill] sm:$0xff] }
  0xe6   :  { %v15404_v29 = vpop.f32.mrf.mxu0  ;;  %v15406_v30 = vpop.f32.mrf.mxu1 }
  0xe7   :  { %2315 = vmatpush1.bf16.msra.mxu1 %v22349_v31 }
  0xe8   :  { %v15409_v32 = vpop.f32.mrf.mxu0  ;;  %v15411_v33 = vpop.f32.mrf.mxu1  ;;  %2242 = vmatpush1.bf16.msra.mxu0 %v22350_v34  ;;  %2316 = vmatprep.subr.bf16.mxu1 %v22351_v35 }
  0xe9   :  { %2243 = vmatprep.subr.bf16.mxu0 %v22352_v36 }
  0xea   :  { %v15416_v37 = vpop.f32.mrf.mxu0  ;;  %v15418_v38 = vpop.f32.mrf.mxu1  ;;  %11982 = vmatmul.mubr.msk.bf16.gmra.mxu0 %vm34_vm0, %v22353_v39  ;;  %11986 = vmatmul.mubr.msk.bf16.gmra.mxu1 %vm34_vm0, %v22353_v39 }
  0xeb   :  { %2115 = vmatprep.mubr.bf16.mxu0 %v22273_v63  ;;  %2188 = vmatprep.mubr.bf16.mxu1 %v22273_v63 }
  0xec   :  { %v15426_v40 = vpop.f32.mrf.mxu0  ;;  %v15428_v41 = vpop.f32.mrf.mxu1  ;;  %2317 = vmatpush1.bf16.msra.mxu1 %v22354_v42  ;;  %2244 = vmatpush1.bf16.msra.mxu0 %v22355_v43  ;;  %v22368_v42 = vld [vmem:[#allocation34_spill] sm:$0xff]  ;;  %v22369_v43 = vld [vmem:[#allocation36_spill] sm:$0xff] }
  0xed   :  { %2318 = vmatprep.subr.bf16.mxu1 %v22356_v44  ;;  %2245 = vmatprep.subr.bf16.mxu0 %v22357_v45  ;;  %v22371_v45 = vld [vmem:[#allocation38_spill] sm:$0xff] }
  0xee   :  { %v15434_v46 = vpop.f32.mrf.mxu0  ;;  %v15436_v47 = vpop.f32.mrf.mxu1 }
  0xf0   :  { %v15438_v48 = vpop.f32.mrf.mxu0  ;;  %v15440_v49 = vpop.f32.mrf.mxu1  ;;  %2319 = vmatpush1.bf16.msra.mxu1 %v22358_v50  ;;  %2246 = vmatpush1.bf16.msra.mxu0 %v22359_v51 }
  0xf1   :  { %2486 = vmatprep.subr.bf16.mxu1 %v22360_v54  ;;  %2413 = vmatprep.subr.bf16.mxu0 %v22361_v55 }
  0xf2   :  { %v15446_v56 = vpop.f32.mrf.mxu0  ;;  %v15448_v57 = vpop.f32.mrf.mxu1  ;;  %11983 = vmatmul.mubr.msk.bf16.gmra.mxu0 %vm34_vm0, %v22362_v60  ;;  %11987 = vmatmul.mubr.msk.bf16.gmra.mxu1 %vm34_vm0, %v22362_v60 }
  0xf3   :  { %2263 = vmatprep.mubr.bf16.mxu0 %v22273_v63  ;;  %2336 = vmatprep.mubr.bf16.mxu1 %v22273_v63 }
  0xf4   :  { %v15456_v0 = vpop.f32.mrf.mxu0  ;;  %v15458_v2 = vpop.f32.mrf.mxu1 }
  0xf6   :  { %v15460_v3 = vpop.f32.mrf.mxu0  ;;  %v15462_v6 = vpop.f32.mrf.mxu1 }
  0xf8   :  { %v15464_v7 = vpop.f32.mrf.mxu0  ;;  %v15466_v8 = vpop.f32.mrf.mxu1 }
  0xfa   :  { %v634_v11 = vpop.f32.mrf.mxu0  ;;  %v707_v12 = vpop.f32.mrf.mxu1  ;;  %11988 = vmatmul.mubr.msk.bf16.vlgmr.msra.gmra.mxu0 %vm34_vm0, %v22363_v15  ;;  %11992 = vmatmul.mubr.msk.bf16.vlgmr.msra.gmra.mxu1 %vm34_vm0, %v22363_v15 }
  0xfb   :  { %v15473_v16 = vadd.f32 %v634_v11, %v15356_v4  ;;  %v15476_v19 = vadd.f32 %v707_v12, %v15358_v5  ;;  %2487 = vmatpush1.bf16.msra.mxu1 %v22364_v20  ;;  %2414 = vmatpush1.bf16.msra.mxu0 %v22365_v23  ;;  %v22367_v4 = vld [vmem:[#allocation35_spill] sm:$0xff]  ;;  %v22374_v12 = vld [vmem:[#allocation40_spill] sm:$0xff] }
  0xfc   :  { %v636_v26 = vpop.f32.mrf.mxu0  ;;  %v709_v27 = vpop.f32.mrf.mxu1  ;;  %2488 = vmatprep.subr.bf16.mxu1 %v22366_v28  ;;  %2273 = vmatprep.mubr.bf16.mxu0 %v22273_v63  ;;  %v22373_v11 = vld [vmem:[#allocation39_spill] sm:$0xff] }
  0xfd   :  { %v15483_v31 = vadd.f32 %v636_v26, %v15366_v9  ;;  %v15486_v34 = vadd.f32 %v709_v27, %v15368_v10  ;;  %2346 = vmatprep.mubr.bf16.mxu1 %v22273_v63  ;;  %2415 = vmatprep.subr.bf16.mxu0 %v22367_v4  ;;  %v22370_v10 = vld [vmem:[#allocation37_spill] sm:$0xff]  ;;  %v22377_v4 = vld [vmem:[#allocation43_spill] sm:$0xff] }
  0xfe   :  { %v638_v5 = vpop.f32.mrf.mxu0  ;;  %v711_v35 = vpop.f32.mrf.mxu1 }
  0xff   :  { %v15491_v36 = vadd.f32 %v638_v5, %v15374_v13  ;;  %v15494_v39 = vadd.f32 %v711_v35, %v15376_v14  ;;  %2489 = vmatpush1.bf16.msra.mxu1 %v22368_v42  ;;  %2416 = vmatpush1.bf16.msra.mxu0 %v22369_v43  ;;  %v22372_v14 = vld [vmem:[#allocation66_spill] sm:$0xff]  ;;  %v22378_v35 = vld [vmem:[#allocation44_spill] sm:$0xff] }
 0x100   :  { %v640_v9 = vpop.f32.mrf.mxu0  ;;  %v713_v44 = vpop.f32.mrf.mxu1  ;;  %2490 = vmatprep.subr.bf16.mxu1 %v22370_v10  ;;  %2417 = vmatprep.subr.bf16.mxu0 %v22371_v45  ;;  %v22381_v45 = vld [vmem:[#allocation48_spill] sm:$0xff] }
 0x101   :  { %v15501_v50 = vadd.f32 %v640_v9, %v15380_v17  ;;  %v15504_v51 = vadd.f32 %v713_v44, %v15382_v18  ;;  %v22380_v9 = vld [vmem:[#allocation46_spill] sm:$0xff] }
 0x102   :  { %v644_v13 = vpop.f32.mrf.mxu0  ;;  %v717_v54 = vpop.f32.mrf.mxu1  ;;  %11989 = vmatmul.mubr.msk.bf16.gmra.mxu0 %vm34_vm0, %v22372_v14  ;;  %11993 = vmatmul.mubr.msk.bf16.gmra.mxu1 %vm34_vm0, %v22372_v14 }
 0x103   :  { %v15511_v55 = vadd.f32 %v644_v13, %v15386_v21  ;;  %v15514_v60 = vadd.f32 %v717_v54, %v15388_v22  ;;  %2491 = vmatpush1.bf16.msra.mxu1 %v22373_v11  ;;  %2283 = vmatprep.mubr.bf16.mxu0 %v22273_v63  ;;  %v22375_v21 = vld [vmem:[#allocation41_spill] sm:$0xff]  ;;  %v22376_v22 = vld [vmem:[#allocation42_spill] sm:$0xff] }
 0x104   :  { %v646_v17 = vpop.f32.mrf.mxu0  ;;  %v719_v18 = vpop.f32.mrf.mxu1  ;;  %2356 = vmatprep.mubr.bf16.mxu1 %v22273_v63  ;;  %2418 = vmatpush1.bf16.msra.mxu0 %v22374_v12  ;;  %v22382_v13 = vld [vmem:[#allocation49_spill] sm:$0xff] }
 0x105   :  { %v15521_v15 = vadd.f32 %v646_v17, %v15396_v24  ;;  %v15524_v20 = vadd.f32 %v719_v18, %v15398_v25  ;;  %2492 = vmatprep.subr.bf16.mxu1 %v22375_v21  ;;  %2419 = vmatprep.subr.bf16.mxu0 %v22376_v22  ;;  %v22379_v25 = vld [vmem:[#allocation45_spill] sm:$0xff]  ;;  %v22385_v22 = vld [vmem:[#allocation52_spill] sm:$0xff] }
 0x106   :  { %v648_v23 = vpop.f32.mrf.mxu0  ;;  %v721_v26 = vpop.f32.mrf.mxu1 }
 0x107   :  { %v15529_v27 = vadd.f32 %v648_v23, %v15404_v29  ;;  %v15532_v28 = vadd.f32 %v721_v26, %v15406_v30  ;;  %2493 = vmatpush1.bf16.msra.mxu1 %v22377_v4  ;;  %v22387_v26 = vld [vmem:[#allocation54_spill] sm:$0xff]  ;;  %v22388_v4 = vld [vmem:[#allocation55_spill] sm:$0xff] }
 0x108   :  { %v650_v5 = vpop.f32.mrf.mxu0  ;;  %v723_v24 = vpop.f32.mrf.mxu1  ;;  %2420 = vmatpush1.bf16.msra.mxu0 %v22378_v35  ;;  %2494 = vmatprep.subr.bf16.mxu1 %v22379_v25 }
 0x109   :  { %v15538_v42 = vadd.f32 %v650_v5, %v15409_v32  ;;  %v15541_v43 = vadd.f32 %v723_v24, %v15411_v33  ;;  %2421 = vmatprep.subr.bf16.mxu0 %v22380_v9 }
 0x10a   :  { %v654_v29 = vpop.f32.mrf.mxu0  ;;  %v727_v44 = vpop.f32.mrf.mxu1  ;;  %11990 = vmatmul.mubr.msk.bf16.gmra.mxu0 %vm34_vm0, %v15199_v1  ;;  %11994 = vmatmul.mubr.msk.bf16.gmra.mxu1 %vm34_vm0, %v15199_v1 }
 0x10b   :  { %v15549_v30 = vadd.f32 %v654_v29, %v15416_v37  ;;  %v15552_v10 = vadd.f32 %v727_v44, %v15418_v38  ;;  %2293 = vmatprep.mubr.bf16.mxu0 %v22273_v63  ;;  %2366 = vmatprep.mubr.bf16.mxu1 %v22273_v63  ;;  %v22383_v37 = vld [vmem:[#allocation50_spill] sm:$0xff]  ;;  %v22384_v38 = vld [vmem:[#allocation51_spill] sm:$0xff] }
 0x10c   :  { %v656_v32 = vpop.f32.mrf.mxu0  ;;  %v729_v33 = vpop.f32.mrf.mxu1  ;;  %2495 = vmatpush1.bf16.msra.mxu1 %v22381_v45  ;;  %2422 = vmatpush1.bf16.msra.mxu0 %v22382_v13 }
 0x10d   :  { %v15559_v54 = vadd.f32 %v656_v32, %v15426_v40  ;;  %v15562_v1 = vadd.f32 %v729_v33, %v15428_v41  ;;  %2496 = vmatprep.subr.bf16.mxu1 %v22383_v37  ;;  %2423 = vmatprep.subr.bf16.mxu0 %v22384_v38  ;;  %v22386_v40 = vld [vmem:[#allocation53_spill] sm:$0xff]  ;;  %v22391_v38 = vld [vmem:[#allocation60_spill] sm:$0xff] }
 0x10e   :  { %v658_v14 = vpop.f32.mrf.mxu0  ;;  %v731_v11 = vpop.f32.mrf.mxu1 }
 0x10f   :  { %v15567_v17 = vadd.f32 %v658_v14, %v15434_v46  ;;  %v15570_v18 = vadd.f32 %v731_v11, %v15436_v47 }
 0x110   :  { %v660_v12 = vpop.f32.mrf.mxu0  ;;  %v733_v21 = vpop.f32.mrf.mxu1  ;;  %2497 = vmatpush1.bf16.msra.mxu1 %v22385_v22  ;;  %2424 = vmatpush1.bf16.msra.mxu0 %v22386_v40  ;;  %v22393_v40 = vld [vmem:[#allocation62_spill] sm:$0xff] }
 0x111   :  { %v15575_v41 = vadd.f32 %v660_v12, %v15438_v48  ;;  %v15578_v23 = vadd.f32 %v733_v21, %v15440_v49  ;;  %2760 = vmatprep.subr.bf16.mxu1 %v22387_v26  ;;  %2687 = vmatprep.subr.bf16.mxu0 %v22388_v4  ;;  %v22394_v26 = vld [vmem:[#allocation63_spill] sm:$0xff] }
 0x112   :  { %v664_v46 = vpop.f32.mrf.mxu0  ;;  %v737_v5 = vpop.f32.mrf.mxu1  ;;  %11991 = vmatmul.mubr.msk.bf16.gmra.mxu0 %vm34_vm0, %v15248_v61  ;;  %11995 = vmatmul.mubr.msk.bf16.gmra.mxu1 %vm34_vm0, %v15248_v61 }
 0x113   :  { %v15587_v47 = vadd.f32 %v664_v46, %v15446_v56  ;;  %v15590_v48 = vadd.f32 %v737_v5, %v15448_v57  ;;  %2441 = vmatprep.mubr.bf16.mxu0 %v22273_v63  ;;  %2514 = vmatprep.mubr.bf16.mxu1 %v22273_v63  ;;  %v22396_v46 = vld [vmem:[#allocation65_spill] sm:$0xff] }
 0x114   :  { %v666_v49 = vpop.f32.mrf.mxu0  ;;  %v739_v24 = vpop.f32.mrf.mxu1 }
 0x115   :  { %v15595_v35 = vadd.f32 %v666_v49, %v15456_v0  ;;  %v15598_v25 = vadd.f32 %v739_v24, %v15458_v2  ;;  %v15615_v2 = vld [vmem:[%s22096_s0] sm:$0xff]  }
 0x116   :  { %v668_v9 = vpop.f32.mrf.mxu0  ;;  %v741_v61 = vpop.f32.mrf.mxu1 }
 0x117   :  { %v15601_v56 = vadd.f32 %v668_v9, %v15460_v3  ;;  %v15604_v57 = vadd.f32 %v741_v61, %v15462_v6 }
 0x118   :  { %v670_v29 = vpop.f32.mrf.mxu0  ;;  %v743_v44 = vpop.f32.mrf.mxu1 }
 0x119   :  { %v15607_v32 = vadd.f32 %v670_v29, %v15464_v7  ;;  %v15610_v33 = vadd.f32 %v743_v44, %v15466_v8  ;;  %v22389_v7 = vld [vmem:[#allocation58_spill] sm:$0xff]  ;;  %v22390_v8 = vld [vmem:[#allocation59_spill] sm:$0xff]  ;;  %v22398_v44 = vld [vmem:[#allocation68_spill] sm:$0xff] }
 0x11a   :  { %v989_v0 = vpop.f32.mrf.mxu0  ;;  %v1062_v45 = vpop.f32.mrf.mxu1  ;;  %11996 = vmatmul.mubr.msk.bf16.vlgmr.msra.gmra.mxu0 %vm34_vm0, %v15615_v2  ;;  %12000 = vmatmul.mubr.msk.bf16.vlgmr.msra.gmra.mxu1 %vm34_vm0, %v15615_v2 }
 0x11b   :  { %v15622_v3 = vadd.f32 %v989_v0, %v15473_v16  ;;  %v15625_v6 = vadd.f32 %v1062_v45, %v15476_v19  ;;  %2761 = vmatpush1.bf16.msra.mxu1 %v22389_v7  ;;  %2688 = vmatpush1.bf16.msra.mxu0 %v22390_v8  ;;  %v22392_v16 = vld [vmem:[#allocation61_spill] sm:$0xff] }
 0x11c   :  { %v991_v13 = vpop.f32.mrf.mxu0  ;;  %v1064_v37 = vpop.f32.mrf.mxu1  ;;  %2762 = vmatprep.subr.bf16.mxu1 %v22391_v38  ;;  %2451 = vmatprep.mubr.bf16.mxu0 %v22273_v63  ;;  %v22401_v38 = vld [vmem:[#allocation71_spill] sm:$0xff] }
 0x11d   :  { %v15632_v14 = vadd.f32 %v991_v13, %v15483_v31  ;;  %v15635_v11 = vadd.f32 %v1064_v37, %v15486_v34  ;;  %2524 = vmatprep.mubr.bf16.mxu1 %v22273_v63  ;;  %2689 = vmatprep.subr.bf16.mxu0 %v22392_v16  ;;  %v22395_v34 = vld [vmem:[#allocation64_spill] sm:$0xff] }
 0x11e   :  { %v993_v19 = vpop.f32.mrf.mxu0  ;;  %v1066_v12 = vpop.f32.mrf.mxu1 }
 0x11f   :  { %v15640_v21 = vadd.f32 %v993_v19, %v15491_v36  ;;  %v15643_v22 = vadd.f32 %v1066_v12, %v15494_v39  ;;  %2763 = vmatpush1.bf16.msra.mxu1 %v22393_v40  ;;  %2690 = vmatpush1.bf16.msra.mxu0 %v22394_v26  ;;  %v15658_v39 = vld [vmem:[%s22096_s0 + $0x8] sm:$0xff]   ;;  %v22404_v26 = vld [vmem:[#allocation74_spill] sm:$0xff] }
 0x120   :  { %v995_v31 = vpop.f32.mrf.mxu0  ;;  %v1068_v4 = vpop.f32.mrf.mxu1  ;;  %2764 = vmatprep.subr.bf16.mxu1 %v22395_v34  ;;  %2691 = vmatprep.subr.bf16.mxu0 %v22396_v46  ;;  %v22402_v19 = vld [vmem:[#allocation72_spill] sm:$0xff]  ;;  %v22405_v46 = vld [vmem:[#allocation75_spill] sm:$0xff] }
 0x121   :  { %v15650_v5 = vadd.f32 %v995_v31, %v15501_v50  ;;  %v15653_v49 = vadd.f32 %v1068_v4, %v15504_v51  ;;  %v22397_v51 = vld [vmem:[#allocation67_spill] sm:$0xff] }
 0x122   :  { %v999_v36 = vpop.f32.mrf.mxu0  ;;  %v1072_v24 = vpop.f32.mrf.mxu1  ;;  %11997 = vmatmul.mubr.msk.bf16.gmra.mxu0 %vm34_vm0, %v15658_v39  ;;  %12001 = vmatmul.mubr.msk.bf16.gmra.mxu1 %vm34_vm0, %v15658_v39 }
 0x123   :  { %v15665_v9 = vadd.f32 %v999_v36, %v15511_v55  ;;  %v15668_v50 = vadd.f32 %v1072_v24, %v15514_v60  ;;  %2765 = vmatpush1.bf16.msra.mxu1 %v22397_v51  ;;  %2461 = vmatprep.mubr.bf16.mxu0 %v22273_v63  ;;  %v22399_v55 = vld [vmem:[#allocation69_spill] sm:$0xff]  ;;  %v22400_v60 = vld [vmem:[#allocation70_spill] sm:$0xff] }
 0x124   :  { %v1001_v61 = vpop.f32.mrf.mxu0  ;;  %v1074_v29 = vpop.f32.mrf.mxu1  ;;  %2534 = vmatprep.mubr.bf16.mxu1 %v22273_v63  ;;  %2692 = vmatpush1.bf16.msra.mxu0 %v22398_v44 }
 0x125   :  { %v15675_v0 = vadd.f32 %v1001_v61, %v15521_v15  ;;  %v15678_v45 = vadd.f32 %v1074_v29, %v15524_v20  ;;  %2766 = vmatprep.subr.bf16.mxu1 %v22399_v55  ;;  %2693 = vmatprep.subr.bf16.mxu0 %v22400_v60  ;;  %v22403_v20 = vld [vmem:[#allocation73_spill] sm:$0xff] }
 0x126   :  { %v1003_v7 = vpop.f32.mrf.mxu0  ;;  %v1076_v8 = vpop.f32.mrf.mxu1 }
 0x127   :  { %v15683_v13 = vadd.f32 %v1003_v7, %v15529_v27  ;;  %v15686_v37 = vadd.f32 %v1076_v8, %v15532_v28  ;;  %2767 = vmatpush1.bf16.msra.mxu1 %v22401_v38  ;;  %v15701_v28 = vld [vmem:[%s22096_s0 + $0x10] sm:$0xff]  }
 0x128   :  { %v1005_v16 = vpop.f32.mrf.mxu0  ;;  %v1078_v15 = vpop.f32.mrf.mxu1  ;;  %2694 = vmatpush1.bf16.msra.mxu0 %v22402_v19  ;;  %2768 = vmatprep.subr.bf16.mxu1 %v22403_v20 }
 0x129   :  { %v15692_v12 = vadd.f32 %v1005_v16, %v15538_v42  ;;  %v15695_v40 = vadd.f32 %v1078_v15, %v15541_v43  ;;  %2695 = vmatprep.subr.bf16.mxu0 %v22404_v26 }
 0x12a   :  { %v1009_v27 = vpop.f32.mrf.mxu0  ;;  %v1082_v31 = vpop.f32.mrf.mxu1  ;;  %11998 = vmatmul.mubr.msk.bf16.gmra.mxu0 %vm34_vm0, %v15701_v28  ;;  %12002 = vmatmul.mubr.msk.bf16.gmra.mxu1 %vm34_vm0, %v15701_v28 }
 0x12b   :  { %v15708_v42 = vadd.f32 %v1009_v27, %v15549_v30  ;;  %v15711_v43 = vadd.f32 %v1082_v31, %v15552_v10  ;;  %2471 = vmatprep.mubr.bf16.mxu0 %v22273_v63  ;;  %2544 = vmatprep.mubr.bf16.mxu1 %v22273_v63 }
 0x12c   :  { %v1011_v4 = vpop.f32.mrf.mxu0  ;;  %v1084_v34 = vpop.f32.mrf.mxu1  ;;  %2769 = vmatpush1.bf16.msra.mxu1 %v22405_v46  ;;  %2696 = vmatpush1.bf16.msra.mxu0 %v15212_v58 }
 0x12d   :  { %v15718_v36 = vadd.f32 %v1011_v4, %v15559_v54  ;;  %v15721_v24 = vadd.f32 %v1084_v34, %v15562_v1  ;;  %2770 = vmatprep.subr.bf16.mxu1 %v15218_v62  ;;  %2697 = vmatprep.subr.bf16.mxu0 %v15223_v59  ;;  %v13837_v59 = vld [vmem:[%s22095_s1 + $0xac] ss:$16 sps:$4 sm:$0xff]   ;;  %v13838_v1 = vld [vmem:[%s22095_s1 + $0xa4] ss:$16 sps:$4 sm:$0xff]  }
 0x12e   :  { %v1013_v30 = vpop.f32.mrf.mxu0  ;;  %v1086_v10 = vpop.f32.mrf.mxu1  ;;  %v13844_v4 = vld [vmem:[%s22095_s1 + $0x84] ss:$16 sps:$4 sm:$0xff]  }
 0x12f   :  { %v15726_v51 = vadd.f32 %v1013_v30, %v15567_v17  ;;  %v15729_v61 = vadd.f32 %v1086_v10, %v15570_v18 }
 0x130   :  { %v1015_v29 = vpop.f32.mrf.mxu0  ;;  %v1088_v58 = vpop.f32.mrf.mxu1  ;;  %2771 = vmatpush1.bf16.msra.mxu1 %v15236_v53  ;;  %2698 = vmatpush1.bf16.msra.mxu0 %v15241_v52  ;;  %v15748_v52 = vld [vmem:[%s22096_s0 + $0x18] sm:$0xff]  }
 0x131   :  { %v15734_v54 = vadd.f32 %v1015_v29, %v15575_v41  ;;  %v15737_v62 = vadd.f32 %v1088_v58, %v15578_v23  ;;  %3034 = vmatprep.subr.bf16.mxu1 %v13837_v59  ;;  %2961 = vmatprep.subr.bf16.mxu0 %v13838_v1 }
 0x132   :  { %v1019_v17 = vpop.f32.mrf.mxu0  ;;  %v1092_v53 = vpop.f32.mrf.mxu1  ;;  %11999 = vmatmul.mubr.msk.bf16.gmra.mxu0 %vm34_vm0, %v15748_v52  ;;  %12003 = vmatmul.mubr.msk.bf16.gmra.mxu1 %vm34_vm0, %v15748_v52 }
 0x133   :  { %v15755_v18 = vadd.f32 %v1019_v17, %v15587_v47  ;;  %v15758_v41 = vadd.f32 %v1092_v53, %v15590_v48  ;;  %2715 = vmatprep.mubr.bf16.mxu0 %v22273_v63  ;;  %2788 = vmatprep.mubr.bf16.mxu1 %v22273_v63 }
 0x134   :  { %v1021_v23 = vpop.f32.mrf.mxu0  ;;  %v1094_v44 = vpop.f32.mrf.mxu1 }
 0x135   :  { %v15763_v55 = vadd.f32 %v1021_v23, %v15595_v35  ;;  %v15766_v60 = vadd.f32 %v1094_v44, %v15598_v25  ;;  %v15783_v25 = vld [vmem:[%s22096_s0 + $0x20] sm:$0xff]   ;;  %v15842_v23 = vld [vmem:[%s22096_s0 + $0x28] sm:$0xff]  }
 0x136   :  { %v1023_v7 = vpop.f32.mrf.mxu0  ;;  %v1096_v8 = vpop.f32.mrf.mxu1 }
 0x137   :  { %v15769_v47 = vadd.f32 %v1023_v7, %v15601_v56  ;;  %v15772_v48 = vadd.f32 %v1096_v8, %v15604_v57 }
 0x138   :  { %v1025_v38 = vpop.f32.mrf.mxu0  ;;  %v1098_v16 = vpop.f32.mrf.mxu1 }
 0x139   :  { %v15775_v15 = vadd.f32 %v1025_v38, %v15607_v32  ;;  %v15778_v19 = vadd.f32 %v1098_v16, %v15610_v33  ;;  %v13841_v32 = vld [vmem:[%s22095_s1 + $0xa8] ss:$16 sps:$4 sm:$0xff]   ;;  %v13842_v33 = vld [vmem:[%s22095_s1 + $0xa0] ss:$16 sps:$4 sm:$0xff]   ;;  %v13852_v16 = vld [vmem:[%s22095_s1 + $0x4c] ss:$16 sps:$4 sm:$0xff]  }
 0x13a   :  { %v1344_v35 = vpop.f32.mrf.mxu0  ;;  %v1417_v20 = vpop.f32.mrf.mxu1  ;;  %12004 = vmatmul.mubr.msk.bf16.vlgmr.msra.gmra.mxu0 %vm34_vm0, %v15783_v25  ;;  %12008 = vmatmul.mubr.msk.bf16.vlgmr.msra.gmra.mxu1 %vm34_vm0, %v15783_v25  ;;  %v13851_v38 = vld [vmem:[%s22095_s1 + $0x60] ss:$16 sps:$4 sm:$0xff]  }
 0x13b   :  { %v15790_v56 = vadd.f32 %v1344_v35, %v15622_v3  ;;  %v15793_v57 = vadd.f32 %v1417_v20, %v15625_v6  ;;  %3035 = vmatpush1.bf16.msra.mxu1 %v13841_v32  ;;  %2962 = vmatpush1.bf16.msra.mxu0 %v13842_v33  ;;  %v13843_v3 = vld [vmem:[%s22095_s1 + $0x8c] ss:$16 sps:$4 sm:$0xff]   ;;  %v13853_v35 = vld [vmem:[%s22095_s1 + $0x44] ss:$16 sps:$4 sm:$0xff]  }
 0x13c   :  { %v1346_v26 = vpop.f32.mrf.mxu0  ;;  %v1419_v27 = vpop.f32.mrf.mxu1  ;;  %3036 = vmatprep.subr.bf16.mxu1 %v13843_v3  ;;  %2725 = vmatprep.mubr.bf16.mxu0 %v22273_v63  ;;  %v15889_v3 = vld [vmem:[%s22095_s1 + $0x40] ss:$16 sps:$4 sm:$0xff]  }
 0x13d   :  { %v15806_v6 = vadd.f32 %v1346_v26, %v15632_v14  ;;  %v15809_v31 = vadd.f32 %v1419_v27, %v15635_v11  ;;  %2798 = vmatprep.mubr.bf16.mxu1 %v22273_v63  ;;  %2963 = vmatprep.subr.bf16.mxu0 %v13844_v4  ;;  %v13845_v14 = vld [vmem:[%s22095_s1 + $0x88] ss:$16 sps:$4 sm:$0xff]   ;;  %v13846_v11 = vld [vmem:[%s22095_s1 + $0x80] ss:$16 sps:$4 sm:$0xff]  }
 0x13e   :  { %v1348_v34 = vpop.f32.mrf.mxu0  ;;  %v1421_v46 = vpop.f32.mrf.mxu1 }
 0x13f   :  { %v15816_v30 = vadd.f32 %v1348_v34, %v15640_v21  ;;  %v15819_v10 = vadd.f32 %v1421_v46, %v15643_v22  ;;  %3037 = vmatpush1.bf16.msra.mxu1 %v13845_v14  ;;  %2964 = vmatpush1.bf16.msra.mxu0 %v13846_v11  ;;  %v13847_v21 = vld [vmem:[%s22095_s1 + $0x6c] ss:$16 sps:$4 sm:$0xff]   ;;  %v13848_v22 = vld [vmem:[%s22095_s1 + $0x64] ss:$16 sps:$4 sm:$0xff]  }
 0x140   :  { %v1350_v29 = vpop.f32.mrf.mxu0  ;;  %v1423_v58 = vpop.f32.mrf.mxu1  ;;  %3038 = vmatprep.subr.bf16.mxu1 %v13847_v21  ;;  %2965 = vmatprep.subr.bf16.mxu0 %v13848_v22  ;;  %v15907_v34 = vld [vmem:[%s22095_s1 + $0x24] ss:$16 sps:$4 sm:$0xff]   ;;  %v15930_v21 = vld [vmem:[%s22095_s1 + $0x28] ss:$16 sps:$4 sm:$0xff]  }
 0x141   :  { %v15834_v59 = vadd.f32 %v1350_v29, %v15650_v5  ;;  %v15837_v1 = vadd.f32 %v1423_v58, %v15653_v49  ;;  %v13850_v49 = vld [vmem:[%s22095_s1 + $0x68] ss:$16 sps:$4 sm:$0xff]   ;;  %v15913_v11 = vld [vmem:[%s22096_s0 + $0x30] sm:$0xff]  }
 0x142   :  { %v1354_v17 = vpop.f32.mrf.mxu0  ;;  %v1427_v53 = vpop.f32.mrf.mxu1  ;;  %12005 = vmatmul.mubr.msk.bf16.gmra.mxu0 %vm34_vm0, %v15842_v23  ;;  %12009 = vmatmul.mubr.msk.bf16.gmra.mxu1 %vm34_vm0, %v15842_v23 }
 0x143   :  { %v15849_v44 = vadd.f32 %v1354_v17, %v15665_v9  ;;  %v15852_v5 = vadd.f32 %v1427_v53, %v15668_v50  ;;  %3039 = vmatpush1.bf16.msra.mxu1 %v13850_v49  ;;  %2735 = vmatprep.mubr.bf16.mxu0 %v22273_v63  ;;  %v15948_v17 = vld [vmem:[%s22095_s1 + $0xc] ss:$16 sps:$4 sm:$0xff]   ;;  %v15954_v53 = vld [vmem:[%s22095_s1 + $0x4] ss:$16 sps:$4 sm:$0xff]  }
 0x144   :  { %v1356_v7 = vpop.f32.mrf.mxu0  ;;  %v1429_v8 = vpop.f32.mrf.mxu1  ;;  %2808 = vmatprep.mubr.bf16.mxu1 %v22273_v63  ;;  %2966 = vmatpush1.bf16.msra.mxu0 %v13851_v38 }
 0x145   :  { %v15863_v9 = vadd.f32 %v1356_v7, %v15675_v0  ;;  %v15866_v50 = vadd.f32 %v1429_v8, %v15678_v45  ;;  %3040 = vmatprep.subr.bf16.mxu1 %v13852_v16  ;;  %2967 = vmatprep.subr.bf16.mxu0 %v13853_v35  ;;  %v15883_v45 = vld [vmem:[%s22095_s1 + $0x48] ss:$16 sps:$4 sm:$0xff]   ;;  %v15972_v35 = vld [vmem:[%s22095_s1] ss:$16 sps:$4 sm:$0xff]  }
 0x146   :  { %v1358_v20 = vpop.f32.mrf.mxu0  ;;  %v1431_v32 = vpop.f32.mrf.mxu1  ;;  %v15966_v16 = vld [vmem:[%s22095_s1 + $0x8] ss:$16 sps:$4 sm:$0xff]  }
 0x147   :  { %v15875_v33 = vadd.f32 %v1358_v20, %v15683_v13  ;;  %v15878_v0 = vadd.f32 %v1431_v32, %v15686_v37  ;;  %3041 = vmatpush1.bf16.msra.mxu1 %v15883_v45  ;;  %v15895_v13 = vld [vmem:[%s22095_s1 + $0x2c] ss:$16 sps:$4 sm:$0xff]   ;;  %v15990_v32 = vld [vmem:[%s22095_s1 + $0x164] ss:$16 sps:$4 sm:$0xff]  }
 0x148   :  { %v1360_v26 = vpop.f32.mrf.mxu0  ;;  %v1433_v27 = vpop.f32.mrf.mxu1  ;;  %2968 = vmatpush1.bf16.msra.mxu0 %v15889_v3  ;;  %3042 = vmatprep.subr.bf16.mxu1 %v15895_v13  ;;  %v15984_v20 = vld [vmem:[%s22095_s1 + $0x16c] ss:$16 sps:$4 sm:$0xff]   ;;  %22407 = vst [vmem:[#allocation4_spill] sm:$0xff] %v15990_v32 }
 0x149   :  { %v15899_v37 = vadd.f32 %v1360_v26, %v15692_v12  ;;  %v15902_v4 = vadd.f32 %v1433_v27, %v15695_v40  ;;  %2969 = vmatprep.subr.bf16.mxu0 %v15907_v34  ;;  %22406 = vst [vmem:[#allocation3_spill] sm:$0xff] %v15984_v20 }
 0x14a   :  { %v1364_v46 = vpop.f32.mrf.mxu0  ;;  %v1437_v14 = vpop.f32.mrf.mxu1  ;;  %12006 = vmatmul.mubr.msk.bf16.gmra.mxu0 %vm34_vm0, %v15913_v11  ;;  %12010 = vmatmul.mubr.msk.bf16.gmra.mxu1 %vm34_vm0, %v15913_v11 }
 0x14b   :  { %v15920_v12 = vadd.f32 %v1364_v46, %v15708_v42  ;;  %v15923_v40 = vadd.f32 %v1437_v14, %v15711_v43  ;;  %2745 = vmatprep.mubr.bf16.mxu0 %v22273_v63  ;;  %2818 = vmatprep.mubr.bf16.mxu1 %v22273_v63  ;;  %v15936_v42 = vld [vmem:[%s22095_s1 + $0x20] ss:$16 sps:$4 sm:$0xff]  }
 0x14c   :  { %v1366_v29 = vpop.f32.mrf.mxu0  ;;  %v1439_v58 = vpop.f32.mrf.mxu1  ;;  %3043 = vmatpush1.bf16.msra.mxu1 %v15930_v21  ;;  %2970 = vmatpush1.bf16.msra.mxu0 %v15936_v42 }
 0x14d   :  { %v15940_v43 = vadd.f32 %v1366_v29, %v15718_v36  ;;  %v15943_v22 = vadd.f32 %v1439_v58, %v15721_v24  ;;  %3044 = vmatprep.subr.bf16.mxu1 %v15948_v17  ;;  %2971 = vmatprep.subr.bf16.mxu0 %v15954_v53 }
 0x14e   :  { %v1368_v49 = vpop.f32.mrf.mxu0  ;;  %v1441_v36 = vpop.f32.mrf.mxu1 }
 0x14f   :  { %v15958_v7 = vadd.f32 %v1368_v49, %v15726_v51  ;;  %v15961_v24 = vadd.f32 %v1441_v36, %v15729_v61 }
 0x150   :  { %v1370_v8 = vpop.f32.mrf.mxu0  ;;  %v1443_v38 = vpop.f32.mrf.mxu1  ;;  %3045 = vmatpush1.bf16.msra.mxu1 %v15966_v16  ;;  %2972 = vmatpush1.bf16.msra.mxu0 %v15972_v35 }
 0x151   :  { %v15976_v51 = vadd.f32 %v1370_v8, %v15734_v54  ;;  %v15979_v61 = vadd.f32 %v1443_v38, %v15737_v62  ;;  %3180 = vmatprep.subr.bf16.mxu1 %v15984_v20  ;;  %3107 = vmatprep.subr.bf16.mxu0 %v15990_v32  ;;  %v15996_v62 = vld [vmem:[%s22096_s0 + $0x38] sm:$0xff]  }
 0x152   :  { %v1374_v26 = vpop.f32.mrf.mxu0  ;;  %v1447_v54 = vpop.f32.mrf.mxu1  ;;  %12007 = vmatmul.mubr.msk.bf16.gmra.mxu0 %vm34_vm0, %v15996_v62  ;;  %12011 = vmatmul.mubr.msk.bf16.gmra.mxu1 %vm34_vm0, %v15996_v62 }
 0x153   :  { %v16003_v27 = vadd.f32 %v1374_v26, %v15755_v18  ;;  %v16006_v46 = vadd.f32 %v1447_v54, %v15758_v41  ;;  %2989 = vmatprep.mubr.bf16.mxu0 %v22273_v63  ;;  %3062 = vmatprep.mubr.bf16.mxu1 %v22273_v63 }
 0x154   :  { %v1376_v14 = vpop.f32.mrf.mxu0  ;;  %v1449_v29 = vpop.f32.mrf.mxu1 }
 0x155   :  { %v16011_v58 = vadd.f32 %v1376_v14, %v15763_v55  ;;  %v16014_v49 = vadd.f32 %v1449_v29, %v15766_v60  ;;  %v16031_v60 = vld [vmem:[%s22096_s0 + $0x40] sm:$0xff]  }
 0x156   :  { %v1378_v36 = vpop.f32.mrf.mxu0  ;;  %v1451_v8 = vpop.f32.mrf.mxu1 }
 0x157   :  { %v16017_v18 = vadd.f32 %v1378_v36, %v15769_v47  ;;  %v16020_v41 = vadd.f32 %v1451_v8, %v15772_v48  ;;  %v13871_v8 = vld [vmem:[%s22095_s1 + $0x14c] ss:$16 sps:$4 sm:$0xff]  }
 0x158   :  { %v1380_v38 = vpop.f32.mrf.mxu0  ;;  %v1453_v26 = vpop.f32.mrf.mxu1 }
 0x159   :  { %v16023_v54 = vadd.f32 %v1380_v38, %v15775_v15  ;;  %v16026_v32 = vadd.f32 %v1453_v26, %v15778_v19  ;;  %v13869_v15 = vld [vmem:[%s22095_s1 + $0x168] ss:$16 sps:$4 sm:$0xff]   ;;  %v13870_v19 = vld [vmem:[%s22095_s1 + $0x160] ss:$16 sps:$4 sm:$0xff]  }
 0x15a   :  { %v1667_v55 = vpop.f32.mrf.mxu0  ;;  %v1740_v14 = vpop.f32.mrf.mxu1  ;;  %12012 = vmatmul.mubr.msk.bf16.vlgmr.msra.gmra.mxu0 %vm34_vm0, %v16031_v60  ;;  %12016 = vmatmul.mubr.msk.bf16.vlgmr.msra.gmra.mxu1 %vm34_vm0, %v16031_v60 }
 0x15b   :  { %v1811_v47 = vrot.slane %v1667_v55, 1  ;;  %v1813_v48 = vrot.slane %v1740_v14, 1  ;;  %3181 = vmatpush1.bf16.msra.mxu1 %v13869_v15  ;;  %3108 = vmatpush1.bf16.msra.mxu0 %v13870_v19  ;;  %v13872_v15 = vld [vmem:[%s22095_s1 + $0x144] ss:$16 sps:$4 sm:$0xff]  }
 0x15c   :  { %v1669_v29 = vpop.f32.mrf.mxu0  ;;  %v1742_v36 = vpop.f32.mrf.mxu1  ;;  %3182 = vmatprep.subr.bf16.mxu1 %v13871_v8  ;;  %2999 = vmatprep.mubr.bf16.mxu0 %v22273_v63 }
 0x15d   :  { %v16048_v38 = vadd.f32 %v1811_v47, %v15790_v56  ;;  %v16051_v26 = vadd.f32 %v1813_v48, %v15793_v57  ;;  %v1812_v55 = vrot.slane %v1669_v29, 1  ;;  %v1814_v14 = vrot.slane %v1742_v36, 1  ;;  %3072 = vmatprep.mubr.bf16.mxu1 %v22273_v63  ;;  %3109 = vmatprep.subr.bf16.mxu0 %v13872_v15  ;;  %v13873_v48 = vld [vmem:[%s22095_s1 + $0x148] ss:$16 sps:$4 sm:$0xff]   ;;  %v13874_v29 = vld [vmem:[%s22095_s1 + $0x140] ss:$16 sps:$4 sm:$0xff]  }
 0x15e   :  { %v1671_v19 = vpop.f32.mrf.mxu0  ;;  %v1744_v20 = vpop.f32.mrf.mxu1 }
 0x15f   :  { %22408 = vst [vmem:[#allocation29_spill] sm:$0xff] %v16048_v38  ;;  %22409 = vst [vmem:[#allocation30_spill] sm:$0xff] %v16051_v26  ;;  %v16058_v8 = vadd.f32 %v1812_v55, %v15806_v6  ;;  %v16061_v56 = vadd.f32 %v1814_v14, %v15809_v31  ;;  %v1815_v47 = vrot.slane %v1671_v19, 1  ;;  %v1817_v57 = vrot.slane %v1744_v20, 1  ;;  %3183 = vmatpush1.bf16.msra.mxu1 %v13873_v48  ;;  %v13875_v6 = vld [vmem:[%s22095_s1 + $0x12c] ss:$16 sps:$4 sm:$0xff]  }
 0x160   :  { %3110 = vmatpush1.bf16.msra.mxu0 %v13874_v29  ;;  %v1673_v36 = vpop.f32.mrf.mxu0  ;;  %v1746_v15 = vpop.f32.mrf.mxu1  ;;  %3184 = vmatprep.subr.bf16.mxu1 %v13875_v6  ;;  %v13876_v31 = vld [vmem:[%s22095_s1 + $0x124] ss:$16 sps:$4 sm:$0xff]  }
 0x161   :  { %22410 = vst [vmem:[#allocation5_spill] sm:$0xff] %v16058_v8  ;;  %22411 = vst [vmem:[#allocation6_spill] sm:$0xff] %v16061_v56  ;;  %3111 = vmatprep.subr.bf16.mxu0 %v13876_v31  ;;  %v16076_v20 = vadd.f32 %v1815_v47, %v15816_v30  ;;  %v16079_v55 = vadd.f32 %v1817_v57, %v15819_v10  ;;  %v1816_v14 = vrot.slane %v1673_v36, 1  ;;  %v1818_v19 = vrot.slane %v1746_v15, 1  ;;  %v16084_v8 = vld [vmem:[%s22096_s0 + $0x48] sm:$0xff]  }
 0x162   :  { %v1677_v48 = vpop.f32.mrf.mxu0  ;;  %v1750_v29 = vpop.f32.mrf.mxu1  ;;  %12013 = vmatmul.mubr.msk.bf16.gmra.mxu0 %vm34_vm0, %v16084_v8  ;;  %12017 = vmatmul.mubr.msk.bf16.gmra.mxu1 %vm34_vm0, %v16084_v8  ;;  %v13878_v36 = vld [vmem:[%s22095_s1 + $0x128] ss:$16 sps:$4 sm:$0xff]   ;;  %v13925_v56 = vld [vmem:[%s22095_s1 + $0x2e0] ss:$16 sps:$4 sm:$0xff]  }
 0x163   :  { %22412 = vst [vmem:[#allocation7_spill] sm:$0xff] %v16076_v20  ;;  %22413 = vst [vmem:[#allocation8_spill] sm:$0xff] %v16079_v55  ;;  %v16091_v30 = vadd.f32 %v1816_v14, %v15834_v59  ;;  %v16094_v10 = vadd.f32 %v1818_v19, %v15837_v1  ;;  %v1819_v47 = vrot.slane %v1677_v48, 1  ;;  %v1821_v57 = vrot.slane %v1750_v29, 1  ;;  %3185 = vmatpush1.bf16.msra.mxu1 %v13878_v36  ;;  %v13879_v59 = vld [vmem:[%s22095_s1 + $0x120] ss:$16 sps:$4 sm:$0xff]  }
 0x164   :  { %3009 = vmatprep.mubr.bf16.mxu0 %v22273_v63  ;;  %v1679_v15 = vpop.f32.mrf.mxu0  ;;  %v1752_v6 = vpop.f32.mrf.mxu1  ;;  %3082 = vmatprep.mubr.bf16.mxu1 %v22273_v63  ;;  %v13880_v48 = vld [vmem:[%s22095_s1 + $0x10c] ss:$16 sps:$4 sm:$0xff]   ;;  %v13881_v29 = vld [vmem:[%s22095_s1 + $0x104] ss:$16 sps:$4 sm:$0xff]  }
 0x165   :  { %22414 = vst [vmem:[#allocation9_spill] sm:$0xff] %v16091_v30  ;;  %22415 = vst [vmem:[#allocation10_spill] sm:$0xff] %v16094_v10  ;;  %3112 = vmatpush1.bf16.msra.mxu0 %v13879_v59  ;;  %v16105_v1 = vadd.f32 %v1819_v47, %v15849_v44  ;;  %v16108_v31 = vadd.f32 %v1821_v57, %v15852_v5  ;;  %v1820_v14 = vrot.slane %v1679_v15, 1  ;;  %v1822_v19 = vrot.slane %v1752_v6, 1  ;;  %v13882_v15 = vld [vmem:[%s22095_s1 + $0x108] ss:$16 sps:$4 sm:$0xff]  }
 0x166   :  { %3186 = vmatprep.subr.bf16.mxu1 %v13880_v48  ;;  %3113 = vmatprep.subr.bf16.mxu0 %v13881_v29  ;;  %v1681_v36 = vpop.f32.mrf.mxu0  ;;  %v1754_v59 = vpop.f32.mrf.mxu1  ;;  %v13883_v29 = vld [vmem:[%s22095_s1 + $0x100] ss:$16 sps:$4 sm:$0xff]  }
 0x167   :  { %22416 = vst [vmem:[#allocation11_spill] sm:$0xff] %v16105_v1  ;;  %22417 = vst [vmem:[#allocation12_spill] sm:$0xff] %v16108_v31  ;;  %v16117_v44 = vadd.f32 %v1820_v14, %v15863_v9  ;;  %v16120_v5 = vadd.f32 %v1822_v19, %v15866_v50  ;;  %v1823_v47 = vrot.slane %v1681_v36, 1  ;;  %v1825_v57 = vrot.slane %v1754_v59, 1  ;;  %3187 = vmatpush1.bf16.msra.mxu1 %v13882_v15  ;;  %v13884_v9 = vld [vmem:[%s22095_s1 + $0xec] ss:$16 sps:$4 sm:$0xff]  }
 0x168   :  { %v1683_v6 = vpop.f32.mrf.mxu0  ;;  %v1756_v48 = vpop.f32.mrf.mxu1  ;;  %3188 = vmatprep.subr.bf16.mxu1 %v13884_v9  ;;  %v13885_v59 = vld [vmem:[%s22095_s1 + $0xe4] ss:$16 sps:$4 sm:$0xff]   ;;  %v13887_v9 = vld [vmem:[%s22095_s1 + $0xe8] ss:$16 sps:$4 sm:$0xff]  }
 0x169   :  { %22418 = vst [vmem:[#allocation13_spill] sm:$0xff] %v16117_v44  ;;  %22419 = vst [vmem:[#allocation14_spill] sm:$0xff] %v16120_v5  ;;  %3114 = vmatpush1.bf16.msra.mxu0 %v13883_v29  ;;  %v16132_v50 = vadd.f32 %v1823_v47, %v15875_v33  ;;  %v16135_v14 = vadd.f32 %v1825_v57, %v15878_v0  ;;  %v1824_v19 = vrot.slane %v1683_v6, 1  ;;  %v1826_v36 = vrot.slane %v1756_v48, 1  ;;  %v16143_v44 = vld [vmem:[%s22096_s0 + $0x50] sm:$0xff]  }
 0x16a   :  { %3115 = vmatprep.subr.bf16.mxu0 %v13885_v59  ;;  %v1687_v15 = vpop.f32.mrf.mxu0  ;;  %v1760_v29 = vpop.f32.mrf.mxu1  ;;  %12014 = vmatmul.mubr.msk.bf16.gmra.mxu0 %vm34_vm0, %v16143_v44 }
 0x16b   :  { %22420 = vst [vmem:[#allocation15_spill] sm:$0xff] %v16132_v50  ;;  %22421 = vst [vmem:[#allocation16_spill] sm:$0xff] %v16135_v14  ;;  %12018 = vmatmul.mubr.msk.bf16.gmra.mxu1 %vm34_vm0, %v16143_v44  ;;  %v16150_v33 = vadd.f32 %v1824_v19, %v15899_v37  ;;  %v16153_v0 = vadd.f32 %v1826_v36, %v15902_v4  ;;  %v1827_v47 = vrot.slane %v1687_v15, 1  ;;  %v1829_v57 = vrot.slane %v1760_v29, 1  ;;  %v13888_v37 = vld [vmem:[%s22095_s1 + $0xe0] ss:$16 sps:$4 sm:$0xff]  }
 0x16c   :  { %3019 = vmatprep.mubr.bf16.mxu0 %v22273_v63  ;;  %3092 = vmatprep.mubr.bf16.mxu1 %v22273_v63  ;;  %v1689_v6 = vpop.f32.mrf.mxu0  ;;  %v1762_v48 = vpop.f32.mrf.mxu1  ;;  %v13889_v15 = vld [vmem:[%s22095_s1 + $0xcc] ss:$16 sps:$4 sm:$0xff]   ;;  %v13890_v29 = vld [vmem:[%s22095_s1 + $0xc4] ss:$16 sps:$4 sm:$0xff]  }
 0x16d   :  { %22422 = vst [vmem:[#allocation17_spill] sm:$0xff] %v16150_v33  ;;  %22423 = vst [vmem:[#allocation18_spill] sm:$0xff] %v16153_v0  ;;  %3189 = vmatpush1.bf16.msra.mxu1 %v13887_v9  ;;  %3116 = vmatpush1.bf16.msra.mxu0 %v13888_v37  ;;  %v16164_v4 = vadd.f32 %v1827_v47, %v15920_v12  ;;  %v16167_v19 = vadd.f32 %v1829_v57, %v15923_v40  ;;  %v1828_v36 = vrot.slane %v1689_v6, 1  ;;  %v13922_v14 = vld [vmem:[%s22095_s1 + $0x2e4] ss:$16 sps:$4 sm:$0xff]  }
 0x16e   :  { %v1830_v59 = vrot.slane %v1762_v48, 1  ;;  %3190 = vmatprep.subr.bf16.mxu1 %v13889_v15  ;;  %3117 = vmatprep.subr.bf16.mxu0 %v13890_v29  ;;  %v1691_v9 = vpop.f32.mrf.mxu0  ;;  %v1764_v37 = vpop.f32.mrf.mxu1  ;;  %v13891_v15 = vld [vmem:[%s22095_s1 + $0xc8] ss:$16 sps:$4 sm:$0xff]   ;;  %v13892_v29 = vld [vmem:[%s22095_s1 + $0xc0] ss:$16 sps:$4 sm:$0xff]  }
 0x16f   :  { %22424 = vst [vmem:[#allocation19_spill] sm:$0xff] %v16164_v4  ;;  %22425 = vst [vmem:[#allocation20_spill] sm:$0xff] %v16167_v19  ;;  %v16176_v12 = vadd.f32 %v1828_v36, %v15940_v43  ;;  %v1831_v47 = vrot.slane %v1691_v9, 1  ;;  %v1833_v57 = vrot.slane %v1764_v37, 1  ;;  %v13893_v9 = vld [vmem:[%s22095_s1 + $0x22c] ss:$16 sps:$4 sm:$0xff]  }
 0x170   :  { %v16179_v40 = vadd.f32 %v1830_v59, %v15943_v22  ;;  %v1693_v6 = vpop.f32.mrf.mxu0  ;;  %v1766_v48 = vpop.f32.mrf.mxu1  ;;  %v13894_v37 = vld [vmem:[%s22095_s1 + $0x224] ss:$16 sps:$4 sm:$0xff]  }
 0x171   :  { %22426 = vst [vmem:[#allocation47_spill] sm:$0xff] %v16176_v12  ;;  %3191 = vmatpush1.bf16.msra.mxu1 %v13891_v15  ;;  %3118 = vmatpush1.bf16.msra.mxu0 %v13892_v29  ;;  %v16188_v43 = vadd.f32 %v1831_v47, %v15958_v7  ;;  %v16191_v22 = vadd.f32 %v1833_v57, %v15961_v24  ;;  %v1832_v36 = vrot.slane %v1693_v6, 1  ;;  %v1834_v59 = vrot.slane %v1766_v48, 1  ;;  %v16202_v7 = vld [vmem:[%s22096_s0 + $0x58] sm:$0xff]   ;;  %v13918_v19 = vld [vmem:[%s22095_s1 + $0x184] ss:$16 sps:$4 sm:$0xff]  }
 0x172   :  { %22427 = vst [vmem:[#allocation21_spill] sm:$0xff] %v16179_v40  ;;  %3358 = vmatprep.subr.bf16.mxu1 %v13893_v9  ;;  %3285 = vmatprep.subr.bf16.mxu0 %v13894_v37  ;;  %v1697_v15 = vpop.f32.mrf.mxu0  ;;  %v1770_v29 = vpop.f32.mrf.mxu1  ;;  %v13916_v40 = vld [vmem:[%s22095_s1 + $0x1a0] ss:$16 sps:$4 sm:$0xff]  }
 0x173   :  { %22428 = vst [vmem:[#allocation22_spill] sm:$0xff] %v16188_v43  ;;  %22429 = vst [vmem:[#allocation23_spill] sm:$0xff] %v16191_v22  ;;  %12015 = vmatmul.mubr.msk.bf16.gmra.mxu0 %vm34_vm0, %v16202_v7  ;;  %12019 = vmatmul.mubr.msk.bf16.gmra.mxu1 %vm34_vm0, %v16202_v7  ;;  %v16209_v24 = vadd.f32 %v1832_v36, %v15976_v51  ;;  %v16212_v47 = vadd.f32 %v1834_v59, %v15979_v61  ;;  %v1835_v57 = vrot.slane %v1697_v15, 1 }
 0x174   :  { %v1837_v6 = vrot.slane %v1770_v29, 1  ;;  %3135 = vmatprep.mubr.bf16.mxu0 %v22273_v63  ;;  %3208 = vmatprep.mubr.bf16.mxu1 %v22273_v63  ;;  %v1699_v48 = vpop.f32.mrf.mxu0  ;;  %v1772_v9 = vpop.f32.mrf.mxu1 }
 0x175   :  { %22430 = vst [vmem:[#allocation24_spill] sm:$0xff] %v16209_v24  ;;  %22431 = vst [vmem:[#allocation25_spill] sm:$0xff] %v16212_v47  ;;  %v16217_v37 = vadd.f32 %v1835_v57, %v16003_v27  ;;  %v1836_v43 = vrot.slane %v1699_v48, 1  ;;  %v1838_v51 = vrot.slane %v1772_v9, 1 }
 0x176   :  { %v16220_v22 = vadd.f32 %v1837_v6, %v16006_v46  ;;  %v1701_v36 = vpop.f32.mrf.mxu0  ;;  %v1774_v24 = vpop.f32.mrf.mxu1 }
 0x177   :  { %22432 = vst [vmem:[#allocation26_spill] sm:$0xff] %v16217_v37  ;;  %v16223_v61 = vadd.f32 %v1836_v43, %v16011_v58  ;;  %v16226_v59 = vadd.f32 %v1838_v51, %v16014_v49  ;;  %v1839_v15 = vrot.slane %v1701_v36, 1  ;;  %v1841_v29 = vrot.slane %v1774_v24, 1  ;;  %v16241_v58 = vld [vmem:[%s22096_s0 + $0x60] sm:$0xff]   ;;  %v13901_v36 = vld [vmem:[%s22095_s1 + $0x208] ss:$16 sps:$4 sm:$0xff]  }
 0x178   :  { %22433 = vst [vmem:[#allocation27_spill] sm:$0xff] %v16220_v22  ;;  %v1703_v47 = vpop.f32.mrf.mxu0  ;;  %v1776_v12 = vpop.f32.mrf.mxu1  ;;  %v13914_v37 = vld [vmem:[%s22096_s0 + $0x70] sm:$0xff]  }
 0x179   :  { %22434 = vst [vmem:[#allocation28_spill] sm:$0xff] %v16223_v61  ;;  %22435 = vst [vmem:[#allocation56_spill] sm:$0xff] %v16226_v59  ;;  %v16229_v27 = vadd.f32 %v1839_v15, %v16017_v18  ;;  %v16232_v46 = vadd.f32 %v1841_v29, %v16020_v41  ;;  %v1840_v57 = vrot.slane %v1703_v47, 1  ;;  %v1842_v6 = vrot.slane %v1776_v12, 1  ;;  %v13897_v41 = vld [vmem:[%s22095_s1 + $0x228] ss:$16 sps:$4 sm:$0xff]  }
 0x17a   :  { %v16234_v48 = vpop.f32.mrf.mxu0  ;;  %v16236_v9 = vpop.f32.mrf.mxu1  ;;  %v13898_v12 = vld [vmem:[%s22095_s1 + $0x220] ss:$16 sps:$4 sm:$0xff]   ;;  %v13913_v59 = vld [vmem:[%s22095_s1 + $0x1a4] ss:$16 sps:$4 sm:$0xff]  }
 0x17b   :  { %22436 = vst [vmem:[#allocation57_spill] sm:$0xff] %v16229_v27  ;;  %22437 = vst [vmem:[#allocation31_spill] sm:$0xff] %v16232_v46  ;;  %12020 = vmatmul.mubr.msk.bf16.vlgmr.msra.gmra.mxu0 %vm34_vm0, %v16241_v58  ;;  %12024 = vmatmul.mubr.msk.bf16.vlgmr.msra.gmra.mxu1 %vm34_vm0, %v16241_v58  ;;  %v16248_v49 = vadd.f32 %v1840_v57, %v16023_v54  ;;  %v16251_v18 = vadd.f32 %v1842_v6, %v16026_v32  ;;  %v13899_v54 = vld [vmem:[%s22095_s1 + $0x20c] ss:$16 sps:$4 sm:$0xff]   ;;  %v13900_v32 = vld [vmem:[%s22095_s1 + $0x204] ss:$16 sps:$4 sm:$0xff]  }
 0x17c   :  { %3359 = vmatpush1.bf16.msra.mxu1 %v13897_v41  ;;  %3286 = vmatpush1.bf16.msra.mxu0 %v13898_v12  ;;  %v16259_v43 = vpop.f32.mrf.mxu0  ;;  %v16261_v24 = vpop.f32.mrf.mxu1  ;;  %v13902_v15 = vld [vmem:[%s22095_s1 + $0x200] ss:$16 sps:$4 sm:$0xff]   ;;  %v13903_v6 = vld [vmem:[%s22095_s1 + $0x1ec] ss:$16 sps:$4 sm:$0xff]   ;;  %v13904_v41 = vld [vmem:[%s22095_s1 + $0x1e4] ss:$16 sps:$4 sm:$0xff]  }
 0x17d   :  { %22438 = vst [vmem:[#allocation32_spill] sm:$0xff] %v16248_v49  ;;  %22439 = vst [vmem:[#allocation33_spill] sm:$0xff] %v16251_v18  ;;  %3360 = vmatprep.subr.bf16.mxu1 %v13899_v54  ;;  %3145 = vmatprep.mubr.bf16.mxu0 %v22273_v63  ;;  %v13908_v49 = vld [vmem:[%s22095_s1 + $0x1cc] ss:$16 sps:$4 sm:$0xff]   ;;  %v13910_v27 = vld [vmem:[%s22095_s1 + $0x1c8] ss:$16 sps:$4 sm:$0xff]  }
 0x17e   :  { %3218 = vmatprep.mubr.bf16.mxu1 %v22273_v63  ;;  %3287 = vmatprep.subr.bf16.mxu0 %v13900_v32  ;;  %v16271_v47 = vpop.f32.mrf.mxu0  ;;  %v16273_v51 = vpop.f32.mrf.mxu1  ;;  %v16298_v32 = vld [vmem:[%s22096_s0 + $0x68] sm:$0xff]  }
 0x17f   :  { %22440 = vst [vmem:[#allocation35_spill] sm:$0xff] %v16298_v32 }
 0x180   :  { %3361 = vmatpush1.bf16.msra.mxu1 %v13901_v36  ;;  %3288 = vmatpush1.bf16.msra.mxu0 %v13902_v15  ;;  %v16281_v29 = vpop.f32.mrf.mxu0  ;;  %v16283_v57 = vpop.f32.mrf.mxu1  ;;  %v13906_v36 = vld [vmem:[%s22095_s1 + $0x1e8] ss:$16 sps:$4 sm:$0xff]  }
 0x181   :  { %3362 = vmatprep.subr.bf16.mxu1 %v13903_v6  ;;  %3289 = vmatprep.subr.bf16.mxu0 %v13904_v41  ;;  %v13907_v41 = vld [vmem:[%s22095_s1 + $0x1e0] ss:$16 sps:$4 sm:$0xff]  }
 0x182   :  { %v16291_v12 = vpop.f32.mrf.mxu0  ;;  %v16293_v54 = vpop.f32.mrf.mxu1 }
 0x183   :  { %12021 = vmatmul.mubr.msk.bf16.gmra.mxu0 %vm34_vm0, %v16298_v32  ;;  %12025 = vmatmul.mubr.msk.bf16.gmra.mxu1 %vm34_vm0, %v16298_v32  ;;  %v13924_v32 = vld [vmem:[%s22095_s1 + $0x2e8] ss:$16 sps:$4 sm:$0xff]  }
 0x184   :  { %3363 = vmatpush1.bf16.msra.mxu1 %v13906_v36  ;;  %3155 = vmatprep.mubr.bf16.mxu0 %v22273_v63  ;;  %v16308_v15 = vpop.f32.mrf.mxu0  ;;  %v16310_v6 = vpop.f32.mrf.mxu1  ;;  %v13909_v36 = vld [vmem:[%s22095_s1 + $0x1c4] ss:$16 sps:$4 sm:$0xff]  }
 0x185   :  { %3228 = vmatprep.mubr.bf16.mxu1 %v22273_v63  ;;  %3290 = vmatpush1.bf16.msra.mxu0 %v13907_v41 }
 0x186   :  { %3364 = vmatprep.subr.bf16.mxu1 %v13908_v49  ;;  %3291 = vmatprep.subr.bf16.mxu0 %v13909_v36  ;;  %v16322_v18 = vpop.f32.mrf.mxu0  ;;  %v16324_v46 = vpop.f32.mrf.mxu1  ;;  %v13911_v49 = vld [vmem:[%s22095_s1 + $0x1c0] ss:$16 sps:$4 sm:$0xff]   ;;  %v13912_v36 = vld [vmem:[%s22095_s1 + $0x1ac] ss:$16 sps:$4 sm:$0xff]  }
 0x188   :  { %3365 = vmatpush1.bf16.msra.mxu1 %v13910_v27  ;;  %v16329_v41 = vpop.f32.mrf.mxu0  ;;  %v16331_v61 = vpop.f32.mrf.mxu1 }
 0x189   :  { %3292 = vmatpush1.bf16.msra.mxu0 %v13911_v49  ;;  %3366 = vmatprep.subr.bf16.mxu1 %v13912_v36 }
 0x18a   :  { %3293 = vmatprep.subr.bf16.mxu0 %v13913_v59  ;;  %v16342_v27 = vpop.f32.mrf.mxu0  ;;  %v16344_v22 = vpop.f32.mrf.mxu1  ;;  %v13915_v59 = vld [vmem:[%s22095_s1 + $0x1a8] ss:$16 sps:$4 sm:$0xff]  }
 0x18b   :  { %12022 = vmatmul.mubr.msk.bf16.gmra.mxu0 %vm34_vm0, %v13914_v37  ;;  %12026 = vmatmul.mubr.msk.bf16.gmra.mxu1 %vm34_vm0, %v13914_v37  ;;  %v13917_v37 = vld [vmem:[%s22095_s1 + $0x18c] ss:$16 sps:$4 sm:$0xff]  }
 0x18c   :  { %3165 = vmatprep.mubr.bf16.mxu0 %v22273_v63  ;;  %3238 = vmatprep.mubr.bf16.mxu1 %v22273_v63  ;;  %v16353_v49 = vpop.f32.mrf.mxu0  ;;  %v16355_v36 = vpop.f32.mrf.mxu1 }
 0x18d   :  { %3367 = vmatpush1.bf16.msra.mxu1 %v13915_v59  ;;  %3294 = vmatpush1.bf16.msra.mxu0 %v13916_v40  ;;  %v13919_v40 = vld [vmem:[%s22095_s1 + $0x188] ss:$16 sps:$4 sm:$0xff]  }
 0x18e   :  { %3368 = vmatprep.subr.bf16.mxu1 %v13917_v37  ;;  %3295 = vmatprep.subr.bf16.mxu0 %v13918_v19  ;;  %v16369_v4 = vpop.f32.mrf.mxu0  ;;  %v16371_v33 = vpop.f32.mrf.mxu1  ;;  %v13920_v37 = vld [vmem:[%s22095_s1 + $0x180] ss:$16 sps:$4 sm:$0xff]   ;;  %v13921_v19 = vld [vmem:[%s22095_s1 + $0x2ec] ss:$16 sps:$4 sm:$0xff]  }
 0x190   :  { %v16373_v59 = vpop.f32.mrf.mxu0  ;;  %v16375_v0 = vpop.f32.mrf.mxu1 }
 0x191   :  { %3369 = vmatpush1.bf16.msra.mxu1 %v13919_v40  ;;  %3296 = vmatpush1.bf16.msra.mxu0 %v13920_v37  ;;  %v13923_v40 = vld [vmem:[%s22096_s0 + $0x78] sm:$0xff]  }
 0x192   :  { %3632 = vmatprep.subr.bf16.mxu1 %v13921_v19  ;;  %3559 = vmatprep.subr.bf16.mxu0 %v13922_v14  ;;  %v16389_v50 = vpop.f32.mrf.mxu0  ;;  %v16391_v5 = vpop.f32.mrf.mxu1 }
 0x193   :  { %12023 = vmatmul.mubr.msk.bf16.gmra.mxu0 %vm34_vm0, %v13923_v40  ;;  %12027 = vmatmul.mubr.msk.bf16.gmra.mxu1 %vm34_vm0, %v13923_v40 }
 0x194   :  { %3313 = vmatprep.mubr.bf16.mxu0 %v22273_v63  ;;  %3386 = vmatprep.mubr.bf16.mxu1 %v22273_v63  ;;  %v16400_v37 = vpop.f32.mrf.mxu0  ;;  %v16402_v19 = vpop.f32.mrf.mxu1 }
 0x196   :  { %v16404_v14 = vpop.f32.mrf.mxu0  ;;  %v16406_v31 = vpop.f32.mrf.mxu1 }
 0x198   :  { %v16408_v1 = vpop.f32.mrf.mxu0  ;;  %v16410_v30 = vpop.f32.mrf.mxu1 }
 0x19a   :  { %v2087_v10 = vpop.f32.mrf.mxu0  ;;  %v2160_v55 = vpop.f32.mrf.mxu1 }
 0x19b   :  { %12028 = vmatmul.mubr.msk.bf16.vlgmr.msra.gmra.mxu0 %vm34_vm0, %v15615_v2  ;;  %12032 = vmatmul.mubr.msk.bf16.vlgmr.msra.gmra.mxu1 %vm34_vm0, %v15615_v2  ;;  %v16417_v40 = vadd.f32 %v2087_v10, %v16234_v48  ;;  %v16420_v20 = vadd.f32 %v2160_v55, %v16236_v9  ;;  %v13926_v2 = vld [vmem:[%s22095_s1 + $0x2cc] ss:$16 sps:$4 sm:$0xff]  }
 0x19c   :  { %3633 = vmatpush1.bf16.msra.mxu1 %v13924_v32  ;;  %3560 = vmatpush1.bf16.msra.mxu0 %v13925_v56  ;;  %v2089_v26 = vpop.f32.mrf.mxu0  ;;  %v2162_v38 = vpop.f32.mrf.mxu1  ;;  %v13927_v56 = vld [vmem:[%s22095_s1 + $0x2c4] ss:$16 sps:$4 sm:$0xff]  }
 0x19d   :  { %3634 = vmatprep.subr.bf16.mxu1 %v13926_v2  ;;  %3323 = vmatprep.mubr.bf16.mxu0 %v22273_v63  ;;  %v16433_v55 = vadd.f32 %v2089_v26, %v16259_v43  ;;  %v16436_v10 = vadd.f32 %v2162_v38, %v16261_v24  ;;  %v13928_v38 = vld [vmem:[%s22095_s1 + $0x2c8] ss:$16 sps:$4 sm:$0xff]   ;;  %v13929_v26 = vld [vmem:[%s22095_s1 + $0x2c0] ss:$16 sps:$4 sm:$0xff]  }
 0x19e   :  { %3396 = vmatprep.mubr.bf16.mxu1 %v22273_v63  ;;  %3561 = vmatprep.subr.bf16.mxu0 %v13927_v56  ;;  %v2091_v48 = vpop.f32.mrf.mxu0  ;;  %v2164_v9 = vpop.f32.mrf.mxu1 }
 0x19f   :  { %v16443_v32 = vadd.f32 %v2091_v48, %v16271_v47  ;;  %v16446_v2 = vadd.f32 %v2164_v9, %v16273_v51  ;;  %v13930_v47 = vld [vmem:[%s22095_s1 + $0x2ac] ss:$16 sps:$4 sm:$0xff]   ;;  %v13931_v51 = vld [vmem:[%s22095_s1 + $0x2a4] ss:$16 sps:$4 sm:$0xff]  }
 0x1a0   :  { %3635 = vmatpush1.bf16.msra.mxu1 %v13928_v38  ;;  %3562 = vmatpush1.bf16.msra.mxu0 %v13929_v26  ;;  %v2093_v43 = vpop.f32.mrf.mxu0  ;;  %v2166_v24 = vpop.f32.mrf.mxu1 }
 0x1a1   :  { %3636 = vmatprep.subr.bf16.mxu1 %v13930_v47  ;;  %3563 = vmatprep.subr.bf16.mxu0 %v13931_v51  ;;  %v16461_v56 = vadd.f32 %v2093_v43, %v16281_v29  ;;  %v16464_v48 = vadd.f32 %v2166_v24, %v16283_v57  ;;  %v13932_v29 = vld [vmem:[%s22095_s1 + $0x2a8] ss:$16 sps:$4 sm:$0xff]   ;;  %v13934_v24 = vld [vmem:[%s22095_s1 + $0x28c] ss:$16 sps:$4 sm:$0xff]   ;;  %v13935_v51 = vld [vmem:[%s22095_s1 + $0x284] ss:$16 sps:$4 sm:$0xff]  }
 0x1a2   :  { %v2097_v9 = vpop.f32.mrf.mxu0  ;;  %v2170_v38 = vpop.f32.mrf.mxu1 }
 0x1a3   :  { %12029 = vmatmul.mubr.msk.bf16.gmra.mxu0 %vm34_vm0, %v15658_v39  ;;  %12033 = vmatmul.mubr.msk.bf16.gmra.mxu1 %vm34_vm0, %v15658_v39  ;;  %v16471_v26 = vadd.f32 %v2097_v9, %v16291_v12  ;;  %v16474_v47 = vadd.f32 %v2170_v38, %v16293_v54  ;;  %v13933_v39 = vld [vmem:[%s22095_s1 + $0x2a0] ss:$16 sps:$4 sm:$0xff]  }
 0x1a4   :  { %3637 = vmatpush1.bf16.msra.mxu1 %v13932_v29  ;;  %3333 = vmatprep.mubr.bf16.mxu0 %v22273_v63  ;;  %v2099_v57 = vpop.f32.mrf.mxu0  ;;  %v2172_v43 = vpop.f32.mrf.mxu1 }
 0x1a5   :  { %3406 = vmatprep.mubr.bf16.mxu1 %v22273_v63  ;;  %3564 = vmatpush1.bf16.msra.mxu0 %v13933_v39  ;;  %v16485_v12 = vadd.f32 %v2099_v57, %v16308_v15  ;;  %v16488_v54 = vadd.f32 %v2172_v43, %v16310_v6  ;;  %v13936_v6 = vld [vmem:[%s22095_s1 + $0x288] ss:$16 sps:$4 sm:$0xff]   ;;  %v13937_v39 = vld [vmem:[%s22095_s1 + $0x280] ss:$16 sps:$4 sm:$0xff]  }
 0x1a6   :  { %3638 = vmatprep.subr.bf16.mxu1 %v13934_v24  ;;  %3565 = vmatprep.subr.bf16.mxu0 %v13935_v51  ;;  %v2101_v9 = vpop.f32.mrf.mxu0  ;;  %v2174_v38 = vpop.f32.mrf.mxu1  ;;  %v13939_v51 = vld [vmem:[%s22095_s1 + $0x264] ss:$16 sps:$4 sm:$0xff]  }
 0x1a7   :  { %v16497_v29 = vadd.f32 %v2101_v9, %v16322_v18  ;;  %v16500_v15 = vadd.f32 %v2174_v38, %v16324_v46  ;;  %v13938_v18 = vld [vmem:[%s22095_s1 + $0x26c] ss:$16 sps:$4 sm:$0xff]  }
 0x1a8   :  { %3639 = vmatpush1.bf16.msra.mxu1 %v13936_v6  ;;  %v2103_v57 = vpop.f32.mrf.mxu0  ;;  %v2176_v43 = vpop.f32.mrf.mxu1 }
 0x1a9   :  { %3566 = vmatpush1.bf16.msra.mxu0 %v13937_v39  ;;  %3640 = vmatprep.subr.bf16.mxu1 %v13938_v18  ;;  %v16512_v46 = vadd.f32 %v2103_v57, %v16329_v41  ;;  %v16515_v24 = vadd.f32 %v2176_v43, %v16331_v61  ;;  %v13940_v43 = vld [vmem:[%s22095_s1 + $0x268] ss:$16 sps:$4 sm:$0xff]   ;;  %v13942_v39 = vld [vmem:[%s22095_s1 + $0x24c] ss:$16 sps:$4 sm:$0xff]   ;;  %v13943_v18 = vld [vmem:[%s22095_s1 + $0x244] ss:$16 sps:$4 sm:$0xff]  }
 0x1aa   :  { %3567 = vmatprep.subr.bf16.mxu0 %v13939_v51  ;;  %v2107_v9 = vpop.f32.mrf.mxu0  ;;  %v2180_v38 = vpop.f32.mrf.mxu1 }
 0x1ab   :  { %12030 = vmatmul.mubr.msk.bf16.gmra.mxu0 %vm34_vm0, %v15701_v28  ;;  %12034 = vmatmul.mubr.msk.bf16.gmra.mxu1 %vm34_vm0, %v15701_v28  ;;  %v16525_v6 = vadd.f32 %v2107_v9, %v16342_v27  ;;  %v16528_v41 = vadd.f32 %v2180_v38, %v16344_v22  ;;  %v13941_v28 = vld [vmem:[%s22095_s1 + $0x260] ss:$16 sps:$4 sm:$0xff]  }
 0x1ac   :  { %3343 = vmatprep.mubr.bf16.mxu0 %v22273_v63  ;;  %3416 = vmatprep.mubr.bf16.mxu1 %v22273_v63  ;;  %v2109_v61 = vpop.f32.mrf.mxu0  ;;  %v2182_v57 = vpop.f32.mrf.mxu1 }
 0x1ad   :  { %3641 = vmatpush1.bf16.msra.mxu1 %v13940_v43  ;;  %3568 = vmatpush1.bf16.msra.mxu0 %v13941_v28  ;;  %v16539_v27 = vadd.f32 %v2109_v61, %v16353_v49  ;;  %v16542_v22 = vadd.f32 %v2182_v57, %v16355_v36  ;;  %v13944_v57 = vld [vmem:[%s22095_s1 + $0x248] ss:$16 sps:$4 sm:$0xff]   ;;  %v13945_v43 = vld [vmem:[%s22095_s1 + $0x240] ss:$16 sps:$4 sm:$0xff]  }
 0x1ae   :  { %3642 = vmatprep.subr.bf16.mxu1 %v13942_v39  ;;  %3569 = vmatprep.subr.bf16.mxu0 %v13943_v18  ;;  %v2111_v51 = vpop.f32.mrf.mxu0  ;;  %v2184_v9 = vpop.f32.mrf.mxu1  ;;  %v13947_v39 = vld [vmem:[%s22095_s1 + $0x3a4] ss:$16 sps:$4 sm:$0xff]  }
 0x1af   :  { %v16551_v38 = vadd.f32 %v2111_v51, %v16369_v4  ;;  %v16554_v49 = vadd.f32 %v2184_v9, %v16371_v33  ;;  %v13946_v33 = vld [vmem:[%s22095_s1 + $0x3ac] ss:$16 sps:$4 sm:$0xff]  }
 0x1b0   :  { %v2113_v36 = vpop.f32.mrf.mxu0  ;;  %v2186_v61 = vpop.f32.mrf.mxu1 }
 0x1b1   :  { %3643 = vmatpush1.bf16.msra.mxu1 %v13944_v57  ;;  %3570 = vmatpush1.bf16.msra.mxu0 %v13945_v43  ;;  %v16563_v28 = vadd.f32 %v2113_v36, %v16373_v59  ;;  %v16566_v4 = vadd.f32 %v2186_v61, %v16375_v0 }
 0x1b2   :  { %3906 = vmatprep.subr.bf16.mxu1 %v13946_v33  ;;  %3833 = vmatprep.subr.bf16.mxu0 %v13947_v39  ;;  %v2117_v18 = vpop.f32.mrf.mxu0  ;;  %v2190_v51 = vpop.f32.mrf.mxu1 }
 0x1b3   :  { %12031 = vmatmul.mubr.msk.bf16.gmra.mxu0 %vm34_vm0, %v15748_v52  ;;  %12035 = vmatmul.mubr.msk.bf16.gmra.mxu1 %vm34_vm0, %v15748_v52  ;;  %v16579_v0 = vadd.f32 %v2117_v18, %v16389_v50  ;;  %v16582_v59 = vadd.f32 %v2190_v51, %v16391_v5 }
 0x1b4   :  { %3587 = vmatprep.mubr.bf16.mxu0 %v22273_v63  ;;  %3660 = vmatprep.mubr.bf16.mxu1 %v22273_v63  ;;  %v2119_v9 = vpop.f32.mrf.mxu0  ;;  %v2192_v36 = vpop.f32.mrf.mxu1 }
 0x1b5   :  { %v16587_v61 = vadd.f32 %v2119_v9, %v16400_v37  ;;  %v16590_v57 = vadd.f32 %v2192_v36, %v16402_v19  ;;  %v13950_v36 = vld [vmem:[%s22095_s1 + $0x38c] ss:$16 sps:$4 sm:$0xff]  }
 0x1b6   :  { %v2121_v43 = vpop.f32.mrf.mxu0  ;;  %v2194_v52 = vpop.f32.mrf.mxu1 }
 0x1b7   :  { %v16593_v50 = vadd.f32 %v2121_v43, %v16404_v14  ;;  %v16596_v5 = vadd.f32 %v2194_v52, %v16406_v31  ;;  %v13951_v43 = vld [vmem:[%s22095_s1 + $0x384] ss:$16 sps:$4 sm:$0xff]  }
 0x1b8   :  { %v2123_v33 = vpop.f32.mrf.mxu0  ;;  %v2196_v39 = vpop.f32.mrf.mxu1 }
 0x1b9   :  { %v16599_v18 = vadd.f32 %v2123_v33, %v16408_v1  ;;  %v16602_v51 = vadd.f32 %v2196_v39, %v16410_v30  ;;  %v13948_v1 = vld [vmem:[%s22095_s1 + $0x3a8] ss:$16 sps:$4 sm:$0xff]   ;;  %v13949_v30 = vld [vmem:[%s22095_s1 + $0x3a0] ss:$16 sps:$4 sm:$0xff]  }
 0x1ba   :  { %v2265_v37 = vpop.f32.mrf.mxu0  ;;  %v16604_v9 = vpop.f32.mrf.mxu1 }
 0x1bb   :  { %12036 = vmatmul.mubr.msk.bf16.vlgmr.msra.gmra.mxu0 %vm34_vm0, %v15783_v25  ;;  %12040 = vmatmul.mubr.msk.bf16.vlgmr.msra.gmra.mxu1 %vm34_vm0, %v15783_v25  ;;  %v16611_v31 = vadd.f32 %v2265_v37, %v16417_v40 }
 0x1bc   :  { %3907 = vmatpush1.bf16.msra.mxu1 %v13948_v1  ;;  %3834 = vmatpush1.bf16.msra.mxu0 %v13949_v30  ;;  %v2267_v19 = vpop.f32.mrf.mxu0  ;;  %v2340_v14 = vpop.f32.mrf.mxu1  ;;  %v13954_v30 = vld [vmem:[%s22095_s1 + $0x36c] ss:$16 sps:$4 sm:$0xff]  }
 0x1bd   :  { %3908 = vmatprep.subr.bf16.mxu1 %v13950_v36  ;;  %3597 = vmatprep.mubr.bf16.mxu0 %v22273_v63  ;;  %v16624_v25 = vadd.f32 %v2267_v19, %v16433_v55  ;;  %v16627_v40 = vadd.f32 %v2340_v14, %v16436_v10  ;;  %v13952_v55 = vld [vmem:[%s22095_s1 + $0x388] ss:$16 sps:$4 sm:$0xff]   ;;  %v13953_v10 = vld [vmem:[%s22095_s1 + $0x380] ss:$16 sps:$4 sm:$0xff]  }
 0x1be   :  { %3670 = vmatprep.mubr.bf16.mxu1 %v22273_v63  ;;  %3835 = vmatprep.subr.bf16.mxu0 %v13951_v43  ;;  %v2269_v52 = vpop.f32.mrf.mxu0  ;;  %v16633_v33 = vpop.f32.mrf.mxu1 }
 0x1bf   :  { %v16636_v39 = vadd.f32 %v2269_v52, %v16443_v32  ;;  %v13955_v32 = vld [vmem:[%s22095_s1 + $0x364] ss:$16 sps:$4 sm:$0xff]  }
 0x1c0   :  { %3909 = vmatpush1.bf16.msra.mxu1 %v13952_v55  ;;  %3836 = vmatpush1.bf16.msra.mxu0 %v13953_v10  ;;  %v2271_v37 = vpop.f32.mrf.mxu0  ;;  %v2344_v1 = vpop.f32.mrf.mxu1 }
 0x1c1   :  { %3910 = vmatprep.subr.bf16.mxu1 %v13954_v30  ;;  %3837 = vmatprep.subr.bf16.mxu0 %v13955_v32  ;;  %v16651_v19 = vadd.f32 %v2271_v37, %v16461_v56  ;;  %v16654_v14 = vadd.f32 %v2344_v1, %v16464_v48  ;;  %v13956_v56 = vld [vmem:[%s22095_s1 + $0x368] ss:$16 sps:$4 sm:$0xff]   ;;  %v13958_v37 = vld [vmem:[%s22095_s1 + $0x34c] ss:$16 sps:$4 sm:$0xff]   ;;  %v13959_v1 = vld [vmem:[%s22095_s1 + $0x344] ss:$16 sps:$4 sm:$0xff]  }
 0x1c2   :  { %v2275_v36 = vpop.f32.mrf.mxu0  ;;  %v2348_v43 = vpop.f32.mrf.mxu1 }
 0x1c3   :  { %12037 = vmatmul.mubr.msk.bf16.gmra.mxu0 %vm34_vm0, %v15842_v23  ;;  %12041 = vmatmul.mubr.msk.bf16.gmra.mxu1 %vm34_vm0, %v15842_v23  ;;  %v16661_v52 = vadd.f32 %v2275_v36, %v16471_v26  ;;  %v16664_v55 = vadd.f32 %v2348_v43, %v16474_v47  ;;  %v13957_v23 = vld [vmem:[%s22095_s1 + $0x360] ss:$16 sps:$4 sm:$0xff]  }
 0x1c4   :  { %3911 = vmatpush1.bf16.msra.mxu1 %v13956_v56  ;;  %3607 = vmatprep.mubr.bf16.mxu0 %v22273_v63  ;;  %v2277_v48 = vpop.f32.mrf.mxu0  ;;  %v2350_v10 = vpop.f32.mrf.mxu1 }
 0x1c5   :  { %3680 = vmatprep.mubr.bf16.mxu1 %v22273_v63  ;;  %3838 = vmatpush1.bf16.msra.mxu0 %v13957_v23  ;;  %v16675_v26 = vadd.f32 %v2277_v48, %v16485_v12  ;;  %v16678_v47 = vadd.f32 %v2350_v10, %v16488_v54  ;;  %v13960_v54 = vld [vmem:[%s22095_s1 + $0x348] ss:$16 sps:$4 sm:$0xff]   ;;  %v13961_v48 = vld [vmem:[%s22095_s1 + $0x340] ss:$16 sps:$4 sm:$0xff]   ;;  %v13963_v23 = vld [vmem:[%s22095_s1 + $0x324] ss:$16 sps:$4 sm:$0xff]  }
 0x1c6   :  { %3912 = vmatprep.subr.bf16.mxu1 %v13958_v37  ;;  %3839 = vmatprep.subr.bf16.mxu0 %v13959_v1  ;;  %v2279_v30 = vpop.f32.mrf.mxu0  ;;  %v2352_v32 = vpop.f32.mrf.mxu1 }
 0x1c7   :  { %v16687_v36 = vadd.f32 %v2279_v30, %v16497_v29  ;;  %v16690_v12 = vadd.f32 %v2352_v32, %v16500_v15  ;;  %v13962_v29 = vld [vmem:[%s22095_s1 + $0x32c] ss:$16 sps:$4 sm:$0xff]  }
 0x1c8   :  { %3913 = vmatpush1.bf16.msra.mxu1 %v13960_v54  ;;  %v2281_v43 = vpop.f32.mrf.mxu0  ;;  %v2354_v56 = vpop.f32.mrf.mxu1  ;;  %v13964_v54 = vld [vmem:[%s22095_s1 + $0x328] ss:$16 sps:$4 sm:$0xff]  }
 0x1c9   :  { %3840 = vmatpush1.bf16.msra.mxu0 %v13961_v48  ;;  %3914 = vmatprep.subr.bf16.mxu1 %v13962_v29  ;;  %v16702_v15 = vadd.f32 %v2281_v43, %v16512_v46  ;;  %v16705_v10 = vadd.f32 %v2354_v56, %v16515_v24  ;;  %v13966_v43 = vld [vmem:[%s22095_s1 + $0x30c] ss:$16 sps:$4 sm:$0xff]   ;;  %v13967_v56 = vld [vmem:[%s22095_s1 + $0x304] ss:$16 sps:$4 sm:$0xff]  }
 0x1ca   :  { %3841 = vmatprep.subr.bf16.mxu0 %v13963_v23  ;;  %v2285_v37 = vpop.f32.mrf.mxu0  ;;  %v2358_v1 = vpop.f32.mrf.mxu1 }
 0x1cb   :  { %12038 = vmatmul.mubr.msk.bf16.gmra.mxu0 %vm34_vm0, %v15913_v11  ;;  %12042 = vmatmul.mubr.msk.bf16.gmra.mxu1 %vm34_vm0, %v15913_v11  ;;  %v16715_v30 = vadd.f32 %v2285_v37, %v16525_v6  ;;  %v16718_v46 = vadd.f32 %v2358_v1, %v16528_v41  ;;  %v13965_v11 = vld [vmem:[%s22095_s1 + $0x320] ss:$16 sps:$4 sm:$0xff]   ;;  %v13968_v1 = vld [vmem:[%s22095_s1 + $0x308] ss:$16 sps:$4 sm:$0xff]  }
 0x1cc   :  { %3617 = vmatprep.mubr.bf16.mxu0 %v22273_v63  ;;  %3690 = vmatprep.mubr.bf16.mxu1 %v22273_v63  ;;  %v2287_v24 = vpop.f32.mrf.mxu0  ;;  %v2360_v32 = vpop.f32.mrf.mxu1 }
 0x1cd   :  { %3915 = vmatpush1.bf16.msra.mxu1 %v13964_v54  ;;  %3842 = vmatpush1.bf16.msra.mxu0 %v13965_v11  ;;  %v16729_v6 = vadd.f32 %v2287_v24, %v16539_v27  ;;  %v16732_v41 = vadd.f32 %v2360_v32, %v16542_v22  ;;  %v13969_v24 = vld [vmem:[%s22095_s1 + $0x300] ss:$16 sps:$4 sm:$0xff]   ;;  %v13971_v54 = vld [vmem:[%s22095_s1 + $0xa4] ss:$16 sps:$4 sm:$0xff]  }
 0x1ce   :  { %3916 = vmatprep.subr.bf16.mxu1 %v13966_v43  ;;  %3843 = vmatprep.subr.bf16.mxu0 %v13967_v56  ;;  %v2289_v48 = vpop.f32.mrf.mxu0  ;;  %v2362_v29 = vpop.f32.mrf.mxu1 }
 0x1cf   :  { %v16741_v23 = vadd.f32 %v2289_v48, %v16551_v38  ;;  %v16744_v27 = vadd.f32 %v2362_v29, %v16554_v49  ;;  %v13970_v49 = vld [vmem:[%s22095_s1 + $0xac] ss:$16 sps:$4 sm:$0xff]  }
 0x1d0   :  { %v2291_v22 = vpop.f32.mrf.mxu0  ;;  %v2364_v37 = vpop.f32.mrf.mxu1 }
 0x1d1   :  { %3917 = vmatpush1.bf16.msra.mxu1 %v13968_v1  ;;  %3844 = vmatpush1.bf16.msra.mxu0 %v13969_v24  ;;  %v16753_v32 = vadd.f32 %v2291_v22, %v16563_v28  ;;  %v16756_v38 = vadd.f32 %v2364_v37, %v16566_v4 }
 0x1d2   :  { %4180 = vmatprep.subr.bf16.mxu1 %v13970_v49  ;;  %4107 = vmatprep.subr.bf16.mxu0 %v13971_v54  ;;  %v2295_v11 = vpop.f32.mrf.mxu0  ;;  %v2368_v43 = vpop.f32.mrf.mxu1 }
 0x1d3   :  { %12039 = vmatmul.mubr.msk.bf16.gmra.mxu0 %vm34_vm0, %v15996_v62  ;;  %12043 = vmatmul.mubr.msk.bf16.gmra.mxu1 %vm34_vm0, %v15996_v62  ;;  %v16769_v28 = vadd.f32 %v2295_v11, %v16579_v0  ;;  %v16772_v4 = vadd.f32 %v2368_v43, %v16582_v59  ;;  %v13974_v43 = vld [vmem:[%s22095_s1 + $0x8c] ss:$16 sps:$4 sm:$0xff]  }
 0x1d4   :  { %3861 = vmatprep.mubr.bf16.mxu0 %v22273_v63  ;;  %3934 = vmatprep.mubr.bf16.mxu1 %v22273_v63  ;;  %v2297_v56 = vpop.f32.mrf.mxu0  ;;  %v2370_v48 = vpop.f32.mrf.mxu1 }
 0x1d5   :  { %v16777_v29 = vadd.f32 %v2297_v56, %v16587_v61  ;;  %v16780_v22 = vadd.f32 %v2370_v48, %v16590_v57  ;;  %v13975_v56 = vld [vmem:[%s22095_s1 + $0x84] ss:$16 sps:$4 sm:$0xff]  }
 0x1d6   :  { %v2299_v37 = vpop.f32.mrf.mxu0  ;;  %v2372_v62 = vpop.f32.mrf.mxu1 }
 0x1d7   :  { %22441 = vst [vmem:[#allocation34_spill] sm:$0xff] %v16777_v29  ;;  %22442 = vst [vmem:[#allocation36_spill] sm:$0xff] %v16780_v22  ;;  %v16783_v0 = vadd.f32 %v2299_v37, %v16593_v50  ;;  %v16786_v59 = vadd.f32 %v2372_v62, %v16596_v5  ;;  %v13972_v50 = vld [vmem:[%s22095_s1 + $0xa8] ss:$16 sps:$4 sm:$0xff]   ;;  %v13973_v5 = vld [vmem:[%s22095_s1 + $0xa0] ss:$16 sps:$4 sm:$0xff]   ;;  %v2383_v22 = vadd.f32 %v16633_v33, %v16446_v2 }
 0x1d8   :  { %v2301_v1 = vpop.f32.mrf.mxu0  ;;  %v2374_v24 = vpop.f32.mrf.mxu1 }
 0x1d9   :  { %22443 = vst [vmem:[#allocation37_spill] sm:$0xff] %v16786_v59  ;;  %v16789_v49 = vadd.f32 %v2301_v1, %v16599_v18  ;;  %v16792_v54 = vadd.f32 %v2374_v24, %v16602_v51  ;;  %v13976_v1 = vld [vmem:[%s22095_s1 + $0x88] ss:$16 sps:$4 sm:$0xff]  }
 0x1da   :  { %v2443_v61 = vpop.f32.mrf.mxu0  ;;  %v16794_v11 = vpop.f32.mrf.mxu1 }
 0x1db   :  { %22444 = vst [vmem:[#allocation38_spill] sm:$0xff] %v16789_v49  ;;  %22445 = vst [vmem:[#allocation66_spill] sm:$0xff] %v16792_v54  ;;  %12044 = vmatmul.mubr.msk.bf16.vlgmr.msra.gmra.mxu0 %vm34_vm0, %v16031_v60  ;;  %12048 = vmatmul.mubr.msk.bf16.vlgmr.msra.gmra.mxu1 %vm34_vm0, %v16031_v60  ;;  %v2587_v57 = vrot.slane %v2443_v61, 1 }
 0x1dc   :  { %4181 = vmatpush1.bf16.msra.mxu1 %v13972_v50  ;;  %4108 = vmatpush1.bf16.msra.mxu0 %v13973_v5  ;;  %v16806_v18 = vpop.f32.mrf.mxu0  ;;  %v16808_v51 = vpop.f32.mrf.mxu1  ;;  %v13979_v50 = vld [vmem:[%s22095_s1 + $0x64] ss:$16 sps:$4 sm:$0xff]  }
 0x1dd   :  { %4182 = vmatprep.subr.bf16.mxu1 %v13974_v43  ;;  %3871 = vmatprep.mubr.bf16.mxu0 %v22273_v63  ;;  %v16815_v60 = vadd.f32 %v2587_v57, %v16611_v31  ;;  %v13977_v31 = vld [vmem:[%s22095_s1 + $0x80] ss:$16 sps:$4 sm:$0xff]   ;;  %v13978_v57 = vld [vmem:[%s22095_s1 + $0x6c] ss:$16 sps:$4 sm:$0xff]  }
 0x1de   :  { %3944 = vmatprep.mubr.bf16.mxu1 %v22273_v63  ;;  %4109 = vmatprep.subr.bf16.mxu0 %v13975_v56  ;;  %v2447_v48 = vpop.f32.mrf.mxu0  ;;  %v16821_v37 = vpop.f32.mrf.mxu1 }
 0x1df   :  { %v2591_v62 = vrot.slane %v2447_v48, 1  ;;  %v2593_v49 = vrot.slane %v16821_v37, 1 }
 0x1e0   :  { %4183 = vmatpush1.bf16.msra.mxu1 %v13976_v1  ;;  %4110 = vmatpush1.bf16.msra.mxu0 %v13977_v31  ;;  %v16829_v24 = vpop.f32.mrf.mxu0  ;;  %v16831_v61 = vpop.f32.mrf.mxu1  ;;  %v13980_v1 = vld [vmem:[%s22095_s1 + $0x68] ss:$16 sps:$4 sm:$0xff]  }
 0x1e1   :  { %4184 = vmatprep.subr.bf16.mxu1 %v13978_v57  ;;  %4111 = vmatprep.subr.bf16.mxu0 %v13979_v50  ;;  %v16840_v5 = vadd.f32 %v2591_v62, %v16636_v39  ;;  %v13981_v62 = vld [vmem:[%s22095_s1 + $0x60] ss:$16 sps:$4 sm:$0xff]   ;;  %v13982_v57 = vld [vmem:[%s22095_s1 + $0x4c] ss:$16 sps:$4 sm:$0xff]   ;;  %v13983_v50 = vld [vmem:[%s22095_s1 + $0x44] ss:$16 sps:$4 sm:$0xff]  }
 0x1e2   :  { %v2453_v43 = vpop.f32.mrf.mxu0  ;;  %v16842_v56 = vpop.f32.mrf.mxu1 }
 0x1e3   :  { %12045 = vmatmul.mubr.msk.bf16.gmra.mxu0 %vm34_vm0, %v16084_v8  ;;  %12049 = vmatmul.mubr.msk.bf16.gmra.mxu1 %vm34_vm0, %v16084_v8  ;;  %v2595_v48 = vrot.slane %v2453_v43, 1 }
 0x1e4   :  { %4185 = vmatpush1.bf16.msra.mxu1 %v13980_v1  ;;  %3881 = vmatprep.mubr.bf16.mxu0 %v22273_v63  ;;  %v16852_v31 = vpop.f32.mrf.mxu0  ;;  %v16854_v39 = vpop.f32.mrf.mxu1 }
 0x1e5   :  { %3954 = vmatprep.mubr.bf16.mxu1 %v22273_v63  ;;  %4112 = vmatpush1.bf16.msra.mxu0 %v13981_v62  ;;  %v16861_v8 = vadd.f32 %v2595_v48, %v16661_v52  ;;  %v2596_v29 = vrot.slane %v16852_v31, 1 }
 0x1e6   :  { %4186 = vmatprep.subr.bf16.mxu1 %v13982_v57  ;;  %4113 = vmatprep.subr.bf16.mxu0 %v13983_v50  ;;  %v2457_v43 = vpop.f32.mrf.mxu0  ;;  %v16869_v1 = vpop.f32.mrf.mxu1 }
 0x1e7   :  { %v2599_v54 = vrot.slane %v2457_v43, 1  ;;  %v2601_v37 = vrot.slane %v16869_v1, 1 }
 0x1e8   :  { %4187 = vmatpush1.bf16.msra.mxu1 %v15883_v45  ;;  %v16872_v62 = vpop.f32.mrf.mxu0  ;;  %v16874_v52 = vpop.f32.mrf.mxu1 }
 0x1e9   :  { %4114 = vmatpush1.bf16.msra.mxu0 %v15889_v3  ;;  %4188 = vmatprep.subr.bf16.mxu1 %v15895_v13  ;;  %v16879_v48 = vadd.f32 %v2599_v54, %v16687_v36 }
 0x1ea   :  { %4115 = vmatprep.subr.bf16.mxu0 %v15907_v34  ;;  %v2463_v57 = vpop.f32.mrf.mxu0  ;;  %v16882_v50 = vpop.f32.mrf.mxu1 }
 0x1eb   :  { %12046 = vmatmul.mubr.msk.bf16.gmra.mxu0 %vm34_vm0, %v16143_v44  ;;  %12050 = vmatmul.mubr.msk.bf16.gmra.mxu1 %vm34_vm0, %v16143_v44  ;;  %v2603_v45 = vrot.slane %v2463_v57, 1 }
 0x1ec   :  { %3891 = vmatprep.mubr.bf16.mxu0 %v22273_v63  ;;  %3964 = vmatprep.mubr.bf16.mxu1 %v22273_v63  ;;  %v16890_v3 = vpop.f32.mrf.mxu0  ;;  %v16892_v13 = vpop.f32.mrf.mxu1 }
 0x1ed   :  { %4189 = vmatpush1.bf16.msra.mxu1 %v15930_v21  ;;  %4116 = vmatpush1.bf16.msra.mxu0 %v15936_v42  ;;  %v16897_v34 = vadd.f32 %v2603_v45, %v16715_v30  ;;  %v22446_v42 = vld [vmem:[#allocation3_spill] sm:$0xff] }
 0x1ee   :  { %4190 = vmatprep.subr.bf16.mxu1 %v15948_v17  ;;  %4117 = vmatprep.subr.bf16.mxu0 %v15954_v53  ;;  %v2467_v44 = vpop.f32.mrf.mxu0  ;;  %v16901_v36 = vpop.f32.mrf.mxu1  ;;  %v22447_v17 = vld [vmem:[#allocation4_spill] sm:$0xff] }
 0x1ef   :  { %v2607_v54 = vrot.slane %v2467_v44, 1 }
 0x1f0   :  { %v16903_v43 = vpop.f32.mrf.mxu0  ;;  %v16905_v57 = vpop.f32.mrf.mxu1 }
 0x1f1   :  { %4191 = vmatpush1.bf16.msra.mxu1 %v15966_v16  ;;  %4118 = vmatpush1.bf16.msra.mxu0 %v15972_v35  ;;  %v16910_v21 = vadd.f32 %v2607_v54, %v16741_v23  ;;  %v2589_v23 = vrot.slane %v16794_v11, 1  ;;  %v2588_v54 = vrot.slane %v16806_v18, 1  ;;  %v2592_v11 = vrot.slane %v16829_v24, 1 }
 0x1f2   :  { %4326 = vmatprep.subr.bf16.mxu1 %v22446_v42  ;;  %4253 = vmatprep.subr.bf16.mxu0 %v22447_v17  ;;  %v2473_v53 = vpop.f32.mrf.mxu0  ;;  %v16914_v30 = vpop.f32.mrf.mxu1  ;;  %v2590_v42 = vrot.slane %v16808_v51, 1  ;;  %v2597_v18 = vrot.slane %v16842_v56, 1  ;;  %v16962_v56 = vadd.f32 %v2593_v49, %v2383_v22 }
 0x1f3   :  { %12047 = vmatmul.mubr.msk.bf16.gmra.mxu0 %vm34_vm0, %v16202_v7  ;;  %12051 = vmatmul.mubr.msk.bf16.gmra.mxu1 %vm34_vm0, %v16202_v7  ;;  %v2611_v45 = vrot.slane %v2473_v53, 1  ;;  %v2379_v53 = vadd.f32 %v16604_v9, %v16420_v20  ;;  %v2598_v20 = vrot.slane %v16854_v39, 1  ;;  %v16952_v2 = vadd.f32 %v2588_v54, %v16624_v25 }
 0x1f4   :  { %4135 = vmatprep.mubr.bf16.mxu0 %v22273_v63  ;;  %4208 = vmatprep.mubr.bf16.mxu1 %v22273_v63  ;;  %v16922_v16 = vpop.f32.mrf.mxu0  ;;  %v16924_v35 = vpop.f32.mrf.mxu1  ;;  %v16955_v33 = vadd.f32 %v2590_v42, %v16627_v40  ;;  %v13984_v40 = vld [vmem:[%s22095_s1 + $0x168] ss:$16 sps:$4 sm:$0xff]   ;;  %v14307_v54 = vmov 0.0   ;;  %v16990_v49 = vadd.f32 %v2597_v18, %v16664_v55  ;;  %v2602_v42 = vrot.slane %v16874_v52, 1  ;;  %v13987_v55 = vld [vmem:[%s22095_s1 + $0x144] ss:$16 sps:$4 sm:$0xff]  }
 0x1f5   :  { %v16928_v44 = vadd.f32 %v2611_v45, %v16769_v28  ;;  %v2594_v28 = vrot.slane %v16831_v61, 1  ;;  %35 = vst.msk [vmem:[#allocation2 + $0x8] sm:$0xff] %vm34_vm0, %v14307_v54  ;;  %33 = vst [vmem:[#allocation2] sm:$0xff] %v14307_v54  ;;  %v17007_v52 = vadd.f32 %v2596_v29, %v16675_v26 }
 0x1f6   :  { %v2477_v17 = vpop.f32.mrf.mxu0  ;;  %v16932_v7 = vpop.f32.mrf.mxu1  ;;  %36 = vst [vmem:[#allocation2 + $0x10] sm:$0xff] %v14307_v54  ;;  %37 = vst.msk [vmem:[#allocation2 + $0x18] sm:$0xff] %vm34_vm0, %v14307_v54  ;;  %v17036_v1 = vadd.f32 %v2602_v42, %v16705_v10 }
 0x1f7   :  { %22448 = vst [vmem:[#allocation39_spill] sm:$0xff] %v16928_v44  ;;  %v2615_v59 = vrot.slane %v2477_v17, 1  ;;  %v2653_v44 = vadd.f32 %v2589_v23, %v2379_v53  ;;  %v13985_v23 = vld [vmem:[%s22095_s1 + $0x160] ss:$16 sps:$4 sm:$0xff]   ;;  %38 = vst [vmem:[#allocation2 + $0x20] sm:$0xff] %v14307_v54  ;;  %v2658_v22 = vadd.f32 %v2594_v28, %v16654_v14  ;;  %v2605_v28 = vrot.slane %v16882_v50, 1 }
 0x1f8   :  { %v16942_v45 = vpop.f32.mrf.mxu0  ;;  %v16944_v51 = vpop.f32.mrf.mxu1  ;;  %39 = vst.msk [vmem:[#allocation2 + $0x28] sm:$0xff] %vm34_vm0, %v14307_v54  ;;  %40 = vst [vmem:[#allocation2 + $0x30] sm:$0xff] %v14307_v54 }
 0x1f9   :  { %v16949_v9 = vadd.f32 %v2615_v59, %v16783_v0  ;;  %v2600_v0 = vrot.slane %v16872_v62, 1  ;;  %41 = vst.msk [vmem:[#allocation2 + $0x38] sm:$0xff] %vm34_vm0, %v14307_v54  ;;  %42 = vst [vmem:[#allocation2 + $0x40] sm:$0xff] %v14307_v54 }
 0x1fa   :  { %v2717_v24 = vpop.f32.mrf.mxu0  ;;  %v2790_v61 = vpop.f32.mrf.mxu1  ;;  %43 = vst.msk [vmem:[#allocation2 + $0x48] sm:$0xff] %vm34_vm0, %v14307_v54  ;;  %44 = vst [vmem:[#allocation2 + $0x50] sm:$0xff] %v14307_v54 }
 0x1fb   :  { %12052 = vmatmul.mubr.msk.bf16.vlgmr.msra.gmra.mxu0 %vm34_vm0, %v16241_v58  ;;  %12056 = vmatmul.mubr.msk.bf16.vlgmr.msra.gmra.mxu1 %vm34_vm0, %v16241_v58  ;;  %v2861_v59 = vrot.slane %v2717_v24, 1  ;;  %v2863_v25 = vrot.slane %v2790_v61, 1  ;;  %45 = vst.msk [vmem:[#allocation2 + $0x58] sm:$0xff] %vm34_vm0, %v14307_v54  ;;  %46 = vst [vmem:[#allocation2 + $0x60] sm:$0xff] %v14307_v54  ;;  %v2656_v58 = vadd.f32 %v2592_v11, %v16651_v19  ;;  %v13986_v24 = vld [vmem:[%s22095_s1 + $0x14c] ss:$16 sps:$4 sm:$0xff]  }
 0x1fc   :  { %4327 = vmatpush1.bf16.msra.mxu1 %v13984_v40  ;;  %4254 = vmatpush1.bf16.msra.mxu0 %v13985_v23  ;;  %47 = vst.msk [vmem:[#allocation2 + $0x68] sm:$0xff] %vm34_vm0, %v14307_v54  ;;  %48 = vst [vmem:[#allocation2 + $0x70] sm:$0xff] %v14307_v54  ;;  %v2719_v17 = vpop.f32.mrf.mxu0  ;;  %v2792_v53 = vpop.f32.mrf.mxu1  ;;  %v17033_v39 = vadd.f32 %v2600_v0, %v16702_v15  ;;  %v13990_v23 = vld [vmem:[%s22095_s1 + $0x12c] ss:$16 sps:$4 sm:$0xff]  }
 0x1fd   :  { %49 = vst.msk [vmem:[#allocation2 + $0x78] sm:$0xff] %vm34_vm0, %v14307_v54  ;;  %50 = vst [vmem:[#allocation2 + $0x80] sm:$0xff] %v14307_v54  ;;  %4328 = vmatprep.subr.bf16.mxu1 %v13986_v24  ;;  %4218 = vmatprep.mubr.bf16.mxu1 %v22273_v63  ;;  %v16998_v61 = vadd.f32 %v2861_v59, %v16815_v60  ;;  %v2927_v19 = vadd.f32 %v2863_v25, %v2653_v44  ;;  %v2862_v11 = vrot.slane %v2719_v17, 1  ;;  %v22449_v25 = vld [vmem:[#allocation29_spill] sm:$0xff]  ;;  %v22451_v0 = vld [vmem:[#allocation6_spill] sm:$0xff] }
 0x1fe   :  { %51 = vst.msk [vmem:[#allocation2 + $0x88] sm:$0xff] %vm34_vm0, %v14307_v54  ;;  %52 = vst [vmem:[#allocation2 + $0x90] sm:$0xff] %v14307_v54  ;;  %v2864_v14 = vrot.slane %v2792_v53, 1  ;;  %4145 = vmatprep.mubr.bf16.mxu0 %v22273_v63  ;;  %4255 = vmatprep.subr.bf16.mxu0 %v13987_v55  ;;  %v17012_v60 = vadd.f32 %v2598_v20, %v16678_v47  ;;  %v17017_v44 = vadd.f32 %v2601_v37, %v16690_v12  ;;  %v2721_v18 = vpop.f32.mrf.mxu0  ;;  %v2794_v59 = vpop.f32.mrf.mxu1  ;;  %v13988_v47 = vld [vmem:[%s22095_s1 + $0x148] ss:$16 sps:$4 sm:$0xff]  }
 0x1ff   :  { %53 = vst.msk [vmem:[#allocation2 + $0x98] sm:$0xff] %vm34_vm0, %v14307_v54  ;;  %54 = vst [vmem:[#allocation2 + $0xa0] sm:$0xff] %v14307_v54  ;;  %v2926_v26 = vadd.f32 %v2862_v11, %v16952_v2  ;;  %v2865_v31 = vrot.slane %v2721_v18, 1  ;;  %v13989_v12 = vld [vmem:[%s22095_s1 + $0x140] ss:$16 sps:$4 sm:$0xff]   ;;  %v2867_v50 = vrot.slane %v2794_v59, 1 }
 0x200   :  { %55 = vst.msk [vmem:[#allocation2 + $0xa8] sm:$0xff] %vm34_vm0, %v14307_v54  ;;  %56 = vst [vmem:[#allocation2 + $0xb0] sm:$0xff] %v14307_v54  ;;  %v2928_v29 = vadd.f32 %v2864_v14, %v16955_v33  ;;  %4329 = vmatpush1.bf16.msra.mxu1 %v13988_v47  ;;  %4256 = vmatpush1.bf16.msra.mxu0 %v13989_v12  ;;  %v2723_v20 = vpop.f32.mrf.mxu0  ;;  %v2796_v2 = vpop.f32.mrf.mxu1  ;;  %v22450_v33 = vld [vmem:[#allocation30_spill] sm:$0xff]  ;;  %v2604_v17 = vrot.slane %v16890_v3, 1  ;;  %v2606_v53 = vrot.slane %v16892_v13, 1  ;;  %v22452_v14 = vld [vmem:[#allocation35_spill] sm:$0xff] }
 0x201   :  { %57 = vst.msk [vmem:[#allocation2 + $0xb8] sm:$0xff] %vm34_vm0, %v14307_v54  ;;  %58 = vst [vmem:[#allocation2 + $0xc0] sm:$0xff] %v14307_v54  ;;  %v5347_v37 = vmax.f32 %v22450_v33, %v2927_v19  ;;  %4330 = vmatprep.subr.bf16.mxu1 %v13990_v23  ;;  %v17046_v15 = vadd.f32 %v2865_v31, %v16840_v5  ;;  %v2866_v10 = vrot.slane %v2723_v20, 1  ;;  %v2868_v62 = vrot.slane %v2796_v2, 1  ;;  %v22453_v5 = vld [vmem:[#allocation5_spill] sm:$0xff]  ;;  %v22454_v18 = vld [vmem:[#allocation7_spill] sm:$0xff] }
 0x202   :  { %59 = vst.msk [vmem:[#allocation2 + $0xc8] sm:$0xff] %vm34_vm0, %v14307_v54  ;;  %60 = vst [vmem:[#allocation2 + $0xd0] sm:$0xff] %v14307_v54  ;;  %v5348_v42 = vmax.f32 %v22451_v0, %v2928_v29  ;;  %v2931_v24 = vadd.f32 %v2867_v50, %v16962_v56  ;;  %v2727_v19 = vpop.f32.mrf.mxu0  ;;  %v2800_v11 = vpop.f32.mrf.mxu1  ;;  %v17056_v55 = vmax.f32 %v22453_v5, %v2926_v26  ;;  %v2609_v56 = vrot.slane %v16901_v36, 1  ;;  %v22455_v50 = vld [vmem:[#allocation8_spill] sm:$0xff]  ;;  %v13993_v36 = vld [vmem:[%s22095_s1 + $0x120] ss:$16 sps:$4 sm:$0xff]  }
 0x203   :  { %61 = vst.msk [vmem:[#allocation2 + $0xd8] sm:$0xff] %vm34_vm0, %v14307_v54  ;;  %62 = vst [vmem:[#allocation2 + $0xe0] sm:$0xff] %v14307_v54  ;;  %5403 = vrot.lane.b32.xlu0 %v5347_v37, %s14308_s30  ;;  %12053 = vmatmul.mubr.msk.bf16.gmra.mxu0 %vm34_vm0, %v22452_v14  ;;  %v2930_v29 = vadd.f32 %v2866_v10, %v2656_v58  ;;  %v2932_v3 = vadd.f32 %v2868_v62, %v2658_v22  ;;  %v2869_v31 = vrot.slane %v2727_v19, 1  ;;  %v13992_v58 = vld [vmem:[%s22095_s1 + $0x128] ss:$16 sps:$4 sm:$0xff]   ;;  %v22457_v0 = vld [vmem:[#allocation9_spill] sm:$0xff] }
 0x204   :  { %63 = vst.msk [vmem:[#allocation2 + $0xe8] sm:$0xff] %vm34_vm0, %v14307_v54  ;;  %64 = vst [vmem:[#allocation2 + $0xf0] sm:$0xff] %v14307_v54  ;;  %12057 = vmatmul.mubr.msk.bf16.gmra.mxu1 %vm34_vm0, %v22452_v14  ;;  %4155 = vmatprep.mubr.bf16.mxu0 %v22273_v63  ;;  %v17064_v13 = vadd.f32 %v2605_v28, %v16718_v46  ;;  %v2871_v47 = vrot.slane %v2800_v11, 1  ;;  %v2729_v12 = vpop.f32.mrf.mxu0  ;;  %v2802_v26 = vpop.f32.mrf.mxu1  ;;  %v5351_v20 = vmax.f32 %v22455_v50, %v2931_v24  ;;  %v22456_v28 = vld [vmem:[#allocation10_spill] sm:$0xff]  ;;  %v22458_v19 = vld [vmem:[#allocation11_spill] sm:$0xff] }
 0x205   :  { %65 = vst.msk [vmem:[#allocation2 + $0xf8] sm:$0xff] %vm34_vm0, %v14307_v54  ;;  %v13991_v54 = vld [vmem:[%s22095_s1 + $0x124] ss:$16 sps:$4 sm:$0xff]   ;;  %4331 = vmatpush1.bf16.msra.mxu1 %v13992_v58  ;;  %4228 = vmatprep.mubr.bf16.mxu1 %v22273_v63  ;;  %v17073_v22 = vadd.f32 %v2869_v31, %v16861_v8  ;;  %v2870_v2 = vrot.slane %v2729_v12, 1  ;;  %v2872_v46 = vrot.slane %v2802_v26, 1  ;;  %v5352_v33 = vmax.f32 %v22456_v28, %v2932_v3 }
 0x206   :  { %4257 = vmatprep.subr.bf16.mxu0 %v13991_v54  ;;  %v13994_v37 = vld [vmem:[%s22095_s1 + $0x10c] ss:$16 sps:$4 sm:$0xff]   ;;  %v2608_v23 = vrot.slane %v16903_v43, 1  ;;  %v2610_v54 = vrot.slane %v16905_v57, 1  ;;  %v2935_v8 = vadd.f32 %v2871_v47, %v16990_v49  ;;  %5409 = vrot.lane.b32.xlu1 %v5351_v20, %s14308_s30  ;;  %v2731_v10 = vpop.f32.mrf.mxu0  ;;  %v2804_v62 = vpop.f32.mrf.mxu1  ;;  %v17088_v24 = vmax.f32 %v22457_v0, %v2930_v29  ;;  %v13995_v49 = vld [vmem:[%s22095_s1 + $0x104] ss:$16 sps:$4 sm:$0xff]  }
 0x207   :  { %4258 = vmatpush1.bf16.msra.mxu0 %v13993_v36  ;;  %4332 = vmatprep.subr.bf16.mxu1 %v13994_v37  ;;  %v2934_v14 = vadd.f32 %v2870_v2, %v17007_v52  ;;  %v17094_v43 = vadd.f32 %v2872_v46, %v17012_v60  ;;  %v2873_v5 = vrot.slane %v2731_v10, 1  ;;  %v2670_v3 = vadd.f32 %v2606_v53, %v16732_v41  ;;  %v13996_v52 = vld [vmem:[%s22095_s1 + $0x108] ss:$16 sps:$4 sm:$0xff]   ;;  %v13998_v41 = vld [vmem:[%s22095_s1 + $0xec] ss:$16 sps:$4 sm:$0xff]   ;;  %v22461_v36 = vld [vmem:[#allocation13_spill] sm:$0xff] }
 0x208   :  { %5405 = vrot.lane.b32.xlu0 %v5348_v42, %s14308_s30  ;;  %4259 = vmatprep.subr.bf16.mxu0 %v13995_v49  ;;  %v2668_v42 = vadd.f32 %v2604_v17, %v16729_v6  ;;  %v2875_v29 = vrot.slane %v2804_v62, 1  ;;  %v2733_v31 = vpop.f32.mrf.mxu0  ;;  %v2806_v47 = vpop.f32.mrf.mxu1  ;;  %v22459_v60 = vld [vmem:[#allocation12_spill] sm:$0xff]  ;;  %v13997_v6 = vld [vmem:[%s22095_s1 + $0x100] ss:$16 sps:$4 sm:$0xff]   ;;  %v22460_v17 = vld [vmem:[#allocation14_spill] sm:$0xff]  ;;  %v2613_v58 = vrot.slane %v16914_v30, 1  ;;  %v2673_v0 = vadd.f32 %v2609_v56, %v16744_v27 }
 0x209   :  { %4333 = vmatpush1.bf16.msra.mxu1 %v13996_v52  ;;  %v5355_v12 = vmax.f32 %v22459_v60, %v2935_v8  ;;  %v17106_v26 = vadd.f32 %v2873_v5, %v16879_v48  ;;  %v2874_v50 = vrot.slane %v2733_v31, 1  ;;  %v2876_v20 = vrot.slane %v2806_v47, 1  ;;  %v22462_v8 = vld [vmem:[#allocation15_spill] sm:$0xff]  ;;  %v14000_v27 = vld [vmem:[%s22095_s1 + $0xe8] ss:$16 sps:$4 sm:$0xff]  }
 0x20a   :  { %4334 = vmatprep.subr.bf16.mxu1 %v13998_v41  ;;  %v5356_v53 = vmax.f32 %v22460_v17, %v17094_v43  ;;  %v2612_v48 = vrot.slane %v16922_v16, 1  ;;  %v17119_v2 = vadd.f32 %v2875_v29, %v17017_v44  ;;  %5411 = vrot.lane.b32.xlu1 %v5352_v33, %s14308_s30  ;;  %v2737_v46 = vpop.f32.mrf.mxu0  ;;  %v2810_v28 = vpop.f32.mrf.mxu1  ;;  %v17125_v37 = vmax.f32 %v22461_v36, %v2934_v14  ;;  %v13999_v33 = vld [vmem:[%s22096_s0 + $0x70] sm:$0xff]   ;;  %v22465_v56 = vld [vmem:[#allocation18_spill] sm:$0xff] }
 0x20b   :  { %4260 = vmatpush1.bf16.msra.mxu0 %v13997_v6  ;;  %v2938_v30 = vadd.f32 %v2874_v50, %v17033_v39  ;;  %v17131_v62 = vadd.f32 %v2876_v20, %v17036_v1  ;;  %v2877_v44 = vrot.slane %v2737_v46, 1  ;;  %v2672_v14 = vadd.f32 %v2608_v23, %v16753_v32  ;;  %v22463_v39 = vld [vmem:[#allocation16_spill] sm:$0xff]  ;;  %v14001_v32 = vld [vmem:[%s22095_s1 + $0xe4] ss:$16 sps:$4 sm:$0xff]   ;;  %v14006_v43 = vld [vmem:[%s22096_s0 + $0x78] sm:$0xff]  }
 0x20c   :  { %5401 = vrot.lane.b32.xlu0 %v17056_v55, %s14308_s30  ;;  %12054 = vmatmul.mubr.msk.bf16.gmra.mxu0 %vm34_vm0, %v13999_v33  ;;  %v2879_v5 = vrot.slane %v2810_v28, 1  ;;  %v2739_v49 = vpop.f32.mrf.mxu0  ;;  %v2812_v29 = vpop.f32.mrf.mxu1  ;;  %v5359_v1 = vmax.f32 %v22463_v39, %v17119_v2  ;;  %v2614_v60 = vrot.slane %v16924_v35, 1  ;;  %v22466_v41 = vld [vmem:[#allocation17_spill] sm:$0xff]  ;;  %v22467_v28 = vld [vmem:[#allocation19_spill] sm:$0xff]  ;;  %v22473_v17 = vld [vmem:[#allocation34_spill] sm:$0xff] }
 0x20d   :  { %12058 = vmatmul.mubr.msk.bf16.gmra.mxu1 %vm34_vm0, %v13999_v33  ;;  %4165 = vmatprep.mubr.bf16.mxu0 %v22273_v63  ;;  %v17145_v31 = vadd.f32 %v2877_v44, %v16897_v34  ;;  %v2878_v47 = vrot.slane %v2739_v49, 1  ;;  %v2880_v52 = vrot.slane %v2812_v29, 1  ;;  %v5360_v23 = vmax.f32 %v22465_v56, %v17131_v62  ;;  %v14004_v49 = vld [vmem:[%s22095_s1 + $0xc4] ss:$16 sps:$4 sm:$0xff]   ;;  %v22468_v29 = vld [vmem:[#allocation20_spill] sm:$0xff]  ;;  %v22483_v56 = vld [vmem:[#allocation38_spill] sm:$0xff] }
 0x20e   :  { %4238 = vmatprep.mubr.bf16.mxu1 %v22273_v63  ;;  %4335 = vmatpush1.bf16.msra.mxu1 %v14000_v27  ;;  %v2617_v34 = vrot.slane %v16932_v7, 1  ;;  %v17158_v50 = vadd.f32 %v2879_v5, %v17064_v13  ;;  %v2741_v20 = vpop.f32.mrf.mxu0  ;;  %v2814_v6 = vpop.f32.mrf.mxu1  ;;  %v17164_v46 = vmax.f32 %v22466_v41, %v2938_v30  ;;  %v14002_v13 = vld [vmem:[%s22095_s1 + $0xe0] ss:$16 sps:$4 sm:$0xff]   ;;  %v2674_v30 = vadd.f32 %v2610_v54, %v16756_v38  ;;  %v14005_v38 = vld [vmem:[%s22095_s1 + $0xc8] ss:$16 sps:$4 sm:$0xff]  }
 0x20f   :  { %22464 = vst [vmem:[#allocation40_spill] sm:$0xff] %v17145_v31  ;;  %4261 = vmatprep.subr.bf16.mxu0 %v14001_v32  ;;  %5407 = vrot.lane.b32.xlu1 %v17088_v24, %s14308_s30  ;;  %v2942_v44 = vadd.f32 %v2878_v47, %v2668_v42  ;;  %v17168_v35 = vadd.f32 %v2880_v52, %v2670_v3  ;;  %v2881_v7 = vrot.slane %v2741_v20, 1  ;;  %v2883_v42 = vrot.slane %v2814_v6, 1  ;;  %v22471_v6 = vld [vmem:[#allocation47_spill] sm:$0xff]  ;;  %v22484_v39 = vld [vmem:[#allocation66_spill] sm:$0xff] }
 0x210   :  { %5415 = vrot.lane.b32.xlu0 %v5355_v12, %s14308_s30  ;;  %4262 = vmatpush1.bf16.msra.mxu0 %v14002_v13  ;;  %v14003_v12 = vld [vmem:[%s22095_s1 + $0xcc] ss:$16 sps:$4 sm:$0xff]   ;;  %v2677_v33 = vadd.f32 %v2613_v58, %v16772_v4  ;;  %v2743_v3 = vpop.f32.mrf.mxu0  ;;  %v2816_v5 = vpop.f32.mrf.mxu1  ;;  %v5363_v47 = vmax.f32 %v22468_v29, %v17158_v50  ;;  %v22470_v4 = vld [vmem:[#allocation21_spill] sm:$0xff]  ;;  %v2616_v54 = vrot.slane %v16942_v45, 1  ;;  %v2618_v58 = vrot.slane %v16944_v51, 1  ;;  %v22476_v29 = vld [vmem:[#allocation39_spill] sm:$0xff] }
 0x211   :  { %4336 = vmatprep.subr.bf16.mxu1 %v14003_v12  ;;  %4263 = vmatprep.subr.bf16.mxu0 %v14004_v49  ;;  %v17186_v52 = vadd.f32 %v2881_v7, %v16910_v21  ;;  %v2882_v27 = vrot.slane %v2743_v3, 1  ;;  %v2884_v32 = vrot.slane %v2816_v5, 1  ;;  %v5364_v57 = vmax.f32 %v22470_v4, %v17168_v35  ;;  %v22475_v5 = vld [vmem:[#allocation23_spill] sm:$0xff]  ;;  %v14015_v35 = vld [vmem:[%s22095_s1 + $0x208] ss:$16 sps:$4 sm:$0xff]  }
 0x212   :  { %4337 = vmatpush1.bf16.msra.mxu1 %v14005_v38  ;;  %v17195_v20 = vadd.f32 %v2883_v42, %v2673_v0  ;;  %v2747_v21 = vpop.f32.mrf.mxu0  ;;  %v2820_v50 = vpop.f32.mrf.mxu1  ;;  %v17204_v41 = vmax.f32 %v22471_v6, %v2942_v44  ;;  %v22474_v44 = vld [vmem:[#allocation36_spill] sm:$0xff]  ;;  %v14009_v62 = vld [vmem:[%s22095_s1 + $0x224] ss:$16 sps:$4 sm:$0xff]   ;;  %v2680_v2 = vadd.f32 %v2616_v54, %v22483_v56  ;;  %v14016_v4 = vld [vmem:[%s22095_s1 + $0x200] ss:$16 sps:$4 sm:$0xff]  }
 0x213   :  { %22469 = vst [vmem:[#allocation41_spill] sm:$0xff] %v17186_v52  ;;  %5417 = vrot.lane.b32.xlu1 %v5356_v53, %s14308_s30  ;;  %v2946_v13 = vadd.f32 %v2882_v27, %v2672_v14  ;;  %v17208_v51 = vadd.f32 %v2884_v32, %v2674_v30  ;;  %v2885_v0 = vrot.slane %v2747_v21, 1  ;;  %v2676_v53 = vadd.f32 %v2612_v48, %v22473_v17  ;;  %v14007_v30 = vld [vmem:[%s22095_s1 + $0xc0] ss:$16 sps:$4 sm:$0xff]   ;;  %v22480_v17 = vld [vmem:[#allocation24_spill] sm:$0xff] }
 0x214   :  { %5413 = vrot.lane.b32.xlu0 %v17125_v37, %s14308_s30  ;;  %12055 = vmatmul.mubr.msk.bf16.gmra.mxu0 %vm34_vm0, %v14006_v43  ;;  %v2678_v12 = vadd.f32 %v2614_v60, %v22474_v44  ;;  %v2887_v42 = vrot.slane %v2820_v50, 1  ;;  %v2749_v3 = vpop.f32.mrf.mxu0  ;;  %v2822_v14 = vpop.f32.mrf.mxu1  ;;  %v5367_v49 = vmax.f32 %v22475_v5, %v17195_v20  ;;  %v14008_v60 = vld [vmem:[%s22095_s1 + $0x22c] ss:$16 sps:$4 sm:$0xff]   ;;  %v22478_v32 = vld [vmem:[#allocation25_spill] sm:$0xff]  ;;  %v14020_v20 = vld [vmem:[%s22095_s1 + $0x1e8] ss:$16 sps:$4 sm:$0xff]  }
 0x215   :  { %12059 = vmatmul.mubr.msk.bf16.gmra.mxu1 %vm34_vm0, %v14006_v43  ;;  %4264 = vmatpush1.bf16.msra.mxu0 %v14007_v30  ;;  %v17226_v27 = vadd.f32 %v2885_v0, %v22476_v29  ;;  %v2886_v16 = vrot.slane %v2749_v3, 1  ;;  %v2888_v48 = vrot.slane %v2822_v14, 1  ;;  %v5368_v38 = vmax.f32 %v22478_v32, %v17208_v51  ;;  %v22479_v21 = vld [vmem:[#allocation37_spill] sm:$0xff]  ;;  %v22485_v29 = vld [vmem:[#allocation27_spill] sm:$0xff]  ;;  %v14039_v59 = vld [vmem:[%s22095_s1 + $0x2e8] ss:$16 sps:$4 sm:$0xff]  }
 0x216   :  { %4281 = vmatprep.mubr.bf16.mxu0 %v22273_v63  ;;  %4354 = vmatprep.mubr.bf16.mxu1 %v22273_v63  ;;  %v2681_v50 = vadd.f32 %v2617_v34, %v22479_v21  ;;  %v17235_v6 = vadd.f32 %v2887_v42, %v2677_v33  ;;  %v2751_v0 = vpop.f32.mrf.mxu0  ;;  %v2824_v43 = vpop.f32.mrf.mxu1  ;;  %v17246_v44 = vmax.f32 %v22480_v17, %v2946_v13  ;;  %v14021_v5 = vld [vmem:[%s22095_s1 + $0x1e0] ss:$16 sps:$4 sm:$0xff]  }
 0x217   :  { %22477 = vst [vmem:[#allocation42_spill] sm:$0xff] %v17226_v27  ;;  %4600 = vmatprep.subr.bf16.mxu1 %v14008_v60  ;;  %5423 = vrot.lane.b32.xlu1 %v5360_v23, %s14308_s30  ;;  %v2950_v33 = vadd.f32 %v2886_v16, %v2676_v53  ;;  %v17250_v42 = vadd.f32 %v2888_v48, %v2678_v12  ;;  %v2889_v14 = vrot.slane %v2751_v0, 1  ;;  %v2891_v23 = vrot.slane %v2824_v43, 1  ;;  %v22487_v48 = vld [vmem:[#allocation56_spill] sm:$0xff] }
 0x218   :  { %5421 = vrot.lane.b32.xlu0 %v5359_v1, %s14308_s30  ;;  %22481 = vst [vmem:[#allocation43_spill] sm:$0xff] %v17246_v44  ;;  %4527 = vmatprep.subr.bf16.mxu0 %v14009_v62  ;;  %v2682_v1 = vadd.f32 %v2618_v58, %v22484_v39  ;;  %v2753_v30 = vpop.f32.mrf.mxu0  ;;  %v2826_v13 = vpop.f32.mrf.mxu1  ;;  %v5371_v60 = vmax.f32 %v22485_v29, %v17235_v6  ;;  %v22488_v6 = vld [vmem:[#allocation28_spill] sm:$0xff]  ;;  %v22491_v39 = vld [vmem:[#allocation31_spill] sm:$0xff] }
 0x219   :  { %v17260_v53 = vadd.f32 %v2889_v14, %v16949_v9  ;;  %v2890_v12 = vrot.slane %v2753_v30, 1  ;;  %v2892_v16 = vrot.slane %v2826_v13, 1  ;;  %v5372_v21 = vmax.f32 %v22487_v48, %v17250_v42  ;;  %v22492_v30 = vld [vmem:[#allocation33_spill] sm:$0xff]  ;;  %v22493_v29 = vld [vmem:[#allocation32_spill] sm:$0xff] }
 0x21a   :  { %v17264_v0 = vadd.f32 %v2891_v23, %v2681_v50  ;;  %v17269_v54 = vpop.f32.mrf.mxu0  ;;  %v17271_v58 = vpop.f32.mrf.mxu1  ;;  %v17274_v43 = vmax.f32 %v22488_v6, %v2950_v33  ;;  %v14011_v50 = vld [vmem:[%s22095_s1 + $0x228] ss:$16 sps:$4 sm:$0xff]   ;;  %v14013_v23 = vld [vmem:[%s22095_s1 + $0x20c] ss:$16 sps:$4 sm:$0xff]   ;;  %v14029_v48 = vld [vmem:[%s22095_s1 + $0x1a4] ss:$16 sps:$4 sm:$0xff]  }
 0x21b   :  { %22486 = vst [vmem:[#allocation44_spill] sm:$0xff] %v17260_v53  ;;  %5419 = vrot.lane.b32.xlu1 %v17164_v46, %s14308_s30  ;;  %v2954_v14 = vadd.f32 %v2890_v12, %v2680_v2  ;;  %v17278_v62 = vadd.f32 %v2892_v16, %v2682_v1  ;;  %v14012_v2 = vld [vmem:[%s22095_s1 + $0x220] ss:$16 sps:$4 sm:$0xff]   ;;  %v14028_v42 = vld [vmem:[%s22095_s1 + $0x1a8] ss:$16 sps:$4 sm:$0xff]  }
 0x21c   :  { %5427 = vrot.lane.b32.xlu0 %v5363_v47, %s14308_s30  ;;  %22489 = vst [vmem:[#allocation45_spill] sm:$0xff] %v17274_v43  ;;  %v14010_v47 = vld [vmem:[%s22096_s0] sm:$0xff]   ;;  %v17288_v33 = vpop.f32.mrf.mxu0  ;;  %v17290_v56 = vpop.f32.mrf.mxu1  ;;  %v5375_v1 = vmax.f32 %v22491_v39, %v17264_v0  ;;  %v14033_v39 = vld [vmem:[%s22095_s1 + $0x188] ss:$16 sps:$4 sm:$0xff]  }
 0x21d   :  { %12060 = vmatmul.mubr.msk.bf16.vlgmr.msra.gmra.mxu0 %vm34_vm0, %v14010_v47  ;;  %12064 = vmatmul.mubr.msk.bf16.vlgmr.msra.gmra.mxu1 %vm34_vm0, %v14010_v47  ;;  %v5376_v13 = vmax.f32 %v22492_v30, %v17278_v62  ;;  %v17304_v12 = vmax.f32 %v22493_v29, %v2954_v14  ;;  %v14014_v47 = vld [vmem:[%s22095_s1 + $0x204] ss:$16 sps:$4 sm:$0xff]   ;;  %v14044_v9 = vld [vmem:[%s22095_s1 + $0x2c0] ss:$16 sps:$4 sm:$0xff]  }
 0x21e   :  { %4601 = vmatpush1.bf16.msra.mxu1 %v14011_v50  ;;  %4528 = vmatpush1.bf16.msra.mxu0 %v14012_v2  ;;  %v17312_v16 = vpop.f32.mrf.mxu0  ;;  %v17314_v6 = vpop.f32.mrf.mxu1  ;;  %v14018_v2 = vld [vmem:[%s22095_s1 + $0x1e4] ss:$16 sps:$4 sm:$0xff]  }
 0x21f   :  { %4602 = vmatprep.subr.bf16.mxu1 %v14013_v23  ;;  %4291 = vmatprep.mubr.bf16.mxu0 %v22273_v63  ;;  %22494 = vst [vmem:[#allocation46_spill] sm:$0xff] %v17304_v12  ;;  %v14032_v0 = vld [vmem:[%s22095_s1 + $0x184] ss:$16 sps:$4 sm:$0xff]  }
 0x220   :  { %5429 = vrot.lane.b32.xlu1 %v5364_v57, %s14308_s30  ;;  %5425 = vrot.lane.b32.xlu0 %v17204_v41, %s14308_s30  ;;  %v17320_v14 = vpop.f32.mrf.mxu0  ;;  %v17322_v50 = vpop.f32.mrf.mxu1  ;;  %v14017_v57 = vld [vmem:[%s22095_s1 + $0x1ec] ss:$16 sps:$4 sm:$0xff]  }
 0x221   :  { %4364 = vmatprep.mubr.bf16.mxu1 %v22273_v63  ;;  %4529 = vmatprep.subr.bf16.mxu0 %v14014_v47  ;;  %v14019_v47 = vld [vmem:[%s22096_s0 + $0x8] sm:$0xff]  }
 0x222   :  { %4603 = vmatpush1.bf16.msra.mxu1 %v14015_v35  ;;  %4530 = vmatpush1.bf16.msra.mxu0 %v14016_v4  ;;  %v17344_v23 = vpop.f32.mrf.mxu0  ;;  %v17346_v29 = vpop.f32.mrf.mxu1  ;;  %v14023_v4 = vld [vmem:[%s22095_s1 + $0x1c4] ss:$16 sps:$4 sm:$0xff]  }
 0x223   :  { %4604 = vmatprep.subr.bf16.mxu1 %v14017_v57  ;;  %4531 = vmatprep.subr.bf16.mxu0 %v14018_v2  ;;  %v14024_v2 = vld [vmem:[%s22095_s1 + $0x1c8] ss:$16 sps:$4 sm:$0xff]  }
 0x224   :  { %5435 = vrot.lane.b32.xlu1 %v5368_v38, %s14308_s30  ;;  %5433 = vrot.lane.b32.xlu0 %v5367_v49, %s14308_s30  ;;  %v17353_v35 = vpop.f32.mrf.mxu0  ;;  %v17355_v51 = vpop.f32.mrf.mxu1  ;;  %v14022_v38 = vld [vmem:[%s22095_s1 + $0x1cc] ss:$16 sps:$4 sm:$0xff]  }
 0x225   :  { %12061 = vmatmul.mubr.msk.bf16.gmra.mxu0 %vm34_vm0, %v14019_v47  ;;  %12065 = vmatmul.mubr.msk.bf16.gmra.mxu1 %vm34_vm0, %v14019_v47  ;;  %v14025_v47 = vld [vmem:[%s22095_s1 + $0x1c0] ss:$16 sps:$4 sm:$0xff]  }
 0x226   :  { %4605 = vmatpush1.bf16.msra.mxu1 %v14020_v20  ;;  %4301 = vmatprep.mubr.bf16.mxu0 %v22273_v63  ;;  %v17368_v49 = vpop.f32.mrf.mxu0  ;;  %v17370_v32 = vpop.f32.mrf.mxu1  ;;  %v14026_v20 = vld [vmem:[%s22095_s1 + $0x1ac] ss:$16 sps:$4 sm:$0xff]  }
 0x227   :  { %4374 = vmatprep.mubr.bf16.mxu1 %v22273_v63  ;;  %4532 = vmatpush1.bf16.msra.mxu0 %v14021_v5 }
 0x228   :  { %5439 = vrot.lane.b32.xlu0 %v5371_v60, %s14308_s30  ;;  %5431 = vrot.lane.b32.xlu1 %v17246_v44, %s14308_s30  ;;  %v17378_v57 = vpop.f32.mrf.mxu0  ;;  %v17380_v60 = vpop.f32.mrf.mxu1 }
 0x229   :  { %4606 = vmatprep.subr.bf16.mxu1 %v14022_v38  ;;  %4533 = vmatprep.subr.bf16.mxu0 %v14023_v4  ;;  %v14027_v4 = vld [vmem:[%s22096_s0 + $0x10] sm:$0xff]  }
 0x22a   :  { %4607 = vmatpush1.bf16.msra.mxu1 %v14024_v2  ;;  %v17397_v5 = vpop.f32.mrf.mxu0 }
 0x22b   :  { %4534 = vmatpush1.bf16.msra.mxu0 %v14025_v47  ;;  %4608 = vmatprep.subr.bf16.mxu1 %v14026_v20  ;;  %v17399_v38 = vpop.f32.mrf.mxu1 }
 0x22c   :  { %5441 = vrot.lane.b32.xlu1 %v5372_v21, %s14308_s30  ;;  %5437 = vrot.lane.b32.xlu0 %v17274_v43, %s14308_s30  ;;  %v17406_v2 = vpop.f32.mrf.mxu0  ;;  %v14072_v43 = vld [vmem:[%s22095_s1 + $0x380] ss:$16 sps:$4 sm:$0xff]  }
 0x22d   :  { %12062 = vmatmul.mubr.msk.bf16.gmra.mxu0 %vm34_vm0, %v14027_v4  ;;  %12066 = vmatmul.mubr.msk.bf16.gmra.mxu1 %vm34_vm0, %v14027_v4  ;;  %v17408_v47 = vpop.f32.mrf.mxu1  ;;  %v14030_v4 = vld [vmem:[%s22095_s1 + $0x1a0] ss:$16 sps:$4 sm:$0xff]  }
 0x22e   :  { %4311 = vmatprep.mubr.bf16.mxu0 %v22273_v63  ;;  %4384 = vmatprep.mubr.bf16.mxu1 %v22273_v63  ;;  %v17426_v21 = vpop.f32.mrf.mxu0 }
 0x22f   :  { %4609 = vmatpush1.bf16.msra.mxu1 %v14028_v42  ;;  %4535 = vmatprep.subr.bf16.mxu0 %v14029_v48  ;;  %v17428_v20 = vpop.f32.mrf.mxu1  ;;  %v14031_v42 = vld [vmem:[%s22095_s1 + $0x18c] ss:$16 sps:$4 sm:$0xff]  }
 0x230   :  { %5447 = vrot.lane.b32.xlu1 %v5376_v13, %s14308_s30  ;;  %5445 = vrot.lane.b32.xlu0 %v5375_v1, %s14308_s30  ;;  %v17436_v62 = vpop.f32.mrf.mxu0  ;;  %v14034_v48 = vld [vmem:[%s22095_s1 + $0x2ec] ss:$16 sps:$4 sm:$0xff]  }
 0x231   :  { %4536 = vmatpush1.bf16.msra.mxu0 %v14030_v4  ;;  %4610 = vmatprep.subr.bf16.mxu1 %v14031_v42  ;;  %v17438_v30 = vpop.f32.mrf.mxu1  ;;  %v14035_v4 = vld [vmem:[%s22096_s0 + $0x18] sm:$0xff]  }
 0x232   :  { %4537 = vmatprep.subr.bf16.mxu0 %v14032_v0 }
 0x233   :  { %4611 = vmatpush1.bf16.msra.mxu1 %v14033_v39  ;;  %v17448_v1 = vpop.f32.mrf.mxu0  ;;  %v17450_v13 = vpop.f32.mrf.mxu1  ;;  %v14036_v39 = vld [vmem:[%s22095_s1 + $0x180] ss:$16 sps:$4 sm:$0xff]  }
 0x234   :  { %5443 = vrot.lane.b32.xlu1 %v17304_v12, %s14308_s30  ;;  %4874 = vmatprep.subr.bf16.mxu1 %v14034_v48  ;;  %v14037_v48 = vld [vmem:[%s22095_s1 + $0x2e4] ss:$16 sps:$4 sm:$0xff]  }
 0x235   :  { %12063 = vmatmul.mubr.msk.bf16.gmra.mxu0 %vm34_vm0, %v14035_v4  ;;  %12067 = vmatmul.mubr.msk.bf16.gmra.mxu1 %vm34_vm0, %v14035_v4  ;;  %v17460_v42 = vpop.f32.mrf.mxu0  ;;  %v17462_v0 = vpop.f32.mrf.mxu1 }
 0x236   :  { %4538 = vmatpush1.bf16.msra.mxu0 %v14036_v39  ;;  %4555 = vmatprep.mubr.bf16.mxu0 %v22273_v63 }
 0x237   :  { %4628 = vmatprep.mubr.bf16.mxu1 %v22273_v63  ;;  %4801 = vmatprep.subr.bf16.mxu0 %v14037_v48  ;;  %v17472_v17 = vpop.f32.mrf.mxu0  ;;  %v17474_v4 = vpop.f32.mrf.mxu1  ;;  %v14038_v48 = vld [vmem:[%s22096_s0 + $0x20] sm:$0xff]  }
 0x239   :  { %v17476_v34 = vpop.f32.mrf.mxu0  ;;  %v17478_v45 = vpop.f32.mrf.mxu1 }
 0x23b   :  { %v3137_v36 = vpop.f32.mrf.mxu0  ;;  %v3210_v10 = vpop.f32.mrf.mxu1 }
 0x23c   :  { %v17481_v39 = vadd.f32 %v3137_v36, %v17269_v54  ;;  %v17484_v11 = vadd.f32 %v3210_v10, %v17271_v58  ;;  %v14040_v10 = vld [vmem:[%s22095_s1 + $0x2e0] ss:$16 sps:$4 sm:$0xff]   ;;  %v14041_v58 = vld [vmem:[%s22095_s1 + $0x2cc] ss:$16 sps:$4 sm:$0xff]  }
 0x23d   :  { %12068 = vmatmul.mubr.msk.bf16.vlgmr.msra.gmra.mxu0 %vm34_vm0, %v14038_v48  ;;  %12072 = vmatmul.mubr.msk.bf16.vlgmr.msra.gmra.mxu1 %vm34_vm0, %v14038_v48  ;;  %v3139_v40 = vpop.f32.mrf.mxu0  ;;  %v3212_v53 = vpop.f32.mrf.mxu1 }
 0x23e   :  { %4875 = vmatpush1.bf16.msra.mxu1 %v14039_v59  ;;  %4802 = vmatpush1.bf16.msra.mxu0 %v14040_v10  ;;  %v17498_v36 = vadd.f32 %v3139_v40, %v17288_v33  ;;  %v17501_v54 = vadd.f32 %v3212_v53, %v17290_v56  ;;  %v14042_v10 = vld [vmem:[%s22095_s1 + $0x2c4] ss:$16 sps:$4 sm:$0xff]  }
 0x23f   :  { %4876 = vmatprep.subr.bf16.mxu1 %v14041_v58  ;;  %4565 = vmatprep.mubr.bf16.mxu0 %v22273_v63  ;;  %v3141_v59 = vpop.f32.mrf.mxu0  ;;  %v3214_v48 = vpop.f32.mrf.mxu1  ;;  %v14043_v58 = vld [vmem:[%s22095_s1 + $0x2c8] ss:$16 sps:$4 sm:$0xff]  }
 0x240   :  { %4638 = vmatprep.mubr.bf16.mxu1 %v22273_v63  ;;  %4803 = vmatprep.subr.bf16.mxu0 %v14042_v10  ;;  %v17512_v40 = vadd.f32 %v3141_v59, %v17312_v16  ;;  %v17515_v53 = vadd.f32 %v3214_v48, %v17314_v6  ;;  %v14045_v6 = vld [vmem:[%s22095_s1 + $0x2ac] ss:$16 sps:$4 sm:$0xff]   ;;  %v14046_v59 = vld [vmem:[%s22095_s1 + $0x2a4] ss:$16 sps:$4 sm:$0xff]  }
 0x241   :  { %v3143_v33 = vpop.f32.mrf.mxu0  ;;  %v3216_v56 = vpop.f32.mrf.mxu1 }
 0x242   :  { %4877 = vmatpush1.bf16.msra.mxu1 %v14043_v58  ;;  %4804 = vmatpush1.bf16.msra.mxu0 %v14044_v9  ;;  %v17524_v10 = vadd.f32 %v3143_v33, %v17320_v14  ;;  %v17527_v16 = vadd.f32 %v3216_v56, %v17322_v50  ;;  %v14047_v50 = vld [vmem:[%s22096_s0 + $0x28] sm:$0xff]  }
 0x243   :  { %4878 = vmatprep.subr.bf16.mxu1 %v14045_v6  ;;  %4805 = vmatprep.subr.bf16.mxu0 %v14046_v59  ;;  %v3147_v48 = vpop.f32.mrf.mxu0  ;;  %v3220_v58 = vpop.f32.mrf.mxu1  ;;  %v14048_v6 = vld [vmem:[%s22095_s1 + $0x2a8] ss:$16 sps:$4 sm:$0xff]   ;;  %v14049_v59 = vld [vmem:[%s22095_s1 + $0x2a0] ss:$16 sps:$4 sm:$0xff]  }
 0x244   :  { %v17536_v9 = vadd.f32 %v3147_v48, %v17344_v23  ;;  %v17539_v14 = vadd.f32 %v3220_v58, %v17346_v29 }
 0x245   :  { %12069 = vmatmul.mubr.msk.bf16.gmra.mxu0 %vm34_vm0, %v14047_v50  ;;  %12073 = vmatmul.mubr.msk.bf16.gmra.mxu1 %vm34_vm0, %v14047_v50  ;;  %v3149_v33 = vpop.f32.mrf.mxu0  ;;  %v3222_v56 = vpop.f32.mrf.mxu1  ;;  %v14050_v50 = vld [vmem:[%s22095_s1 + $0x28c] ss:$16 sps:$4 sm:$0xff]  }
 0x246   :  { %4879 = vmatpush1.bf16.msra.mxu1 %v14048_v6  ;;  %4575 = vmatprep.mubr.bf16.mxu0 %v22273_v63  ;;  %v17551_v23 = vadd.f32 %v3149_v33, %v17353_v35  ;;  %v17554_v29 = vadd.f32 %v3222_v56, %v17355_v51  ;;  %v14051_v35 = vld [vmem:[%s22095_s1 + $0x284] ss:$16 sps:$4 sm:$0xff]  }
 0x247   :  { %4648 = vmatprep.mubr.bf16.mxu1 %v22273_v63  ;;  %4806 = vmatpush1.bf16.msra.mxu0 %v14049_v59  ;;  %v3151_v48 = vpop.f32.mrf.mxu0  ;;  %v3224_v58 = vpop.f32.mrf.mxu1  ;;  %v14052_v59 = vld [vmem:[%s22095_s1 + $0x288] ss:$16 sps:$4 sm:$0xff]  }
 0x248   :  { %4880 = vmatprep.subr.bf16.mxu1 %v14050_v50  ;;  %4807 = vmatprep.subr.bf16.mxu0 %v14051_v35  ;;  %v17567_v51 = vadd.f32 %v3151_v48, %v17368_v49  ;;  %v17570_v33 = vadd.f32 %v3224_v58, %v17370_v32  ;;  %v14053_v49 = vld [vmem:[%s22095_s1 + $0x280] ss:$16 sps:$4 sm:$0xff]   ;;  %v14054_v32 = vld [vmem:[%s22095_s1 + $0x26c] ss:$16 sps:$4 sm:$0xff]  }
 0x249   :  { %v3153_v56 = vpop.f32.mrf.mxu0  ;;  %v3226_v6 = vpop.f32.mrf.mxu1 }
 0x24a   :  { %4881 = vmatpush1.bf16.msra.mxu1 %v14052_v59  ;;  %v17576_v50 = vadd.f32 %v3153_v56, %v17378_v57  ;;  %v17579_v12 = vadd.f32 %v3226_v6, %v17380_v60  ;;  %v14055_v57 = vld [vmem:[%s22095_s1 + $0x264] ss:$16 sps:$4 sm:$0xff]  }
 0x24b   :  { %4808 = vmatpush1.bf16.msra.mxu0 %v14053_v49  ;;  %4882 = vmatprep.subr.bf16.mxu1 %v14054_v32  ;;  %v3157_v48 = vpop.f32.mrf.mxu0  ;;  %v3230_v58 = vpop.f32.mrf.mxu1  ;;  %v14056_v56 = vld [vmem:[%s22096_s0 + $0x30] sm:$0xff]   ;;  %v14057_v49 = vld [vmem:[%s22095_s1 + $0x268] ss:$16 sps:$4 sm:$0xff]  }
 0x24c   :  { %4809 = vmatprep.subr.bf16.mxu0 %v14055_v57  ;;  %v17591_v60 = vadd.f32 %v3157_v48, %v17397_v5  ;;  %v17594_v35 = vadd.f32 %v3230_v58, %v17399_v38  ;;  %v14058_v32 = vld [vmem:[%s22095_s1 + $0x260] ss:$16 sps:$4 sm:$0xff]  }
 0x24d   :  { %12070 = vmatmul.mubr.msk.bf16.gmra.mxu0 %vm34_vm0, %v14056_v56  ;;  %12074 = vmatmul.mubr.msk.bf16.gmra.mxu1 %vm34_vm0, %v14056_v56  ;;  %v3159_v6 = vpop.f32.mrf.mxu0  ;;  %v3232_v59 = vpop.f32.mrf.mxu1 }
 0x24e   :  { %4585 = vmatprep.mubr.bf16.mxu0 %v22273_v63  ;;  %4658 = vmatprep.mubr.bf16.mxu1 %v22273_v63  ;;  %v17604_v5 = vadd.f32 %v3159_v6, %v17406_v2  ;;  %v17607_v38 = vadd.f32 %v3232_v59, %v17408_v47  ;;  %v14059_v2 = vld [vmem:[%s22095_s1 + $0x24c] ss:$16 sps:$4 sm:$0xff]   ;;  %v14060_v47 = vld [vmem:[%s22095_s1 + $0x244] ss:$16 sps:$4 sm:$0xff]  }
 0x24f   :  { %4883 = vmatpush1.bf16.msra.mxu1 %v14057_v49  ;;  %4810 = vmatpush1.bf16.msra.mxu0 %v14058_v32  ;;  %v3161_v48 = vpop.f32.mrf.mxu0  ;;  %v3234_v58 = vpop.f32.mrf.mxu1 }
 0x250   :  { %4884 = vmatprep.subr.bf16.mxu1 %v14059_v2  ;;  %4811 = vmatprep.subr.bf16.mxu0 %v14060_v47  ;;  %v17622_v57 = vadd.f32 %v3161_v48, %v17426_v21  ;;  %v17625_v56 = vadd.f32 %v3234_v58, %v17428_v20  ;;  %v14061_v2 = vld [vmem:[%s22095_s1 + $0x248] ss:$16 sps:$4 sm:$0xff]   ;;  %v14062_v21 = vld [vmem:[%s22095_s1 + $0x240] ss:$16 sps:$4 sm:$0xff]  }
 0x251   :  { %v3163_v6 = vpop.f32.mrf.mxu0  ;;  %v3236_v59 = vpop.f32.mrf.mxu1 }
 0x252   :  { %v17628_v49 = vadd.f32 %v3163_v6, %v17436_v62  ;;  %v17631_v32 = vadd.f32 %v3236_v59, %v17438_v30  ;;  %v14063_v62 = vld [vmem:[%s22095_s1 + $0x3ac] ss:$16 sps:$4 sm:$0xff]   ;;  %v14064_v30 = vld [vmem:[%s22095_s1 + $0x3a4] ss:$16 sps:$4 sm:$0xff]  }
 0x253   :  { %4885 = vmatpush1.bf16.msra.mxu1 %v14061_v2  ;;  %4812 = vmatpush1.bf16.msra.mxu0 %v14062_v21  ;;  %v3167_v20 = vpop.f32.mrf.mxu0  ;;  %v3240_v48 = vpop.f32.mrf.mxu1  ;;  %v14065_v6 = vld [vmem:[%s22096_s0 + $0x38] sm:$0xff]  }
 0x254   :  { %5148 = vmatprep.subr.bf16.mxu1 %v14063_v62  ;;  %5075 = vmatprep.subr.bf16.mxu0 %v14064_v30  ;;  %v17646_v58 = vadd.f32 %v3167_v20, %v17448_v1  ;;  %v17649_v47 = vadd.f32 %v3240_v48, %v17450_v13 }
 0x255   :  { %12071 = vmatmul.mubr.msk.bf16.gmra.mxu0 %vm34_vm0, %v14065_v6  ;;  %12075 = vmatmul.mubr.msk.bf16.gmra.mxu1 %vm34_vm0, %v14065_v6  ;;  %v3169_v59 = vpop.f32.mrf.mxu0  ;;  %v3242_v2 = vpop.f32.mrf.mxu1 }
 0x256   :  { %4829 = vmatprep.mubr.bf16.mxu0 %v22273_v63  ;;  %4902 = vmatprep.mubr.bf16.mxu1 %v22273_v63  ;;  %v17659_v1 = vadd.f32 %v3169_v59, %v17460_v42  ;;  %v17662_v13 = vadd.f32 %v3242_v2, %v17462_v0 }
 0x257   :  { %v3171_v21 = vpop.f32.mrf.mxu0  ;;  %v3244_v20 = vpop.f32.mrf.mxu1 }
 0x258   :  { %v17665_v48 = vadd.f32 %v3171_v21, %v17472_v17  ;;  %v17668_v62 = vadd.f32 %v3244_v20, %v17474_v4  ;;  %v14066_v17 = vld [vmem:[%s22096_s0 + $0x40] sm:$0xff]  }
 0x259   :  { %v3173_v30 = vpop.f32.mrf.mxu0  ;;  %v3246_v6 = vpop.f32.mrf.mxu1  ;;  %v14068_v21 = vld [vmem:[%s22095_s1 + $0x3a0] ss:$16 sps:$4 sm:$0xff]  }
 0x25a   :  { %v17671_v27 = vadd.f32 %v3173_v30, %v17476_v34  ;;  %v17674_v3 = vadd.f32 %v3246_v6, %v17478_v45  ;;  %v14067_v34 = vld [vmem:[%s22095_s1 + $0x3a8] ss:$16 sps:$4 sm:$0xff]  }
 0x25b   :  { %v3315_v42 = vpop.f32.mrf.mxu0  ;;  %v3388_v59 = vpop.f32.mrf.mxu1 }
 0x25c   :  { %v3459_v0 = vrot.slane %v3315_v42, 1  ;;  %v3461_v2 = vrot.slane %v3388_v59, 1  ;;  %v14069_v59 = vld [vmem:[%s22095_s1 + $0x38c] ss:$16 sps:$4 sm:$0xff]  }
 0x25d   :  { %12076 = vmatmul.mubr.msk.bf16.vlgmr.msra.gmra.mxu0 %vm34_vm0, %v14066_v17  ;;  %12080 = vmatmul.mubr.msk.bf16.vlgmr.msra.gmra.mxu1 %vm34_vm0, %v14066_v17  ;;  %v3317_v4 = vpop.f32.mrf.mxu0  ;;  %v3390_v45 = vpop.f32.mrf.mxu1 }
 0x25e   :  { %5149 = vmatpush1.bf16.msra.mxu1 %v14067_v34  ;;  %5076 = vmatpush1.bf16.msra.mxu0 %v14068_v21  ;;  %v17688_v20 = vadd.f32 %v3459_v0, %v17481_v39  ;;  %v17691_v30 = vadd.f32 %v3461_v2, %v17484_v11  ;;  %v3460_v6 = vrot.slane %v3317_v4, 1  ;;  %v3462_v42 = vrot.slane %v3390_v45, 1  ;;  %v14070_v39 = vld [vmem:[%s22095_s1 + $0x384] ss:$16 sps:$4 sm:$0xff]  }
 0x25f   :  { %5150 = vmatprep.subr.bf16.mxu1 %v14069_v59  ;;  %4839 = vmatprep.mubr.bf16.mxu0 %v22273_v63  ;;  %v3319_v17 = vpop.f32.mrf.mxu0  ;;  %v3392_v34 = vpop.f32.mrf.mxu1  ;;  %v14071_v59 = vld [vmem:[%s22095_s1 + $0x388] ss:$16 sps:$4 sm:$0xff]  }
 0x260   :  { %4912 = vmatprep.mubr.bf16.mxu1 %v22273_v63  ;;  %5077 = vmatprep.subr.bf16.mxu0 %v14070_v39  ;;  %v17702_v11 = vadd.f32 %v3460_v6, %v17498_v36  ;;  %v17705_v0 = vadd.f32 %v3462_v42, %v17501_v54  ;;  %v3463_v2 = vrot.slane %v3319_v17, 1  ;;  %v3465_v4 = vrot.slane %v3392_v34, 1  ;;  %v14073_v17 = vld [vmem:[%s22095_s1 + $0x36c] ss:$16 sps:$4 sm:$0xff]   ;;  %v14074_v34 = vld [vmem:[%s22095_s1 + $0x364] ss:$16 sps:$4 sm:$0xff]  }
 0x261   :  { %v3321_v45 = vpop.f32.mrf.mxu0  ;;  %v3394_v21 = vpop.f32.mrf.mxu1 }
 0x262   :  { %5151 = vmatpush1.bf16.msra.mxu1 %v14071_v59  ;;  %5078 = vmatpush1.bf16.msra.mxu0 %v14072_v43  ;;  %v17714_v36 = vadd.f32 %v3463_v2, %v17512_v40  ;;  %v17717_v54 = vadd.f32 %v3465_v4, %v17515_v53  ;;  %v3464_v6 = vrot.slane %v3321_v45, 1  ;;  %v3466_v42 = vrot.slane %v3394_v21, 1  ;;  %v14075_v45 = vld [vmem:[%s22096_s0 + $0x48] sm:$0xff]  }
 0x263   :  { %5152 = vmatprep.subr.bf16.mxu1 %v14073_v17  ;;  %5079 = vmatprep.subr.bf16.mxu0 %v14074_v34  ;;  %v3325_v39 = vpop.f32.mrf.mxu0  ;;  %v3398_v43 = vpop.f32.mrf.mxu1  ;;  %v14077_v34 = vld [vmem:[%s22095_s1 + $0x360] ss:$16 sps:$4 sm:$0xff]  }
 0x264   :  { %v17726_v40 = vadd.f32 %v3464_v6, %v17524_v10  ;;  %v17729_v53 = vadd.f32 %v3466_v42, %v17527_v16  ;;  %v3467_v2 = vrot.slane %v3325_v39, 1  ;;  %v3469_v4 = vrot.slane %v3398_v43, 1  ;;  %v14076_v10 = vld [vmem:[%s22095_s1 + $0x368] ss:$16 sps:$4 sm:$0xff]  }
 0x265   :  { %12077 = vmatmul.mubr.msk.bf16.gmra.mxu0 %vm34_vm0, %v14075_v45  ;;  %12081 = vmatmul.mubr.msk.bf16.gmra.mxu1 %vm34_vm0, %v14075_v45  ;;  %v3327_v21 = vpop.f32.mrf.mxu0  ;;  %v3400_v59 = vpop.f32.mrf.mxu1  ;;  %v14078_v45 = vld [vmem:[%s22095_s1 + $0x34c] ss:$16 sps:$4 sm:$0xff]  }
 0x266   :  { %5153 = vmatpush1.bf16.msra.mxu1 %v14076_v10  ;;  %4849 = vmatprep.mubr.bf16.mxu0 %v22273_v63  ;;  %v17741_v16 = vadd.f32 %v3467_v2, %v17536_v9  ;;  %v17744_v6 = vadd.f32 %v3469_v4, %v17539_v14  ;;  %v3468_v42 = vrot.slane %v3327_v21, 1  ;;  %v3470_v17 = vrot.slane %v3400_v59, 1  ;;  %v14079_v9 = vld [vmem:[%s22095_s1 + $0x344] ss:$16 sps:$4 sm:$0xff]  }
 0x267   :  { %4922 = vmatprep.mubr.bf16.mxu1 %v22273_v63  ;;  %5080 = vmatpush1.bf16.msra.mxu0 %v14077_v34  ;;  %v3329_v39 = vpop.f32.mrf.mxu0  ;;  %v3402_v43 = vpop.f32.mrf.mxu1  ;;  %v14080_v34 = vld [vmem:[%s22095_s1 + $0x348] ss:$16 sps:$4 sm:$0xff]  }
 0x268   :  { %5154 = vmatprep.subr.bf16.mxu1 %v14078_v45  ;;  %5081 = vmatprep.subr.bf16.mxu0 %v14079_v9  ;;  %v17757_v14 = vadd.f32 %v3468_v42, %v17551_v23  ;;  %v17760_v2 = vadd.f32 %v3470_v17, %v17554_v29  ;;  %v3471_v4 = vrot.slane %v3329_v39, 1  ;;  %v3473_v21 = vrot.slane %v3402_v43, 1  ;;  %v14081_v29 = vld [vmem:[%s22095_s1 + $0x340] ss:$16 sps:$4 sm:$0xff]   ;;  %v14082_v17 = vld [vmem:[%s22095_s1 + $0x32c] ss:$16 sps:$4 sm:$0xff]  }
 0x269   :  { %v3331_v59 = vpop.f32.mrf.mxu0  ;;  %v3404_v10 = vpop.f32.mrf.mxu1 }
 0x26a   :  { %5155 = vmatpush1.bf16.msra.mxu1 %v14080_v34  ;;  %v17766_v45 = vadd.f32 %v3471_v4, %v17567_v51  ;;  %v17769_v9 = vadd.f32 %v3473_v21, %v17570_v33  ;;  %v3472_v23 = vrot.slane %v3331_v59, 1  ;;  %v3474_v42 = vrot.slane %v3404_v10, 1  ;;  %v14083_v51 = vld [vmem:[%s22095_s1 + $0x324] ss:$16 sps:$4 sm:$0xff]  }
 0x26b   :  { %5082 = vmatpush1.bf16.msra.mxu0 %v14081_v29  ;;  %5156 = vmatprep.subr.bf16.mxu1 %v14082_v17  ;;  %v3335_v39 = vpop.f32.mrf.mxu0  ;;  %v3408_v43 = vpop.f32.mrf.mxu1  ;;  %v14084_v10 = vld [vmem:[%s22096_s0 + $0x50] sm:$0xff]  }
 0x26c   :  { %5083 = vmatprep.subr.bf16.mxu0 %v14083_v51  ;;  %v17781_v33 = vadd.f32 %v3472_v23, %v17576_v50  ;;  %v17784_v4 = vadd.f32 %v3474_v42, %v17579_v12  ;;  %v3475_v21 = vrot.slane %v3335_v39, 1  ;;  %v3477_v59 = vrot.slane %v3408_v43, 1  ;;  %v14085_v39 = vld [vmem:[%s22095_s1 + $0x328] ss:$16 sps:$4 sm:$0xff]   ;;  %v14086_v43 = vld [vmem:[%s22095_s1 + $0x320] ss:$16 sps:$4 sm:$0xff]  }
 0x26d   :  { %12078 = vmatmul.mubr.msk.bf16.gmra.mxu0 %vm34_vm0, %v14084_v10  ;;  %12082 = vmatmul.mubr.msk.bf16.gmra.mxu1 %vm34_vm0, %v14084_v10  ;;  %v3337_v34 = vpop.f32.mrf.mxu0  ;;  %v3410_v29 = vpop.f32.mrf.mxu1  ;;  %v5500_v50 = vlaneseq }
 0x26e   :  { %4859 = vmatprep.mubr.bf16.mxu0 %v22273_v63  ;;  %4932 = vmatprep.mubr.bf16.mxu1 %v22273_v63  ;;  %v17794_v12 = vadd.f32 %v3475_v21, %v17591_v60  ;;  %v17797_v23 = vadd.f32 %v3477_v59, %v17594_v35  ;;  %v3476_v42 = vrot.slane %v3337_v34, 1  ;;  %v3478_v17 = vrot.slane %v3410_v29, 1  ;;  %v14087_v60 = vld [vmem:[%s22095_s1 + $0x304] ss:$16 sps:$4 sm:$0xff]   ;;  %v14088_v35 = vld [vmem:[%s22095_s1 + $0x30c] ss:$16 sps:$4 sm:$0xff]  }
 0x26f   :  { %5157 = vmatpush1.bf16.msra.mxu1 %v14085_v39  ;;  %5084 = vmatpush1.bf16.msra.mxu0 %v14086_v43  ;;  %v3339_v51 = vpop.f32.mrf.mxu0  ;;  %v3412_v10 = vpop.f32.mrf.mxu1  ;;  %v13227_v21 = vld [vmem:[%s22097_s3 + $0xac] ss:$12 sps:$4 sm:$0xff]  }
 0x270   :  { %5085 = vmatprep.subr.bf16.mxu0 %v14087_v60  ;;  %5158 = vmatprep.subr.bf16.mxu1 %v14088_v35  ;;  %v17815_v59 = vadd.f32 %v3476_v42, %v17604_v5  ;;  %v17818_v34 = vadd.f32 %v3478_v17, %v17607_v38  ;;  %v3479_v29 = vrot.slane %v3339_v51, 1  ;;  %v3481_v39 = vrot.slane %v3412_v10, 1  ;;  %v14089_v5 = vld [vmem:[%s22095_s1 + $0x300] ss:$16 sps:$4 sm:$0xff]   ;;  %v14090_v38 = vld [vmem:[%s22095_s1 + $0x308] ss:$16 sps:$4 sm:$0xff]  }
 0x271   :  { %v3341_v43 = vpop.f32.mrf.mxu0  ;;  %v3414_v52 = vpop.f32.mrf.mxu1  ;;  %v17820_v60 = vshrl.u32 %v5500_v50, 7  ;;  %v14091_v51 = vld [vmem:[%s22096_s0 + $0x58] sm:$0xff]  }
 0x272   :  { %v17823_v7 = vadd.f32 %v3479_v29, %v17622_v57  ;;  %v17826_v35 = vadd.f32 %v3481_v39, %v17625_v56  ;;  %v3480_v44 = vrot.slane %v3341_v43, 1  ;;  %v3482_v31 = vrot.slane %v3414_v52, 1  ;;  %v5498_v39 = vld [vmem:[%s22098_s2] sm:$0x3] }
 0x273   :  { %22495 = vst [vmem:[#allocation48_spill] sm:$0xff] %v17820_v60  ;;  %5086 = vmatpush1.bf16.msra.mxu0 %v14089_v5  ;;  %5159 = vmatpush1.bf16.msra.mxu1 %v14090_v38  ;;  %v3345_v50 = vpop.f32.mrf.mxu0  ;;  %v3418_v42 = vpop.f32.mrf.mxu1  ;;  %v17847_v29 = vsub.s32 1, %v17820_v60 }
 0x274   :  { %6100 = vmatprep.subr.bf16.mxu0 %v13227_v21  ;;  %6173 = vmatprep.subr.bf16.mxu1 %v22273_v63  ;;  %v17836_v57 = vadd.f32 %v3480_v44, %v17628_v49  ;;  %v17839_v52 = vadd.f32 %v3482_v31, %v17631_v32  ;;  %v3483_v56 = vrot.slane %v3345_v50, 1  ;;  %v3485_v17 = vrot.slane %v3418_v42, 1 }
 0x275   :  { %12079 = vmatmul.mubr.msk.bf16.gmra.mxu0 %vm34_vm0, %v14091_v51  ;;  %12083 = vmatmul.mubr.msk.bf16.gmra.mxu1 %vm34_vm0, %v14091_v51  ;;  %v5404_v10 = vpop.permute.xlu0 %5403  ;;  %v3347_v21 = vpop.f32.mrf.mxu0  ;;  %22496 = vst [vmem:[#allocation49_spill] sm:$0xff] %v17847_v29 }
 0x276   :  { %5103 = vmatprep.mubr.bf16.mxu0 %v22273_v63  ;;  %5176 = vmatprep.mubr.bf16.mxu1 %v22273_v63  ;;  %v17852_v31 = vadd.f32 %v3483_v56, %v17646_v58  ;;  %v17855_v44 = vadd.f32 %v3485_v17, %v17649_v47  ;;  %v3484_v49 = vrot.slane %v3347_v21, 1  ;;  %v3420_v32 = vpop.f32.mrf.mxu1  ;;  %v17864_v58 = vsub.s32 0, %v17820_v60 }
 0x277   :  { %v3486_v43 = vrot.slane %v3420_v32, 1  ;;  %v3349_v5 = vpop.f32.mrf.mxu0  ;;  %v17870_v17 = vrot.slane %v5498_v39, %v17847_v29  ;;  %v13225_v32 = vld [vmem:[%s22097_s3 + $0xa8] ss:$12 sps:$4 sm:$0xff]  }
 0x278   :  { %22497 = vst [vmem:[#allocation50_spill] sm:$0xff] %v17852_v31  ;;  %22498 = vst [vmem:[#allocation51_spill] sm:$0xff] %v17855_v44  ;;  %v17861_v38 = vadd.f32 %v3484_v49, %v17659_v1  ;;  %v3487_v50 = vrot.slane %v3349_v5, 1  ;;  %v3422_v42 = vpop.f32.mrf.mxu1  ;;  %v5410_v21 = vpop.permute.xlu1 %5409  ;;  %v13228_v1 = vld [vmem:[%s22097_s3 + $0xb0] ss:$12 sps:$4 sm:$0xff]  }
 0x279   :  { %22500 = vst [vmem:[#allocation53_spill] sm:$0xff] %v17864_v58  ;;  %v17867_v47 = vadd.f32 %v3486_v43, %v17662_v13  ;;  %v3489_v56 = vrot.slane %v3422_v42, 1  ;;  %22502 = vst [vmem:[#allocation55_spill] sm:$0xff] %v17870_v17  ;;  %v3351_v43 = vpop.f32.mrf.mxu0  ;;  %v13231_v42 = vld [vmem:[%s22097_s3 + $0x94] ss:$12 sps:$4 sm:$0xff]  }
 0x27a   :  { %22499 = vst [vmem:[#allocation52_spill] sm:$0xff] %v17861_v38  ;;  %v5406_v51 = vpop.permute.xlu0 %5405  ;;  %v17879_v49 = vadd.f32 %v3487_v50, %v17665_v48  ;;  %v3424_v5 = vpop.f32.mrf.mxu1  ;;  %v14092_v48 = vld [vmem:[%s22096_s0 + $0x60] sm:$0xff]   ;;  %v17895_v50 = vrot.slane %v5498_v39, %v17864_v58 }
 0x27b   :  { %22501 = vst [vmem:[#allocation54_spill] sm:$0xff] %v17867_v47  ;;  %v5451_v13 = vsel %vm5449_vm1, %v5404_v10, %v5406_v51  ;;  %v17886_v60 = vadd.f32 %v3489_v56, %v17668_v62  ;;  %v3488_v47 = vrot.slane %v3351_v43, 1  ;;  %v3490_v38 = vrot.slane %v3424_v5, 1  ;;  %v3589_v44 = vpop.f32.mrf.mxu0  ;;  %v13229_v5 = vld [vmem:[%s22097_s3 + $0x90] ss:$12 sps:$4 sm:$0xff]  }
 0x27c   :  { %v5483_v29 = vmax.f32 %v17056_v55, %v5451_v13  ;;  %v3662_v31 = vpop.f32.mrf.mxu1  ;;  %22503 = vst [vmem:[#allocation58_spill] sm:$0xff] %v17895_v50  ;;  %v3733_v51 = vrot.slane %v3589_v44, 1  ;;  %v5412_v13 = vpop.permute.xlu1 %5411  ;;  %v13232_v39 = vld [vmem:[%s22097_s3 + $0x98] ss:$12 sps:$4 sm:$0xff]  }
 0x27d   :  { %12084 = vmatmul.mubr.msk.bf16.vlgmr.msra.gmra.mxu0 %vm34_vm0, %v14092_v48  ;;  %12088 = vmatmul.mubr.msk.bf16.vlgmr.msra.gmra.mxu1 %vm34_vm0, %v14092_v48  ;;  %v17899_v56 = vadd.f32 %v3488_v47, %v17671_v27  ;;  %v17902_v55 = vadd.f32 %v3490_v38, %v17674_v3  ;;  %v5453_v27 = vsel %vm5449_vm1, %v5410_v21, %v5412_v13  ;;  %v3591_v38 = vpop.f32.mrf.mxu0  ;;  %v13235_v47 = vld [vmem:[%s22097_s3 + $0x7c] ss:$12 sps:$4 sm:$0xff]  }
 0x27e   :  { %v5511_v62 = vadd.f32 %v17870_v17, %v5483_v29  ;;  %6101 = vmatpush1.bf16.msra.mxu0 %v13225_v32  ;;  %6174 = vmatpush1.bf16.msra.mxu1 %v13228_v1  ;;  %v5402_v43 = vpop.permute.xlu0 %5401  ;;  %v3735_v29 = vrot.slane %v3662_v31, 1  ;;  %v3664_v44 = vpop.f32.mrf.mxu1  ;;  %v17917_v1 = vadd.f32 %v3733_v51, %v17688_v20  ;;  %v5485_v48 = vmax.f32 %v17088_v24, %v5453_v27 }
 0x27f   :  { %v5450_v3 = vsel %vm5449_vm1, %v5402_v43, %v5404_v10  ;;  %6102 = vmatprep.subr.bf16.mxu0 %v13231_v42  ;;  %6175 = vmatprep.subr.bf16.mxu1 %v22273_v63  ;;  %v22504_v31 = vmax.f32 %v22449_v25, %v16998_v61  ;;  %v3734_v42 = vrot.slane %v3591_v38, 1  ;;  %v3736_v43 = vrot.slane %v3664_v44, 1  ;;  %v3593_v58 = vpop.f32.mrf.mxu0  ;;  %v13239_v44 = vld [vmem:[%s22097_s3 + $0x64] ss:$12 sps:$4 sm:$0xff]  }
 0x280   :  { %v5527_v32 = vmax.f32 %v5511_v62, 0.0  ;;  %5113 = vmatprep.mubr.bf16.mxu0 %v22273_v63  ;;  %5186 = vmatprep.mubr.bf16.mxu1 %v22273_v63  ;;  %v17926_v10 = vadd.f32 %v3735_v29, %v17691_v30  ;;  %v3666_v62 = vpop.f32.mrf.mxu1  ;;  %v5513_v20 = vadd.f32 %v17870_v17, %v5485_v48  ;;  %v3737_v51 = vrot.slane %v3593_v58, 1  ;;  %v13233_v30 = vld [vmem:[%s22097_s3 + $0x78] ss:$12 sps:$4 sm:$0xff]   ;;  %v13236_v29 = vld [vmem:[%s22097_s3 + $0x80] ss:$12 sps:$4 sm:$0xff]  }
 0x281   :  { %v5482_v13 = vmax.f32 %v22504_v31, %v5450_v3  ;;  %v3739_v61 = vrot.slane %v3666_v62, 1  ;;  %v5408_v27 = vpop.permute.xlu1 %5407  ;;  %v17938_v3 = vadd.f32 %v3734_v42, %v17702_v11  ;;  %v17941_v38 = vadd.f32 %v3736_v43, %v17705_v0  ;;  %v14093_v62 = vld [vmem:[%s22096_s0 + $0x68] sm:$0xff]  }
 0x282   :  { %5728 = vst.msk [vmem:[#allocation2 + $0x8] sm:$0x7f] %vm5727_vm2, %v5527_v32  ;;  %6103 = vmatpush1.bf16.msra.mxu0 %v13229_v5  ;;  %6176 = vmatpush1.bf16.msra.mxu1 %v13232_v39  ;;  %v5416_v25 = vpop.permute.xlu0 %5415  ;;  %v5452_v58 = vsel %vm5449_vm1, %v5408_v27, %v5410_v21  ;;  %v3595_v5 = vpop.f32.mrf.mxu0  ;;  %v5529_v32 = vmax.f32 %v5513_v20, 0.0  ;;  %v17949_v31 = vadd.f32 %v3737_v51, %v17714_v36  ;;  %v13237_v20 = vld [vmem:[%s22097_s3 + $0x60] ss:$12 sps:$4 sm:$0xff]  }
 0x283   :  { %v5510_v24 = vadd.f32 %v17895_v50, %v5482_v13  ;;  %v3668_v39 = vpop.f32.mrf.mxu1  ;;  %6104 = vmatprep.subr.bf16.mxu0 %v13235_v47  ;;  %6177 = vmatprep.subr.bf16.mxu1 %v22273_v63  ;;  %v17952_v11 = vadd.f32 %v3739_v61, %v17717_v54  ;;  %v22505_v0 = vmax.f32 %v22454_v18, %v17046_v15  ;;  %v3738_v13 = vrot.slane %v3595_v5, 1  ;;  %v13243_v5 = vld [vmem:[%s22097_s3 + $0x4c] ss:$12 sps:$4 sm:$0xff]  }
 0x284   :  { %v3740_v47 = vrot.slane %v3668_v39, 1  ;;  %v3599_v42 = vpop.f32.mrf.mxu0  ;;  %5733 = vst.msk [vmem:[#allocation2 + $0x18] sm:$0x7f] %vm5727_vm2, %v5529_v32 }
 0x285   :  { %v5526_v48 = vmax.f32 %v5510_v24, 0.0  ;;  %v5484_v21 = vmax.f32 %v22505_v0, %v5452_v58  ;;  %v3672_v43 = vpop.f32.mrf.mxu1  ;;  %12085 = vmatmul.mubr.msk.bf16.gmra.mxu0 %vm34_vm0, %v14093_v62  ;;  %12089 = vmatmul.mubr.msk.bf16.gmra.mxu1 %vm34_vm0, %v14093_v62  ;;  %v3741_v36 = vrot.slane %v3599_v42, 1  ;;  %v5418_v15 = vpop.permute.xlu1 %5417  ;;  %v13240_v24 = vld [vmem:[%s22097_s3 + $0x68] ss:$12 sps:$4 sm:$0xff]   ;;  %v17971_v61 = vadd.f32 %v3738_v13, %v17726_v40 }
 0x286   :  { %v3743_v54 = vrot.slane %v3672_v43, 1  ;;  %6105 = vmatpush1.bf16.msra.mxu0 %v13233_v30  ;;  %6178 = vmatpush1.bf16.msra.mxu1 %v13236_v29  ;;  %v5414_v18 = vpop.permute.xlu0 %5413  ;;  %v17974_v27 = vadd.f32 %v3740_v47, %v17729_v53  ;;  %v5455_v30 = vsel %vm5449_vm1, %v5416_v25, %v5418_v15  ;;  %v3601_v29 = vpop.f32.mrf.mxu0 }
 0x287   :  { %5726 = vst [vmem:[#allocation2] sm:$0x7f] %v5526_v48  ;;  %v5512_v51 = vadd.f32 %v17895_v50, %v5484_v21  ;;  %v3674_v58 = vpop.f32.mrf.mxu1  ;;  %6106 = vmatprep.subr.bf16.mxu0 %v13239_v44  ;;  %v17981_v39 = vadd.f32 %v3741_v36, %v17741_v16  ;;  %v5487_v40 = vmax.f32 %v17125_v37, %v5455_v30  ;;  %v3742_v21 = vrot.slane %v3601_v29, 1 }
 0x288   :  { %v17984_v32 = vadd.f32 %v3743_v54, %v17744_v6  ;;  %v5454_v53 = vsel %vm5449_vm1, %v5414_v18, %v5416_v25  ;;  %6179 = vmatprep.subr.bf16.mxu1 %v22273_v63  ;;  %v22506_v44 = vmax.f32 %v22458_v19, %v17073_v22  ;;  %v3744_v13 = vrot.slane %v3674_v58, 1  ;;  %v3603_v47 = vpop.f32.mrf.mxu0  ;;  %5123 = vmatprep.mubr.bf16.mxu0 %v22273_v63  ;;  %v13241_v22 = vld [vmem:[%s22097_s3 + $0x48] ss:$12 sps:$4 sm:$0xff]   ;;  %v13244_v19 = vld [vmem:[%s22097_s3 + $0x50] ss:$12 sps:$4 sm:$0xff]  }
 0x289   :  { %v5528_v48 = vmax.f32 %v5512_v51, 0.0  ;;  %v3676_v42 = vpop.f32.mrf.mxu1  ;;  %5196 = vmatprep.mubr.bf16.mxu1 %v22273_v63  ;;  %v5515_v16 = vadd.f32 %v17870_v17, %v5487_v40  ;;  %v3745_v37 = vrot.slane %v3603_v47, 1  ;;  %v5424_v25 = vpop.permute.xlu1 %5423  ;;  %v18003_v36 = vadd.f32 %v3742_v21, %v17757_v14  ;;  %v13245_v21 = vld [vmem:[%s22097_s3 + $0x30] ss:$12 sps:$4 sm:$0xff]  }
 0x28a   :  { %v5486_v0 = vmax.f32 %v22506_v44, %v5454_v53  ;;  %v3747_v6 = vrot.slane %v3676_v42, 1  ;;  %6107 = vmatpush1.bf16.msra.mxu0 %v13237_v20  ;;  %6180 = vmatpush1.bf16.msra.mxu1 %v13240_v24  ;;  %v5422_v43 = vpop.permute.xlu0 %5421  ;;  %v18006_v54 = vadd.f32 %v3744_v13, %v17760_v2  ;;  %v3605_v18 = vpop.f32.mrf.mxu0  ;;  %v13247_v24 = vld [vmem:[%s22097_s3 + $0x34] ss:$12 sps:$4 sm:$0xff]   ;;  %v13248_v13 = vld [vmem:[%s22097_s3 + $0x38] ss:$12 sps:$4 sm:$0xff]  }
 0x28b   :  { %5732 = vst [vmem:[#allocation2 + $0x10] sm:$0x7f] %v5528_v48  ;;  %v5457_v15 = vsel %vm5449_vm1, %v5422_v43, %v5424_v25  ;;  %v3678_v20 = vpop.f32.mrf.mxu1  ;;  %6108 = vmatprep.subr.bf16.mxu0 %v13243_v5  ;;  %v5531_v51 = vmax.f32 %v5515_v16, 0.0  ;;  %v18013_v30 = vadd.f32 %v3745_v37, %v17766_v45  ;;  %6181 = vmatprep.subr.bf16.mxu1 %v22273_v63  ;;  %v3746_v58 = vrot.slane %v3605_v18, 1  ;;  %v14094_v48 = vld [vmem:[%s22096_s0 + $0x70] sm:$0xff]  }
 0x28c   :  { %v5514_v62 = vadd.f32 %v17895_v50, %v5486_v0  ;;  %v18016_v29 = vadd.f32 %v3747_v6, %v17769_v9  ;;  %v5489_v14 = vmax.f32 %v17164_v46, %v5457_v15  ;;  %v3748_v40 = vrot.slane %v3678_v20, 1  ;;  %v3609_v53 = vpop.f32.mrf.mxu0  ;;  %v13251_v25 = vld [vmem:[%s22097_s3 + $0x1c] ss:$12 sps:$4 sm:$0xff]  }
 0x28d   :  { %v3682_v5 = vpop.f32.mrf.mxu1  ;;  %12086 = vmatmul.mubr.msk.bf16.gmra.mxu0 %vm34_vm0, %v14094_v48  ;;  %12090 = vmatmul.mubr.msk.bf16.gmra.mxu1 %vm34_vm0, %v14094_v48  ;;  %5737 = vst.msk [vmem:[#allocation2 + $0x28] sm:$0x7f] %vm5727_vm2, %v5531_v51  ;;  %v3749_v46 = vrot.slane %v3609_v53, 1  ;;  %v5420_v0 = vpop.permute.xlu1 %5419  ;;  %v18034_v47 = vadd.f32 %v3746_v58, %v17781_v33 }
 0x28e   :  { %v5530_v2 = vmax.f32 %v5514_v62, 0.0  ;;  %v5517_v45 = vadd.f32 %v17870_v17, %v5489_v14  ;;  %v3751_v9 = vrot.slane %v3682_v5, 1  ;;  %6109 = vmatpush1.bf16.msra.mxu0 %v13241_v22  ;;  %6182 = vmatpush1.bf16.msra.mxu1 %v13244_v19  ;;  %v5428_v44 = vpop.permute.xlu0 %5427  ;;  %v18037_v42 = vadd.f32 %v3748_v40, %v17784_v4  ;;  %v3611_v37 = vpop.f32.mrf.mxu0 }
 0x28f   :  { %v5456_v16 = vsel %vm5449_vm1, %v5420_v0, %v5422_v43  ;;  %v3684_v6 = vpop.f32.mrf.mxu1  ;;  %6110 = vmatprep.subr.bf16.mxu0 %v13247_v24  ;;  %6183 = vmatprep.subr.bf16.mxu1 %v22273_v63  ;;  %v18045_v19 = vadd.f32 %v3749_v46, %v17794_v12  ;;  %v22507_v4 = vmax.f32 %v22462_v8, %v17106_v26  ;;  %v3750_v62 = vrot.slane %v3611_v37, 1  ;;  %v13249_v12 = vld [vmem:[%s22097_s3 + $0x18] ss:$12 sps:$4 sm:$0xff]  }
 0x290   :  { %5736 = vst [vmem:[#allocation2 + $0x20] sm:$0x7f] %v5530_v2  ;;  %v5533_v22 = vmax.f32 %v5517_v45, 0.0  ;;  %v18048_v33 = vadd.f32 %v3751_v9, %v17797_v23  ;;  %5133 = vmatprep.mubr.bf16.mxu0 %v22273_v63  ;;  %5206 = vmatprep.mubr.bf16.mxu1 %v22273_v63  ;;  %v3752_v15 = vrot.slane %v3684_v6, 1  ;;  %v3613_v18 = vpop.f32.mrf.mxu0  ;;  %v5763_v24 = vld [vmem:[#allocation2 + $0x18] sm:$0xff]  ;;  %v5761_v45 = vld [vmem:[#allocation2 + $0x8] sm:$0xff] }
 0x291   :  { %v5488_v43 = vmax.f32 %v22507_v4, %v5456_v16  ;;  %v3686_v20 = vpop.f32.mrf.mxu1  ;;  %v3753_v51 = vrot.slane %v3613_v18, 1  ;;  %v13252_v2 = vld [vmem:[%s22097_s3 + $0x20] ss:$12 sps:$4 sm:$0xff]   ;;  %v18064_v58 = vadd.f32 %v3750_v62, %v17815_v59  ;;  %v13255_v59 = vld [vmem:[%s22097_s3 + $0x4] ss:$12 sps:$4 sm:$0xff]  }
 0x292   :  { %5741 = vst.msk [vmem:[#allocation2 + $0x38] sm:$0x7f] %vm5727_vm2, %v5533_v22  ;;  %v3755_v26 = vrot.slane %v3686_v20, 1  ;;  %6111 = vmatpush1.bf16.msra.mxu0 %v13245_v21  ;;  %6184 = vmatpush1.bf16.msra.mxu1 %v13248_v13  ;;  %v5430_v8 = vpop.permute.xlu1 %5429  ;;  %v5426_v14 = vpop.permute.xlu0 %5425  ;;  %v18067_v40 = vadd.f32 %v3752_v15, %v17818_v34  ;;  %v18081_v34 = vpack.c.bf16 %v5763_v24, %v5761_v45  ;;  %v13253_v18 = vld [vmem:[%s22097_s3] ss:$12 sps:$4 sm:$0xff]  }
 0x293   :  { %v5516_v23 = vadd.f32 %v17895_v50, %v5488_v43  ;;  %v5459_v53 = vsel %vm5449_vm1, %v5428_v44, %v5430_v8  ;;  %v3615_v5 = vpop.f32.mrf.mxu0  ;;  %v3688_v48 = vpop.f32.mrf.mxu1  ;;  %6112 = vmatprep.subr.bf16.mxu0 %v13251_v25  ;;  %v18071_v9 = vadd.f32 %v3753_v51, %v17823_v7  ;;  %6185 = vmatprep.subr.bf16.mxu1 %v22273_v63  ;;  %v22509_v25 = vld [vmem:[#allocation40_spill] sm:$0xff] }
 0x294   :  { %v18074_v0 = vadd.f32 %v3755_v26, %v17826_v35  ;;  %v5491_v21 = vmax.f32 %v17204_v41, %v5459_v53  ;;  %22508 = vst [vmem:[#allocation59_spill] sm:$0xff] %v18081_v34  ;;  %v5458_v13 = vsel %vm5449_vm1, %v5426_v14, %v5428_v44  ;;  %v3754_v16 = vrot.slane %v3615_v5, 1  ;;  %v14095_v35 = vld [vmem:[%s22096_s0 + $0x78] sm:$0xff]   ;;  %v13256_v20 = vld [vmem:[%s22097_s3 + $0x8] ss:$12 sps:$4 sm:$0xff]   ;;  %v22515_v5 = vld [vmem:[#allocation43_spill] sm:$0xff] }
 0x295   :  { %v5532_v46 = vmax.f32 %v5516_v23, 0.0  ;;  %v3756_v37 = vrot.slane %v3688_v48, 1  ;;  %v3619_v6 = vpop.f32.mrf.mxu0  ;;  %v3692_v7 = vpop.f32.mrf.mxu1  ;;  %12087 = vmatmul.mubr.msk.bf16.gmra.mxu0 %vm34_vm0, %v14095_v35  ;;  %12091 = vmatmul.mubr.msk.bf16.gmra.mxu1 %vm34_vm0, %v14095_v35  ;;  %v22510_v22 = vmax.f32 %v22467_v28, %v22509_v25  ;;  %v13259_v26 = vld [vmem:[%s22097_s3 + $0x13c] ss:$12 sps:$4 sm:$0xff]  }
 0x296   :  { %v5519_v41 = vadd.f32 %v17870_v17, %v5491_v21  ;;  %v3757_v44 = vrot.slane %v3619_v6, 1  ;;  %v3759_v43 = vrot.slane %v3692_v7, 1  ;;  %6113 = vmatpush1.bf16.msra.mxu0 %v13249_v12  ;;  %6186 = vmatpush1.bf16.msra.mxu1 %v13252_v2  ;;  %v5436_v62 = vpop.permute.xlu1 %5435  ;;  %v5434_v15 = vpop.permute.xlu0 %5433  ;;  %v18100_v24 = vadd.f32 %v3754_v16, %v17836_v57  ;;  %v22513_v14 = vld [vmem:[#allocation50_spill] sm:$0xff]  ;;  %v22514_v2 = vld [vmem:[#allocation51_spill] sm:$0xff] }
 0x297   :  { %5740 = vst [vmem:[#allocation2 + $0x30] sm:$0x7f] %v5532_v46  ;;  %v5490_v4 = vmax.f32 %v22510_v22, %v5458_v13  ;;  %v18103_v28 = vadd.f32 %v3756_v37, %v17839_v52  ;;  %12138 = vmatprep.mubr.msk.bf16.mxu1 %vm34_vm0, %v18081_v34  ;;  %v5461_v12 = vsel %vm5449_vm1, %v5434_v15, %v5436_v62  ;;  %v3621_v23 = vpop.f32.mrf.mxu0  ;;  %v3694_v51 = vpop.f32.mrf.mxu1  ;;  %v13257_v16 = vld [vmem:[%s22097_s3 + $0x138] ss:$12 sps:$4 sm:$0xff]   ;;  %v22516_v22 = vld [vmem:[#allocation52_spill] sm:$0xff] }
 0x298   :  { %22511 = vst [vmem:[#allocation60_spill] sm:$0xff] %v18100_v24  ;;  %12134 = vmatprep.mubr.msk.bf16.mxu0 %vm34_vm0, %v18081_v34  ;;  %v5535_v8 = vmax.f32 %v5519_v41, 0.0  ;;  %v18115_v52 = vadd.f32 %v3757_v44, %v22513_v14  ;;  %v18118_v53 = vadd.f32 %v3759_v43, %v22514_v2  ;;  %6114 = vmatprep.subr.bf16.mxu0 %v13255_v59  ;;  %v3758_v45 = vrot.slane %v3621_v23, 1  ;;  %v13260_v41 = vld [vmem:[%s22097_s3 + $0x140] ss:$12 sps:$4 sm:$0xff]   ;;  %v22517_v44 = vld [vmem:[#allocation54_spill] sm:$0xff] }
 0x299   :  { %22512 = vst [vmem:[#allocation61_spill] sm:$0xff] %v18103_v28  ;;  %v5518_v57 = vadd.f32 %v17895_v50, %v5490_v4  ;;  %6187 = vmatprep.subr.bf16.mxu1 %v22273_v63  ;;  %v5493_v48 = vmax.f32 %v22515_v5, %v5461_v12  ;;  %v3760_v46 = vrot.slane %v3694_v51, 1  ;;  %v3623_v21 = vpop.f32.mrf.mxu0  ;;  %v3696_v13 = vpop.f32.mrf.mxu1 }
 0x29a   :  { %5745 = vst.msk [vmem:[#allocation2 + $0x48] sm:$0x7f] %vm5727_vm2, %v5535_v8  ;;  %v3761_v6 = vrot.slane %v3623_v21, 1  ;;  %v3763_v7 = vrot.slane %v3696_v13, 1  ;;  %6115 = vmatpush1.bf16.msra.mxu0 %v13253_v18  ;;  %6188 = vmatpush1.bf16.msra.mxu1 %v13256_v20  ;;  %v5440_v59 = vpop.permute.xlu0 %5439  ;;  %v5432_v35 = vpop.permute.xlu1 %5431  ;;  %v18131_v4 = vadd.f32 %v3758_v45, %v22516_v22  ;;  %v13263_v18 = vld [vmem:[%s22097_s3 + $0x124] ss:$12 sps:$4 sm:$0xff]  }
 0x29b   :  { %v5534_v37 = vmax.f32 %v5518_v57, 0.0  ;;  %v5521_v25 = vadd.f32 %v17870_v17, %v5493_v48  ;;  %v18134_v43 = vadd.f32 %v3760_v46, %v22517_v44  ;;  %v5460_v62 = vsel %vm5449_vm1, %v5432_v35, %v5434_v15  ;;  %v3625_v12 = vpop.f32.mrf.mxu0  ;;  %v3698_v23 = vpop.f32.mrf.mxu1  ;;  %6120 = vmatprep.subr.bf16.mxu0 %v13259_v26  ;;  %v22518_v8 = vld [vmem:[#allocation22_spill] sm:$0xff]  ;;  %v22519_v57 = vld [vmem:[#allocation41_spill] sm:$0xff]  ;;  %6193 = vmatprep.subr.bf16.mxu1 %v22273_v63 }
 0x29c   :  { %v18141_v20 = vadd.f32 %v3761_v6, %v17879_v49  ;;  %v18144_v51 = vadd.f32 %v3763_v7, %v17886_v60  ;;  %v22520_v14 = vmax.f32 %v22518_v8, %v22519_v57  ;;  %v3762_v5 = vrot.slane %v3625_v12, 1  ;;  %v13264_v6 = vld [vmem:[%s22097_s3 + $0x128] ss:$12 sps:$4 sm:$0xff]   ;;  %v13267_v22 = vld [vmem:[%s22097_s3 + $0x10c] ss:$12 sps:$4 sm:$0xff]  }
 0x29d   :  { %5744 = vst [vmem:[#allocation2 + $0x40] sm:$0x7f] %v5534_v37  ;;  %v5537_v15 = vmax.f32 %v5521_v25, 0.0  ;;  %v3764_v26 = vrot.slane %v3698_v23, 1  ;;  %v3863_v48 = vpop.f32.mrf.mxu0  ;;  %v3936_v45 = vpop.f32.mrf.mxu1  ;;  %v13261_v37 = vld [vmem:[%s22097_s3 + $0x120] ss:$12 sps:$4 sm:$0xff]  }
 0x29e   :  { %v5492_v2 = vmax.f32 %v22520_v14, %v5460_v62  ;;  %v18152_v21 = vadd.f32 %v3762_v5, %v17899_v56  ;;  %v4007_v49 = vrot.slane %v3863_v48, 1  ;;  %6121 = vmatpush2.bf16.msra.mxu0 %v13257_v16  ;;  %6194 = vmatpush2.bf16.msra.mxu1 %v13260_v41  ;;  %v5442_v60 = vpop.permute.xlu1 %5441  ;;  %v5438_v13 = vpop.permute.xlu0 %5437  ;;  %v4009_v56 = vrot.slane %v3936_v45, 1  ;;  %v22525_v23 = vld [vmem:[#allocation26_spill] sm:$0xff] }
 0x29f   :  { %5749 = vst.msk [vmem:[#allocation2 + $0x58] sm:$0x7f] %vm5727_vm2, %v5537_v15  ;;  %v18162_v7 = vadd.f32 %v3764_v26, %v17902_v55  ;;  %v5463_v35 = vsel %vm5449_vm1, %v5440_v59, %v5442_v60  ;;  %v5462_v16 = vsel %vm5449_vm1, %v5438_v13, %v5440_v59  ;;  %v3865_v41 = vpop.f32.mrf.mxu0  ;;  %v3938_v25 = vpop.f32.mrf.mxu1  ;;  %6122 = vmatprep.subr.bf16.mxu0 %v13263_v18  ;;  %v22524_v55 = vld [vmem:[#allocation45_spill] sm:$0xff]  ;;  %v22526_v8 = vld [vmem:[#allocation42_spill] sm:$0xff] }
 0x2a0   :  { %v5520_v46 = vadd.f32 %v17895_v50, %v5492_v2  ;;  %22521 = vst [vmem:[#allocation62_spill] sm:$0xff] %v18152_v21  ;;  %6195 = vmatprep.subr.bf16.mxu1 %v22273_v63  ;;  %v18171_v62 = vadd.f32 %v4007_v49, %v17917_v1  ;;  %v5495_v12 = vmax.f32 %v22524_v55, %v5463_v35  ;;  %v4008_v18 = vrot.slane %v3865_v41, 1  ;;  %v13268_v60 = vld [vmem:[%s22097_s3 + $0x110] ss:$12 sps:$4 sm:$0xff]  }
 0x2a1   :  { %22522 = vst [vmem:[#allocation63_spill] sm:$0xff] %v18162_v7  ;;  %v22527_v57 = vmax.f32 %v22525_v23, %v22526_v8  ;;  %v18178_v59 = vadd.f32 %v4009_v56, %v17926_v10  ;;  %v4010_v2 = vrot.slane %v3938_v25, 1  ;;  %v3867_v5 = vpop.f32.mrf.mxu0  ;;  %v3940_v15 = vpop.f32.mrf.mxu1  ;;  %v13265_v10 = vld [vmem:[%s22097_s3 + $0x108] ss:$12 sps:$4 sm:$0xff]  }
 0x2a2   :  { %v5536_v44 = vmax.f32 %v5520_v46, 0.0  ;;  %22523 = vst [vmem:[#allocation64_spill] sm:$0xff] %v18171_v62  ;;  %v5523_v26 = vadd.f32 %v17870_v17, %v5495_v12  ;;  %v4011_v1 = vrot.slane %v3867_v5, 1  ;;  %v4013_v45 = vrot.slane %v3940_v15, 1  ;;  %6123 = vmatpush2.bf16.msra.mxu0 %v13261_v37  ;;  %6196 = vmatpush2.bf16.msra.mxu1 %v13264_v6  ;;  %v5448_v46 = vpop.permute.xlu1 %5447  ;;  %v5446_v49 = vpop.permute.xlu0 %5445  ;;  %v13275_v5 = vld [vmem:[%s22097_s3 + $0xdc] ss:$12 sps:$4 sm:$0xff]  }
 0x2a3   :  { %v5494_v14 = vmax.f32 %v22527_v57, %v5462_v16  ;;  %22528 = vst [vmem:[#allocation65_spill] sm:$0xff] %v18178_v59  ;;  %v18189_v13 = vadd.f32 %v4008_v18, %v17938_v3  ;;  %v18192_v56 = vadd.f32 %v4010_v2, %v17941_v38  ;;  %v5465_v35 = vsel %vm5449_vm1, %v5446_v49, %v5448_v46  ;;  %v18195_v37 = vpop.f32.mrf.mxu0  ;;  %v18197_v6 = vpop.f32.mrf.mxu1  ;;  %v13271_v16 = vld [vmem:[%s22097_s3 + $0xf4] ss:$12 sps:$4 sm:$0xff]  }
 0x2a4   :  { %5748 = vst [vmem:[#allocation2 + $0x50] sm:$0x7f] %v5536_v44  ;;  %6124 = vmatprep.subr.bf16.mxu0 %v13267_v22  ;;  %6197 = vmatprep.subr.bf16.mxu1 %v22273_v63  ;;  %v5539_v41 = vmax.f32 %v5523_v26, 0.0  ;;  %v18204_v3 = vadd.f32 %v4011_v1, %v17949_v31  ;;  %v18207_v38 = vadd.f32 %v4013_v45, %v17952_v11  ;;  %v22533_v44 = vld [vmem:[#allocation46_spill] sm:$0xff]  ;;  %v22536_v46 = vld [vmem:[#allocation57_spill] sm:$0xff] }
 0x2a5   :  { %v5522_v48 = vadd.f32 %v17895_v50, %v5494_v14  ;;  %22529 = vst [vmem:[#allocation67_spill] sm:$0xff] %v18189_v13  ;;  %22530 = vst [vmem:[#allocation68_spill] sm:$0xff] %v18192_v56  ;;  %v5497_v55 = vmax.f32 %v22533_v44, %v5465_v35  ;;  %v3873_v12 = vpop.f32.mrf.mxu0  ;;  %v3946_v23 = vpop.f32.mrf.mxu1  ;;  %v13269_v31 = vld [vmem:[%s22097_s3 + $0xf0] ss:$12 sps:$4 sm:$0xff]   ;;  %v13272_v11 = vld [vmem:[%s22097_s3 + $0xf8] ss:$12 sps:$4 sm:$0xff]  }
 0x2a6   :  { %22531 = vst [vmem:[#allocation69_spill] sm:$0xff] %v18204_v3  ;;  %22532 = vst [vmem:[#allocation70_spill] sm:$0xff] %v18207_v38  ;;  %v4015_v22 = vrot.slane %v3873_v12, 1  ;;  %v4017_v8 = vrot.slane %v3946_v23, 1  ;;  %6125 = vmatpush2.bf16.msra.mxu0 %v13265_v10  ;;  %6198 = vmatpush2.bf16.msra.mxu1 %v13268_v60  ;;  %v5444_v57 = vpop.permute.xlu1 %5443  ;;  %v22537_v10 = vld [vmem:[#allocation44_spill] sm:$0xff] }
 0x2a7   :  { %v5538_v25 = vmax.f32 %v5522_v48, 0.0  ;;  %5753 = vst.msk [vmem:[#allocation2 + $0x68] sm:$0x7f] %vm5727_vm2, %v5539_v41  ;;  %v5525_v14 = vadd.f32 %v17870_v17, %v5497_v55  ;;  %v3875_v18 = vpop.f32.mrf.mxu0  ;;  %v3948_v2 = vpop.f32.mrf.mxu1  ;;  %6126 = vmatprep.subr.bf16.mxu0 %v13271_v16  ;;  %v5464_v48 = vsel %vm5449_vm1, %v5444_v57, %v5446_v49  ;;  %6199 = vmatprep.subr.bf16.mxu1 %v22273_v63  ;;  %v13276_v49 = vld [vmem:[%s22097_s3 + $0xe0] ss:$12 sps:$4 sm:$0xff]  }
 0x2a8   :  { %v18222_v15 = vadd.f32 %v4015_v22, %v17981_v39  ;;  %v18225_v26 = vadd.f32 %v4017_v8, %v17984_v32  ;;  %v4016_v1 = vrot.slane %v3875_v18, 1  ;;  %v22538_v60 = vmax.f32 %v22536_v46, %v22537_v10  ;;  %v13273_v32 = vld [vmem:[%s22097_s3 + $0xd8] ss:$12 sps:$4 sm:$0xff]  }
 0x2a9   :  { %5752 = vst [vmem:[#allocation2 + $0x60] sm:$0x7f] %v5538_v25  ;;  %v5541_v45 = vmax.f32 %v5525_v14, 0.0  ;;  %v4018_v16 = vrot.slane %v3948_v2, 1  ;;  %v3877_v41 = vpop.f32.mrf.mxu0  ;;  %v3950_v25 = vpop.f32.mrf.mxu1  ;;  %v13279_v8 = vld [vmem:[%s22097_s3 + $0xc4] ss:$12 sps:$4 sm:$0xff]  }
 0x2aa   :  { %22534 = vst [vmem:[#allocation71_spill] sm:$0xff] %v18222_v15  ;;  %22535 = vst [vmem:[#allocation72_spill] sm:$0xff] %v18225_v26  ;;  %v5496_v35 = vmax.f32 %v22538_v60, %v5464_v48  ;;  %v18233_v44 = vadd.f32 %v4016_v1, %v18003_v36  ;;  %v4019_v39 = vrot.slane %v3877_v41, 1  ;;  %v4021_v55 = vrot.slane %v3950_v25, 1  ;;  %6127 = vmatpush2.bf16.msra.mxu0 %v13269_v31  ;;  %v13280_v48 = vld [vmem:[%s22097_s3 + $0xc8] ss:$12 sps:$4 sm:$0xff]  }
 0x2ab   :  { %6200 = vmatpush2.bf16.msra.mxu1 %v13272_v11  ;;  %5757 = vst.msk [vmem:[#allocation2 + $0x78] sm:$0x7f] %vm5727_vm2, %v5541_v45  ;;  %v18244_v23 = vadd.f32 %v4018_v16, %v18006_v54  ;;  %v18246_v36 = vpop.f32.mrf.mxu0  ;;  %v18248_v22 = vpop.f32.mrf.mxu1  ;;  %6128 = vmatprep.subr.bf16.mxu0 %v13275_v5  ;;  %v13277_v5 = vld [vmem:[%s22097_s3 + $0xc0] ss:$12 sps:$4 sm:$0xff]  }
 0x2ac   :  { %22539 = vst [vmem:[#allocation73_spill] sm:$0xff] %v18233_v44  ;;  %v5524_v12 = vadd.f32 %v17895_v50, %v5496_v35  ;;  %6201 = vmatprep.subr.bf16.mxu1 %v22273_v63  ;;  %v18255_v57 = vadd.f32 %v4019_v39, %v18013_v30  ;;  %v18258_v31 = vadd.f32 %v4021_v55, %v18016_v29  ;;  %v5762_v29 = vld [vmem:[#allocation2 + $0x10] sm:$0xff]  ;;  %v5767_v35 = vld [vmem:[#allocation2 + $0x38] sm:$0xff]  ;;  %v5760_v25 = vld [vmem:[#allocation2] sm:$0xff] }
 0x2ad   :  { %22540 = vst [vmem:[#allocation74_spill] sm:$0xff] %v18244_v23  ;;  %v3883_v54 = vpop.f32.mrf.mxu0  ;;  %v3956_v14 = vpop.f32.mrf.mxu1 }
 0x2ae   :  { %22541 = vst [vmem:[#allocation75_spill] sm:$0xff] %v18255_v57  ;;  %22542 = vst [vmem:[#allocation3_spill] sm:$0xff] %v18258_v31  ;;  %v5540_v11 = vmax.f32 %v5524_v12, 0.0  ;;  %v4023_v18 = vrot.slane %v3883_v54, 1  ;;  %v4025_v2 = vrot.slane %v3956_v14, 1  ;;  %6129 = vmatpush2.bf16.msra.mxu0 %v13273_v32 }
 0x2af   :  { %6202 = vmatpush2.bf16.msra.mxu1 %v13276_v49  ;;  %v3885_v30 = vpop.f32.mrf.mxu0  ;;  %v3958_v1 = vpop.f32.mrf.mxu1  ;;  %6130 = vmatprep.subr.bf16.mxu0 %v13279_v8 }
 0x2b0   :  { %5756 = vst [vmem:[#allocation2 + $0x70] sm:$0x7f] %v5540_v11  ;;  %6203 = vmatprep.subr.bf16.mxu1 %v22273_v63  ;;  %v18268_v45 = vadd.f32 %v4023_v18, %v18045_v19  ;;  %v18271_v46 = vadd.f32 %v4025_v2, %v18048_v33  ;;  %v4024_v10 = vrot.slane %v3885_v30, 1  ;;  %v4026_v60 = vrot.slane %v3958_v1, 1  ;;  %v5765_v33 = vld [vmem:[#allocation2 + $0x28] sm:$0xff] }
 0x2b1   :  { %v3887_v16 = vpop.f32.mrf.mxu0  ;;  %v3960_v41 = vpop.f32.mrf.mxu1  ;;  %v18279_v19 = vpack.c.bf16 %v5762_v29, %v5760_v25  ;;  %v18286_v11 = vpack.c.bf16 %v5767_v35, %v5765_v33 }
 0x2b2   :  { %22543 = vst [vmem:[#allocation4_spill] sm:$0xff] %v18268_v45  ;;  %22544 = vst [vmem:[#allocation29_spill] sm:$0xff] %v18271_v46  ;;  %v18274_v39 = vadd.f32 %v4024_v10, %v18064_v58  ;;  %v18277_v55 = vadd.f32 %v4026_v60, %v18067_v40  ;;  %v4027_v32 = vrot.slane %v3887_v16, 1  ;;  %v4029_v49 = vrot.slane %v3960_v41, 1  ;;  %6131 = vmatpush2.bf16.msra.mxu0 %v13277_v5  ;;  %v5771_v10 = vld [vmem:[#allocation2 + $0x58] sm:$0xff]  ;;  %v5764_v16 = vld [vmem:[#allocation2 + $0x20] sm:$0xff] }
 0x2b3   :  { %6204 = vmatpush2.bf16.msra.mxu1 %v13280_v48  ;;  %22547 = vst [vmem:[#allocation35_spill] sm:$0xff] %v18279_v19  ;;  %v18281_v12 = vpop.f32.mrf.mxu0  ;;  %v18283_v8 = vpop.f32.mrf.mxu1  ;;  %22549 = vst [vmem:[#allocation7_spill] sm:$0xff] %v18286_v11  ;;  %v5766_v48 = vld [vmem:[#allocation2 + $0x30] sm:$0xff] }
 0x2b4   :  { %22545 = vst [vmem:[#allocation30_spill] sm:$0xff] %v18274_v39  ;;  %22546 = vst [vmem:[#allocation6_spill] sm:$0xff] %v18277_v55  ;;  %6604 = vmatprep.subr.bf16.mxu1 %v22273_v63  ;;  %v18289_v58 = vadd.f32 %v4027_v32, %v18071_v9  ;;  %v18292_v40 = vadd.f32 %v4029_v49, %v18074_v0  ;;  %v18312_v33 = vpack.c.bf16 %v5766_v48, %v5764_v16  ;;  %v5770_v48 = vld [vmem:[#allocation2 + $0x50] sm:$0xff] }
 0x2b5   :  { %22548 = vst [vmem:[#allocation5_spill] sm:$0xff] %v18281_v12  ;;  %6133 = vmatmul.mubr.bf16.vlgmr.msra.gmra.mxu0 %v18279_v19  ;;  %v3893_v54 = vpop.f32.mrf.mxu0  ;;  %v3966_v14 = vpop.f32.mrf.mxu1 }
 0x2b6   :  { %22550 = vst [vmem:[#allocation8_spill] sm:$0xff] %v18289_v58  ;;  %22551 = vst [vmem:[#allocation10_spill] sm:$0xff] %v18292_v40  ;;  %6206 = vmatmul.mubr.bf16.vlgmr.msra.gmra.mxu1 %v18279_v19  ;;  %v4031_v18 = vrot.slane %v3893_v54, 1  ;;  %v4033_v2 = vrot.slane %v3966_v14, 1  ;;  %12135 = vmatprep.mubr.msk.bf16.mxu0 %vm34_vm0, %v18286_v11  ;;  %v5772_v19 = vld [vmem:[#allocation2 + $0x60] sm:$0xff] }
 0x2b7   :  { %12139 = vmatprep.mubr.msk.bf16.mxu1 %vm34_vm0, %v18286_v11  ;;  %v3895_v5 = vpop.f32.mrf.mxu0  ;;  %v3968_v9 = vpop.f32.mrf.mxu1  ;;  %22556 = vst [vmem:[#allocation13_spill] sm:$0xff] %v18312_v33 }
 0x2b8   :  { %v18301_v0 = vadd.f32 %v4031_v18, %v18115_v52  ;;  %v18304_v30 = vadd.f32 %v4033_v2, %v18118_v53  ;;  %v4032_v1 = vrot.slane %v3895_v5, 1  ;;  %v4034_v29 = vrot.slane %v3968_v9, 1  ;;  %v5769_v52 = vld [vmem:[#allocation2 + $0x48] sm:$0xff] }
 0x2b9   :  { %v3897_v60 = vpop.f32.mrf.mxu0  ;;  %v3970_v35 = vpop.f32.mrf.mxu1  ;;  %v18318_v14 = vpack.c.bf16 %v5771_v10, %v5769_v52 }
 0x2ba   :  { %22552 = vst [vmem:[#allocation9_spill] sm:$0xff] %v18301_v0  ;;  %22553 = vst [vmem:[#allocation11_spill] sm:$0xff] %v18304_v30  ;;  %v18307_v41 = vadd.f32 %v4032_v1, %v18131_v4  ;;  %v18310_v25 = vadd.f32 %v4034_v29, %v18134_v43  ;;  %v4035_v32 = vrot.slane %v3897_v60, 1  ;;  %v4037_v49 = vrot.slane %v3970_v35, 1  ;;  %v5773_v60 = vld [vmem:[#allocation2 + $0x68] sm:$0xff] }
 0x2bb   :  { %v18314_v54 = vpop.f32.mrf.mxu0  ;;  %v18316_v53 = vpop.f32.mrf.mxu1  ;;  %22559 = vst [vmem:[#allocation18_spill] sm:$0xff] %v18318_v14 }
 0x2bc   :  { %22554 = vst [vmem:[#allocation12_spill] sm:$0xff] %v18307_v41  ;;  %22555 = vst [vmem:[#allocation14_spill] sm:$0xff] %v18310_v25  ;;  %v18321_v18 = vadd.f32 %v4035_v32, %v18141_v20  ;;  %v18324_v4 = vadd.f32 %v4037_v49, %v18144_v51  ;;  %v5775_v20 = vld [vmem:[#allocation2 + $0x78] sm:$0xff]  ;;  %v5768_v51 = vld [vmem:[#allocation2 + $0x40] sm:$0xff] }
 0x2bd   :  { %22557 = vst [vmem:[#allocation15_spill] sm:$0xff] %v18314_v54  ;;  %22558 = vst [vmem:[#allocation16_spill] sm:$0xff] %v18316_v53  ;;  %6143 = vmatmul.mubr.bf16.gmra.mxu0 %v18312_v33  ;;  %v4137_v43 = vpop.f32.mrf.mxu0  ;;  %v4210_v2 = vpop.f32.mrf.mxu1  ;;  %v18332_v10 = vpack.c.bf16 %v5770_v48, %v5768_v51  ;;  %v18338_v32 = vpack.c.bf16 %v5775_v20, %v5773_v60 }
 0x2be   :  { %22560 = vst [vmem:[#allocation17_spill] sm:$0xff] %v18321_v18  ;;  %22561 = vst [vmem:[#allocation19_spill] sm:$0xff] %v18324_v4  ;;  %6214 = vmatmul.mubr.bf16.gmra.mxu1 %v18312_v33  ;;  %12136 = vmatprep.mubr.msk.bf16.mxu0 %vm34_vm0, %v18318_v14 }
 0x2bf   :  { %12140 = vmatprep.mubr.msk.bf16.mxu1 %vm34_vm0, %v18318_v14  ;;  %v4139_v5 = vpop.f32.mrf.mxu0  ;;  %v4212_v9 = vpop.f32.mrf.mxu1  ;;  %22562 = vst [vmem:[#allocation20_spill] sm:$0xff] %v18332_v10  ;;  %22563 = vst [vmem:[#allocation21_spill] sm:$0xff] %v18338_v32  ;;  %v5774_v14 = vld [vmem:[#allocation2 + $0x70] sm:$0xff] }
 0x2c0   :  { %v18346_v20 = vpack.c.bf16 %v5774_v14, %v5772_v19 }
 0x2c1   :  { %v4141_v1 = vpop.f32.mrf.mxu0  ;;  %v4214_v29 = vpop.f32.mrf.mxu1 }
 0x2c2   :  { %22564 = vst [vmem:[#allocation47_spill] sm:$0xff] %v18346_v20 }
 0x2c3   :  { %v18334_v35 = vpop.f32.mrf.mxu0  ;;  %v18336_v16 = vpop.f32.mrf.mxu1 }
 0x2c5   :  { %6153 = vmatmul.mubr.bf16.gmra.mxu0 %v18332_v10  ;;  %v4147_v49 = vpop.f32.mrf.mxu0  ;;  %v4220_v52 = vpop.f32.mrf.mxu1 }
 0x2c6   :  { %6222 = vmatmul.mubr.bf16.gmra.mxu1 %v18332_v10  ;;  %12137 = vmatprep.mubr.msk.bf16.mxu0 %vm34_vm0, %v18338_v32 }
 0x2c7   :  { %12141 = vmatprep.mubr.msk.bf16.mxu1 %vm34_vm0, %v18338_v32  ;;  %v4149_v48 = vpop.f32.mrf.mxu0  ;;  %v4222_v51 = vpop.f32.mrf.mxu1 }
 0x2c9   :  { %v4151_v33 = vpop.f32.mrf.mxu0  ;;  %v4224_v11 = vpop.f32.mrf.mxu1 }
 0x2cb   :  { %v18348_v60 = vpop.f32.mrf.mxu0  ;;  %v18350_v34 = vpop.f32.mrf.mxu1 }
 0x2cd   :  { %6163 = vmatmul.mubr.bf16.gmra.mxu0 %v18346_v20  ;;  %v4157_v10 = vpop.f32.mrf.mxu0  ;;  %v4230_v50 = vpop.f32.mrf.mxu1 }
 0x2ce   :  { %6230 = vmatmul.mubr.bf16.gmra.mxu1 %v18346_v20 }
 0x2cf   :  { %v18354_v17 = vpop.f32.mrf.mxu0  ;;  %v18356_v32 = vpop.f32.mrf.mxu1 }
 0x2d1   :  { %v18358_v21 = vpop.f32.mrf.mxu0  ;;  %v18360_v7 = vpop.f32.mrf.mxu1 }
 0x2d3   :  { %v18362_v19 = vpop.f32.mrf.mxu0  ;;  %v18364_v14 = vpop.f32.mrf.mxu1 }
 0x2d4   :  { %22565 = vst [vmem:[#allocation34_spill] sm:$0xff] %v18362_v19 }
 0x2d5   :  { %v18366_v54 = vpop.f32.mrf.mxu0  ;;  %v18368_v53 = vpop.f32.mrf.mxu1 }
 0x2d7   :  { %v18370_v24 = vpop.f32.mrf.mxu0  ;;  %v18372_v20 = vpop.f32.mrf.mxu1 }
 0x2d9   :  { %v18374_v4 = vpop.f32.mrf.mxu0  ;;  %v18376_v18 = vpop.f32.mrf.mxu1 }
 0x2db   :  { %v18378_v28 = vpop.f32.mrf.mxu0  ;;  %v18380_v41 = vpop.f32.mrf.mxu1 }
 0x2dc   :  { %22566 = vst [vmem:[#allocation36_spill] sm:$0xff] %v18378_v28  ;;  %22567 = vst [vmem:[#allocation23_spill] sm:$0xff] %v18380_v41 }
 0x2dd   :  { %v4283_v12 = vpop.f32.mrf.mxu0  ;;  %v4356_v25 = vpop.f32.mrf.mxu1 }
 0x2de   :  { %v4427_v30 = vrot.slane %v4283_v12, 1  ;;  %v4429_v0 = vrot.slane %v4356_v25, 1 }
 0x2df   :  { %v4285_v19 = vpop.f32.mrf.mxu0  ;;  %v4358_v40 = vpop.f32.mrf.mxu1 }
 0x2e0   :  { %v18382_v58 = vadd.f32 %v4427_v30, %v4137_v43  ;;  %v18384_v39 = vadd.f32 %v4429_v0, %v4210_v2  ;;  %v4428_v55 = vrot.slane %v4285_v19, 1  ;;  %v4430_v46 = vrot.slane %v4358_v40, 1 }
 0x2e1   :  { %v4287_v45 = vpop.f32.mrf.mxu0  ;;  %v4360_v31 = vpop.f32.mrf.mxu1 }
 0x2e2   :  { %v18386_v57 = vadd.f32 %v4428_v55, %v4139_v5  ;;  %v18388_v44 = vadd.f32 %v4430_v46, %v4212_v9  ;;  %v4431_v28 = vrot.slane %v4287_v45, 1  ;;  %v4433_v41 = vrot.slane %v4360_v31, 1 }
 0x2e3   :  { %v18390_v23 = vpop.f32.mrf.mxu0  ;;  %v18392_v12 = vpop.f32.mrf.mxu1 }
 0x2e4   :  { %v18394_v25 = vadd.f32 %v4431_v28, %v4141_v1  ;;  %v18396_v30 = vadd.f32 %v4433_v41, %v4214_v29 }
 0x2e5   :  { %v4293_v0 = vpop.f32.mrf.mxu0  ;;  %v4366_v43 = vpop.f32.mrf.mxu1 }
 0x2e6   :  { %22568 = vst [vmem:[#allocation39_spill] sm:$0xff] %v18396_v30  ;;  %v4435_v2 = vrot.slane %v4293_v0, 1  ;;  %v4437_v40 = vrot.slane %v4366_v43, 1 }
 0x2e7   :  { %v4295_v19 = vpop.f32.mrf.mxu0  ;;  %v4368_v26 = vpop.f32.mrf.mxu1 }
 0x2e8   :  { %v18398_v55 = vadd.f32 %v4435_v2, %v4147_v49  ;;  %v18400_v46 = vadd.f32 %v4437_v40, %v4220_v52  ;;  %v4436_v45 = vrot.slane %v4295_v19, 1  ;;  %v4438_v31 = vrot.slane %v4368_v26, 1 }
 0x2e9   :  { %v4297_v5 = vpop.f32.mrf.mxu0  ;;  %v4370_v9 = vpop.f32.mrf.mxu1 }
 0x2ea   :  { %v18402_v15 = vadd.f32 %v4436_v45, %v4149_v48  ;;  %v18404_v28 = vadd.f32 %v4438_v31, %v4222_v51  ;;  %v4439_v41 = vrot.slane %v4297_v5, 1  ;;  %v4441_v1 = vrot.slane %v4370_v9, 1 }
 0x2eb   :  { %v18406_v29 = vpop.f32.mrf.mxu0  ;;  %v18408_v0 = vpop.f32.mrf.mxu1 }
 0x2ec   :  { %22569 = vst [vmem:[#allocation25_spill] sm:$0xff] %v18402_v15  ;;  %v18410_v43 = vadd.f32 %v4439_v41, %v4151_v33  ;;  %v18412_v49 = vadd.f32 %v4441_v1, %v4224_v11 }
 0x2ed   :  { %v4303_v52 = vpop.f32.mrf.mxu0  ;;  %v4376_v2 = vpop.f32.mrf.mxu1 }
 0x2ee   :  { %v4443_v40 = vrot.slane %v4303_v52, 1  ;;  %v4445_v26 = vrot.slane %v4376_v2, 1 }
 0x2ef   :  { %v4305_v19 = vpop.f32.mrf.mxu0  ;;  %v4378_v38 = vpop.f32.mrf.mxu1 }
 0x2f0   :  { %v18414_v48 = vadd.f32 %v4443_v40, %v4157_v10  ;;  %v18416_v51 = vadd.f32 %v4445_v26, %v4230_v50  ;;  %v4444_v45 = vrot.slane %v4305_v19, 1  ;;  %v4446_v31 = vrot.slane %v4378_v38, 1 }
 0x2f1   :  { %v4307_v5 = vpop.f32.mrf.mxu0  ;;  %v4380_v9 = vpop.f32.mrf.mxu1 }
 0x2f2   :  { %v18419_v3 = vadd.f32 %v4444_v45, %v18354_v17  ;;  %v18422_v11 = vadd.f32 %v4446_v31, %v18356_v32  ;;  %v4447_v33 = vrot.slane %v4307_v5, 1  ;;  %v4449_v41 = vrot.slane %v4380_v9, 1 }
 0x2f3   :  { %v18424_v1 = vpop.f32.mrf.mxu0  ;;  %v18426_v52 = vpop.f32.mrf.mxu1 }
 0x2f4   :  { %22570 = vst [vmem:[#allocation37_spill] sm:$0xff] %v18424_v1  ;;  %v18429_v10 = vadd.f32 %v4447_v33, %v18358_v21  ;;  %v18432_v50 = vadd.f32 %v4449_v41, %v18360_v7 }
 0x2f5   :  { %v4313_v38 = vpop.f32.mrf.mxu0  ;;  %v4386_v2 = vpop.f32.mrf.mxu1 }
 0x2f6   :  { %v4451_v40 = vrot.slane %v4313_v38, 1  ;;  %v4453_v17 = vrot.slane %v4386_v2, 1 }
 0x2f7   :  { %v4315_v26 = vpop.f32.mrf.mxu0  ;;  %v4388_v19 = vpop.f32.mrf.mxu1 }
 0x2f8   :  { %v18435_v32 = vadd.f32 %v4451_v40, %v18366_v54  ;;  %v18438_v45 = vadd.f32 %v4453_v17, %v18368_v53  ;;  %v4452_v31 = vrot.slane %v4315_v26, 1  ;;  %v4454_v5 = vrot.slane %v4388_v19, 1 }
 0x2f9   :  { %v4317_v9 = vpop.f32.mrf.mxu0  ;;  %v4390_v21 = vpop.f32.mrf.mxu1 }
 0x2fa   :  { %v18441_v33 = vadd.f32 %v4452_v31, %v18370_v24  ;;  %v18444_v7 = vadd.f32 %v4454_v5, %v18372_v20  ;;  %v4455_v41 = vrot.slane %v4317_v9, 1  ;;  %v4457_v38 = vrot.slane %v4390_v21, 1 }
 0x2fb   :  { %v18446_v2 = vpop.f32.mrf.mxu0  ;;  %v18448_v13 = vpop.f32.mrf.mxu1 }
 0x2fc   :  { %22571 = vst [vmem:[#allocation24_spill] sm:$0xff] %v18446_v2  ;;  %22572 = vst [vmem:[#allocation38_spill] sm:$0xff] %v18448_v13  ;;  %v18451_v54 = vadd.f32 %v4455_v41, %v18374_v4  ;;  %v18454_v53 = vadd.f32 %v4457_v38, %v18376_v18 }
 0x2fd   :  { %v4557_v40 = vpop.f32.mrf.mxu0  ;;  %v18456_v17 = vpop.f32.mrf.mxu1 }
 0x2fe   :  { %v4701_v24 = vrot.slane %v4557_v40, 1 }
 0x2ff   :  { %v18458_v26 = vpop.f32.mrf.mxu0  ;;  %v18460_v20 = vpop.f32.mrf.mxu1 }
 0x300   :  { %v18463_v19 = vadd.f32 %v4701_v24, %v18382_v58 }
 0x301   :  { %v4561_v31 = vpop.f32.mrf.mxu0  ;;  %v18465_v5 = vpop.f32.mrf.mxu1 }
 0x302   :  { %v4705_v9 = vrot.slane %v4561_v31, 1 }
 0x303   :  { %v18467_v4 = vpop.f32.mrf.mxu0  ;;  %v18469_v21 = vpop.f32.mrf.mxu1 }
 0x304   :  { %v18472_v18 = vadd.f32 %v4705_v9, %v18394_v25 }
 0x305   :  { %v4567_v41 = vpop.f32.mrf.mxu0  ;;  %v4640_v38 = vpop.f32.mrf.mxu1 }
 0x306   :  { %v4709_v40 = vrot.slane %v4567_v41, 1  ;;  %v4711_v2 = vrot.slane %v4640_v38, 1 }
 0x307   :  { %v18474_v13 = vpop.f32.mrf.mxu0  ;;  %v4642_v56 = vpop.f32.mrf.mxu1 }
 0x308   :  { %v18477_v58 = vadd.f32 %v4709_v40, %v18398_v55  ;;  %v18480_v24 = vadd.f32 %v4711_v2, %v18400_v46  ;;  %v4712_v31 = vrot.slane %v4642_v56, 1 }
 0x309   :  { %v4571_v59 = vpop.f32.mrf.mxu0  ;;  %v4644_v62 = vpop.f32.mrf.mxu1 }
 0x30a   :  { %22573 = vst [vmem:[#allocation66_spill] sm:$0xff] %v18480_v24  ;;  %v18483_v15 = vadd.f32 %v4712_v31, %v18404_v28  ;;  %v4713_v25 = vrot.slane %v4571_v59, 1  ;;  %v4715_v9 = vrot.slane %v4644_v62, 1 }
 0x30b   :  { %v18485_v1 = vpop.f32.mrf.mxu0  ;;  %v18487_v41 = vpop.f32.mrf.mxu1 }
 0x30c   :  { %22574 = vst [vmem:[#allocation27_spill] sm:$0xff] %v18483_v15  ;;  %v18490_v38 = vadd.f32 %v4713_v25, %v18410_v43  ;;  %v18493_v55 = vadd.f32 %v4715_v9, %v18412_v49 }
 0x30d   :  { %v4577_v46 = vpop.f32.mrf.mxu0  ;;  %v4650_v2 = vpop.f32.mrf.mxu1 }
 0x30e   :  { %22575 = vst [vmem:[#allocation56_spill] sm:$0xff] %v18493_v55  ;;  %v4717_v56 = vrot.slane %v4577_v46, 1  ;;  %v4719_v40 = vrot.slane %v4650_v2, 1 }
 0x30f   :  { %v4579_v24 = vpop.f32.mrf.mxu0  ;;  %v4652_v30 = vpop.f32.mrf.mxu1 }
 0x310   :  { %v18496_v28 = vadd.f32 %v4717_v56, %v18414_v48  ;;  %v18499_v62 = vadd.f32 %v4719_v40, %v18416_v51  ;;  %v4718_v59 = vrot.slane %v4579_v24, 1  ;;  %v4720_v31 = vrot.slane %v4652_v30, 1  ;;  %v13281_v48 = vld [vmem:[%s22097_s3 + $0x1f8] ss:$12 sps:$4 sm:$0xff]   ;;  %v13283_v30 = vld [vmem:[%s22097_s3 + $0x1fc] ss:$12 sps:$4 sm:$0xff]  }
 0x311   :  { %v4581_v15 = vpop.f32.mrf.mxu0  ;;  %v4654_v43 = vpop.f32.mrf.mxu1  ;;  %6531 = vmatprep.subr.bf16.mxu0 %v13283_v30  ;;  %v13288_v40 = vld [vmem:[%s22097_s3 + $0x1e8] ss:$12 sps:$4 sm:$0xff]  }
 0x312   :  { %22576 = vst [vmem:[#allocation28_spill] sm:$0xff] %v18499_v62  ;;  %v18502_v25 = vadd.f32 %v4718_v59, %v18419_v3  ;;  %v18505_v49 = vadd.f32 %v4720_v31, %v18422_v11  ;;  %v4721_v9 = vrot.slane %v4581_v15, 1  ;;  %v4723_v46 = vrot.slane %v4654_v43, 1  ;;  %v13284_v3 = vld [vmem:[%s22097_s3 + $0x200] ss:$12 sps:$4 sm:$0xff]   ;;  %6532 = vmatpush1.bf16.msra.mxu0 %v13281_v48 }
 0x313   :  { %v18507_v2 = vpop.f32.mrf.mxu0  ;;  %v18509_v55 = vpop.f32.mrf.mxu1  ;;  %v13287_v11 = vld [vmem:[%s22097_s3 + $0x1e4] ss:$12 sps:$4 sm:$0xff]   ;;  %6605 = vmatpush1.bf16.msra.mxu1 %v13284_v3 }
 0x314   :  { %22577 = vst [vmem:[#allocation31_spill] sm:$0xff] %v18502_v25  ;;  %22578 = vst [vmem:[#allocation33_spill] sm:$0xff] %v18505_v49  ;;  %v18521_v51 = vadd.f32 %v4721_v9, %v18429_v10  ;;  %v18524_v15 = vadd.f32 %v4723_v46, %v18432_v50  ;;  %v13285_v10 = vld [vmem:[%s22097_s3 + $0x1e0] ss:$12 sps:$4 sm:$0xff]   ;;  %6606 = vmatprep.subr.bf16.mxu1 %v22273_v63  ;;  %6533 = vmatprep.subr.bf16.mxu0 %v13287_v11  ;;  %v13312_v25 = vld [vmem:[%s22097_s3 + $0x158] ss:$12 sps:$4 sm:$0xff]  }
 0x315   :  { %22579 = vst [vmem:[#allocation32_spill] sm:$0xff] %v18509_v55  ;;  %v4587_v24 = vpop.f32.mrf.mxu0  ;;  %v4660_v56 = vpop.f32.mrf.mxu1  ;;  %v13291_v9 = vld [vmem:[%s22097_s3 + $0x1cc] ss:$12 sps:$4 sm:$0xff]   ;;  %v4012_v55 = vrot.slane %v18195_v37, 1  ;;  %v4434_v37 = vrot.slane %v18392_v12, 1 }
 0x316   :  { %22580 = vst [vmem:[#allocation40_spill] sm:$0xff] %v18524_v15  ;;  %v4725_v59 = vrot.slane %v4587_v24, 1  ;;  %v4727_v31 = vrot.slane %v4660_v56, 1  ;;  %v13292_v15 = vld [vmem:[%s22097_s3 + $0x1d0] ss:$12 sps:$4 sm:$0xff]   ;;  %6534 = vmatpush1.bf16.msra.mxu0 %v13285_v10 }
 0x317   :  { %v4589_v50 = vpop.f32.mrf.mxu0  ;;  %v4662_v43 = vpop.f32.mrf.mxu1  ;;  %6607 = vmatpush1.bf16.msra.mxu1 %v13288_v40  ;;  %6535 = vmatprep.subr.bf16.mxu0 %v13291_v9  ;;  %v13293_v9 = vld [vmem:[%s22097_s3 + $0x1b0] ss:$12 sps:$4 sm:$0xff]  }
 0x318   :  { %v18540_v46 = vadd.f32 %v4725_v59, %v18435_v32  ;;  %v18543_v30 = vadd.f32 %v4727_v31, %v18438_v45  ;;  %v4726_v48 = vrot.slane %v4589_v50, 1  ;;  %v4728_v3 = vrot.slane %v4662_v43, 1  ;;  %v13289_v45 = vld [vmem:[%s22097_s3 + $0x1c8] ss:$12 sps:$4 sm:$0xff]   ;;  %6608 = vmatprep.subr.bf16.mxu1 %v22273_v63 }
 0x319   :  { %v4591_v24 = vpop.f32.mrf.mxu0  ;;  %v4664_v56 = vpop.f32.mrf.mxu1 }
 0x31a   :  { %22581 = vst [vmem:[#allocation50_spill] sm:$0xff] %v18543_v30  ;;  %v18549_v11 = vadd.f32 %v4726_v48, %v18441_v33  ;;  %v18552_v49 = vadd.f32 %v4728_v3, %v18444_v7  ;;  %v4729_v32 = vrot.slane %v4591_v24, 1  ;;  %v4731_v59 = vrot.slane %v4664_v56, 1  ;;  %v13295_v33 = vld [vmem:[%s22097_s3 + $0x1b4] ss:$12 sps:$4 sm:$0xff]   ;;  %6536 = vmatpush1.bf16.msra.mxu0 %v13289_v45 }
 0x31b   :  { %v18558_v40 = vpop.f32.mrf.mxu0  ;;  %v18560_v31 = vpop.f32.mrf.mxu1  ;;  %6609 = vmatpush1.bf16.msra.mxu1 %v13292_v15  ;;  %v13296_v48 = vld [vmem:[%s22097_s3 + $0x1b8] ss:$12 sps:$4 sm:$0xff]   ;;  %6537 = vmatprep.subr.bf16.mxu0 %v13295_v33  ;;  %v13299_v15 = vld [vmem:[%s22097_s3 + $0x19c] ss:$12 sps:$4 sm:$0xff]  }
 0x31c   :  { %22582 = vst [vmem:[#allocation51_spill] sm:$0xff] %v18549_v11  ;;  %22583 = vst [vmem:[#allocation43_spill] sm:$0xff] %v18552_v49  ;;  %v18566_v7 = vadd.f32 %v4729_v32, %v18451_v54  ;;  %v18569_v10 = vadd.f32 %v4731_v59, %v18454_v53  ;;  %6610 = vmatprep.subr.bf16.mxu1 %v22273_v63  ;;  %v13300_v59 = vld [vmem:[%s22097_s3 + $0x1a0] ss:$12 sps:$4 sm:$0xff]   ;;  %v13297_v33 = vld [vmem:[%s22097_s3 + $0x198] ss:$12 sps:$4 sm:$0xff]  }
 0x31d   :  { %22584 = vst [vmem:[#allocation52_spill] sm:$0xff] %v18558_v40  ;;  %22585 = vst [vmem:[#allocation54_spill] sm:$0xff] %v18560_v31  ;;  %v4831_v50 = vpop.f32.mrf.mxu0  ;;  %v18571_v43 = vpop.f32.mrf.mxu1  ;;  %v13304_v40 = vld [vmem:[%s22097_s3 + $0x188] ss:$12 sps:$4 sm:$0xff]   ;;  %v13308_v49 = vld [vmem:[%s22097_s3 + $0x170] ss:$12 sps:$4 sm:$0xff]  }
 0x31e   :  { %22586 = vst [vmem:[#allocation22_spill] sm:$0xff] %v18569_v10  ;;  %v4975_v3 = vrot.slane %v4831_v50, 1  ;;  %6538 = vmatpush1.bf16.msra.mxu0 %v13293_v9 }
 0x31f   :  { %v18580_v54 = vpop.f32.mrf.mxu0  ;;  %v18582_v53 = vpop.f32.mrf.mxu1  ;;  %6611 = vmatpush1.bf16.msra.mxu1 %v13296_v48  ;;  %6539 = vmatprep.subr.bf16.mxu0 %v13299_v15  ;;  %v13303_v48 = vld [vmem:[%s22097_s3 + $0x184] ss:$12 sps:$4 sm:$0xff]   ;;  %v13301_v15 = vld [vmem:[%s22097_s3 + $0x180] ss:$12 sps:$4 sm:$0xff]  }
 0x320   :  { %v18588_v24 = vadd.f32 %v4975_v3, %v18463_v19  ;;  %6612 = vmatprep.subr.bf16.mxu1 %v22273_v63 }
 0x321   :  { %v4835_v56 = vpop.f32.mrf.mxu0  ;;  %v18590_v32 = vpop.f32.mrf.mxu1 }
 0x322   :  { %v4979_v45 = vrot.slane %v4835_v56, 1  ;;  %6540 = vmatpush1.bf16.msra.mxu0 %v13297_v33 }
 0x323   :  { %v18599_v50 = vpop.f32.mrf.mxu0  ;;  %v18601_v19 = vpop.f32.mrf.mxu1  ;;  %6613 = vmatpush1.bf16.msra.mxu1 %v13300_v59  ;;  %6541 = vmatprep.subr.bf16.mxu0 %v13303_v48  ;;  %v13307_v59 = vld [vmem:[%s22097_s3 + $0x16c] ss:$12 sps:$4 sm:$0xff]   ;;  %v13305_v48 = vld [vmem:[%s22097_s3 + $0x168] ss:$12 sps:$4 sm:$0xff]  }
 0x324   :  { %v18607_v3 = vadd.f32 %v4979_v45, %v18472_v18  ;;  %6614 = vmatprep.subr.bf16.mxu1 %v22273_v63 }
 0x325   :  { %v4841_v56 = vpop.f32.mrf.mxu0  ;;  %v18609_v9 = vpop.f32.mrf.mxu1 }
 0x326   :  { %v4983_v31 = vrot.slane %v4841_v56, 1  ;;  %6542 = vmatpush1.bf16.msra.mxu0 %v13301_v15 }
 0x327   :  { %v18618_v10 = vpop.f32.mrf.mxu0  ;;  %v18620_v18 = vpop.f32.mrf.mxu1  ;;  %6615 = vmatpush1.bf16.msra.mxu1 %v13304_v40  ;;  %6543 = vmatprep.subr.bf16.mxu0 %v13307_v59  ;;  %v13311_v40 = vld [vmem:[%s22097_s3 + $0x154] ss:$12 sps:$4 sm:$0xff]   ;;  %v13309_v59 = vld [vmem:[%s22097_s3 + $0x150] ss:$12 sps:$4 sm:$0xff]  }
 0x328   :  { %v18626_v45 = vadd.f32 %v4983_v31, %v18477_v58  ;;  %6616 = vmatprep.subr.bf16.mxu1 %v22273_v63 }
 0x329   :  { %v4845_v56 = vpop.f32.mrf.mxu0  ;;  %v18628_v33 = vpop.f32.mrf.mxu1 }
 0x32a   :  { %22587 = vst [vmem:[#allocation41_spill] sm:$0xff] %v18626_v45  ;;  %v4987_v11 = vrot.slane %v4845_v56, 1  ;;  %6544 = vmatpush1.bf16.msra.mxu0 %v13305_v48 }
 0x32b   :  { %v18637_v30 = vpop.f32.mrf.mxu0  ;;  %v18639_v58 = vpop.f32.mrf.mxu1  ;;  %6617 = vmatpush1.bf16.msra.mxu1 %v13308_v49  ;;  %6545 = vmatprep.subr.bf16.mxu0 %v13311_v40  ;;  %v4020_v49 = vrot.slane %v18246_v36, 1  ;;  %v18673_v40 = vadd.f32 %v4012_v55, %v17971_v61  ;;  %v4450_v61 = vrot.slane %v18426_v52, 1  ;;  %v4707_v52 = vrot.slane %v18465_v5, 1 }
 0x32c   :  { %22588 = vst [vmem:[#allocation45_spill] sm:$0xff] %v18639_v58  ;;  %v18645_v31 = vadd.f32 %v4987_v11, %v18490_v38  ;;  %6618 = vmatprep.subr.bf16.mxu1 %v22273_v63  ;;  %v4014_v38 = vrot.slane %v18197_v6, 1 }
 0x32d   :  { %v4851_v56 = vpop.f32.mrf.mxu0  ;;  %v18647_v15 = vpop.f32.mrf.mxu1  ;;  %v18685_v12 = vadd.f32 %v4020_v49, %v18034_v47  ;;  %v4498_v47 = vadd.f32 %v4434_v37, %v18336_v16  ;;  %v4710_v16 = vrot.slane %v18474_v13, 1  ;;  %v13315_v13 = vld [vmem:[%s22097_s3 + $0x28c] ss:$12 sps:$4 sm:$0xff]  }
 0x32e   :  { %22589 = vst [vmem:[#allocation26_spill] sm:$0xff] %v18645_v31  ;;  %22590 = vst [vmem:[#allocation42_spill] sm:$0xff] %v18647_v15  ;;  %v4991_v62 = vrot.slane %v4851_v56, 1  ;;  %v4022_v56 = vrot.slane %v18248_v22, 1  ;;  %v4432_v15 = vrot.slane %v18390_v23, 1  ;;  %6546 = vmatpush1.bf16.msra.mxu0 %v13309_v59  ;;  %v18676_v36 = vadd.f32 %v4014_v38, %v17974_v27 }
 0x32f   :  { %v18658_v11 = vpop.f32.mrf.mxu0  ;;  %v18660_v31 = vpop.f32.mrf.mxu1  ;;  %6619 = vmatpush1.bf16.msra.mxu1 %v13312_v25  ;;  %v4440_v22 = vrot.slane %v18406_v29, 1  ;;  %v4442_v23 = vrot.slane %v18408_v0, 1  ;;  %v4030_v27 = vrot.slane %v18283_v8, 1  ;;  %v4703_v0 = vrot.slane %v18456_v17, 1  ;;  %6551 = vmatprep.subr.bf16.mxu0 %v13315_v13  ;;  %v22639_v8 = vld [vmem:[#allocation60_spill] sm:$0xff] }
 0x330   :  { %v18665_v48 = vadd.f32 %v4991_v62, %v18496_v28  ;;  %6624 = vmatprep.subr.bf16.mxu1 %v22273_v63  ;;  %v18688_v25 = vadd.f32 %v4022_v56, %v18037_v42  ;;  %v4496_v29 = vadd.f32 %v4432_v15, %v18334_v35  ;;  %v4704_v42 = vrot.slane %v18460_v20, 1 }
 0x331   :  { %v4855_v45 = vpop.f32.mrf.mxu0  ;;  %v18668_v58 = vpop.f32.mrf.mxu1  ;;  %v4506_v56 = vadd.f32 %v4442_v23, %v18350_v34  ;;  %v4706_v35 = vrot.slane %v18467_v4, 1  ;;  %v4708_v17 = vrot.slane %v18469_v21, 1  ;;  %v4714_v20 = vrot.slane %v18485_v1, 1  ;;  %v22591_v1 = vld [vmem:[#allocation39_spill] sm:$0xff] }
 0x332   :  { %v4995_v6 = vrot.slane %v4855_v45, 1  ;;  %v4702_v45 = vrot.slane %v18458_v26, 1  ;;  %v4767_v34 = vadd.f32 %v4703_v0, %v18384_v39  ;;  %v4716_v4 = vrot.slane %v18487_v41, 1  ;;  %v13316_v41 = vld [vmem:[%s22097_s3 + $0x290] ss:$12 sps:$4 sm:$0xff]  }
 0x333   :  { %v18680_v28 = vpop.f32.mrf.mxu0  ;;  %v18682_v62 = vpop.f32.mrf.mxu1  ;;  %v4977_v21 = vrot.slane %v18571_v43, 1  ;;  %v4976_v23 = vrot.slane %v18580_v54, 1  ;;  %v4770_v43 = vadd.f32 %v4706_v35, %v4496_v29  ;;  %v4978_v0 = vrot.slane %v18582_v53, 1  ;;  %v22592_v54 = vld [vmem:[#allocation37_spill] sm:$0xff]  ;;  %6625 = vmatpush2.bf16.msra.mxu1 %v13316_v41 }
 0x334   :  { %v18692_v55 = vadd.f32 %v4995_v6, %v18521_v51  ;;  %v4504_v51 = vadd.f32 %v4440_v22, %v18348_v60  ;;  %v18712_v6 = vadd.f32 %v4450_v61, %v18364_v14  ;;  %v4766_v60 = vadd.f32 %v4702_v45, %v18386_v57  ;;  %v13313_v57 = vld [vmem:[%s22097_s3 + $0x288] ss:$12 sps:$4 sm:$0xff]   ;;  %6626 = vmatprep.subr.bf16.mxu1 %v22273_v63 }
 0x335   :  { %v4861_v59 = vpop.f32.mrf.mxu0  ;;  %v18698_v38 = vpop.f32.mrf.mxu1  ;;  %v4768_v14 = vadd.f32 %v4704_v42, %v18388_v44  ;;  %v4772_v61 = vadd.f32 %v4708_v17, %v4498_v47  ;;  %v4981_v45 = vrot.slane %v18590_v32, 1  ;;  %v4448_v42 = vrot.slane %v22592_v54, 1  ;;  %6552 = vmatpush2.bf16.msra.mxu0 %v13313_v57 }
 0x336   :  { %v4999_v49 = vrot.slane %v4861_v59, 1  ;;  %v18750_v29 = vadd.f32 %v4716_v4, %v4506_v56  ;;  %v4980_v53 = vrot.slane %v18599_v50, 1  ;;  %v4982_v32 = vrot.slane %v18601_v19, 1  ;;  %v13317_v50 = vld [vmem:[%s22097_s3 + $0x270] ss:$12 sps:$4 sm:$0xff]  }
 0x337   :  { %v18707_v15 = vpop.f32.mrf.mxu0  ;;  %v18709_v26 = vpop.f32.mrf.mxu1  ;;  %v4985_v47 = vrot.slane %v18609_v9, 1  ;;  %v13320_v19 = vld [vmem:[%s22097_s3 + $0x278] ss:$12 sps:$4 sm:$0xff]   ;;  %v5042_v9 = vadd.f32 %v4978_v0, %v4768_v14  ;;  %v4984_v4 = vrot.slane %v18618_v10, 1 }
 0x338   :  { %v18717_v5 = vadd.f32 %v4999_v49, %v18540_v46  ;;  %v4771_v46 = vadd.f32 %v4707_v52, %v22591_v1  ;;  %v22593_v52 = vld [vmem:[#allocation25_spill] sm:$0xff]  ;;  %6627 = vmatpush2.bf16.msra.mxu1 %v13320_v19 }
 0x339   :  { %v4865_v37 = vpop.f32.mrf.mxu0  ;;  %v18723_v22 = vpop.f32.mrf.mxu1  ;;  %v4774_v49 = vadd.f32 %v4710_v16, %v22593_v52  ;;  %v5040_v16 = vadd.f32 %v4976_v23, %v4766_v60  ;;  %v5044_v52 = vadd.f32 %v4980_v53, %v4770_v43  ;;  %6628 = vmatprep.subr.bf16.mxu1 %v22273_v63  ;;  %v13321_v43 = vld [vmem:[%s22097_s3 + $0x258] ss:$12 sps:$4 sm:$0xff]   ;;  %v22597_v19 = vld [vmem:[#allocation65_spill] sm:$0xff] }
 0x33a   :  { %v5003_v39 = vrot.slane %v4865_v37, 1  ;;  %v18745_v37 = vadd.f32 %v4714_v20, %v4504_v51  ;;  %v13319_v51 = vld [vmem:[%s22097_s3 + $0x274] ss:$12 sps:$4 sm:$0xff]   ;;  %v5045_v56 = vadd.f32 %v4981_v45, %v4771_v46  ;;  %v4989_v46 = vrot.slane %v18628_v33, 1 }
 0x33b   :  { %v18739_v44 = vpop.f32.mrf.mxu0  ;;  %v18741_v59 = vpop.f32.mrf.mxu1  ;;  %6553 = vmatprep.subr.bf16.mxu0 %v13319_v51  ;;  %v13324_v33 = vld [vmem:[%s22097_s3 + $0x260] ss:$12 sps:$4 sm:$0xff]  }
 0x33c   :  { %v18748_v1 = vadd.f32 %v5003_v39, %v18566_v7  ;;  %v5041_v7 = vadd.f32 %v4977_v21, %v4767_v34  ;;  %v4986_v39 = vrot.slane %v18620_v18, 1  ;;  %6554 = vmatpush2.bf16.msra.mxu0 %v13317_v50  ;;  %v13323_v18 = vld [vmem:[%s22097_s3 + $0x25c] ss:$12 sps:$4 sm:$0xff]   ;;  %v22596_v53 = vld [vmem:[#allocation27_spill] sm:$0xff]  ;;  %6629 = vmatpush2.bf16.msra.mxu1 %v13324_v33 }
 0x33d   :  { %v5105_v35 = vpop.f32.mrf.mxu0  ;;  %v5178_v17 = vpop.f32.mrf.mxu1  ;;  %6555 = vmatprep.subr.bf16.mxu0 %v13323_v18  ;;  %6630 = vmatprep.subr.bf16.mxu1 %v22273_v63  ;;  %v13328_v33 = vld [vmem:[%s22097_s3 + $0x248] ss:$12 sps:$4 sm:$0xff]  }
 0x33e   :  { %v5249_v20 = vrot.slane %v5105_v35, 1  ;;  %v5251_v13 = vrot.slane %v5178_v17, 1  ;;  %v5046_v35 = vadd.f32 %v4982_v32, %v4772_v61  ;;  %v22594_v17 = vld [vmem:[#allocation66_spill] sm:$0xff]  ;;  %v5048_v61 = vadd.f32 %v4984_v4, %v4774_v49  ;;  %v22599_v49 = vld [vmem:[#allocation56_spill] sm:$0xff] }
 0x33f   :  { %v5107_v57 = vpop.f32.mrf.mxu0  ;;  %v5180_v41 = vpop.f32.mrf.mxu1  ;;  %v5049_v14 = vadd.f32 %v4985_v47, %v22594_v17  ;;  %v5050_v32 = vadd.f32 %v4986_v39, %v22596_v53  ;;  %v4722_v17 = vrot.slane %v18507_v2, 1  ;;  %v5053_v4 = vadd.f32 %v4989_v46, %v22599_v49  ;;  %v22602_v53 = vld [vmem:[#allocation45_spill] sm:$0xff] }
 0x340   :  { %v18768_v34 = vadd.f32 %v5249_v20, %v18588_v24  ;;  %v5315_v60 = vadd.f32 %v5251_v13, %v5041_v7  ;;  %v5250_v21 = vrot.slane %v5107_v57, 1  ;;  %v5252_v23 = vrot.slane %v5180_v41, 1  ;;  %v22595_v24 = vld [vmem:[#allocation64_spill] sm:$0xff]  ;;  %6556 = vmatpush2.bf16.msra.mxu0 %v13321_v43  ;;  %6631 = vmatpush2.bf16.msra.mxu1 %v13328_v33 }
 0x341   :  { %v5109_v10 = vpop.f32.mrf.mxu0  ;;  %v5182_v0 = vpop.f32.mrf.mxu1  ;;  %6632 = vmatprep.subr.bf16.mxu1 %v22273_v63 }
 0x342   :  { %v5542_v45 = vmax.f32 %v22595_v24, %v18768_v34  ;;  %v5314_v51 = vadd.f32 %v5250_v21, %v5040_v16  ;;  %v5316_v7 = vadd.f32 %v5252_v23, %v5042_v9  ;;  %v5253_v20 = vrot.slane %v5109_v10, 1  ;;  %v22598_v21 = vld [vmem:[#allocation68_spill] sm:$0xff] }
 0x343   :  { %v5255_v47 = vrot.slane %v5182_v0, 1  ;;  %v5111_v13 = vpop.f32.mrf.mxu0  ;;  %v5184_v50 = vpop.f32.mrf.mxu1  ;;  %v5544_v57 = vmax.f32 %v22597_v19, %v5315_v60  ;;  %v22600_v60 = vld [vmem:[#allocation67_spill] sm:$0xff] }
 0x344   :  { %v18787_v16 = vadd.f32 %v5253_v20, %v18607_v3  ;;  %v5254_v9 = vrot.slane %v5111_v13, 1  ;;  %v5256_v41 = vrot.slane %v5184_v50, 1  ;;  %v5545_v23 = vmax.f32 %v22598_v21, %v5316_v7  ;;  %v13327_v3 = vld [vmem:[%s22097_s3 + $0x244] ss:$12 sps:$4 sm:$0xff]  }
 0x345   :  { %v5319_v39 = vadd.f32 %v5255_v47, %v5045_v56  ;;  %5600 = vrot.lane.b32.xlu0 %v5544_v57, %s14308_s30  ;;  %v5115_v10 = vpop.f32.mrf.mxu0  ;;  %v5188_v0 = vpop.f32.mrf.mxu1  ;;  %v18794_v18 = vmax.f32 %v22600_v60, %v5314_v51  ;;  %v4988_v7 = vrot.slane %v18637_v30, 1  ;;  %v22601_v20 = vld [vmem:[#allocation69_spill] sm:$0xff]  ;;  %v13325_v51 = vld [vmem:[%s22097_s3 + $0x240] ss:$12 sps:$4 sm:$0xff]   ;;  %v4990_v47 = vrot.slane %v22602_v53, 1  ;;  %v22603_v57 = vld [vmem:[#allocation70_spill] sm:$0xff]  ;;  %6557 = vmatprep.subr.bf16.mxu0 %v13327_v3 }
 0x346   :  { %v5320_v46 = vadd.f32 %v5256_v41, %v5046_v35  ;;  %v5257_v56 = vrot.slane %v5115_v10, 1  ;;  %5602 = vrot.lane.b32.xlu1 %v5545_v23, %s14308_s30  ;;  %v5318_v13 = vadd.f32 %v5254_v9, %v5044_v52  ;;  %v5259_v50 = vrot.slane %v5188_v0, 1  ;;  %v22604_v35 = vld [vmem:[#allocation41_spill] sm:$0xff]  ;;  %6558 = vmatpush2.bf16.msra.mxu0 %v13325_v51  ;;  %v22605_v60 = vld [vmem:[#allocation42_spill] sm:$0xff] }
 0x347   :  { %v5117_v30 = vpop.f32.mrf.mxu0  ;;  %v5190_v19 = vpop.f32.mrf.mxu1  ;;  %v5548_v21 = vmax.f32 %v22603_v57, %v5319_v39  ;;  %v4993_v43 = vrot.slane %v22605_v60, 1  ;;  %v4992_v53 = vrot.slane %v18658_v11, 1  ;;  %v4994_v52 = vrot.slane %v18660_v31, 1  ;;  %v13331_v3 = vld [vmem:[%s22097_s3 + $0x22c] ss:$12 sps:$4 sm:$0xff]  }
 0x348   :  { %v18813_v41 = vadd.f32 %v5257_v56, %v22604_v35  ;;  %v5258_v23 = vrot.slane %v5117_v30, 1  ;;  %v5260_v49 = vrot.slane %v5190_v19, 1  ;;  %v5549_v10 = vmax.f32 %v18676_v36, %v5320_v46  ;;  %v22606_v36 = vld [vmem:[#allocation71_spill] sm:$0xff]  ;;  %v13329_v31 = vld [vmem:[%s22097_s3 + $0x228] ss:$12 sps:$4 sm:$0xff]   ;;  %6559 = vmatprep.subr.bf16.mxu0 %v13331_v3 }
 0x349   :  { %v5323_v9 = vadd.f32 %v5259_v50, %v5049_v14  ;;  %5606 = vrot.lane.b32.xlu0 %v5548_v21, %s14308_s30  ;;  %v5119_v39 = vpop.f32.mrf.mxu0  ;;  %v5192_v0 = vpop.f32.mrf.mxu1  ;;  %v13332_v11 = vld [vmem:[%s22097_s3 + $0x230] ss:$12 sps:$4 sm:$0xff]   ;;  %v5052_v14 = vadd.f32 %v4988_v7, %v18745_v37  ;;  %v5054_v50 = vadd.f32 %v4990_v47, %v18750_v29  ;;  %v22610_v37 = vld [vmem:[#allocation32_spill] sm:$0xff] }
 0x34a   :  { %v5550_v46 = vmax.f32 %v22606_v36, %v18813_v41  ;;  %v5322_v56 = vadd.f32 %v5258_v23, %v5048_v61  ;;  %v5324_v51 = vadd.f32 %v5260_v49, %v5050_v32  ;;  %v5261_v33 = vrot.slane %v5119_v39, 1  ;;  %5608 = vrot.lane.b32.xlu1 %v5549_v10, %s14308_s30  ;;  %v22607_v61 = vld [vmem:[#allocation72_spill] sm:$0xff]  ;;  %v22608_v21 = vld [vmem:[#allocation26_spill] sm:$0xff]  ;;  %6560 = vmatpush2.bf16.msra.mxu0 %v13329_v31  ;;  %v22612_v3 = vld [vmem:[#allocation73_spill] sm:$0xff] }
 0x34b   :  { %v5263_v30 = vrot.slane %v5192_v0, 1  ;;  %v5121_v19 = vpop.f32.mrf.mxu0  ;;  %v5194_v57 = vpop.f32.mrf.mxu1  ;;  %v5552_v32 = vmax.f32 %v22607_v61, %v5323_v9  ;;  %v18840_v49 = vmax.f32 %v18673_v40, %v5318_v13  ;;  %v22609_v10 = vld [vmem:[#allocation74_spill] sm:$0xff]  ;;  %6633 = vmatpush2.bf16.msra.mxu1 %v13332_v11  ;;  %v4724_v7 = vrot.slane %v22610_v37, 1  ;;  %v22611_v29 = vld [vmem:[#allocation28_spill] sm:$0xff]  ;;  %v13335_v40 = vld [vmem:[%s22097_s3 + $0x214] ss:$12 sps:$4 sm:$0xff]  }
 0x34c   :  { %v18837_v35 = vadd.f32 %v5261_v33, %v22608_v21  ;;  %v5264_v23 = vrot.slane %v5194_v57, 1  ;;  %v5553_v60 = vmax.f32 %v22609_v10, %v5324_v51  ;;  %v5057_v47 = vadd.f32 %v4993_v43, %v22611_v29  ;;  %6634 = vmatprep.subr.bf16.mxu1 %v22273_v63  ;;  %v22613_v13 = vld [vmem:[#allocation31_spill] sm:$0xff]  ;;  %v22614_v31 = vld [vmem:[#allocation33_spill] sm:$0xff]  ;;  %6561 = vmatprep.subr.bf16.mxu0 %v13335_v40 }
 0x34d   :  { %v18845_v39 = vadd.f32 %v5263_v30, %v5053_v4  ;;  %5598 = vrot.lane.b32.xlu0 %v18794_v18, %s14308_s30  ;;  %v5125_v9 = vpop.f32.mrf.mxu0  ;;  %v5198_v0 = vpop.f32.mrf.mxu1  ;;  %v18850_v33 = vmax.f32 %v22612_v3, %v5322_v56  ;;  %v5056_v51 = vadd.f32 %v4992_v53, %v22613_v13  ;;  %v5058_v43 = vadd.f32 %v4994_v52, %v22614_v31  ;;  %v22615_v4 = vld [vmem:[#allocation75_spill] sm:$0xff]  ;;  %v13333_v56 = vld [vmem:[%s22097_s3 + $0x210] ss:$12 sps:$4 sm:$0xff]  }
 0x34e   :  { %v5265_v30 = vrot.slane %v5125_v9, 1  ;;  %5604 = vrot.lane.b32.xlu1 %v18840_v49, %s14308_s30  ;;  %v13336_v57 = vld [vmem:[%s22097_s3 + $0x218] ss:$12 sps:$4 sm:$0xff]   ;;  %v4997_v61 = vrot.slane %v18668_v58, 1  ;;  %v5262_v53 = vrot.slane %v5121_v19, 1  ;;  %v5267_v21 = vrot.slane %v5198_v0, 1  ;;  %6562 = vmatpush2.bf16.msra.mxu0 %v13333_v56 }
 0x34f   :  { %v5127_v52 = vpop.f32.mrf.mxu0  ;;  %v5200_v10 = vpop.f32.mrf.mxu1  ;;  %v22616_v37 = vld [vmem:[#allocation3_spill] sm:$0xff]  ;;  %v5328_v9 = vadd.f32 %v5264_v23, %v5054_v50  ;;  %6635 = vmatpush2.bf16.msra.mxu1 %v13336_v57  ;;  %v5001_v11 = vrot.slane %v18698_v38, 1  ;;  %v5000_v58 = vrot.slane %v18707_v15, 1  ;;  %v5002_v19 = vrot.slane %v18709_v26, 1  ;;  %v22617_v50 = vld [vmem:[#allocation4_spill] sm:$0xff] }
 0x350   :  { %v5556_v29 = vmax.f32 %v22616_v37, %v18845_v39  ;;  %v18872_v3 = vadd.f32 %v5265_v30, %v18665_v48  ;;  %v5266_v13 = vrot.slane %v5127_v52, 1  ;;  %v5268_v31 = vrot.slane %v5200_v10, 1  ;;  %v13339_v48 = vld [vmem:[%s22097_s3 + $0x34c] ss:$12 sps:$4 sm:$0xff]   ;;  %7047 = vmatprep.subr.bf16.mxu1 %v22273_v63  ;;  %v22619_v52 = vld [vmem:[#allocation29_spill] sm:$0xff] }
 0x351   :  { %v18877_v0 = vadd.f32 %v5267_v21, %v5057_v47  ;;  %5612 = vrot.lane.b32.xlu0 %v5552_v32, %s14308_s30  ;;  %v5129_v39 = vpop.f32.mrf.mxu0  ;;  %v5202_v40 = vpop.f32.mrf.mxu1  ;;  %v22618_v26 = vld [vmem:[#allocation40_spill] sm:$0xff]  ;;  %v5326_v32 = vadd.f32 %v5262_v53, %v5052_v14  ;;  %6974 = vmatprep.subr.bf16.mxu0 %v13339_v48  ;;  %v4788_v37 = vadd.f32 %v4724_v7, %v18712_v6  ;;  %v22621_v14 = vld [vmem:[#allocation50_spill] sm:$0xff] }
 0x352   :  { %v5330_v38 = vadd.f32 %v5266_v13, %v5056_v51  ;;  %v18886_v30 = vadd.f32 %v5268_v31, %v5058_v43  ;;  %v5269_v15 = vrot.slane %v5129_v39, 1  ;;  %5614 = vrot.lane.b32.xlu1 %v5553_v60, %s14308_s30  ;;  %v5061_v47 = vadd.f32 %v4997_v61, %v22618_v26  ;;  %v22620_v43 = vld [vmem:[#allocation6_spill] sm:$0xff] }
 0x353   :  { %v5271_v56 = vrot.slane %v5202_v40, 1  ;;  %v5131_v57 = vpop.f32.mrf.mxu0  ;;  %v5204_v21 = vpop.f32.mrf.mxu1  ;;  %v5560_v10 = vmax.f32 %v22619_v52, %v18877_v0  ;;  %v5557_v51 = vmax.f32 %v18688_v25, %v5328_v9  ;;  %v4998_v61 = vrot.slane %v18682_v62, 1  ;;  %v22622_v6 = vld [vmem:[#allocation30_spill] sm:$0xff]  ;;  %v22624_v25 = vld [vmem:[#allocation43_spill] sm:$0xff]  ;;  %v22625_v40 = vld [vmem:[#allocation8_spill] sm:$0xff] }
 0x354   :  { %v18894_v23 = vadd.f32 %v5269_v15, %v18692_v55  ;;  %v5561_v60 = vmax.f32 %v22620_v43, %v18886_v30  ;;  %v5065_v53 = vadd.f32 %v5001_v11, %v22621_v14  ;;  %v18906_v7 = vmax.f32 %v22622_v6, %v5330_v38  ;;  %v22623_v55 = vld [vmem:[#allocation51_spill] sm:$0xff]  ;;  %v22626_v38 = vld [vmem:[#allocation10_spill] sm:$0xff] }
 0x355   :  { %v18901_v13 = vadd.f32 %v5271_v56, %v5061_v47  ;;  %5610 = vrot.lane.b32.xlu0 %v18850_v33, %s14308_s30  ;;  %v5135_v31 = vpop.f32.mrf.mxu0  ;;  %v5208_v0 = vpop.f32.mrf.mxu1  ;;  %v5064_v39 = vadd.f32 %v5000_v58, %v22623_v55  ;;  %v5066_v9 = vadd.f32 %v5002_v19, %v22624_v25  ;;  %v5005_v11 = vrot.slane %v18723_v22, 1  ;;  %v22627_v14 = vld [vmem:[#allocation34_spill] sm:$0xff] }
 0x356   :  { %v5562_v48 = vmax.f32 %v22625_v40, %v18894_v23  ;;  %v5273_v62 = vrot.slane %v5135_v31, 1  ;;  %5620 = vrot.lane.b32.xlu1 %v5557_v51, %s14308_s30  ;;  %v5275_v30 = vrot.slane %v5208_v0, 1  ;;  %v18915_v47 = vmax.f32 %v18685_v12, %v5326_v32 }
 0x357   :  { %v5137_v15 = vpop.f32.mrf.mxu0  ;;  %v5210_v26 = vpop.f32.mrf.mxu1  ;;  %v5564_v56 = vmax.f32 %v22626_v38, %v18901_v13  ;;  %v5272_v58 = vrot.slane %v5204_v21, 1  ;;  %v4512_v51 = vadd.f32 %v4448_v42, %v22627_v14  ;;  %v4996_v22 = vrot.slane %v18680_v28, 1  ;;  %v22628_v13 = vld [vmem:[#allocation9_spill] sm:$0xff]  ;;  %v22629_v42 = vld [vmem:[#allocation22_spill] sm:$0xff]  ;;  %v22633_v38 = vld [vmem:[#allocation12_spill] sm:$0xff] }
 0x358   :  { %v18920_v19 = vadd.f32 %v5273_v62, %v18717_v5  ;;  %v5274_v52 = vrot.slane %v5137_v15, 1  ;;  %v5276_v43 = vrot.slane %v5210_v26, 1  ;;  %v5062_v31 = vadd.f32 %v4998_v61, %v4788_v37  ;;  %v22630_v61 = vld [vmem:[#allocation11_spill] sm:$0xff] }
 0x359   :  { %v5339_v0 = vadd.f32 %v5275_v30, %v5065_v53  ;;  %5618 = vrot.lane.b32.xlu0 %v5556_v29, %s14308_s30  ;;  %v5139_v12 = vpop.f32.mrf.mxu0  ;;  %v5212_v32 = vpop.f32.mrf.mxu1  ;;  %v4786_v54 = vadd.f32 %v4722_v17, %v4512_v51  ;;  %v5069_v28 = vadd.f32 %v5005_v11, %v22629_v42  ;;  %v5270_v29 = vrot.slane %v5131_v57, 1  ;;  %v22631_v30 = vld [vmem:[#allocation14_spill] sm:$0xff]  ;;  %v22634_v17 = vld [vmem:[#allocation61_spill] sm:$0xff]  ;;  %v22637_v14 = vld [vmem:[#allocation19_spill] sm:$0xff] }
 0x35a   :  { %v5566_v21 = vmax.f32 %v22628_v13, %v18920_v19  ;;  %v5338_v6 = vadd.f32 %v5274_v52, %v5064_v39  ;;  %v5340_v5 = vadd.f32 %v5276_v43, %v5066_v9  ;;  %v5277_v55 = vrot.slane %v5139_v12, 1  ;;  %5616 = vrot.lane.b32.xlu1 %v18915_v47, %s14308_s30  ;;  %v22632_v9 = vld [vmem:[#allocation5_spill] sm:$0xff]  ;;  %v22635_v52 = vld [vmem:[#allocation38_spill] sm:$0xff]  ;;  %v13364_v13 = vld [vmem:[%s22097_s3 + $0x2c0] ss:$12 sps:$4 sm:$0xff]  }
 0x35b   :  { %v5279_v37 = vrot.slane %v5212_v32, 1  ;;  %v5568_v53 = vmax.f32 %v22630_v61, %v5339_v0  ;;  %v5336_v25 = vadd.f32 %v5272_v58, %v5062_v31  ;;  %v4028_v15 = vrot.slane %v22632_v9, 1  ;;  %v22638_v31 = vld [vmem:[#allocation54_spill] sm:$0xff]  ;;  %v5214_v32 = vpop.f32.mrf.mxu1  ;;  %v22644_v9 = vld [vmem:[#allocation36_spill] sm:$0xff] }
 0x35c   :  { %v18936_v62 = vadd.f32 %v5277_v55, %v18748_v1  ;;  %v5569_v39 = vmax.f32 %v22631_v30, %v5340_v5  ;;  %v18942_v2 = vmax.f32 %v22633_v38, %v5338_v6  ;;  %v4094_v11 = vadd.f32 %v4030_v27, %v22634_v17  ;;  %v22636_v1 = vld [vmem:[#allocation17_spill] sm:$0xff]  ;;  %v22640_v6 = vld [vmem:[#allocation24_spill] sm:$0xff] }
 0x35d   :  { %v5343_v26 = vadd.f32 %v5279_v37, %v5069_v28  ;;  %5624 = vrot.lane.b32.xlu0 %v5560_v10, %s14308_s30  ;;  %v4458_v57 = vrot.slane %v22635_v52, 1  ;;  %v5060_v58 = vadd.f32 %v4996_v22, %v4786_v54  ;;  %v4732_v0 = vrot.slane %v22638_v31, 1  ;;  %v22641_v22 = vld [vmem:[#allocation23_spill] sm:$0xff] }
 0x35e   :  { %v5570_v43 = vmax.f32 %v22636_v1, %v18936_v62  ;;  %5626 = vrot.lane.b32.xlu1 %v5561_v60, %s14308_s30  ;;  %v5565_v12 = vmax.f32 %v4094_v11, %v5336_v25  ;;  %v4092_v27 = vadd.f32 %v4028_v15, %v22639_v8  ;;  %v4456_v5 = vrot.slane %v22640_v6, 1  ;;  %v22642_v60 = vld [vmem:[#allocation52_spill] sm:$0xff]  ;;  %v22645_v52 = vld [vmem:[#allocation15_spill] sm:$0xff] }
 0x35f   :  { %v5572_v51 = vmax.f32 %v22637_v14, %v5343_v26  ;;  %v5334_v10 = vadd.f32 %v5270_v29, %v5060_v58  ;;  %v4522_v55 = vadd.f32 %v4458_v57, %v22641_v22  ;;  %v5006_v54 = vrot.slane %v18741_v59, 1  ;;  %v5141_v29 = vpop.f32.mrf.mxu0  ;;  %v22643_v25 = vld [vmem:[#allocation16_spill] sm:$0xff]  ;;  %v22646_v58 = vld [vmem:[#allocation63_spill] sm:$0xff] }
 0x360   :  { %v4730_v42 = vrot.slane %v22642_v60, 1  ;;  %v5280_v37 = vrot.slane %v5214_v32, 1  ;;  %v4038_v30 = vrot.slane %v22643_v25, 1  ;;  %v4520_v15 = vadd.f32 %v4456_v5, %v22644_v9  ;;  %v13367_v1 = vld [vmem:[%s22097_s3 + $0x2a4] ss:$12 sps:$4 sm:$0xff]  }
 0x361   :  { %5622 = vrot.lane.b32.xlu0 %v18906_v7, %s14308_s30  ;;  %v4796_v28 = vadd.f32 %v4732_v0, %v4522_v55  ;;  %v18961_v61 = vmax.f32 %v4092_v27, %v5334_v10  ;;  %v5004_v26 = vrot.slane %v18739_v44, 1  ;;  %v5278_v17 = vrot.slane %v5141_v29, 1  ;;  %v22647_v44 = vld [vmem:[#allocation62_spill] sm:$0xff] }
 0x362   :  { %5632 = vrot.lane.b32.xlu1 %v5565_v12, %s14308_s30  ;;  %v4794_v59 = vadd.f32 %v4730_v42, %v4520_v15  ;;  %v4036_v57 = vrot.slane %v22645_v52, 1  ;;  %v4102_v14 = vadd.f32 %v4038_v30, %v22646_v58  ;;  %v22651_v41 = vmax.f32 %v22615_v4, %v18837_v35  ;;  %v13340_v35 = vld [vmem:[%s22097_s3 + $0x350] ss:$12 sps:$4 sm:$0xff]  }
 0x363   :  { %v5070_v38 = vadd.f32 %v5006_v54, %v4796_v28 }
 0x364   :  { %v4100_v10 = vadd.f32 %v4036_v57, %v22647_v44 }
 0x365   :  { %5630 = vrot.lane.b32.xlu0 %v5564_v56, %s14308_s30  ;;  %v5344_v11 = vadd.f32 %v5280_v37, %v5070_v38  ;;  %v5068_v56 = vadd.f32 %v5004_v26, %v4794_v59  ;;  %v22648_v38 = vld [vmem:[#allocation55_spill] sm:$0xff] }
 0x366   :  { %5628 = vrot.lane.b32.xlu1 %v18961_v61, %s14308_s30 }
 0x367   :  { %v5342_v31 = vadd.f32 %v5278_v17, %v5068_v56  ;;  %v5573_v0 = vmax.f32 %v4102_v14, %v5344_v11 }
 0x369   :  { %5636 = vrot.lane.b32.xlu0 %v5568_v53, %s14308_s30  ;;  %v18976_v12 = vmax.f32 %v4100_v10, %v5342_v31  ;;  %v22649_v10 = vmax.f32 %v22601_v20, %v18787_v16 }
 0x36a   :  { %5638 = vrot.lane.b32.xlu1 %v5569_v39, %s14308_s30 }
 0x36d   :  { %5642 = vrot.lane.b32.xlu0 %v5572_v51, %s14308_s30 }
 0x36e   :  { %5644 = vrot.lane.b32.xlu1 %v5573_v0, %s14308_s30 }
 0x371   :  { %5634 = vrot.lane.b32.xlu0 %v18942_v2, %s14308_s30 }
 0x372   :  { %5640 = vrot.lane.b32.xlu1 %v18976_v12, %s14308_s30 }
 0x376   :  { %v18982_v53 = vpop.f32.mrf.mxu1 }
 0x378   :  { %v6209_v32 = vpop.f32.mrf.mxu1 }
 0x37a   :  { %v18984_v39 = vpop.f32.mrf.mxu1 }
 0x37c   :  { %v6212_v8 = vpop.f32.mrf.mxu1 }
 0x37e   :  { %v18986_v27 = vpop.f32.mrf.mxu1 }
 0x380   :  { %v6217_v51 = vpop.f32.mrf.mxu1 }
 0x382   :  { %v18988_v6 = vpop.f32.mrf.mxu1 }
 0x384   :  { %v6220_v5 = vpop.f32.mrf.mxu1 }
 0x386   :  { %v18990_v22 = vpop.f32.mrf.mxu1 }
 0x388   :  { %v6225_v55 = vpop.f32.mrf.mxu1 }
 0x38a   :  { %v18992_v54 = vpop.f32.mrf.mxu1 }
 0x38c   :  { %v6228_v60 = vpop.f32.mrf.mxu1 }
 0x38e   :  { %v18994_v42 = vpop.f32.mrf.mxu1 }
 0x390   :  { %v6233_v28 = vpop.f32.mrf.mxu1 }
 0x392   :  { %v18996_v37 = vpop.f32.mrf.mxu1 }
 0x394   :  { %v6236_v29 = vpop.f32.mrf.mxu1 }
 0x3b7   :  { %v5601_v25 = vpop.permute.xlu0 %5600 }
 0x3b8   :  { %v5603_v30 = vpop.permute.xlu1 %5602 }
 0x3b9   :  { %v5647_v9 = vsel %vm5449_vm1, %v5601_v25, %v5603_v30 }
 0x3ba   :  { %v5679_v15 = vmax.f32 %v18794_v18, %v5647_v9 }
 0x3bb   :  { %v5607_v26 = vpop.permute.xlu0 %5606 }
 0x3bc   :  { %v5695_v59 = vadd.f32 %v5679_v15, %v22648_v38  ;;  %v5609_v17 = vpop.permute.xlu1 %5608 }
 0x3bd   :  { %v5649_v11 = vsel %vm5449_vm1, %v5607_v26, %v5609_v17 }
 0x3be   :  { %v5711_v52 = vmax.f32 %v5695_v59, 0.0  ;;  %v5681_v57 = vmax.f32 %v18840_v49, %v5649_v11  ;;  %v22650_v49 = vld [vmem:[#allocation58_spill] sm:$0xff] }
 0x3bf   :  { %v5599_v58 = vpop.permute.xlu0 %5598 }
 0x3c0   :  { %5731 = vst.msk [vmem:[#allocation2 + $0x88] sm:$0x7f] %vm5727_vm2, %v5711_v52  ;;  %v5697_v14 = vadd.f32 %v5681_v57, %v22648_v38  ;;  %v5646_v56 = vsel %vm5449_vm1, %v5599_v58, %v5601_v25  ;;  %v5605_v31 = vpop.permute.xlu1 %5604 }
 0x3c1   :  { %v5678_v18 = vmax.f32 %v5542_v45, %v5646_v56  ;;  %v5648_v0 = vsel %vm5449_vm1, %v5605_v31, %v5607_v26 }
 0x3c2   :  { %v5713_v44 = vmax.f32 %v5697_v14, 0.0  ;;  %v5680_v32 = vmax.f32 %v22649_v10, %v5648_v0 }
 0x3c3   :  { %v5694_v8 = vadd.f32 %v5678_v18, %v22650_v49  ;;  %v5613_v51 = vpop.permute.xlu0 %5612 }
 0x3c4   :  { %5735 = vst.msk [vmem:[#allocation2 + $0x98] sm:$0x7f] %vm5727_vm2, %v5713_v44  ;;  %v5696_v5 = vadd.f32 %v5680_v32, %v22650_v49  ;;  %v5615_v55 = vpop.permute.xlu1 %5614  ;;  %v13343_v44 = vld [vmem:[%s22097_s3 + $0x334] ss:$12 sps:$4 sm:$0xff]  }
 0x3c5   :  { %v5710_v60 = vmax.f32 %v5694_v8, 0.0  ;;  %v5651_v28 = vsel %vm5449_vm1, %v5613_v51, %v5615_v55  ;;  %v13341_v55 = vld [vmem:[%s22097_s3 + $0x330] ss:$12 sps:$4 sm:$0xff]  }
 0x3c6   :  { %v5712_v34 = vmax.f32 %v5696_v5, 0.0  ;;  %v5683_v24 = vmax.f32 %v18850_v33, %v5651_v28 }
 0x3c7   :  { %5730 = vst [vmem:[#allocation2 + $0x80] sm:$0x7f] %v5710_v60  ;;  %v5611_v45 = vpop.permute.xlu0 %5610  ;;  %v5785_v9 = vld [vmem:[#allocation2 + $0x88] sm:$0xff]  ;;  %v13344_v60 = vld [vmem:[%s22097_s3 + $0x338] ss:$12 sps:$4 sm:$0xff]  }
 0x3c8   :  { %5734 = vst [vmem:[#allocation2 + $0x90] sm:$0x7f] %v5712_v34  ;;  %v5699_v16 = vadd.f32 %v5683_v24, %v22648_v38  ;;  %v5650_v20 = vsel %vm5449_vm1, %v5611_v45, %v5613_v51  ;;  %v5621_v29 = vpop.permute.xlu1 %5620  ;;  %v13347_v24 = vld [vmem:[%s22097_s3 + $0x31c] ss:$12 sps:$4 sm:$0xff]   ;;  %v22652_v45 = vmax.f32 %v22617_v50, %v18872_v3  ;;  %v13351_v50 = vld [vmem:[%s22097_s3 + $0x304] ss:$12 sps:$4 sm:$0xff]  }
 0x3c9   :  { %v5682_v25 = vmax.f32 %v5550_v46, %v5650_v20  ;;  %v13337_v46 = vld [vmem:[%s22097_s3 + $0x348] ss:$12 sps:$4 sm:$0xff]  }
 0x3ca   :  { %v5715_v30 = vmax.f32 %v5699_v16, 0.0 }
 0x3cb   :  { %v5787_v15 = vld [vmem:[#allocation2 + $0x98] sm:$0xff]  ;;  %v5698_v26 = vadd.f32 %v5682_v25, %v22650_v49  ;;  %v5619_v59 = vpop.permute.xlu0 %5618 }
 0x3cc   :  { %v19024_v17 = vpack.c.bf16 %v5787_v15, %v5785_v9  ;;  %5739 = vst.msk [vmem:[#allocation2 + $0xa8] sm:$0x7f] %vm5727_vm2, %v5715_v30  ;;  %v5653_v33 = vsel %vm5449_vm1, %v5619_v59, %v5621_v29  ;;  %v5617_v11 = vpop.permute.xlu1 %5616  ;;  %v13345_v30 = vld [vmem:[%s22097_s3 + $0x318] ss:$12 sps:$4 sm:$0xff]   ;;  %v13348_v9 = vld [vmem:[%s22097_s3 + $0x320] ss:$12 sps:$4 sm:$0xff]  }
 0x3cd   :  { %v5714_v52 = vmax.f32 %v5698_v26, 0.0  ;;  %v5685_v57 = vmax.f32 %v18915_v47, %v5653_v33  ;;  %v5652_v58 = vsel %vm5449_vm1, %v5617_v11, %v5619_v59 }
 0x3ce   :  { %v5684_v36 = vmax.f32 %v22651_v41, %v5652_v58  ;;  %12240 = vmatprep.mubr.msk.bf16.mxu0 %vm34_vm0, %v19024_v17  ;;  %12244 = vmatprep.mubr.msk.bf16.mxu1 %vm34_vm0, %v19024_v17  ;;  %v5784_v14 = vld [vmem:[#allocation2 + $0x80] sm:$0xff] }
 0x3cf   :  { %v5786_v56 = vld [vmem:[#allocation2 + $0x90] sm:$0xff]  ;;  %5738 = vst [vmem:[#allocation2 + $0xa0] sm:$0x7f] %v5714_v52  ;;  %v5701_v47 = vadd.f32 %v5685_v57, %v22648_v38  ;;  %v5625_v31 = vpop.permute.xlu0 %5624  ;;  %v13349_v58 = vld [vmem:[%s22097_s3 + $0x300] ss:$12 sps:$4 sm:$0xff]  }
 0x3d0   :  { %v19044_v4 = vpack.c.bf16 %v5786_v56, %v5784_v14  ;;  %v5700_v18 = vadd.f32 %v5684_v36, %v22650_v49  ;;  %v5627_v0 = vpop.permute.xlu1 %5626  ;;  %v13352_v56 = vld [vmem:[%s22097_s3 + $0x308] ss:$12 sps:$4 sm:$0xff]  }
 0x3d1   :  { %v5717_v10 = vmax.f32 %v5701_v47, 0.0  ;;  %v5655_v32 = vsel %vm5449_vm1, %v5625_v31, %v5627_v0  ;;  %v13355_v47 = vld [vmem:[%s22097_s3 + $0x2ec] ss:$12 sps:$4 sm:$0xff]  }
 0x3d2   :  { %v5716_v8 = vmax.f32 %v5700_v18, 0.0  ;;  %v5687_v51 = vmax.f32 %v18906_v7, %v5655_v32  ;;  %6564 = vmatmul.mubr.bf16.vlgmr.msra.gmra.mxu0 %v19044_v4  ;;  %6637 = vmatmul.mubr.bf16.vlgmr.msra.gmra.mxu1 %v19044_v4  ;;  %v13356_v32 = vld [vmem:[%s22097_s3 + $0x2f0] ss:$12 sps:$4 sm:$0xff]  }
 0x3d3   :  { %5743 = vst.msk [vmem:[#allocation2 + $0xb8] sm:$0x7f] %vm5727_vm2, %v5717_v10  ;;  %v5623_v5 = vpop.permute.xlu0 %5622  ;;  %6975 = vmatpush1.bf16.msra.mxu0 %v13337_v46  ;;  %7048 = vmatpush1.bf16.msra.mxu1 %v13340_v35  ;;  %v5789_v11 = vld [vmem:[#allocation2 + $0xa8] sm:$0xff] }
 0x3d4   :  { %5742 = vst [vmem:[#allocation2 + $0xb0] sm:$0x7f] %v5716_v8  ;;  %v5703_v7 = vadd.f32 %v5687_v51, %v22648_v38  ;;  %v5654_v28 = vsel %vm5449_vm1, %v5623_v5, %v5625_v31  ;;  %v5633_v34 = vpop.permute.xlu1 %5632  ;;  %6976 = vmatprep.subr.bf16.mxu0 %v13343_v44  ;;  %7049 = vmatprep.subr.bf16.mxu1 %v22273_v63  ;;  %v13353_v10 = vld [vmem:[%s22097_s3 + $0x2e8] ss:$12 sps:$4 sm:$0xff]  }
 0x3d5   :  { %v5686_v16 = vmax.f32 %v22652_v45, %v5654_v28  ;;  %v13359_v51 = vld [vmem:[%s22097_s3 + $0x2d4] ss:$12 sps:$4 sm:$0xff]   ;;  %v13357_v28 = vld [vmem:[%s22097_s3 + $0x2d0] ss:$12 sps:$4 sm:$0xff]  }
 0x3d6   :  { %v5719_v20 = vmax.f32 %v5703_v7, 0.0  ;;  %v5788_v41 = vld [vmem:[#allocation2 + $0xa0] sm:$0xff] }
 0x3d7   :  { %v5702_v29 = vadd.f32 %v5686_v16, %v22650_v49  ;;  %v5631_v25 = vpop.permute.xlu0 %5630  ;;  %6977 = vmatpush1.bf16.msra.mxu0 %v13341_v55  ;;  %7050 = vmatpush1.bf16.msra.mxu1 %v13344_v60 }
 0x3d8   :  { %5747 = vst.msk [vmem:[#allocation2 + $0xc8] sm:$0x7f] %vm5727_vm2, %v5719_v20  ;;  %v5657_v15 = vsel %vm5449_vm1, %v5631_v25, %v5633_v34  ;;  %v5629_v3 = vpop.permute.xlu1 %5628  ;;  %6978 = vmatprep.subr.bf16.mxu0 %v13347_v24  ;;  %7051 = vmatprep.subr.bf16.mxu1 %v22273_v63  ;;  %v13360_v34 = vld [vmem:[%s22097_s3 + $0x2d8] ss:$12 sps:$4 sm:$0xff]  }
 0x3d9   :  { %v5718_v26 = vmax.f32 %v5702_v29, 0.0  ;;  %v5689_v59 = vmax.f32 %v18961_v61, %v5657_v15  ;;  %v5656_v33 = vsel %vm5449_vm1, %v5629_v3, %v5631_v25  ;;  %v13361_v15 = vld [vmem:[%s22097_s3 + $0x2b8] ss:$12 sps:$4 sm:$0xff]  }
 0x3da   :  { %v5791_v52 = vld [vmem:[#allocation2 + $0xb8] sm:$0xff]  ;;  %v5688_v57 = vmax.f32 %v5562_v48, %v5656_v33  ;;  %v13368_v33 = vld [vmem:[%s22097_s3 + $0x2a8] ss:$12 sps:$4 sm:$0xff]  }
 0x3db   :  { %v19091_v36 = vpack.c.bf16 %v5791_v52, %v5789_v11  ;;  %v5790_v46 = vld [vmem:[#allocation2 + $0xb0] sm:$0xff]  ;;  %5746 = vst [vmem:[#allocation2 + $0xc0] sm:$0x7f] %v5718_v26  ;;  %v5705_v14 = vadd.f32 %v5689_v59, %v22648_v38  ;;  %v5637_v61 = vpop.permute.xlu0 %5636  ;;  %6979 = vmatpush1.bf16.msra.mxu0 %v13345_v30  ;;  %7052 = vmatpush1.bf16.msra.mxu1 %v13348_v9  ;;  %v13371_v11 = vld [vmem:[%s22097_s3 + $0x3dc] ss:$12 sps:$4 sm:$0xff]  }
 0x3dc   :  { %v19097_v23 = vpack.c.bf16 %v5790_v46, %v5788_v41  ;;  %v5704_v40 = vadd.f32 %v5688_v57, %v22650_v49  ;;  %v5639_v48 = vpop.permute.xlu1 %5638  ;;  %6980 = vmatprep.subr.bf16.mxu0 %v13351_v50  ;;  %7053 = vmatprep.subr.bf16.mxu1 %v22273_v63  ;;  %v13369_v52 = vld [vmem:[%s22097_s3 + $0x3d8] ss:$12 sps:$4 sm:$0xff]   ;;  %v13372_v41 = vld [vmem:[%s22097_s3 + $0x3e0] ss:$12 sps:$4 sm:$0xff]  }
 0x3dd   :  { %v5721_v31 = vmax.f32 %v5705_v14, 0.0  ;;  %v5659_v35 = vsel %vm5449_vm1, %v5637_v61, %v5639_v48  ;;  %12241 = vmatprep.mubr.msk.bf16.mxu0 %vm34_vm0, %v19091_v36  ;;  %12245 = vmatprep.mubr.msk.bf16.mxu1 %vm34_vm0, %v19091_v36  ;;  %v13375_v14 = vld [vmem:[%s22097_s3 + $0x3c4] ss:$12 sps:$4 sm:$0xff]   ;;  %v13376_v48 = vld [vmem:[%s22097_s3 + $0x3c8] ss:$12 sps:$4 sm:$0xff]  }
 0x3de   :  { %v5720_v18 = vmax.f32 %v5704_v40, 0.0  ;;  %v5691_v0 = vmax.f32 %v18942_v2, %v5659_v35  ;;  %6574 = vmatmul.mubr.bf16.gmra.mxu0 %v19097_v23  ;;  %6645 = vmatmul.mubr.bf16.gmra.mxu1 %v19097_v23  ;;  %v13377_v35 = vld [vmem:[%s22097_s3 + $0x3a8] ss:$12 sps:$4 sm:$0xff]  }
 0x3df   :  { %5751 = vst.msk [vmem:[#allocation2 + $0xd8] sm:$0x7f] %vm5727_vm2, %v5721_v31  ;;  %v5643_v44 = vpop.permute.xlu0 %5642  ;;  %6981 = vmatpush1.bf16.msra.mxu0 %v13349_v58  ;;  %7054 = vmatpush1.bf16.msra.mxu1 %v13352_v56  ;;  %v5793_v25 = vld [vmem:[#allocation2 + $0xc8] sm:$0xff] }
 0x3e0   :  { %5750 = vst [vmem:[#allocation2 + $0xd0] sm:$0x7f] %v5720_v18  ;;  %v5707_v2 = vadd.f32 %v5691_v0, %v22648_v38  ;;  %v5645_v8 = vpop.permute.xlu1 %5644  ;;  %6982 = vmatprep.subr.bf16.mxu0 %v13355_v47  ;;  %7055 = vmatprep.subr.bf16.mxu1 %v22273_v63  ;;  %v13379_v31 = vld [vmem:[%s22097_s3 + $0x3ac] ss:$12 sps:$4 sm:$0xff]   ;;  %v13380_v18 = vld [vmem:[%s22097_s3 + $0x3b0] ss:$12 sps:$4 sm:$0xff]  }
 0x3e1   :  { %v5661_v5 = vsel %vm5449_vm1, %v5643_v44, %v5645_v8  ;;  %v22655_v0 = vld [vmem:[#allocation59_spill] sm:$0xff] }
 0x3e2   :  { %v5723_v55 = vmax.f32 %v5707_v2, 0.0  ;;  %v5693_v60 = vmax.f32 %v18976_v12, %v5661_v5  ;;  %v13363_v12 = vld [vmem:[%s22097_s3 + $0x2bc] ss:$12 sps:$4 sm:$0xff]   ;;  %v5792_v3 = vld [vmem:[#allocation2 + $0xc0] sm:$0xff] }
 0x3e3   :  { %v5635_v7 = vpop.permute.xlu0 %5634  ;;  %6983 = vmatpush1.bf16.msra.mxu0 %v13353_v10  ;;  %7056 = vmatpush1.bf16.msra.mxu1 %v13356_v32  ;;  %v13381_v10 = vld [vmem:[%s22097_s3 + $0x390] ss:$12 sps:$4 sm:$0xff]   ;;  %v13384_v32 = vld [vmem:[%s22097_s3 + $0x398] ss:$12 sps:$4 sm:$0xff]  }
 0x3e4   :  { %5755 = vst.msk [vmem:[#allocation2 + $0xe8] sm:$0x7f] %vm5727_vm2, %v5723_v55  ;;  %v5709_v24 = vadd.f32 %v5693_v60, %v22648_v38  ;;  %v5658_v45 = vsel %vm5449_vm1, %v5635_v7, %v5637_v61  ;;  %v5641_v16 = vpop.permute.xlu1 %5640  ;;  %6984 = vmatprep.subr.bf16.mxu0 %v13359_v51  ;;  %7057 = vmatprep.subr.bf16.mxu1 %v22273_v63  ;;  %v13373_v61 = vld [vmem:[%s22097_s3 + $0x3c0] ss:$12 sps:$4 sm:$0xff]   ;;  %v13387_v2 = vld [vmem:[%s22097_s3 + $0x37c] ss:$12 sps:$4 sm:$0xff]  }
 0x3e5   :  { %v5690_v20 = vmax.f32 %v5566_v21, %v5658_v45  ;;  %v5660_v29 = vsel %vm5449_vm1, %v5641_v16, %v5643_v44  ;;  %v13383_v44 = vld [vmem:[%s22097_s3 + $0x394] ss:$12 sps:$4 sm:$0xff]   ;;  %v13385_v8 = vld [vmem:[%s22097_s3 + $0x378] ss:$12 sps:$4 sm:$0xff]   ;;  %v13395_v7 = vld [vmem:[%s22097_s3 + $0x49c] ss:$12 sps:$4 sm:$0xff]  }
 0x3e6   :  { %v5795_v30 = vld [vmem:[#allocation2 + $0xd8] sm:$0xff]  ;;  %v5725_v9 = vmax.f32 %v5709_v24, 0.0  ;;  %v5692_v38 = vmax.f32 %v5570_v43, %v5660_v29  ;;  %v13388_v51 = vld [vmem:[%s22097_s3 + $0x380] ss:$12 sps:$4 sm:$0xff]   ;;  %v13391_v5 = vld [vmem:[%s22097_s3 + $0x364] ss:$12 sps:$4 sm:$0xff]  }
 0x3e7   :  { %v19149_v50 = vpack.c.bf16 %v5795_v30, %v5793_v25  ;;  %v5794_v26 = vld [vmem:[#allocation2 + $0xd0] sm:$0xff]  ;;  %v5706_v19 = vadd.f32 %v5690_v20, %v22650_v49  ;;  %6985 = vmatpush1.bf16.msra.mxu0 %v13357_v28  ;;  %7058 = vmatpush1.bf16.msra.mxu1 %v13360_v34  ;;  %v13389_v55 = vld [vmem:[%s22097_s3 + $0x360] ss:$12 sps:$4 sm:$0xff]   ;;  %v13393_v28 = vld [vmem:[%s22097_s3 + $0x498] ss:$12 sps:$4 sm:$0xff]  }
 0x3e8   :  { %v19155_v21 = vpack.c.bf16 %v5794_v26, %v5792_v3  ;;  %5759 = vst.msk [vmem:[#allocation2 + $0xf8] sm:$0x7f] %vm5727_vm2, %v5725_v9  ;;  %v5708_v62 = vadd.f32 %v5692_v38, %v22650_v49  ;;  %6986 = vmatprep.subr.bf16.mxu0 %v13363_v12  ;;  %7059 = vmatprep.subr.bf16.mxu1 %v22273_v63  ;;  %v13365_v49 = vld [vmem:[%s22097_s3 + $0x2a0] ss:$12 sps:$4 sm:$0xff]   ;;  %v13392_v60 = vld [vmem:[%s22097_s3 + $0x368] ss:$12 sps:$4 sm:$0xff]  }
 0x3e9   :  { %v5722_v43 = vmax.f32 %v5706_v19, 0.0  ;;  %12242 = vmatprep.mubr.msk.bf16.mxu0 %vm34_vm0, %v19149_v50  ;;  %12246 = vmatprep.mubr.msk.bf16.mxu1 %vm34_vm0, %v19149_v50  ;;  %v13396_v34 = vld [vmem:[%s22097_s3 + $0x4a0] ss:$12 sps:$4 sm:$0xff]   ;;  %v13399_v24 = vld [vmem:[%s22097_s3 + $0x484] ss:$12 sps:$4 sm:$0xff]  }
 0x3ea   :  { %22653 = vst [vmem:[#allocation46_spill] sm:$0xff] %v19155_v21  ;;  %v5724_v59 = vmax.f32 %v5708_v62, 0.0  ;;  %6584 = vmatmul.mubr.bf16.gmra.mxu0 %v19155_v21  ;;  %6653 = vmatmul.mubr.bf16.gmra.mxu1 %v19155_v21  ;;  %v22656_v45 = vld [vmem:[#allocation35_spill] sm:$0xff]  ;;  %v13400_v20 = vld [vmem:[%s22097_s3 + $0x488] ss:$12 sps:$4 sm:$0xff]  }
 0x3eb   :  { %5754 = vst [vmem:[#allocation2 + $0xe0] sm:$0x7f] %v5722_v43  ;;  %6987 = vmatpush1.bf16.msra.mxu0 %v13361_v15  ;;  %7060 = vmatpush1.bf16.msra.mxu1 %v13364_v13  ;;  %v5797_v57 = vld [vmem:[#allocation2 + $0xe8] sm:$0xff]  ;;  %v22657_v16 = vld [vmem:[#allocation7_spill] sm:$0xff]  ;;  %v13404_v30 = vld [vmem:[%s22097_s3 + $0x470] ss:$12 sps:$4 sm:$0xff]  }
 0x3ec   :  { %5758 = vst [vmem:[#allocation2 + $0xf0] sm:$0x7f] %v5724_v59  ;;  %6988 = vmatprep.subr.bf16.mxu0 %v13367_v1  ;;  %7061 = vmatprep.subr.bf16.mxu1 %v22273_v63  ;;  %v13397_v12 = vld [vmem:[%s22097_s3 + $0x480] ss:$12 sps:$4 sm:$0xff]   ;;  %v13401_v25 = vld [vmem:[%s22097_s3 + $0x468] ss:$12 sps:$4 sm:$0xff]  }
 0x3ed   :  { %v13403_v29 = vld [vmem:[%s22097_s3 + $0x46c] ss:$12 sps:$4 sm:$0xff]   ;;  %v13407_v9 = vld [vmem:[%s22097_s3 + $0x454] ss:$12 sps:$4 sm:$0xff]   ;;  %v13405_v3 = vld [vmem:[%s22097_s3 + $0x450] ss:$12 sps:$4 sm:$0xff]  }
 0x3ee   :  { %v22658_v38 = vld [vmem:[#allocation13_spill] sm:$0xff]  ;;  %v22659_v15 = vld [vmem:[#allocation18_spill] sm:$0xff]  ;;  %v13412_v62 = vld [vmem:[%s22097_s3 + $0x440] ss:$12 sps:$4 sm:$0xff]  }
 0x3ef   :  { %v5799_v58 = vld [vmem:[#allocation2 + $0xf8] sm:$0xff]  ;;  %6989 = vmatpush1.bf16.msra.mxu0 %v13365_v49  ;;  %7062 = vmatpush1.bf16.msra.mxu1 %v13368_v33  ;;  %v13415_v1 = vld [vmem:[%s22097_s3 + $0x424] ss:$12 sps:$4 sm:$0xff]   ;;  %v22660_v43 = vld [vmem:[#allocation20_spill] sm:$0xff] }
 0x3f0   :  { %v19185_v46 = vpack.c.bf16 %v5799_v58, %v5797_v57  ;;  %6994 = vmatprep.subr.bf16.mxu0 %v13371_v11  ;;  %7067 = vmatprep.subr.bf16.mxu1 %v22273_v63  ;;  %v13408_v26 = vld [vmem:[%s22097_s3 + $0x458] ss:$12 sps:$4 sm:$0xff]   ;;  %v13411_v19 = vld [vmem:[%s22097_s3 + $0x43c] ss:$12 sps:$4 sm:$0xff]   ;;  %v22661_v59 = vld [vmem:[#allocation21_spill] sm:$0xff] }
 0x3f1   :  { %v13409_v13 = vld [vmem:[%s22097_s3 + $0x438] ss:$12 sps:$4 sm:$0xff]   ;;  %v13413_v49 = vld [vmem:[%s22097_s3 + $0x420] ss:$12 sps:$4 sm:$0xff]   ;;  %v13416_v33 = vld [vmem:[%s22097_s3 + $0x428] ss:$12 sps:$4 sm:$0xff]  }
 0x3f2   :  { %22654 = vst [vmem:[#allocation57_spill] sm:$0xff] %v19185_v46  ;;  %12243 = vmatprep.mubr.msk.bf16.mxu0 %vm34_vm0, %v19185_v46  ;;  %12247 = vmatprep.mubr.msk.bf16.mxu1 %vm34_vm0, %v19185_v46  ;;  %v5796_v56 = vld [vmem:[#allocation2 + $0xe0] sm:$0xff]  ;;  %v13419_v11 = vld [vmem:[%s22097_s3 + $0x40c] ss:$12 sps:$4 sm:$0xff]   ;;  %v13420_v57 = vld [vmem:[%s22097_s3 + $0x410] ss:$12 sps:$4 sm:$0xff]  }
 0x3f3   :  { %v5798_v40 = vld [vmem:[#allocation2 + $0xf0] sm:$0xff]  ;;  %6995 = vmatpush2.bf16.msra.mxu0 %v13369_v52  ;;  %7068 = vmatpush2.bf16.msra.mxu1 %v13372_v41  ;;  %v22662_v41 = vld [vmem:[#allocation47_spill] sm:$0xff] }
 0x3f4   :  { %v19201_v47 = vpack.c.bf16 %v5798_v40, %v5796_v56  ;;  %6996 = vmatprep.subr.bf16.mxu0 %v13375_v14  ;;  %7069 = vmatprep.subr.bf16.mxu1 %v22273_v63  ;;  %v13417_v52 = vld [vmem:[%s22097_s3 + $0x408] ss:$12 sps:$4 sm:$0xff]   ;;  %v13421_v14 = vld [vmem:[%s22097_s3 + $0x3f0] ss:$12 sps:$4 sm:$0xff]   ;;  %v13427_v56 = vld [vmem:[%s22097_s3 + $0x52c] ss:$12 sps:$4 sm:$0xff]  }
 0x3f5   :  { %v13423_v58 = vld [vmem:[%s22097_s3 + $0x3f4] ss:$12 sps:$4 sm:$0xff]  }
 0x3f6   :  { %6594 = vmatmul.mubr.bf16.gmra.mxu0 %v19201_v47  ;;  %6661 = vmatmul.mubr.bf16.gmra.mxu1 %v19201_v47  ;;  %v13425_v40 = vld [vmem:[%s22097_s3 + $0x528] ss:$12 sps:$4 sm:$0xff]  }
 0x3f7   :  { %6997 = vmatpush2.bf16.msra.mxu0 %v13373_v61  ;;  %7070 = vmatpush2.bf16.msra.mxu1 %v13376_v48  ;;  %v13424_v61 = vld [vmem:[%s22097_s3 + $0x3f8] ss:$12 sps:$4 sm:$0xff]   ;;  %v13428_v48 = vld [vmem:[%s22097_s3 + $0x530] ss:$12 sps:$4 sm:$0xff]  }
 0x3f8   :  { %12346 = vmatprep.mubr.msk.bf16.mxu0 %vm34_vm0, %v22655_v0  ;;  %12350 = vmatprep.mubr.msk.bf16.mxu1 %vm34_vm0, %v22655_v0 }
 0x3f9   :  { %6998 = vmatprep.subr.bf16.mxu0 %v13379_v31  ;;  %7071 = vmatprep.subr.bf16.mxu1 %v22273_v63  ;;  %v13431_v31 = vld [vmem:[%s22097_s3 + $0x514] ss:$12 sps:$4 sm:$0xff]  }
 0x3fb   :  { %6999 = vmatpush2.bf16.msra.mxu0 %v13377_v35  ;;  %7072 = vmatpush2.bf16.msra.mxu1 %v13380_v18  ;;  %v13429_v35 = vld [vmem:[%s22097_s3 + $0x510] ss:$12 sps:$4 sm:$0xff]   ;;  %v13432_v18 = vld [vmem:[%s22097_s3 + $0x518] ss:$12 sps:$4 sm:$0xff]  }
 0x3fc   :  { %7000 = vmatprep.subr.bf16.mxu0 %v13383_v44  ;;  %7073 = vmatprep.subr.bf16.mxu1 %v22273_v63  ;;  %v13435_v44 = vld [vmem:[%s22097_s3 + $0x4fc] ss:$12 sps:$4 sm:$0xff]  }
 0x3ff   :  { %7001 = vmatpush2.bf16.msra.mxu0 %v13381_v10  ;;  %7074 = vmatpush2.bf16.msra.mxu1 %v13384_v32  ;;  %v13433_v10 = vld [vmem:[%s22097_s3 + $0x4f8] ss:$12 sps:$4 sm:$0xff]   ;;  %v13436_v32 = vld [vmem:[%s22097_s3 + $0x500] ss:$12 sps:$4 sm:$0xff]  }
 0x400   :  { %7002 = vmatprep.subr.bf16.mxu0 %v13387_v2  ;;  %7075 = vmatprep.subr.bf16.mxu1 %v22273_v63  ;;  %v13439_v2 = vld [vmem:[%s22097_s3 + $0x4e4] ss:$12 sps:$4 sm:$0xff]  }
 0x403   :  { %7003 = vmatpush2.bf16.msra.mxu0 %v13385_v8  ;;  %7076 = vmatpush2.bf16.msra.mxu1 %v13388_v51  ;;  %v13437_v8 = vld [vmem:[%s22097_s3 + $0x4e0] ss:$12 sps:$4 sm:$0xff]   ;;  %v13440_v51 = vld [vmem:[%s22097_s3 + $0x4e8] ss:$12 sps:$4 sm:$0xff]  }
 0x404   :  { %7004 = vmatprep.subr.bf16.mxu0 %v13391_v5  ;;  %7077 = vmatprep.subr.bf16.mxu1 %v22273_v63  ;;  %v13443_v5 = vld [vmem:[%s22097_s3 + $0x4cc] ss:$12 sps:$4 sm:$0xff]  }
 0x407   :  { %7005 = vmatpush2.bf16.msra.mxu0 %v13389_v55  ;;  %7078 = vmatpush2.bf16.msra.mxu1 %v13392_v60  ;;  %v13441_v55 = vld [vmem:[%s22097_s3 + $0x4c8] ss:$12 sps:$4 sm:$0xff]   ;;  %v13444_v60 = vld [vmem:[%s22097_s3 + $0x4d0] ss:$12 sps:$4 sm:$0xff]  }
 0x408   :  { %7489 = vmatprep.subr.bf16.mxu0 %v13395_v7  ;;  %7562 = vmatprep.subr.bf16.mxu1 %v22273_v63  ;;  %v13447_v7 = vld [vmem:[%s22097_s3 + $0x4b4] ss:$12 sps:$4 sm:$0xff]  }
 0x40a   :  { %7007 = vmatmul.mubr.bf16.vlgmr.msra.gmra.mxu0 %v22656_v45  ;;  %7080 = vmatmul.mubr.bf16.vlgmr.msra.gmra.mxu1 %v22656_v45 }
 0x40b   :  { %12347 = vmatprep.mubr.msk.bf16.mxu0 %vm34_vm0, %v22657_v16  ;;  %12351 = vmatprep.mubr.msk.bf16.mxu1 %vm34_vm0, %v22657_v16 }
 0x40c   :  { %7490 = vmatpush1.bf16.msra.mxu0 %v13393_v28  ;;  %7563 = vmatpush1.bf16.msra.mxu1 %v13396_v34  ;;  %v13445_v28 = vld [vmem:[%s22097_s3 + $0x4b0] ss:$12 sps:$4 sm:$0xff]   ;;  %v13448_v34 = vld [vmem:[%s22097_s3 + $0x4b8] ss:$12 sps:$4 sm:$0xff]  }
 0x40d   :  { %7491 = vmatprep.subr.bf16.mxu0 %v13399_v24  ;;  %7564 = vmatprep.subr.bf16.mxu1 %v22273_v63  ;;  %v13451_v24 = vld [vmem:[%s22097_s3 + $0x5ec] ss:$12 sps:$4 sm:$0xff]  }
 0x410   :  { %7492 = vmatpush1.bf16.msra.mxu0 %v13397_v12  ;;  %7565 = vmatpush1.bf16.msra.mxu1 %v13400_v20  ;;  %v13449_v12 = vld [vmem:[%s22097_s3 + $0x5e8] ss:$12 sps:$4 sm:$0xff]   ;;  %v13452_v20 = vld [vmem:[%s22097_s3 + $0x5f0] ss:$12 sps:$4 sm:$0xff]  }
 0x411   :  { %7493 = vmatprep.subr.bf16.mxu0 %v13403_v29  ;;  %7566 = vmatprep.subr.bf16.mxu1 %v22273_v63  ;;  %v13455_v29 = vld [vmem:[%s22097_s3 + $0x5d4] ss:$12 sps:$4 sm:$0xff]  }
 0x412   :  { %7017 = vmatmul.mubr.bf16.gmra.mxu0 %v22658_v38  ;;  %7088 = vmatmul.mubr.bf16.gmra.mxu1 %v22658_v38 }
 0x413   :  { %12348 = vmatprep.mubr.msk.bf16.mxu0 %vm34_vm0, %v22659_v15  ;;  %12352 = vmatprep.mubr.msk.bf16.mxu1 %vm34_vm0, %v22659_v15 }
 0x414   :  { %7494 = vmatpush1.bf16.msra.mxu0 %v13401_v25  ;;  %7567 = vmatpush1.bf16.msra.mxu1 %v13404_v30  ;;  %v13453_v25 = vld [vmem:[%s22097_s3 + $0x5d0] ss:$12 sps:$4 sm:$0xff]   ;;  %v13456_v30 = vld [vmem:[%s22097_s3 + $0x5d8] ss:$12 sps:$4 sm:$0xff]  }
 0x415   :  { %7495 = vmatprep.subr.bf16.mxu0 %v13407_v9  ;;  %7568 = vmatprep.subr.bf16.mxu1 %v22273_v63  ;;  %v13459_v9 = vld [vmem:[%s22097_s3 + $0x5bc] ss:$12 sps:$4 sm:$0xff]  }
 0x418   :  { %7496 = vmatpush1.bf16.msra.mxu0 %v13405_v3  ;;  %7569 = vmatpush1.bf16.msra.mxu1 %v13408_v26  ;;  %v13457_v3 = vld [vmem:[%s22097_s3 + $0x5b8] ss:$12 sps:$4 sm:$0xff]   ;;  %v13460_v26 = vld [vmem:[%s22097_s3 + $0x5c0] ss:$12 sps:$4 sm:$0xff]  }
 0x419   :  { %7497 = vmatprep.subr.bf16.mxu0 %v13411_v19  ;;  %7570 = vmatprep.subr.bf16.mxu1 %v22273_v63  ;;  %v13463_v19 = vld [vmem:[%s22097_s3 + $0x5a4] ss:$12 sps:$4 sm:$0xff]  }
 0x41a   :  { %7027 = vmatmul.mubr.bf16.gmra.mxu0 %v22660_v43  ;;  %7096 = vmatmul.mubr.bf16.gmra.mxu1 %v22660_v43 }
 0x41b   :  { %12349 = vmatprep.mubr.msk.bf16.mxu0 %vm34_vm0, %v22661_v59  ;;  %12353 = vmatprep.mubr.msk.bf16.mxu1 %vm34_vm0, %v22661_v59 }
 0x41c   :  { %7498 = vmatpush1.bf16.msra.mxu0 %v13409_v13  ;;  %7571 = vmatpush1.bf16.msra.mxu1 %v13412_v62  ;;  %v13461_v13 = vld [vmem:[%s22097_s3 + $0x5a0] ss:$12 sps:$4 sm:$0xff]   ;;  %v13464_v62 = vld [vmem:[%s22097_s3 + $0x5a8] ss:$12 sps:$4 sm:$0xff]  }
 0x41d   :  { %7499 = vmatprep.subr.bf16.mxu0 %v13415_v1  ;;  %7572 = vmatprep.subr.bf16.mxu1 %v22273_v63  ;;  %v13467_v1 = vld [vmem:[%s22097_s3 + $0x58c] ss:$12 sps:$4 sm:$0xff]  }
 0x420   :  { %7500 = vmatpush1.bf16.msra.mxu0 %v13413_v49  ;;  %7573 = vmatpush1.bf16.msra.mxu1 %v13416_v33  ;;  %v13465_v49 = vld [vmem:[%s22097_s3 + $0x588] ss:$12 sps:$4 sm:$0xff]   ;;  %v13468_v33 = vld [vmem:[%s22097_s3 + $0x590] ss:$12 sps:$4 sm:$0xff]  }
 0x421   :  { %7501 = vmatprep.subr.bf16.mxu0 %v13419_v11  ;;  %7574 = vmatprep.subr.bf16.mxu1 %v22273_v63  ;;  %v13471_v11 = vld [vmem:[%s22097_s3 + $0x574] ss:$12 sps:$4 sm:$0xff]  }
 0x422   :  { %7037 = vmatmul.mubr.bf16.gmra.mxu0 %v22662_v41  ;;  %7104 = vmatmul.mubr.bf16.gmra.mxu1 %v22662_v41 }
 0x423   :  { %12452 = vmatprep.mubr.msk.bf16.mxu0 %vm34_vm0, %v19024_v17  ;;  %12456 = vmatprep.mubr.msk.bf16.mxu1 %vm34_vm0, %v19024_v17 }
 0x424   :  { %7502 = vmatpush1.bf16.msra.mxu0 %v13417_v52  ;;  %7575 = vmatpush1.bf16.msra.mxu1 %v13420_v57  ;;  %v19481_v52 = vpop.f32.mrf.mxu0  ;;  %v13469_v57 = vld [vmem:[%s22097_s3 + $0x570] ss:$12 sps:$4 sm:$0xff]  }
 0x425   :  { %7503 = vmatprep.subr.bf16.mxu0 %v13423_v58  ;;  %7576 = vmatprep.subr.bf16.mxu1 %v22273_v63  ;;  %v13472_v58 = vld [vmem:[%s22097_s3 + $0x578] ss:$12 sps:$4 sm:$0xff]  }
 0x428   :  { %7504 = vmatpush1.bf16.msra.mxu0 %v13421_v14  ;;  %7577 = vmatpush1.bf16.msra.mxu1 %v13424_v61  ;;  %v13475_v14 = vld [vmem:[%s22097_s3 + $0x55c] ss:$12 sps:$4 sm:$0xff]   ;;  %v19497_v61 = vpop.f32.mrf.mxu0 }
 0x429   :  { %7509 = vmatprep.subr.bf16.mxu0 %v13427_v56  ;;  %7582 = vmatprep.subr.bf16.mxu1 %v22273_v63  ;;  %v13473_v56 = vld [vmem:[%s22097_s3 + $0x558] ss:$12 sps:$4 sm:$0xff]  }
 0x42c   :  { %7510 = vmatpush2.bf16.msra.mxu0 %v13425_v40  ;;  %7583 = vmatpush2.bf16.msra.mxu1 %v13428_v48  ;;  %v13476_v40 = vld [vmem:[%s22097_s3 + $0x560] ss:$12 sps:$4 sm:$0xff]   ;;  %v13479_v48 = vld [vmem:[%s22097_s3 + $0x544] ss:$12 sps:$4 sm:$0xff]  }
 0x42d   :  { %7511 = vmatprep.subr.bf16.mxu0 %v13431_v31  ;;  %7584 = vmatprep.subr.bf16.mxu1 %v22273_v63  ;;  %v19511_v31 = vpop.f32.mrf.mxu0 }
 0x430   :  { %7512 = vmatpush2.bf16.msra.mxu0 %v13429_v35  ;;  %7585 = vmatpush2.bf16.msra.mxu1 %v13432_v18  ;;  %v13477_v35 = vld [vmem:[%s22097_s3 + $0x540] ss:$12 sps:$4 sm:$0xff]   ;;  %v13480_v18 = vld [vmem:[%s22097_s3 + $0x548] ss:$12 sps:$4 sm:$0xff]  }
 0x431   :  { %7513 = vmatprep.subr.bf16.mxu0 %v13435_v44  ;;  %7586 = vmatprep.subr.bf16.mxu1 %v22273_v63  ;;  %v13483_v44 = vld [vmem:[%s22097_s3 + $0x67c] ss:$12 sps:$4 sm:$0xff]  }
 0x434   :  { %7514 = vmatpush2.bf16.msra.mxu0 %v13433_v10  ;;  %7587 = vmatpush2.bf16.msra.mxu1 %v13436_v32  ;;  %v19527_v10 = vpop.f32.mrf.mxu0  ;;  %v13481_v32 = vld [vmem:[%s22097_s3 + $0x678] ss:$12 sps:$4 sm:$0xff]  }
 0x435   :  { %7515 = vmatprep.subr.bf16.mxu0 %v13439_v2  ;;  %7588 = vmatprep.subr.bf16.mxu1 %v22273_v63  ;;  %22663 = vst [vmem:[#allocation44_spill] sm:$0xff] %v19527_v10  ;;  %v13484_v2 = vld [vmem:[%s22097_s3 + $0x680] ss:$12 sps:$4 sm:$0xff]  }
 0x438   :  { %7516 = vmatpush2.bf16.msra.mxu0 %v13437_v8  ;;  %7589 = vmatpush2.bf16.msra.mxu1 %v13440_v51  ;;  %v13487_v8 = vld [vmem:[%s22097_s3 + $0x664] ss:$12 sps:$4 sm:$0xff]   ;;  %v19539_v51 = vpop.f32.mrf.mxu0 }
 0x439   :  { %7517 = vmatprep.subr.bf16.mxu0 %v13443_v5  ;;  %7590 = vmatprep.subr.bf16.mxu1 %v22273_v63  ;;  %v13485_v5 = vld [vmem:[%s22097_s3 + $0x660] ss:$12 sps:$4 sm:$0xff]  }
 0x43c   :  { %7518 = vmatpush2.bf16.msra.mxu0 %v13441_v55  ;;  %7591 = vmatpush2.bf16.msra.mxu1 %v13444_v60  ;;  %v13488_v55 = vld [vmem:[%s22097_s3 + $0x668] ss:$12 sps:$4 sm:$0xff]   ;;  %v13491_v60 = vld [vmem:[%s22097_s3 + $0x64c] ss:$12 sps:$4 sm:$0xff]  }
 0x43d   :  { %7519 = vmatprep.subr.bf16.mxu0 %v13447_v7  ;;  %7592 = vmatprep.subr.bf16.mxu1 %v22273_v63  ;;  %v19551_v7 = vpop.f32.mrf.mxu0 }
 0x440   :  { %7520 = vmatpush2.bf16.msra.mxu0 %v13445_v28  ;;  %7593 = vmatpush2.bf16.msra.mxu1 %v13448_v34  ;;  %v13489_v28 = vld [vmem:[%s22097_s3 + $0x648] ss:$12 sps:$4 sm:$0xff]   ;;  %v13492_v34 = vld [vmem:[%s22097_s3 + $0x650] ss:$12 sps:$4 sm:$0xff]  }
 0x441   :  { %8004 = vmatprep.subr.bf16.mxu0 %v13451_v24  ;;  %8077 = vmatprep.subr.bf16.mxu1 %v22273_v63  ;;  %v13495_v24 = vld [vmem:[%s22097_s3 + $0x634] ss:$12 sps:$4 sm:$0xff]  }
 0x443   :  { %7522 = vmatmul.mubr.bf16.vlgmr.msra.gmra.mxu0 %v19044_v4  ;;  %7595 = vmatmul.mubr.bf16.vlgmr.msra.gmra.mxu1 %v19044_v4 }
 0x444   :  { %12453 = vmatprep.mubr.msk.bf16.mxu0 %vm34_vm0, %v19091_v36  ;;  %12457 = vmatprep.mubr.msk.bf16.mxu1 %vm34_vm0, %v19091_v36 }
 0x445   :  { %8005 = vmatpush1.bf16.msra.mxu0 %v13449_v12  ;;  %8078 = vmatpush1.bf16.msra.mxu1 %v13452_v20  ;;  %v19563_v12 = vpop.f32.mrf.mxu0  ;;  %v13493_v20 = vld [vmem:[%s22097_s3 + $0x630] ss:$12 sps:$4 sm:$0xff]  }
 0x446   :  { %8006 = vmatprep.subr.bf16.mxu0 %v13455_v29  ;;  %8079 = vmatprep.subr.bf16.mxu1 %v22273_v63  ;;  %v13496_v29 = vld [vmem:[%s22097_s3 + $0x638] ss:$12 sps:$4 sm:$0xff]  }
 0x449   :  { %8007 = vmatpush1.bf16.msra.mxu0 %v13453_v25  ;;  %8080 = vmatpush1.bf16.msra.mxu1 %v13456_v30  ;;  %v13499_v25 = vld [vmem:[%s22097_s3 + $0x61c] ss:$12 sps:$4 sm:$0xff]   ;;  %v19575_v30 = vpop.f32.mrf.mxu0 }
 0x44a   :  { %8008 = vmatprep.subr.bf16.mxu0 %v13459_v9  ;;  %8081 = vmatprep.subr.bf16.mxu1 %v22273_v63  ;;  %22664 = vst [vmem:[#allocation39_spill] sm:$0xff] %v19575_v30  ;;  %v13497_v9 = vld [vmem:[%s22097_s3 + $0x618] ss:$12 sps:$4 sm:$0xff]  }
 0x44b   :  { %7532 = vmatmul.mubr.bf16.gmra.mxu0 %v19097_v23  ;;  %7603 = vmatmul.mubr.bf16.gmra.mxu1 %v19097_v23 }
 0x44c   :  { %12454 = vmatprep.mubr.msk.bf16.mxu0 %vm34_vm0, %v19149_v50  ;;  %12458 = vmatprep.mubr.msk.bf16.mxu1 %vm34_vm0, %v19149_v50 }
 0x44d   :  { %8009 = vmatpush1.bf16.msra.mxu0 %v13457_v3  ;;  %8082 = vmatpush1.bf16.msra.mxu1 %v13460_v26  ;;  %v13500_v3 = vld [vmem:[%s22097_s3 + $0x620] ss:$12 sps:$4 sm:$0xff]   ;;  %v13503_v26 = vld [vmem:[%s22097_s3 + $0x604] ss:$12 sps:$4 sm:$0xff]  }
 0x44e   :  { %8010 = vmatprep.subr.bf16.mxu0 %v13463_v19  ;;  %8083 = vmatprep.subr.bf16.mxu1 %v22273_v63  ;;  %v19587_v19 = vpop.f32.mrf.mxu0 }
 0x451   :  { %8011 = vmatpush1.bf16.msra.mxu0 %v13461_v13  ;;  %8084 = vmatpush1.bf16.msra.mxu1 %v13464_v62  ;;  %v13501_v13 = vld [vmem:[%s22097_s3 + $0x600] ss:$12 sps:$4 sm:$0xff]   ;;  %v13504_v62 = vld [vmem:[%s22097_s3 + $0x608] ss:$12 sps:$4 sm:$0xff]  }
 0x452   :  { %8012 = vmatprep.subr.bf16.mxu0 %v13467_v1  ;;  %8085 = vmatprep.subr.bf16.mxu1 %v22273_v63  ;;  %v19596_v1 = vpop.f32.mrf.mxu0 }
 0x453   :  { %7542 = vmatmul.mubr.bf16.gmra.mxu0 %v19155_v21  ;;  %7611 = vmatmul.mubr.bf16.gmra.mxu1 %v19155_v21 }
 0x454   :  { %12455 = vmatprep.mubr.msk.bf16.mxu0 %vm34_vm0, %v19185_v46  ;;  %12459 = vmatprep.mubr.msk.bf16.mxu1 %vm34_vm0, %v19185_v46 }
 0x455   :  { %8013 = vmatpush1.bf16.msra.mxu0 %v13465_v49  ;;  %8086 = vmatpush1.bf16.msra.mxu1 %v13468_v33  ;;  %v14096_v49 = vld [vmem:[%s22097_s3 + $0xac] ss:$12 sps:$4 sm:$0xff]   ;;  %v19602_v33 = vpop.f32.mrf.mxu0 }
 0x456   :  { %8014 = vmatprep.subr.bf16.mxu0 %v13471_v11  ;;  %8087 = vmatprep.subr.bf16.mxu1 %v22273_v63  ;;  %v14097_v11 = vld [vmem:[%s22097_s3 + $0xa8] ss:$12 sps:$4 sm:$0xff]  }
 0x459   :  { %8015 = vmatpush1.bf16.msra.mxu0 %v13469_v57  ;;  %8088 = vmatpush1.bf16.msra.mxu1 %v13472_v58  ;;  %v14098_v57 = vld [vmem:[%s22097_s3 + $0xb0] ss:$12 sps:$4 sm:$0xff]   ;;  %v14099_v58 = vld [vmem:[%s22097_s3 + $0x94] ss:$12 sps:$4 sm:$0xff]  }
 0x45a   :  { %8016 = vmatprep.subr.bf16.mxu0 %v13475_v14  ;;  %8089 = vmatprep.subr.bf16.mxu1 %v22273_v63  ;;  %v19620_v14 = vpop.f32.mrf.mxu0 }
 0x45b   :  { %7552 = vmatmul.mubr.bf16.gmra.mxu0 %v19201_v47  ;;  %7619 = vmatmul.mubr.bf16.gmra.mxu1 %v19201_v47  ;;  %22665 = vst [vmem:[#allocation37_spill] sm:$0xff] %v19620_v14 }
 0x45c   :  { %12558 = vmatprep.mubr.msk.bf16.mxu0 %vm34_vm0, %v22655_v0  ;;  %12562 = vmatprep.mubr.msk.bf16.mxu1 %vm34_vm0, %v22655_v0 }
 0x45d   :  { %8017 = vmatpush1.bf16.msra.mxu0 %v13473_v56  ;;  %8090 = vmatpush1.bf16.msra.mxu1 %v13476_v40  ;;  %v14100_v56 = vld [vmem:[%s22097_s3 + $0x90] ss:$12 sps:$4 sm:$0xff]   ;;  %v14101_v40 = vld [vmem:[%s22097_s3 + $0x98] ss:$12 sps:$4 sm:$0xff]  }
 0x45e   :  { %8018 = vmatprep.subr.bf16.mxu0 %v13479_v48  ;;  %8091 = vmatprep.subr.bf16.mxu1 %v22273_v63  ;;  %v14102_v48 = vld [vmem:[%s22097_s3 + $0x7c] ss:$12 sps:$4 sm:$0xff]  }
 0x461   :  { %8019 = vmatpush1.bf16.msra.mxu0 %v13477_v35  ;;  %8092 = vmatpush1.bf16.msra.mxu1 %v13480_v18  ;;  %v19632_v35 = vpop.f32.mrf.mxu0  ;;  %v14103_v18 = vld [vmem:[%s22097_s3 + $0x78] ss:$12 sps:$4 sm:$0xff]  }
 0x462   :  { %8024 = vmatprep.subr.bf16.mxu0 %v13483_v44  ;;  %8097 = vmatprep.subr.bf16.mxu1 %v22273_v63  ;;  %v14104_v44 = vld [vmem:[%s22097_s3 + $0x80] ss:$12 sps:$4 sm:$0xff]  }
 0x465   :  { %8025 = vmatpush2.bf16.msra.mxu0 %v13481_v32  ;;  %8098 = vmatpush2.bf16.msra.mxu1 %v13484_v2  ;;  %v14105_v32 = vld [vmem:[%s22097_s3 + $0x64] ss:$12 sps:$4 sm:$0xff]   ;;  %v19650_v2 = vpop.f32.mrf.mxu0 }
 0x466   :  { %8026 = vmatprep.subr.bf16.mxu0 %v13487_v8  ;;  %8099 = vmatprep.subr.bf16.mxu1 %v22273_v63  ;;  %v14106_v8 = vld [vmem:[%s22097_s3 + $0x60] ss:$12 sps:$4 sm:$0xff]  }
 0x469   :  { %8027 = vmatpush2.bf16.msra.mxu0 %v13485_v5  ;;  %8100 = vmatpush2.bf16.msra.mxu1 %v13488_v55  ;;  %v14107_v5 = vld [vmem:[%s22097_s3 + $0x68] ss:$12 sps:$4 sm:$0xff]   ;;  %v14108_v55 = vld [vmem:[%s22097_s3 + $0x4c] ss:$12 sps:$4 sm:$0xff]  }
 0x46a   :  { %8028 = vmatprep.subr.bf16.mxu0 %v13491_v60  ;;  %8101 = vmatprep.subr.bf16.mxu1 %v22273_v63  ;;  %v19662_v60 = vpop.f32.mrf.mxu0 }
 0x46d   :  { %8029 = vmatpush2.bf16.msra.mxu0 %v13489_v28  ;;  %8102 = vmatpush2.bf16.msra.mxu1 %v13492_v34  ;;  %v14109_v28 = vld [vmem:[%s22097_s3 + $0x48] ss:$12 sps:$4 sm:$0xff]   ;;  %v14110_v34 = vld [vmem:[%s22097_s3 + $0x50] ss:$12 sps:$4 sm:$0xff]  }
 0x46e   :  { %8030 = vmatprep.subr.bf16.mxu0 %v13495_v24  ;;  %8103 = vmatprep.subr.bf16.mxu1 %v22273_v63  ;;  %v14111_v24 = vld [vmem:[%s22097_s3 + $0x34] ss:$12 sps:$4 sm:$0xff]  }
 0x471   :  { %8031 = vmatpush2.bf16.msra.mxu0 %v13493_v20  ;;  %8104 = vmatpush2.bf16.msra.mxu1 %v13496_v29  ;;  %v19680_v20 = vpop.f32.mrf.mxu0  ;;  %v14112_v29 = vld [vmem:[%s22097_s3 + $0x30] ss:$12 sps:$4 sm:$0xff]  }
 0x472   :  { %8032 = vmatprep.subr.bf16.mxu0 %v13499_v25  ;;  %8105 = vmatprep.subr.bf16.mxu1 %v22273_v63  ;;  %22666 = vst [vmem:[#allocation25_spill] sm:$0xff] %v19680_v20  ;;  %v14113_v25 = vld [vmem:[%s22097_s3 + $0x38] ss:$12 sps:$4 sm:$0xff]  }
 0x475   :  { %8033 = vmatpush2.bf16.msra.mxu0 %v13497_v9  ;;  %8106 = vmatpush2.bf16.msra.mxu1 %v13500_v3 }
 0x476   :  { %8034 = vmatprep.subr.bf16.mxu0 %v13503_v26  ;;  %8107 = vmatprep.subr.bf16.mxu1 %v22273_v63  ;;  %v14114_v26 = vld [vmem:[%s22097_s3 + $0x1c] ss:$12 sps:$4 sm:$0xff]  }
 0x479   :  { %8035 = vmatpush2.bf16.msra.mxu0 %v13501_v13  ;;  %8108 = vmatpush2.bf16.msra.mxu1 %v13504_v62  ;;  %v14115_v62 = vld [vmem:[%s22097_s3 + $0x18] ss:$12 sps:$4 sm:$0xff]  }
 0x47a   :  { %8238 = vmatprep.subr.bf16.mxu0 %v14096_v49  ;;  %8311 = vmatprep.subr.bf16.mxu1 %v22273_v63  ;;  %v14116_v49 = vld [vmem:[%s22097_s3 + $0x20] ss:$12 sps:$4 sm:$0xff]  }
 0x47c   :  { %8037 = vmatmul.mubr.bf16.vlgmr.msra.gmra.mxu0 %v22656_v45  ;;  %8110 = vmatmul.mubr.bf16.vlgmr.msra.gmra.mxu1 %v22656_v45 }
 0x47d   :  { %12559 = vmatprep.mubr.msk.bf16.mxu0 %vm34_vm0, %v22657_v16  ;;  %12563 = vmatprep.mubr.msk.bf16.mxu1 %vm34_vm0, %v22657_v16 }
 0x47e   :  { %8239 = vmatpush1.bf16.msra.mxu0 %v14097_v11  ;;  %8312 = vmatpush1.bf16.msra.mxu1 %v14098_v57 }
 0x47f   :  { %8240 = vmatprep.subr.bf16.mxu0 %v14099_v58  ;;  %8313 = vmatprep.subr.bf16.mxu1 %v22273_v63  ;;  %v14117_v58 = vld [vmem:[%s22097_s3 + $0x4] ss:$12 sps:$4 sm:$0xff]  }
 0x482   :  { %8241 = vmatpush1.bf16.msra.mxu0 %v14100_v56  ;;  %8314 = vmatpush1.bf16.msra.mxu1 %v14101_v40 }
 0x483   :  { %8242 = vmatprep.subr.bf16.mxu0 %v14102_v48  ;;  %8315 = vmatprep.subr.bf16.mxu1 %v22273_v63  ;;  %v14118_v48 = vld [vmem:[%s22097_s3] ss:$12 sps:$4 sm:$0xff]  }
 0x484   :  { %8047 = vmatmul.mubr.bf16.gmra.mxu0 %v22658_v38  ;;  %8118 = vmatmul.mubr.bf16.gmra.mxu1 %v22658_v38 }
 0x485   :  { %12560 = vmatprep.mubr.msk.bf16.mxu0 %vm34_vm0, %v22659_v15  ;;  %12564 = vmatprep.mubr.msk.bf16.mxu1 %vm34_vm0, %v22659_v15 }
 0x486   :  { %8243 = vmatpush1.bf16.msra.mxu0 %v14103_v18  ;;  %8316 = vmatpush1.bf16.msra.mxu1 %v14104_v44  ;;  %v14119_v18 = vld [vmem:[%s22097_s3 + $0x8] ss:$12 sps:$4 sm:$0xff]  }
 0x487   :  { %8244 = vmatprep.subr.bf16.mxu0 %v14105_v32  ;;  %8317 = vmatprep.subr.bf16.mxu1 %v22273_v63  ;;  %v14120_v44 = vld [vmem:[%s22097_s3 + $0x13c] ss:$12 sps:$4 sm:$0xff]  }
 0x48a   :  { %8245 = vmatpush1.bf16.msra.mxu0 %v14106_v8  ;;  %8318 = vmatpush1.bf16.msra.mxu1 %v14107_v5  ;;  %v14121_v8 = vld [vmem:[%s22097_s3 + $0x138] ss:$12 sps:$4 sm:$0xff]   ;;  %v14122_v5 = vld [vmem:[%s22097_s3 + $0x140] ss:$12 sps:$4 sm:$0xff]  }
 0x48b   :  { %8246 = vmatprep.subr.bf16.mxu0 %v14108_v55  ;;  %8319 = vmatprep.subr.bf16.mxu1 %v22273_v63 }
 0x48c   :  { %8057 = vmatmul.mubr.bf16.gmra.mxu0 %v22660_v43  ;;  %8126 = vmatmul.mubr.bf16.gmra.mxu1 %v22660_v43 }
 0x48d   :  { %12561 = vmatprep.mubr.msk.bf16.mxu0 %vm34_vm0, %v22661_v59  ;;  %12565 = vmatprep.mubr.msk.bf16.mxu1 %vm34_vm0, %v22661_v59 }
 0x48e   :  { %8247 = vmatpush1.bf16.msra.mxu0 %v14109_v28  ;;  %8320 = vmatpush1.bf16.msra.mxu1 %v14110_v34  ;;  %v14123_v28 = vld [vmem:[%s22097_s3 + $0x124] ss:$12 sps:$4 sm:$0xff]  }
 0x48f   :  { %8248 = vmatprep.subr.bf16.mxu0 %v14111_v24  ;;  %8321 = vmatprep.subr.bf16.mxu1 %v22273_v63 }
 0x492   :  { %8249 = vmatpush1.bf16.msra.mxu0 %v14112_v29  ;;  %8322 = vmatpush1.bf16.msra.mxu1 %v14113_v25  ;;  %v19688_v9 = vpop.f32.mrf.mxu0  ;;  %v19690_v3 = vpop.f32.mrf.mxu1  ;;  %v14124_v29 = vld [vmem:[%s22097_s3 + $0x120] ss:$12 sps:$4 sm:$0xff]   ;;  %v14125_v25 = vld [vmem:[%s22097_s3 + $0x128] ss:$12 sps:$4 sm:$0xff]  }
 0x493   :  { %8250 = vmatprep.subr.bf16.mxu0 %v14114_v26  ;;  %8323 = vmatprep.subr.bf16.mxu1 %v22273_v63  ;;  %v6669_v10 = vadd.f32 %v19688_v9, %v19481_v52 }
 0x494   :  { %8067 = vmatmul.mubr.bf16.gmra.mxu0 %v22662_v41  ;;  %8134 = vmatmul.mubr.bf16.gmra.mxu1 %v22662_v41  ;;  %v6640_v13 = vpop.f32.mrf.mxu1  ;;  %v19708_v11 = vpop.f32.mrf.mxu0 }
 0x495   :  { %12566 = vmatprep.mubr.msk.bf16.mxu0 %vm34_vm0, %v19024_v17  ;;  %12570 = vmatprep.mubr.msk.bf16.mxu1 %vm34_vm0, %v19024_v17  ;;  %v14126_v13 = vld [vmem:[%s22097_s3 + $0x10c] ss:$12 sps:$4 sm:$0xff]   ;;  %v6670_v9 = vadd.f32 %v19708_v11, %v19497_v61 }
 0x496   :  { %8251 = vmatpush1.bf16.msra.mxu0 %v14115_v62  ;;  %8324 = vmatpush1.bf16.msra.mxu1 %v14116_v49  ;;  %v19710_v57 = vpop.f32.mrf.mxu1  ;;  %v19716_v40 = vpop.f32.mrf.mxu0 }
 0x497   :  { %8252 = vmatprep.subr.bf16.mxu0 %v14117_v58  ;;  %8325 = vmatprep.subr.bf16.mxu1 %v22273_v63  ;;  %v14127_v58 = vld [vmem:[%s22097_s3 + $0x108] ss:$12 sps:$4 sm:$0xff]  }
 0x498   :  { %v6643_v56 = vpop.f32.mrf.mxu1  ;;  %v19728_v32 = vpop.f32.mrf.mxu0 }
 0x499   :  { %22667 = vst [vmem:[#allocation66_spill] sm:$0xff] %v19728_v32  ;;  %v14128_v56 = vld [vmem:[%s22097_s3 + $0x110] ss:$12 sps:$4 sm:$0xff]  }
 0x49a   :  { %8253 = vmatpush1.bf16.msra.mxu0 %v14118_v48  ;;  %8326 = vmatpush1.bf16.msra.mxu1 %v14119_v18  ;;  %v14129_v48 = vld [vmem:[%s22097_s3 + $0xf4] ss:$12 sps:$4 sm:$0xff]  }
 0x49b   :  { %8258 = vmatprep.subr.bf16.mxu0 %v14120_v44  ;;  %8331 = vmatprep.subr.bf16.mxu1 %v22273_v63  ;;  %v14130_v44 = vld [vmem:[%s22097_s3 + $0xf0] ss:$12 sps:$4 sm:$0xff]  }
 0x49e   :  { %8259 = vmatpush2.bf16.msra.mxu0 %v14121_v8  ;;  %8332 = vmatpush2.bf16.msra.mxu1 %v14122_v5  ;;  %v19736_v55 = vpop.f32.mrf.mxu1  ;;  %v19742_v34 = vpop.f32.mrf.mxu0  ;;  %v14131_v8 = vld [vmem:[%s22097_s3 + $0xf8] ss:$12 sps:$4 sm:$0xff]  }
 0x49f   :  { %8260 = vmatprep.subr.bf16.mxu0 %v14123_v28  ;;  %8333 = vmatprep.subr.bf16.mxu1 %v22273_v63  ;;  %v14132_v28 = vld [vmem:[%s22097_s3 + $0xdc] ss:$12 sps:$4 sm:$0xff]  }
 0x4a0   :  { %v6648_v24 = vpop.f32.mrf.mxu1  ;;  %v19756_v62 = vpop.f32.mrf.mxu0 }
 0x4a2   :  { %8261 = vmatpush2.bf16.msra.mxu0 %v14124_v29  ;;  %8334 = vmatpush2.bf16.msra.mxu1 %v14125_v25  ;;  %v19750_v26 = vpop.f32.mrf.mxu1  ;;  %v19768_v18 = vpop.f32.mrf.mxu0 }
 0x4a3   :  { %8262 = vmatprep.subr.bf16.mxu0 %v14126_v13  ;;  %8335 = vmatprep.subr.bf16.mxu1 %v22273_v63  ;;  %v14133_v13 = vld [vmem:[%s22097_s3 + $0xd8] ss:$12 sps:$4 sm:$0xff]  }
 0x4a4   :  { %v6651_v49 = vpop.f32.mrf.mxu1  ;;  %v19782_v24 = vpop.f32.mrf.mxu0 }
 0x4a5   :  { %22668 = vst [vmem:[#allocation64_spill] sm:$0xff] %v19782_v24  ;;  %v14134_v49 = vld [vmem:[%s22097_s3 + $0xe0] ss:$12 sps:$4 sm:$0xff]   ;;  %v14150_v24 = vld [vmem:[%s22097_s3 + $0x19c] ss:$12 sps:$4 sm:$0xff]  }
 0x4a6   :  { %8263 = vmatpush2.bf16.msra.mxu0 %v14127_v58  ;;  %8336 = vmatpush2.bf16.msra.mxu1 %v14128_v56  ;;  %v14135_v56 = vld [vmem:[%s22097_s3 + $0xc4] ss:$12 sps:$4 sm:$0xff]  }
 0x4a7   :  { %8264 = vmatprep.subr.bf16.mxu0 %v14129_v48  ;;  %8337 = vmatprep.subr.bf16.mxu1 %v22273_v63 }
 0x4aa   :  { %8265 = vmatpush2.bf16.msra.mxu0 %v14130_v44  ;;  %8338 = vmatpush2.bf16.msra.mxu1 %v14131_v8  ;;  %v19776_v5 = vpop.f32.mrf.mxu1  ;;  %v19784_v25 = vpop.f32.mrf.mxu0  ;;  %v14136_v8 = vld [vmem:[%s22097_s3 + $0xc0] ss:$12 sps:$4 sm:$0xff]  }
 0x4ab   :  { %8266 = vmatprep.subr.bf16.mxu0 %v14132_v28  ;;  %8339 = vmatprep.subr.bf16.mxu1 %v22273_v63  ;;  %v14137_v28 = vld [vmem:[%s22097_s3 + $0xc8] ss:$12 sps:$4 sm:$0xff]  }
 0x4ac   :  { %v6656_v29 = vpop.f32.mrf.mxu1  ;;  %v19798_v44 = vpop.f32.mrf.mxu0 }
 0x4ad   :  { %v14138_v29 = vld [vmem:[%s22097_s3 + $0x1fc] ss:$12 sps:$4 sm:$0xff]  }
 0x4ae   :  { %8267 = vmatpush2.bf16.msra.mxu0 %v14133_v13  ;;  %8340 = vmatpush2.bf16.msra.mxu1 %v14134_v49  ;;  %v19792_v58 = vpop.f32.mrf.mxu1  ;;  %v19812_v13 = vpop.f32.mrf.mxu0 }
 0x4af   :  { %8268 = vmatprep.subr.bf16.mxu0 %v14135_v56  ;;  %8341 = vmatprep.subr.bf16.mxu1 %v22273_v63  ;;  %v14139_v56 = vld [vmem:[%s22097_s3 + $0x1f8] ss:$12 sps:$4 sm:$0xff]  }
 0x4b0   :  { %v6659_v48 = vpop.f32.mrf.mxu1 }
 0x4b1   :  { %v14140_v48 = vld [vmem:[%s22097_s3 + $0x200] ss:$12 sps:$4 sm:$0xff]  }
 0x4b2   :  { %8269 = vmatpush2.bf16.msra.mxu0 %v14136_v8  ;;  %8342 = vmatpush2.bf16.msra.mxu1 %v14137_v28  ;;  %v14141_v8 = vld [vmem:[%s22097_s3 + $0x1e4] ss:$12 sps:$4 sm:$0xff]  }
 0x4b3   :  { %8376 = vmatprep.subr.bf16.mxu0 %v14138_v29  ;;  %8449 = vmatprep.subr.bf16.mxu1 %v22273_v63  ;;  %v19830_v29 = vpop.f32.mrf.mxu0 }
 0x4b4   :  { %22669 = vst [vmem:[#allocation27_spill] sm:$0xff] %v19830_v29  ;;  %v14148_v29 = vld [vmem:[%s22097_s3 + $0x1b0] ss:$12 sps:$4 sm:$0xff]  }
 0x4b5   :  { %8271 = vmatmul.mubr.bf16.vlgmr.msra.gmra.mxu0 %v19044_v4  ;;  %8344 = vmatmul.mubr.bf16.vlgmr.msra.gmra.mxu1 %v19044_v4 }
 0x4b6   :  { %12567 = vmatprep.mubr.msk.bf16.mxu0 %vm34_vm0, %v19091_v36  ;;  %12571 = vmatprep.mubr.msk.bf16.mxu1 %vm34_vm0, %v19091_v36  ;;  %v19818_v49 = vpop.f32.mrf.mxu1  ;;  %v19840_v14 = vpop.f32.mrf.mxu0 }
 0x4b7   :  { %8377 = vmatpush1.bf16.msra.mxu0 %v14139_v56  ;;  %8450 = vmatpush1.bf16.msra.mxu1 %v14140_v48  ;;  %v14142_v56 = vld [vmem:[%s22097_s3 + $0x1e0] ss:$12 sps:$4 sm:$0xff]   ;;  %v14143_v48 = vld [vmem:[%s22097_s3 + $0x1e8] ss:$12 sps:$4 sm:$0xff]  }
 0x4b8   :  { %8378 = vmatprep.subr.bf16.mxu0 %v14141_v8  ;;  %8451 = vmatprep.subr.bf16.mxu1 %v22273_v63  ;;  %v6664_v28 = vpop.f32.mrf.mxu1  ;;  %v14144_v8 = vld [vmem:[%s22097_s3 + $0x1cc] ss:$12 sps:$4 sm:$0xff]  }
 0x4ba   :  { %v19832_v20 = vpop.f32.mrf.mxu1 }
 0x4bb   :  { %8379 = vmatpush1.bf16.msra.mxu0 %v14142_v56  ;;  %8452 = vmatpush1.bf16.msra.mxu1 %v14143_v48  ;;  %v14145_v56 = vld [vmem:[%s22097_s3 + $0x1c8] ss:$12 sps:$4 sm:$0xff]   ;;  %v14146_v48 = vld [vmem:[%s22097_s3 + $0x1d0] ss:$12 sps:$4 sm:$0xff]  }
 0x4bc   :  { %8380 = vmatprep.subr.bf16.mxu0 %v14144_v8  ;;  %8453 = vmatprep.subr.bf16.mxu1 %v22273_v63  ;;  %v6667_v28 = vpop.f32.mrf.mxu1  ;;  %v19858_v8 = vpop.f32.mrf.mxu0 }
 0x4bd   :  { %8281 = vmatmul.mubr.bf16.gmra.mxu0 %v19097_v23  ;;  %8352 = vmatmul.mubr.bf16.gmra.mxu1 %v19097_v23  ;;  %v14147_v28 = vld [vmem:[%s22097_s3 + $0x1b4] ss:$12 sps:$4 sm:$0xff]  }
 0x4be   :  { %12568 = vmatprep.mubr.msk.bf16.mxu0 %vm34_vm0, %v19149_v50  ;;  %12572 = vmatprep.mubr.msk.bf16.mxu1 %vm34_vm0, %v19149_v50 }
 0x4bf   :  { %8381 = vmatpush1.bf16.msra.mxu0 %v14145_v56  ;;  %8454 = vmatpush1.bf16.msra.mxu1 %v14146_v48  ;;  %v14149_v56 = vld [vmem:[%s22097_s3 + $0x1b8] ss:$12 sps:$4 sm:$0xff]   ;;  %v19870_v48 = vpop.f32.mrf.mxu0 }
 0x4c0   :  { %8382 = vmatprep.subr.bf16.mxu0 %v14147_v28  ;;  %8455 = vmatprep.subr.bf16.mxu1 %v22273_v63 }
 0x4c1   :  { %v19888_v28 = vpop.f32.mrf.mxu0 }
 0x4c2   :  { %22670 = vst [vmem:[#allocation65_spill] sm:$0xff] %v19888_v28  ;;  %v14155_v28 = vld [vmem:[%s22097_s3 + $0x188] ss:$12 sps:$4 sm:$0xff]  }
 0x4c3   :  { %8383 = vmatpush1.bf16.msra.mxu0 %v14148_v29  ;;  %8456 = vmatpush1.bf16.msra.mxu1 %v14149_v56  ;;  %v14151_v29 = vld [vmem:[%s22097_s3 + $0x198] ss:$12 sps:$4 sm:$0xff]  }
 0x4c4   :  { %8384 = vmatprep.subr.bf16.mxu0 %v14150_v24  ;;  %8457 = vmatprep.subr.bf16.mxu1 %v22273_v63  ;;  %v14152_v24 = vld [vmem:[%s22097_s3 + $0x1a0] ss:$12 sps:$4 sm:$0xff]   ;;  %v14153_v56 = vld [vmem:[%s22097_s3 + $0x184] ss:$12 sps:$4 sm:$0xff]  }
 0x4c5   :  { %8291 = vmatmul.mubr.bf16.gmra.mxu0 %v19155_v21  ;;  %8360 = vmatmul.mubr.bf16.gmra.mxu1 %v19155_v21  ;;  %v14156_v21 = vld [vmem:[%s22097_s3 + $0x16c] ss:$12 sps:$4 sm:$0xff]  }
 0x4c6   :  { %12569 = vmatprep.mubr.msk.bf16.mxu0 %vm34_vm0, %v19185_v46  ;;  %12573 = vmatprep.mubr.msk.bf16.mxu1 %vm34_vm0, %v19185_v46 }
 0x4c7   :  { %8385 = vmatpush1.bf16.msra.mxu0 %v14151_v29  ;;  %8458 = vmatpush1.bf16.msra.mxu1 %v14152_v24  ;;  %v6671_v29 = vadd.f32 %v19690_v3, %v18982_v53  ;;  %v14154_v24 = vld [vmem:[%s22097_s3 + $0x180] ss:$12 sps:$4 sm:$0xff]  }
 0x4c8   :  { %8386 = vmatprep.subr.bf16.mxu0 %v14153_v56  ;;  %8459 = vmatprep.subr.bf16.mxu1 %v22273_v63 }
 0x4ca   :  { %v7008_v30 = vpop.f32.mrf.mxu0  ;;  %v7081_v32 = vpop.f32.mrf.mxu1 }
 0x4cb   :  { %8387 = vmatpush1.bf16.msra.mxu0 %v14154_v24  ;;  %8460 = vmatpush1.bf16.msra.mxu1 %v14155_v28  ;;  %v7136_v56 = vrot.slane %v7008_v30, 1  ;;  %v7138_v46 = vrot.slane %v7081_v32, 1  ;;  %v6672_v32 = vadd.f32 %v19716_v40, %v19511_v31  ;;  %v14158_v31 = vld [vmem:[%s22097_s3 + $0x170] ss:$12 sps:$4 sm:$0xff]  }
 0x4cc   :  { %8388 = vmatprep.subr.bf16.mxu0 %v14156_v21  ;;  %8461 = vmatprep.subr.bf16.mxu1 %v22273_v63  ;;  %v7010_v53 = vpop.f32.mrf.mxu0  ;;  %v7083_v52 = vpop.f32.mrf.mxu1 }
 0x4cd   :  { %v19910_v3 = vadd.f32 %v7136_v56, %v6669_v10  ;;  %v19912_v24 = vadd.f32 %v7138_v46, %v6671_v29  ;;  %8301 = vmatmul.mubr.bf16.gmra.mxu0 %v19201_v47  ;;  %8368 = vmatmul.mubr.bf16.gmra.mxu1 %v19201_v47  ;;  %v7137_v30 = vrot.slane %v7010_v53, 1  ;;  %v6674_v46 = vadd.f32 %v19710_v57, %v18984_v39  ;;  %v14157_v10 = vld [vmem:[%s22097_s3 + $0x168] ss:$12 sps:$4 sm:$0xff]  }
 0x4ce   :  { %12574 = vmatprep.mubr.msk.bf16.mxu0 %vm34_vm0, %v22655_v0  ;;  %12578 = vmatprep.mubr.msk.bf16.mxu1 %vm34_vm0, %v22655_v0  ;;  %v7012_v21 = vpop.f32.mrf.mxu0  ;;  %v7084_v61 = vpop.f32.mrf.mxu1  ;;  %v14159_v29 = vld [vmem:[%s22097_s3 + $0x154] ss:$12 sps:$4 sm:$0xff]  }
 0x4cf   :  { %8389 = vmatpush1.bf16.msra.mxu0 %v14157_v10  ;;  %8462 = vmatpush1.bf16.msra.mxu1 %v14158_v31  ;;  %v19930_v11 = vadd.f32 %v7137_v30, %v6670_v9  ;;  %v7139_v40 = vrot.slane %v7012_v21, 1  ;;  %v7141_v28 = vrot.slane %v7084_v61, 1  ;;  %v6675_v9 = vadd.f32 %v19742_v34, %v19539_v51  ;;  %v14160_v21 = vld [vmem:[%s22097_s3 + $0x150] ss:$12 sps:$4 sm:$0xff]   ;;  %v14162_v31 = vld [vmem:[%s22097_s3 + $0x28c] ss:$12 sps:$4 sm:$0xff]  }
 0x4d0   :  { %8390 = vmatprep.subr.bf16.mxu0 %v14159_v29  ;;  %8463 = vmatprep.subr.bf16.mxu1 %v22273_v63  ;;  %v19936_v39 = vpop.f32.mrf.mxu0  ;;  %v7086_v57 = vpop.f32.mrf.mxu1  ;;  %v6677_v30 = vadd.f32 %v19736_v55, %v18986_v27  ;;  %v6676_v55 = vadd.f32 %v19756_v62, %v19551_v7  ;;  %v6678_v29 = vadd.f32 %v19768_v18, %v19563_v12  ;;  %v14164_v7 = vld [vmem:[%s22097_s3 + $0x290] ss:$12 sps:$4 sm:$0xff]   ;;  %v14165_v12 = vld [vmem:[%s22097_s3 + $0x274] ss:$12 sps:$4 sm:$0xff]  }
 0x4d1   :  { %v19938_v56 = vadd.f32 %v7139_v40, %v6672_v32  ;;  %v19940_v53 = vadd.f32 %v7141_v28, %v6674_v46  ;;  %v14161_v32 = vld [vmem:[%s22097_s3 + $0x158] ss:$12 sps:$4 sm:$0xff]  }
 0x4d2   :  { %v7018_v52 = vpop.f32.mrf.mxu0  ;;  %v7089_v10 = vpop.f32.mrf.mxu1 }
 0x4d3   :  { %8391 = vmatpush1.bf16.msra.mxu0 %v14160_v21  ;;  %8464 = vmatpush1.bf16.msra.mxu1 %v14161_v32  ;;  %v7142_v61 = vrot.slane %v7018_v52, 1  ;;  %v7144_v46 = vrot.slane %v7089_v10, 1  ;;  %v6680_v10 = vadd.f32 %v19750_v26, %v18988_v6  ;;  %v14163_v21 = vld [vmem:[%s22097_s3 + $0x288] ss:$12 sps:$4 sm:$0xff]  }
 0x4d4   :  { %8396 = vmatprep.subr.bf16.mxu0 %v14162_v31  ;;  %8469 = vmatprep.subr.bf16.mxu1 %v22273_v63  ;;  %v7020_v27 = vpop.f32.mrf.mxu0  ;;  %v7091_v51 = vpop.f32.mrf.mxu1  ;;  %v6681_v31 = vadd.f32 %v19784_v25, %v19587_v19 }
 0x4d5   :  { %v19958_v34 = vadd.f32 %v7142_v61, %v6675_v9  ;;  %v19960_v40 = vadd.f32 %v7144_v46, %v6677_v30  ;;  %v7143_v28 = vrot.slane %v7020_v27, 1  ;;  %v6683_v27 = vadd.f32 %v19776_v5, %v18990_v22  ;;  %v14166_v51 = vld [vmem:[%s22097_s3 + $0x270] ss:$12 sps:$4 sm:$0xff]  }
 0x4d6   :  { %v7022_v57 = vpop.f32.mrf.mxu0  ;;  %v7092_v52 = vpop.f32.mrf.mxu1  ;;  %v6682_v5 = vadd.f32 %v19798_v44, %v19596_v1  ;;  %v14170_v1 = vld [vmem:[%s22097_s3 + $0x260] ss:$12 sps:$4 sm:$0xff]  }
 0x4d7   :  { %8397 = vmatpush2.bf16.msra.mxu0 %v14163_v21  ;;  %8470 = vmatpush2.bf16.msra.mxu1 %v14164_v7  ;;  %v19972_v62 = vadd.f32 %v7143_v28, %v6676_v55  ;;  %v7145_v9 = vrot.slane %v7022_v57, 1  ;;  %v7147_v30 = vrot.slane %v7092_v52, 1  ;;  %v14167_v55 = vld [vmem:[%s22097_s3 + $0x278] ss:$12 sps:$4 sm:$0xff]   ;;  %v14168_v57 = vld [vmem:[%s22097_s3 + $0x25c] ss:$12 sps:$4 sm:$0xff]   ;;  %v6684_v21 = vadd.f32 %v19812_v13, %v19602_v33 }
 0x4d8   :  { %8398 = vmatprep.subr.bf16.mxu0 %v14165_v12  ;;  %8471 = vmatprep.subr.bf16.mxu1 %v22273_v63  ;;  %v19978_v6 = vpop.f32.mrf.mxu0  ;;  %v7094_v26 = vpop.f32.mrf.mxu1  ;;  %v14169_v12 = vld [vmem:[%s22097_s3 + $0x258] ss:$12 sps:$4 sm:$0xff]  }
 0x4d9   :  { %v19980_v18 = vadd.f32 %v7145_v9, %v6678_v29  ;;  %v19982_v32 = vadd.f32 %v7147_v30, %v6680_v10  ;;  %v6686_v30 = vadd.f32 %v19792_v58, %v18992_v54  ;;  %v14171_v33 = vld [vmem:[%s22097_s3 + $0x244] ss:$12 sps:$4 sm:$0xff]  }
 0x4da   :  { %v7028_v61 = vpop.f32.mrf.mxu0  ;;  %v7097_v46 = vpop.f32.mrf.mxu1 }
 0x4db   :  { %8399 = vmatpush2.bf16.msra.mxu0 %v14166_v51  ;;  %8472 = vmatpush2.bf16.msra.mxu1 %v14167_v55  ;;  %v7148_v28 = vrot.slane %v7028_v61, 1  ;;  %v7150_v29 = vrot.slane %v7097_v46, 1  ;;  %v6687_v51 = vadd.f32 %v19840_v14, %v19632_v35  ;;  %v6689_v55 = vadd.f32 %v19818_v49, %v18994_v42 }
 0x4dc   :  { %8400 = vmatprep.subr.bf16.mxu0 %v14168_v57  ;;  %8473 = vmatprep.subr.bf16.mxu1 %v22273_v63  ;;  %v7030_v22 = vpop.f32.mrf.mxu0  ;;  %v7099_v19 = vpop.f32.mrf.mxu1  ;;  %v6688_v35 = vadd.f32 %v19858_v8, %v19650_v2  ;;  %v14176_v2 = vld [vmem:[%s22097_s3 + $0x230] ss:$12 sps:$4 sm:$0xff]  }
 0x4dd   :  { %v20000_v25 = vadd.f32 %v7148_v28, %v6681_v31  ;;  %v20002_v52 = vadd.f32 %v7150_v29, %v6683_v27  ;;  %v7149_v10 = vrot.slane %v7030_v22, 1  ;;  %v14172_v28 = vld [vmem:[%s22097_s3 + $0x240] ss:$12 sps:$4 sm:$0xff]   ;;  %v14173_v29 = vld [vmem:[%s22097_s3 + $0x248] ss:$12 sps:$4 sm:$0xff]  }
 0x4de   :  { %v7032_v7 = vpop.f32.mrf.mxu0  ;;  %v7100_v9 = vpop.f32.mrf.mxu1  ;;  %v14174_v19 = vld [vmem:[%s22097_s3 + $0x22c] ss:$12 sps:$4 sm:$0xff]  }
 0x4df   :  { %8401 = vmatpush2.bf16.msra.mxu0 %v14169_v12  ;;  %8474 = vmatpush2.bf16.msra.mxu1 %v14170_v1  ;;  %v20014_v44 = vadd.f32 %v7149_v10, %v6682_v5  ;;  %v7151_v26 = vrot.slane %v7032_v7, 1  ;;  %v7153_v61 = vrot.slane %v7100_v9, 1  ;;  %v14175_v12 = vld [vmem:[%s22097_s3 + $0x228] ss:$12 sps:$4 sm:$0xff]  }
 0x4e0   :  { %8402 = vmatprep.subr.bf16.mxu0 %v14171_v33  ;;  %8475 = vmatprep.subr.bf16.mxu1 %v22273_v63  ;;  %v20020_v54 = vpop.f32.mrf.mxu0  ;;  %v7102_v58 = vpop.f32.mrf.mxu1  ;;  %v14179_v33 = vld [vmem:[%s22097_s3 + $0x218] ss:$12 sps:$4 sm:$0xff]  }
 0x4e1   :  { %v20022_v13 = vadd.f32 %v7151_v26, %v6684_v21  ;;  %v20024_v46 = vadd.f32 %v7153_v61, %v6686_v30  ;;  %v6690_v21 = vadd.f32 %v19870_v48, %v19662_v60  ;;  %v6692_v30 = vadd.f32 %v19832_v20, %v18996_v37  ;;  %v14177_v60 = vld [vmem:[%s22097_s3 + $0x214] ss:$12 sps:$4 sm:$0xff]   ;;  %v14178_v61 = vld [vmem:[%s22097_s3 + $0x210] ss:$12 sps:$4 sm:$0xff]   ;;  %v14180_v58 = vld [vmem:[%s22097_s3 + $0x34c] ss:$12 sps:$4 sm:$0xff]  }
 0x4e2   :  { %v7038_v31 = vpop.f32.mrf.mxu0  ;;  %v7105_v27 = vpop.f32.mrf.mxu1 }
 0x4e3   :  { %8403 = vmatpush2.bf16.msra.mxu0 %v14172_v28  ;;  %8476 = vmatpush2.bf16.msra.mxu1 %v14173_v29  ;;  %v7154_v57 = vrot.slane %v7038_v31, 1  ;;  %v7156_v22 = vrot.slane %v7105_v27, 1  ;;  %v14181_v31 = vld [vmem:[%s22097_s3 + $0x348] ss:$12 sps:$4 sm:$0xff]   ;;  %v14182_v27 = vld [vmem:[%s22097_s3 + $0x350] ss:$12 sps:$4 sm:$0xff]  }
 0x4e4   :  { %8404 = vmatprep.subr.bf16.mxu0 %v14174_v19  ;;  %8477 = vmatprep.subr.bf16.mxu1 %v22273_v63  ;;  %v7040_v42 = vpop.f32.mrf.mxu0  ;;  %v7107_v14 = vpop.f32.mrf.mxu1  ;;  %v14185_v28 = vld [vmem:[%s22097_s3 + $0x338] ss:$12 sps:$4 sm:$0xff]   ;;  %v14186_v29 = vld [vmem:[%s22097_s3 + $0x31c] ss:$12 sps:$4 sm:$0xff]  }
 0x4e5   :  { %v20042_v49 = vadd.f32 %v7154_v57, %v6687_v51  ;;  %v20044_v5 = vadd.f32 %v7156_v22, %v6689_v55  ;;  %v7155_v10 = vrot.slane %v7040_v42, 1  ;;  %v14183_v51 = vld [vmem:[%s22097_s3 + $0x334] ss:$12 sps:$4 sm:$0xff]   ;;  %v14184_v55 = vld [vmem:[%s22097_s3 + $0x330] ss:$12 sps:$4 sm:$0xff]  }
 0x4e6   :  { %v7042_v7 = vpop.f32.mrf.mxu0  ;;  %v7108_v9 = vpop.f32.mrf.mxu1  ;;  %v14187_v57 = vld [vmem:[%s22097_s3 + $0x318] ss:$12 sps:$4 sm:$0xff]   ;;  %v14188_v22 = vld [vmem:[%s22097_s3 + $0x320] ss:$12 sps:$4 sm:$0xff]   ;;  %v14191_v14 = vld [vmem:[%s22097_s3 + $0x308] ss:$12 sps:$4 sm:$0xff]  }
 0x4e7   :  { %8405 = vmatpush2.bf16.msra.mxu0 %v14175_v12  ;;  %8478 = vmatpush2.bf16.msra.mxu1 %v14176_v2  ;;  %v20056_v8 = vadd.f32 %v7155_v10, %v6688_v35  ;;  %v7157_v1 = vrot.slane %v7042_v7, 1  ;;  %v7159_v26 = vrot.slane %v7108_v9, 1  ;;  %v14189_v19 = vld [vmem:[%s22097_s3 + $0x304] ss:$12 sps:$4 sm:$0xff]   ;;  %v14190_v42 = vld [vmem:[%s22097_s3 + $0x300] ss:$12 sps:$4 sm:$0xff]  }
 0x4e8   :  { %8406 = vmatprep.subr.bf16.mxu0 %v14177_v60  ;;  %8479 = vmatprep.subr.bf16.mxu1 %v22273_v63  ;;  %v7110_v37 = vpop.f32.mrf.mxu1  ;;  %v14192_v35 = vld [vmem:[%s22097_s3 + $0x2ec] ss:$12 sps:$4 sm:$0xff]   ;;  %v14193_v10 = vld [vmem:[%s22097_s3 + $0x2e8] ss:$12 sps:$4 sm:$0xff]   ;;  %v20140_v7 = vpop.f32.mrf.mxu0  ;;  %v14196_v2 = vld [vmem:[%s22097_s3 + $0x2d0] ss:$12 sps:$4 sm:$0xff]  }
 0x4e9   :  { %v20062_v20 = vadd.f32 %v7157_v1, %v6690_v21  ;;  %v20064_v48 = vadd.f32 %v7159_v26, %v6692_v30  ;;  %v14194_v21 = vld [vmem:[%s22097_s3 + $0x2f0] ss:$12 sps:$4 sm:$0xff]   ;;  %v14195_v9 = vld [vmem:[%s22097_s3 + $0x2d4] ss:$12 sps:$4 sm:$0xff]   ;;  %v14197_v1 = vld [vmem:[%s22097_s3 + $0x2d8] ss:$12 sps:$4 sm:$0xff]  }
 0x4ea   :  { %v14198_v37 = vld [vmem:[%s22097_s3 + $0x2bc] ss:$12 sps:$4 sm:$0xff]  }
 0x4eb   :  { %8407 = vmatpush2.bf16.msra.mxu0 %v14178_v61  ;;  %8480 = vmatpush2.bf16.msra.mxu1 %v14179_v33 }
 0x4ec   :  { %8610 = vmatprep.subr.bf16.mxu0 %v14180_v58  ;;  %8683 = vmatprep.subr.bf16.mxu1 %v22273_v63 }
 0x4ee   :  { %8409 = vmatmul.mubr.bf16.vlgmr.msra.gmra.mxu0 %v22656_v45  ;;  %8482 = vmatmul.mubr.bf16.vlgmr.msra.gmra.mxu1 %v22656_v45 }
 0x4ef   :  { %12575 = vmatprep.mubr.msk.bf16.mxu0 %vm34_vm0, %v22657_v16  ;;  %12579 = vmatprep.mubr.msk.bf16.mxu1 %vm34_vm0, %v22657_v16 }
 0x4f0   :  { %8611 = vmatpush1.bf16.msra.mxu0 %v14181_v31  ;;  %8684 = vmatpush1.bf16.msra.mxu1 %v14182_v27 }
 0x4f1   :  { %8612 = vmatprep.subr.bf16.mxu0 %v14183_v51  ;;  %8685 = vmatprep.subr.bf16.mxu1 %v22273_v63 }
 0x4f4   :  { %8613 = vmatpush1.bf16.msra.mxu0 %v14184_v55  ;;  %8686 = vmatpush1.bf16.msra.mxu1 %v14185_v28 }
 0x4f5   :  { %8614 = vmatprep.subr.bf16.mxu0 %v14186_v29  ;;  %8687 = vmatprep.subr.bf16.mxu1 %v22273_v63 }
 0x4f6   :  { %8419 = vmatmul.mubr.bf16.gmra.mxu0 %v22658_v38  ;;  %8490 = vmatmul.mubr.bf16.gmra.mxu1 %v22658_v38 }
 0x4f7   :  { %12576 = vmatprep.mubr.msk.bf16.mxu0 %vm34_vm0, %v22659_v15  ;;  %12580 = vmatprep.mubr.msk.bf16.mxu1 %vm34_vm0, %v22659_v15 }
 0x4f8   :  { %8615 = vmatpush1.bf16.msra.mxu0 %v14187_v57  ;;  %8688 = vmatpush1.bf16.msra.mxu1 %v14188_v22  ;;  %v14201_v22 = vld [vmem:[%s22097_s3 + $0x2a4] ss:$12 sps:$4 sm:$0xff]  }
 0x4f9   :  { %8616 = vmatprep.subr.bf16.mxu0 %v14189_v19  ;;  %8689 = vmatprep.subr.bf16.mxu1 %v22273_v63 }
 0x4fc   :  { %8617 = vmatpush1.bf16.msra.mxu0 %v14190_v42  ;;  %8690 = vmatpush1.bf16.msra.mxu1 %v14191_v14 }
 0x4fd   :  { %8618 = vmatprep.subr.bf16.mxu0 %v14192_v35  ;;  %8691 = vmatprep.subr.bf16.mxu1 %v22273_v63 }
 0x4fe   :  { %8429 = vmatmul.mubr.bf16.gmra.mxu0 %v22660_v43  ;;  %8498 = vmatmul.mubr.bf16.gmra.mxu1 %v22660_v43 }
 0x4ff   :  { %12577 = vmatprep.mubr.msk.bf16.mxu0 %vm34_vm0, %v22661_v59  ;;  %12581 = vmatprep.mubr.msk.bf16.mxu1 %vm34_vm0, %v22661_v59 }
 0x500   :  { %8619 = vmatpush1.bf16.msra.mxu0 %v14193_v10  ;;  %8692 = vmatpush1.bf16.msra.mxu1 %v14194_v21  ;;  %v14202_v21 = vld [vmem:[%s22097_s3 + $0x2a0] ss:$12 sps:$4 sm:$0xff]  }
 0x501   :  { %8620 = vmatprep.subr.bf16.mxu0 %v14195_v9  ;;  %8693 = vmatprep.subr.bf16.mxu1 %v22273_v63  ;;  %v14203_v9 = vld [vmem:[%s22097_s3 + $0x2a8] ss:$12 sps:$4 sm:$0xff]  }
 0x503   :  { %v7523_v30 = vpop.f32.mrf.mxu0  ;;  %v7596_v12 = vpop.f32.mrf.mxu1 }
 0x504   :  { %8621 = vmatpush1.bf16.msra.mxu0 %v14196_v2  ;;  %8694 = vmatpush1.bf16.msra.mxu1 %v14197_v1  ;;  %v7651_v26 = vrot.slane %v7523_v30, 1  ;;  %v7653_v60 = vrot.slane %v7596_v12, 1 }
 0x505   :  { %8622 = vmatprep.subr.bf16.mxu0 %v14198_v37  ;;  %8695 = vmatprep.subr.bf16.mxu1 %v22273_v63  ;;  %v7525_v61 = vpop.f32.mrf.mxu0  ;;  %v7598_v33 = vpop.f32.mrf.mxu1 }
 0x506   :  { %v20157_v58 = vadd.f32 %v7651_v26, %v19910_v3  ;;  %v20160_v31 = vadd.f32 %v7653_v60, %v19912_v24  ;;  %8439 = vmatmul.mubr.bf16.gmra.mxu0 %v22662_v41  ;;  %8506 = vmatmul.mubr.bf16.gmra.mxu1 %v22662_v41  ;;  %v7652_v27 = vrot.slane %v7525_v61, 1  ;;  %v14199_v3 = vld [vmem:[%s22097_s3 + $0x2b8] ss:$12 sps:$4 sm:$0xff]   ;;  %v14200_v24 = vld [vmem:[%s22097_s3 + $0x2c0] ss:$12 sps:$4 sm:$0xff]  }
 0x507   :  { %12582 = vmatprep.mubr.msk.bf16.mxu0 %vm34_vm0, %v19024_v17  ;;  %12586 = vmatprep.mubr.msk.bf16.mxu1 %vm34_vm0, %v19024_v17  ;;  %v7527_v51 = vpop.f32.mrf.mxu0  ;;  %v7599_v55 = vpop.f32.mrf.mxu1  ;;  %v14205_v33 = vld [vmem:[%s22097_s3 + $0x3d8] ss:$12 sps:$4 sm:$0xff]  }
 0x508   :  { %8623 = vmatpush1.bf16.msra.mxu0 %v14199_v3  ;;  %8696 = vmatpush1.bf16.msra.mxu1 %v14200_v24  ;;  %v20175_v28 = vadd.f32 %v7652_v27, %v19930_v11  ;;  %v7654_v29 = vrot.slane %v7527_v51, 1  ;;  %v7656_v57 = vrot.slane %v7599_v55, 1  ;;  %v14206_v27 = vld [vmem:[%s22097_s3 + $0x3e0] ss:$12 sps:$4 sm:$0xff]  }
 0x509   :  { %8624 = vmatprep.subr.bf16.mxu0 %v14201_v22  ;;  %8697 = vmatprep.subr.bf16.mxu1 %v22273_v63  ;;  %v20181_v19 = vpop.f32.mrf.mxu0  ;;  %v7601_v42 = vpop.f32.mrf.mxu1 }
 0x50a   :  { %v20184_v14 = vadd.f32 %v7654_v29, %v19938_v56  ;;  %v20187_v35 = vadd.f32 %v7656_v57, %v19940_v53  ;;  %v14204_v56 = vld [vmem:[%s22097_s3 + $0x3dc] ss:$12 sps:$4 sm:$0xff]   ;;  %v14208_v42 = vld [vmem:[%s22097_s3 + $0x3c0] ss:$12 sps:$4 sm:$0xff]  }
 0x50b   :  { %v7533_v11 = vpop.f32.mrf.mxu0  ;;  %v7604_v10 = vpop.f32.mrf.mxu1 }
 0x50c   :  { %8625 = vmatpush1.bf16.msra.mxu0 %v14202_v21  ;;  %8698 = vmatpush1.bf16.msra.mxu1 %v14203_v9  ;;  %v7657_v30 = vrot.slane %v7533_v11, 1  ;;  %v7659_v12 = vrot.slane %v7604_v10, 1  ;;  %v14209_v11 = vld [vmem:[%s22097_s3 + $0x3c8] ss:$12 sps:$4 sm:$0xff]  }
 0x50d   :  { %8630 = vmatprep.subr.bf16.mxu0 %v14204_v56  ;;  %8703 = vmatprep.subr.bf16.mxu1 %v22273_v63  ;;  %v7535_v53 = vpop.f32.mrf.mxu0  ;;  %v7606_v2 = vpop.f32.mrf.mxu1 }
 0x50e   :  { %v20200_v1 = vadd.f32 %v7657_v30, %v19958_v34  ;;  %v20203_v26 = vadd.f32 %v7659_v12, %v19960_v40  ;;  %v7658_v60 = vrot.slane %v7535_v53, 1  ;;  %v14207_v40 = vld [vmem:[%s22097_s3 + $0x3c4] ss:$12 sps:$4 sm:$0xff]  }
 0x50f   :  { %v7537_v37 = vpop.f32.mrf.mxu0  ;;  %v7607_v61 = vpop.f32.mrf.mxu1 }
 0x510   :  { %8631 = vmatpush2.bf16.msra.mxu0 %v14205_v33  ;;  %8704 = vmatpush2.bf16.msra.mxu1 %v14206_v27  ;;  %v20212_v51 = vadd.f32 %v7658_v60, %v19972_v62  ;;  %v7660_v34 = vrot.slane %v7537_v37, 1  ;;  %v7662_v55 = vrot.slane %v7607_v61, 1  ;;  %v14211_v60 = vld [vmem:[%s22097_s3 + $0x3a8] ss:$12 sps:$4 sm:$0xff]   ;;  %v14212_v37 = vld [vmem:[%s22097_s3 + $0x3b0] ss:$12 sps:$4 sm:$0xff]  }
 0x511   :  { %8632 = vmatprep.subr.bf16.mxu0 %v14207_v40  ;;  %8705 = vmatprep.subr.bf16.mxu1 %v22273_v63  ;;  %v20218_v3 = vpop.f32.mrf.mxu0  ;;  %v7609_v24 = vpop.f32.mrf.mxu1 }
 0x512   :  { %v20221_v29 = vadd.f32 %v7660_v34, %v19980_v18  ;;  %v20224_v57 = vadd.f32 %v7662_v55, %v19982_v32  ;;  %v14210_v18 = vld [vmem:[%s22097_s3 + $0x3ac] ss:$12 sps:$4 sm:$0xff]  }
 0x513   :  { %v7543_v62 = vpop.f32.mrf.mxu0  ;;  %v7612_v22 = vpop.f32.mrf.mxu1 }
 0x514   :  { %8633 = vmatpush2.bf16.msra.mxu0 %v14208_v42  ;;  %8706 = vmatpush2.bf16.msra.mxu1 %v14209_v11  ;;  %v7663_v10 = vrot.slane %v7543_v62, 1  ;;  %v7665_v21 = vrot.slane %v7612_v22, 1  ;;  %v14214_v62 = vld [vmem:[%s22097_s3 + $0x390] ss:$12 sps:$4 sm:$0xff]   ;;  %v14215_v22 = vld [vmem:[%s22097_s3 + $0x398] ss:$12 sps:$4 sm:$0xff]  }
 0x515   :  { %8634 = vmatprep.subr.bf16.mxu0 %v14210_v18  ;;  %8707 = vmatprep.subr.bf16.mxu1 %v22273_v63  ;;  %v7545_v32 = vpop.f32.mrf.mxu0  ;;  %v7614_v9 = vpop.f32.mrf.mxu1 }
 0x516   :  { %v20237_v30 = vadd.f32 %v7663_v10, %v20000_v25  ;;  %v20240_v12 = vadd.f32 %v7665_v21, %v20002_v52  ;;  %v7664_v56 = vrot.slane %v7545_v32, 1  ;;  %v14213_v52 = vld [vmem:[%s22097_s3 + $0x394] ss:$12 sps:$4 sm:$0xff]  }
 0x517   :  { %v7547_v53 = vpop.f32.mrf.mxu0  ;;  %v7615_v2 = vpop.f32.mrf.mxu1 }
 0x518   :  { %8635 = vmatpush2.bf16.msra.mxu0 %v14211_v60  ;;  %8708 = vmatpush2.bf16.msra.mxu1 %v14212_v37  ;;  %v20249_v61 = vadd.f32 %v7664_v56, %v20014_v44  ;;  %v7666_v25 = vrot.slane %v7547_v53, 1  ;;  %v7668_v33 = vrot.slane %v7615_v2, 1  ;;  %v14217_v53 = vld [vmem:[%s22097_s3 + $0x378] ss:$12 sps:$4 sm:$0xff]   ;;  %v14218_v2 = vld [vmem:[%s22097_s3 + $0x380] ss:$12 sps:$4 sm:$0xff]  }
 0x519   :  { %8636 = vmatprep.subr.bf16.mxu0 %v14213_v52  ;;  %8709 = vmatprep.subr.bf16.mxu1 %v22273_v63  ;;  %v20255_v27 = vpop.f32.mrf.mxu0  ;;  %v7617_v34 = vpop.f32.mrf.mxu1 }
 0x51a   :  { %v20258_v55 = vadd.f32 %v7666_v25, %v20022_v13  ;;  %v20261_v40 = vadd.f32 %v7668_v33, %v20024_v46  ;;  %v14216_v13 = vld [vmem:[%s22097_s3 + $0x37c] ss:$12 sps:$4 sm:$0xff]  }
 0x51b   :  { %v7553_v44 = vpop.f32.mrf.mxu0  ;;  %v7620_v24 = vpop.f32.mrf.mxu1  ;;  %v14221_v34 = vld [vmem:[%s22097_s3 + $0x368] ss:$12 sps:$4 sm:$0xff]  }
 0x51c   :  { %8637 = vmatpush2.bf16.msra.mxu0 %v14214_v62  ;;  %8710 = vmatpush2.bf16.msra.mxu1 %v14215_v22  ;;  %v7669_v42 = vrot.slane %v7553_v44, 1  ;;  %v7671_v11 = vrot.slane %v7620_v24, 1  ;;  %v14222_v44 = vld [vmem:[%s22097_s3 + $0x49c] ss:$12 sps:$4 sm:$0xff]   ;;  %v14225_v24 = vld [vmem:[%s22097_s3 + $0x484] ss:$12 sps:$4 sm:$0xff]  }
 0x51d   :  { %8638 = vmatprep.subr.bf16.mxu0 %v14216_v13  ;;  %8711 = vmatprep.subr.bf16.mxu1 %v22273_v63  ;;  %v7555_v46 = vpop.f32.mrf.mxu0  ;;  %v7622_v10 = vpop.f32.mrf.mxu1  ;;  %v14226_v62 = vld [vmem:[%s22097_s3 + $0x480] ss:$12 sps:$4 sm:$0xff]   ;;  %v14227_v22 = vld [vmem:[%s22097_s3 + $0x488] ss:$12 sps:$4 sm:$0xff]   ;;  %v14230_v13 = vld [vmem:[%s22097_s3 + $0x470] ss:$12 sps:$4 sm:$0xff]  }
 0x51e   :  { %v20274_v21 = vadd.f32 %v7669_v42, %v20042_v49  ;;  %v20277_v18 = vadd.f32 %v7671_v11, %v20044_v5  ;;  %v7670_v32 = vrot.slane %v7555_v46, 1  ;;  %v14219_v5 = vld [vmem:[%s22097_s3 + $0x364] ss:$12 sps:$4 sm:$0xff]   ;;  %v14228_v42 = vld [vmem:[%s22097_s3 + $0x46c] ss:$12 sps:$4 sm:$0xff]  }
 0x51f   :  { %v7557_v9 = vpop.f32.mrf.mxu0  ;;  %v7623_v56 = vpop.f32.mrf.mxu1  ;;  %v14229_v11 = vld [vmem:[%s22097_s3 + $0x468] ss:$12 sps:$4 sm:$0xff]   ;;  %v14232_v10 = vld [vmem:[%s22097_s3 + $0x450] ss:$12 sps:$4 sm:$0xff]  }
 0x520   :  { %8639 = vmatpush2.bf16.msra.mxu0 %v14217_v53  ;;  %8712 = vmatpush2.bf16.msra.mxu1 %v14218_v2  ;;  %v20286_v60 = vadd.f32 %v7670_v32, %v20056_v8  ;;  %v7672_v49 = vrot.slane %v7557_v9, 1  ;;  %v7674_v37 = vrot.slane %v7623_v56, 1  ;;  %v14220_v8 = vld [vmem:[%s22097_s3 + $0x360] ss:$12 sps:$4 sm:$0xff]   ;;  %v14233_v32 = vld [vmem:[%s22097_s3 + $0x458] ss:$12 sps:$4 sm:$0xff]  }
 0x521   :  { %8640 = vmatprep.subr.bf16.mxu0 %v14219_v5  ;;  %8713 = vmatprep.subr.bf16.mxu1 %v22273_v63  ;;  %v7625_v25 = vpop.f32.mrf.mxu1  ;;  %v14231_v46 = vld [vmem:[%s22097_s3 + $0x454] ss:$12 sps:$4 sm:$0xff]   ;;  %v14234_v9 = vld [vmem:[%s22097_s3 + $0x43c] ss:$12 sps:$4 sm:$0xff]   ;;  %v14235_v2 = vld [vmem:[%s22097_s3 + $0x438] ss:$12 sps:$4 sm:$0xff]  }
 0x522   :  { %v20293_v33 = vadd.f32 %v7672_v49, %v20062_v20  ;;  %v20296_v52 = vadd.f32 %v7674_v37, %v20064_v48  ;;  %v14223_v20 = vld [vmem:[%s22097_s3 + $0x498] ss:$12 sps:$4 sm:$0xff]   ;;  %v14224_v48 = vld [vmem:[%s22097_s3 + $0x4a0] ss:$12 sps:$4 sm:$0xff]   ;;  %v22672_v53 = vld [vmem:[#allocation57_spill] sm:$0xff]  ;;  %v20372_v37 = vpop.f32.mrf.mxu0 }
 0x523   :  { %v22671_v56 = vld [vmem:[#allocation46_spill] sm:$0xff]  ;;  %v14236_v49 = vld [vmem:[%s22097_s3 + $0x440] ss:$12 sps:$4 sm:$0xff]   ;;  %v14237_v5 = vld [vmem:[%s22097_s3 + $0x424] ss:$12 sps:$4 sm:$0xff]  }
 0x524   :  { %8641 = vmatpush2.bf16.msra.mxu0 %v14220_v8  ;;  %8714 = vmatpush2.bf16.msra.mxu1 %v14221_v34  ;;  %v14238_v34 = vld [vmem:[%s22097_s3 + $0x420] ss:$12 sps:$4 sm:$0xff]  }
 0x525   :  { %8844 = vmatprep.subr.bf16.mxu0 %v14222_v44  ;;  %8917 = vmatprep.subr.bf16.mxu1 %v22273_v63  ;;  %v14239_v44 = vld [vmem:[%s22097_s3 + $0x428] ss:$12 sps:$4 sm:$0xff]  }
 0x527   :  { %8643 = vmatmul.mubr.bf16.vlgmr.msra.gmra.mxu0 %v19044_v4  ;;  %8716 = vmatmul.mubr.bf16.vlgmr.msra.gmra.mxu1 %v19044_v4 }
 0x528   :  { %12583 = vmatprep.mubr.msk.bf16.mxu0 %vm34_vm0, %v19091_v36  ;;  %12587 = vmatprep.mubr.msk.bf16.mxu1 %vm34_vm0, %v19091_v36 }
 0x529   :  { %8845 = vmatpush1.bf16.msra.mxu0 %v14223_v20  ;;  %8918 = vmatpush1.bf16.msra.mxu1 %v14224_v48 }
 0x52a   :  { %8846 = vmatprep.subr.bf16.mxu0 %v14225_v24  ;;  %8919 = vmatprep.subr.bf16.mxu1 %v22273_v63  ;;  %v14240_v24 = vld [vmem:[%s22097_s3 + $0x40c] ss:$12 sps:$4 sm:$0xff]  }
 0x52d   :  { %8847 = vmatpush1.bf16.msra.mxu0 %v14226_v62  ;;  %8920 = vmatpush1.bf16.msra.mxu1 %v14227_v22 }
 0x52e   :  { %8848 = vmatprep.subr.bf16.mxu0 %v14228_v42  ;;  %8921 = vmatprep.subr.bf16.mxu1 %v22273_v63 }
 0x52f   :  { %8653 = vmatmul.mubr.bf16.gmra.mxu0 %v19097_v23  ;;  %8724 = vmatmul.mubr.bf16.gmra.mxu1 %v19097_v23 }
 0x530   :  { %12584 = vmatprep.mubr.msk.bf16.mxu0 %vm34_vm0, %v19149_v50  ;;  %12588 = vmatprep.mubr.msk.bf16.mxu1 %vm34_vm0, %v19149_v50 }
 0x531   :  { %8849 = vmatpush1.bf16.msra.mxu0 %v14229_v11  ;;  %8922 = vmatpush1.bf16.msra.mxu1 %v14230_v13 }
 0x532   :  { %8850 = vmatprep.subr.bf16.mxu0 %v14231_v46  ;;  %8923 = vmatprep.subr.bf16.mxu1 %v22273_v63 }
 0x535   :  { %8851 = vmatpush1.bf16.msra.mxu0 %v14232_v10  ;;  %8924 = vmatpush1.bf16.msra.mxu1 %v14233_v32 }
 0x536   :  { %8852 = vmatprep.subr.bf16.mxu0 %v14234_v9  ;;  %8925 = vmatprep.subr.bf16.mxu1 %v22273_v63 }
 0x537   :  { %8663 = vmatmul.mubr.bf16.gmra.mxu0 %v22671_v56  ;;  %8732 = vmatmul.mubr.bf16.gmra.mxu1 %v22671_v56 }
 0x538   :  { %12585 = vmatprep.mubr.msk.bf16.mxu0 %vm34_vm0, %v22672_v53  ;;  %12589 = vmatprep.mubr.msk.bf16.mxu1 %vm34_vm0, %v22672_v53 }
 0x539   :  { %8853 = vmatpush1.bf16.msra.mxu0 %v14235_v2  ;;  %8926 = vmatpush1.bf16.msra.mxu1 %v14236_v49 }
 0x53a   :  { %8854 = vmatprep.subr.bf16.mxu0 %v14237_v5  ;;  %8927 = vmatprep.subr.bf16.mxu1 %v22273_v63 }
 0x53c   :  { %v8038_v25 = vpop.f32.mrf.mxu0  ;;  %v8111_v8 = vpop.f32.mrf.mxu1 }
 0x53d   :  { %8855 = vmatpush1.bf16.msra.mxu0 %v14238_v34  ;;  %8928 = vmatpush1.bf16.msra.mxu1 %v14239_v44  ;;  %v8166_v20 = vrot.slane %v8038_v25, 2  ;;  %v8168_v48 = vrot.slane %v8111_v8, 2  ;;  %v14244_v44 = vld [vmem:[%s22097_s3 + $0x3f0] ss:$12 sps:$4 sm:$0xff]  }
 0x53e   :  { %8856 = vmatprep.subr.bf16.mxu0 %v14240_v24  ;;  %8929 = vmatprep.subr.bf16.mxu1 %v22273_v63  ;;  %v8040_v62 = vpop.f32.mrf.mxu0  ;;  %v8113_v22 = vpop.f32.mrf.mxu1 }
 0x53f   :  { %v20389_v42 = vadd.f32 %v8166_v20, %v20157_v58  ;;  %v20392_v11 = vadd.f32 %v8168_v48, %v20160_v31  ;;  %8673 = vmatmul.mubr.bf16.gmra.mxu0 %v19201_v47  ;;  %8740 = vmatmul.mubr.bf16.gmra.mxu1 %v19201_v47  ;;  %v8167_v13 = vrot.slane %v8040_v62, 2  ;;  %v14241_v58 = vld [vmem:[%s22097_s3 + $0x408] ss:$12 sps:$4 sm:$0xff]   ;;  %v14242_v31 = vld [vmem:[%s22097_s3 + $0x410] ss:$12 sps:$4 sm:$0xff]  }
 0x540   :  { %12590 = vmatprep.mubr.msk.bf16.mxu0 %vm34_vm0, %v22655_v0  ;;  %12594 = vmatprep.mubr.msk.bf16.mxu1 %vm34_vm0, %v22655_v0  ;;  %v8042_v46 = vpop.f32.mrf.mxu0  ;;  %v8114_v10 = vpop.f32.mrf.mxu1  ;;  %v14243_v0 = vld [vmem:[%s22097_s3 + $0x3f4] ss:$12 sps:$4 sm:$0xff]   ;;  %v14245_v20 = vld [vmem:[%s22097_s3 + $0x3f8] ss:$12 sps:$4 sm:$0xff]  }
 0x541   :  { %8857 = vmatpush1.bf16.msra.mxu0 %v14241_v58  ;;  %8930 = vmatpush1.bf16.msra.mxu1 %v14242_v31  ;;  %v20407_v32 = vadd.f32 %v8167_v13, %v20175_v28  ;;  %v8169_v9 = vrot.slane %v8042_v46, 2  ;;  %v8171_v2 = vrot.slane %v8114_v10, 2  ;;  %v14247_v31 = vld [vmem:[%s22097_s3 + $0x528] ss:$12 sps:$4 sm:$0xff]  }
 0x542   :  { %8858 = vmatprep.subr.bf16.mxu0 %v14243_v0  ;;  %8931 = vmatprep.subr.bf16.mxu1 %v22273_v63  ;;  %v20413_v49 = vpop.f32.mrf.mxu0  ;;  %v8116_v5 = vpop.f32.mrf.mxu1 }
 0x543   :  { %v20416_v25 = vadd.f32 %v8169_v9, %v20184_v14  ;;  %v20419_v8 = vadd.f32 %v8171_v2, %v20187_v35  ;;  %v14246_v14 = vld [vmem:[%s22097_s3 + $0x52c] ss:$12 sps:$4 sm:$0xff]   ;;  %v14248_v9 = vld [vmem:[%s22097_s3 + $0x530] ss:$12 sps:$4 sm:$0xff]  }
 0x544   :  { %v8048_v28 = vpop.f32.mrf.mxu0  ;;  %v8119_v34 = vpop.f32.mrf.mxu1 }
 0x545   :  { %8859 = vmatpush1.bf16.msra.mxu0 %v14244_v44  ;;  %8932 = vmatpush1.bf16.msra.mxu1 %v14245_v20  ;;  %v8172_v48 = vrot.slane %v8048_v28, 2  ;;  %v8174_v24 = vrot.slane %v8119_v34, 2 }
 0x546   :  { %8864 = vmatprep.subr.bf16.mxu0 %v14246_v14  ;;  %8937 = vmatprep.subr.bf16.mxu1 %v22273_v63  ;;  %v8050_v35 = vpop.f32.mrf.mxu0  ;;  %v8121_v62 = vpop.f32.mrf.mxu1 }
 0x547   :  { %v20432_v22 = vadd.f32 %v8172_v48, %v20200_v1  ;;  %v20435_v13 = vadd.f32 %v8174_v24, %v20203_v26  ;;  %v8173_v46 = vrot.slane %v8050_v35, 2  ;;  %v14249_v26 = vld [vmem:[%s22097_s3 + $0x514] ss:$12 sps:$4 sm:$0xff]   ;;  %v14250_v48 = vld [vmem:[%s22097_s3 + $0x510] ss:$12 sps:$4 sm:$0xff]  }
 0x548   :  { %v8052_v10 = vpop.f32.mrf.mxu0  ;;  %v8122_v58 = vpop.f32.mrf.mxu1  ;;  %v14251_v24 = vld [vmem:[%s22097_s3 + $0x518] ss:$12 sps:$4 sm:$0xff]  }
 0x549   :  { %8865 = vmatpush2.bf16.msra.mxu0 %v14247_v31  ;;  %8938 = vmatpush2.bf16.msra.mxu1 %v14248_v9  ;;  %v20444_v2 = vadd.f32 %v8173_v46, %v20212_v51  ;;  %v8175_v1 = vrot.slane %v8052_v10, 2  ;;  %v8177_v0 = vrot.slane %v8122_v58, 2 }
 0x54a   :  { %8866 = vmatprep.subr.bf16.mxu0 %v14249_v26  ;;  %8939 = vmatprep.subr.bf16.mxu1 %v22273_v63  ;;  %v20450_v5 = vpop.f32.mrf.mxu0  ;;  %v8124_v28 = vpop.f32.mrf.mxu1 }
 0x54b   :  { %22673 = vst [vmem:[#allocation68_spill] sm:$0xff] %v20444_v2  ;;  %v20453_v34 = vadd.f32 %v8175_v1, %v20221_v29  ;;  %v20456_v44 = vadd.f32 %v8177_v0, %v20224_v57  ;;  %v14252_v29 = vld [vmem:[%s22097_s3 + $0x4fc] ss:$12 sps:$4 sm:$0xff]   ;;  %v14253_v1 = vld [vmem:[%s22097_s3 + $0x4f8] ss:$12 sps:$4 sm:$0xff]  }
 0x54c   :  { %v8058_v51 = vpop.f32.mrf.mxu0  ;;  %v8127_v20 = vpop.f32.mrf.mxu1  ;;  %v14254_v0 = vld [vmem:[%s22097_s3 + $0x500] ss:$12 sps:$4 sm:$0xff]  }
 0x54d   :  { %22674 = vst [vmem:[#allocation56_spill] sm:$0xff] %v20453_v34  ;;  %22675 = vst [vmem:[#allocation67_spill] sm:$0xff] %v20456_v44  ;;  %8867 = vmatpush2.bf16.msra.mxu0 %v14250_v48  ;;  %8940 = vmatpush2.bf16.msra.mxu1 %v14251_v24  ;;  %v8178_v14 = vrot.slane %v8058_v51, 2  ;;  %v8180_v35 = vrot.slane %v8127_v20, 2 }
 0x54e   :  { %8868 = vmatprep.subr.bf16.mxu0 %v14252_v29  ;;  %8941 = vmatprep.subr.bf16.mxu1 %v22273_v63  ;;  %v8060_v57 = vpop.f32.mrf.mxu0  ;;  %v8129_v62 = vpop.f32.mrf.mxu1  ;;  %v14257_v29 = vld [vmem:[%s22097_s3 + $0x4e8] ss:$12 sps:$4 sm:$0xff]  }
 0x54f   :  { %v20469_v46 = vadd.f32 %v8178_v14, %v20237_v30  ;;  %v20472_v10 = vadd.f32 %v8180_v35, %v20240_v12  ;;  %v8179_v58 = vrot.slane %v8060_v57, 2  ;;  %v14255_v12 = vld [vmem:[%s22097_s3 + $0x4e4] ss:$12 sps:$4 sm:$0xff]   ;;  %v14256_v35 = vld [vmem:[%s22097_s3 + $0x4e0] ss:$12 sps:$4 sm:$0xff]  }
 0x550   :  { %v8062_v31 = vpop.f32.mrf.mxu0  ;;  %v8130_v9 = vpop.f32.mrf.mxu1 }
 0x551   :  { %22676 = vst [vmem:[#allocation69_spill] sm:$0xff] %v20469_v46  ;;  %22677 = vst [vmem:[#allocation45_spill] sm:$0xff] %v20472_v10  ;;  %8869 = vmatpush2.bf16.msra.mxu0 %v14253_v1  ;;  %8942 = vmatpush2.bf16.msra.mxu1 %v14254_v0  ;;  %v20481_v26 = vadd.f32 %v8179_v58, %v20249_v61  ;;  %v8181_v30 = vrot.slane %v8062_v31, 2  ;;  %v8183_v28 = vrot.slane %v8130_v9, 2 }
 0x552   :  { %8870 = vmatprep.subr.bf16.mxu0 %v14255_v12  ;;  %8943 = vmatprep.subr.bf16.mxu1 %v22273_v63  ;;  %v20487_v51 = vpop.f32.mrf.mxu0  ;;  %v8132_v20 = vpop.f32.mrf.mxu1  ;;  %v14260_v12 = vld [vmem:[%s22097_s3 + $0x4d0] ss:$12 sps:$4 sm:$0xff]  }
 0x553   :  { %22678 = vst [vmem:[#allocation70_spill] sm:$0xff] %v20481_v26  ;;  %v20490_v48 = vadd.f32 %v8181_v30, %v20258_v55  ;;  %v20493_v24 = vadd.f32 %v8183_v28, %v20261_v40  ;;  %v14258_v55 = vld [vmem:[%s22097_s3 + $0x4cc] ss:$12 sps:$4 sm:$0xff]   ;;  %v14259_v28 = vld [vmem:[%s22097_s3 + $0x4c8] ss:$12 sps:$4 sm:$0xff]  }
 0x554   :  { %v8068_v61 = vpop.f32.mrf.mxu0  ;;  %v8135_v14 = vpop.f32.mrf.mxu1 }
 0x555   :  { %22679 = vst [vmem:[#allocation41_spill] sm:$0xff] %v20490_v48  ;;  %22680 = vst [vmem:[#allocation42_spill] sm:$0xff] %v20493_v24  ;;  %8871 = vmatpush2.bf16.msra.mxu0 %v14256_v35  ;;  %8944 = vmatpush2.bf16.msra.mxu1 %v14257_v29  ;;  %v8184_v57 = vrot.slane %v8068_v61, 2  ;;  %v8186_v62 = vrot.slane %v8135_v14, 2 }
 0x556   :  { %8872 = vmatprep.subr.bf16.mxu0 %v14258_v55  ;;  %8945 = vmatprep.subr.bf16.mxu1 %v22273_v63  ;;  %v8070_v40 = vpop.f32.mrf.mxu0  ;;  %v8137_v58 = vpop.f32.mrf.mxu1  ;;  %v14269_v55 = vld [vmem:[%s22097_s3 + $0x5d8] ss:$12 sps:$4 sm:$0xff]  }
 0x557   :  { %v20506_v31 = vadd.f32 %v8184_v57, %v20274_v21  ;;  %v20509_v9 = vadd.f32 %v8186_v62, %v20277_v18  ;;  %v8185_v1 = vrot.slane %v8070_v40, 2  ;;  %v14261_v18 = vld [vmem:[%s22097_s3 + $0x4b4] ss:$12 sps:$4 sm:$0xff]   ;;  %v14263_v57 = vld [vmem:[%s22097_s3 + $0x4b8] ss:$12 sps:$4 sm:$0xff]  }
 0x558   :  { %v8072_v0 = vpop.f32.mrf.mxu0  ;;  %v8138_v30 = vpop.f32.mrf.mxu1  ;;  %v14264_v62 = vld [vmem:[%s22097_s3 + $0x5ec] ss:$12 sps:$4 sm:$0xff]   ;;  %v14270_v40 = vld [vmem:[%s22097_s3 + $0x5bc] ss:$12 sps:$4 sm:$0xff]  }
 0x559   :  { %22681 = vst [vmem:[#allocation71_spill] sm:$0xff] %v20506_v31  ;;  %22682 = vst [vmem:[#allocation72_spill] sm:$0xff] %v20509_v9  ;;  %8873 = vmatpush2.bf16.msra.mxu0 %v14259_v28  ;;  %8946 = vmatpush2.bf16.msra.mxu1 %v14260_v12  ;;  %v20518_v20 = vadd.f32 %v8185_v1, %v20286_v60  ;;  %v8187_v21 = vrot.slane %v8072_v0, 2  ;;  %v8189_v61 = vrot.slane %v8138_v30, 2  ;;  %v14262_v60 = vld [vmem:[%s22097_s3 + $0x4b0] ss:$12 sps:$4 sm:$0xff]  }
 0x55a   :  { %8874 = vmatprep.subr.bf16.mxu0 %v14261_v18  ;;  %8947 = vmatprep.subr.bf16.mxu1 %v22273_v63  ;;  %v8140_v14 = vpop.f32.mrf.mxu1  ;;  %v14271_v58 = vld [vmem:[%s22097_s3 + $0x5b8] ss:$12 sps:$4 sm:$0xff]   ;;  %v14272_v1 = vld [vmem:[%s22097_s3 + $0x5c0] ss:$12 sps:$4 sm:$0xff]   ;;  %v14275_v0 = vld [vmem:[%s22097_s3 + $0x5a8] ss:$12 sps:$4 sm:$0xff]  }
 0x55b   :  { %22683 = vst [vmem:[#allocation26_spill] sm:$0xff] %v20518_v20  ;;  %v20525_v35 = vadd.f32 %v8187_v21, %v20293_v33  ;;  %v20528_v29 = vadd.f32 %v8189_v61, %v20296_v52  ;;  %v14265_v33 = vld [vmem:[%s22097_s3 + $0x5e8] ss:$12 sps:$4 sm:$0xff]   ;;  %v14266_v52 = vld [vmem:[%s22097_s3 + $0x5f0] ss:$12 sps:$4 sm:$0xff]   ;;  %v20604_v21 = vpop.f32.mrf.mxu0 }
 0x55c   :  { %v14276_v30 = vld [vmem:[%s22097_s3 + $0x58c] ss:$12 sps:$4 sm:$0xff]   ;;  %v14277_v28 = vld [vmem:[%s22097_s3 + $0x588] ss:$12 sps:$4 sm:$0xff]   ;;  %v14278_v12 = vld [vmem:[%s22097_s3 + $0x590] ss:$12 sps:$4 sm:$0xff]  }
 0x55d   :  { %22684 = vst [vmem:[#allocation74_spill] sm:$0xff] %v20525_v35  ;;  %22685 = vst [vmem:[#allocation32_spill] sm:$0xff] %v20528_v29  ;;  %8875 = vmatpush2.bf16.msra.mxu0 %v14262_v60  ;;  %8948 = vmatpush2.bf16.msra.mxu1 %v14263_v57  ;;  %v14280_v18 = vld [vmem:[%s22097_s3 + $0x570] ss:$12 sps:$4 sm:$0xff]   ;;  %v14281_v14 = vld [vmem:[%s22097_s3 + $0x578] ss:$12 sps:$4 sm:$0xff]  }
 0x55e   :  { %9078 = vmatprep.subr.bf16.mxu0 %v14264_v62  ;;  %9151 = vmatprep.subr.bf16.mxu1 %v22273_v63  ;;  %22686 = vst [vmem:[#allocation28_spill] sm:$0xff] %v20604_v21  ;;  %v14282_v60 = vld [vmem:[%s22097_s3 + $0x55c] ss:$12 sps:$4 sm:$0xff]  }
 0x560   :  { %8877 = vmatmul.mubr.bf16.vlgmr.msra.gmra.mxu0 %v22656_v45  ;;  %8950 = vmatmul.mubr.bf16.vlgmr.msra.gmra.mxu1 %v22656_v45  ;;  %v14267_v45 = vld [vmem:[%s22097_s3 + $0x5d4] ss:$12 sps:$4 sm:$0xff]  }
 0x561   :  { %12591 = vmatprep.mubr.msk.bf16.mxu0 %vm34_vm0, %v22657_v16  ;;  %12595 = vmatprep.mubr.msk.bf16.mxu1 %vm34_vm0, %v22657_v16  ;;  %v14268_v16 = vld [vmem:[%s22097_s3 + $0x5d0] ss:$12 sps:$4 sm:$0xff]  }
 0x562   :  { %9079 = vmatpush1.bf16.msra.mxu0 %v14265_v33  ;;  %9152 = vmatpush1.bf16.msra.mxu1 %v14266_v52 }
 0x563   :  { %9080 = vmatprep.subr.bf16.mxu0 %v14267_v45  ;;  %9153 = vmatprep.subr.bf16.mxu1 %v22273_v63  ;;  %v14283_v45 = vld [vmem:[%s22097_s3 + $0x558] ss:$12 sps:$4 sm:$0xff]  }
 0x566   :  { %9081 = vmatpush1.bf16.msra.mxu0 %v14268_v16  ;;  %9154 = vmatpush1.bf16.msra.mxu1 %v14269_v55  ;;  %v14284_v16 = vld [vmem:[%s22097_s3 + $0x560] ss:$12 sps:$4 sm:$0xff]  }
 0x567   :  { %9082 = vmatprep.subr.bf16.mxu0 %v14270_v40  ;;  %9155 = vmatprep.subr.bf16.mxu1 %v22273_v63 }
 0x568   :  { %8887 = vmatmul.mubr.bf16.gmra.mxu0 %v22658_v38  ;;  %8958 = vmatmul.mubr.bf16.gmra.mxu1 %v22658_v38  ;;  %v14273_v38 = vld [vmem:[%s22097_s3 + $0x5a4] ss:$12 sps:$4 sm:$0xff]  }
 0x569   :  { %12592 = vmatprep.mubr.msk.bf16.mxu0 %vm34_vm0, %v22659_v15  ;;  %12596 = vmatprep.mubr.msk.bf16.mxu1 %vm34_vm0, %v22659_v15  ;;  %v14274_v15 = vld [vmem:[%s22097_s3 + $0x5a0] ss:$12 sps:$4 sm:$0xff]  }
 0x56a   :  { %9083 = vmatpush1.bf16.msra.mxu0 %v14271_v58  ;;  %9156 = vmatpush1.bf16.msra.mxu1 %v14272_v1  ;;  %v14286_v58 = vld [vmem:[%s22097_s3 + $0x540] ss:$12 sps:$4 sm:$0xff]   ;;  %v14287_v1 = vld [vmem:[%s22097_s3 + $0x548] ss:$12 sps:$4 sm:$0xff]  }
 0x56b   :  { %9084 = vmatprep.subr.bf16.mxu0 %v14273_v38  ;;  %9157 = vmatprep.subr.bf16.mxu1 %v22273_v63  ;;  %v14288_v38 = vld [vmem:[%s22097_s3 + $0x67c] ss:$12 sps:$4 sm:$0xff]  }
 0x56e   :  { %9085 = vmatpush1.bf16.msra.mxu0 %v14274_v15  ;;  %9158 = vmatpush1.bf16.msra.mxu1 %v14275_v0 }
 0x56f   :  { %9086 = vmatprep.subr.bf16.mxu0 %v14276_v30  ;;  %9159 = vmatprep.subr.bf16.mxu1 %v22273_v63 }
 0x570   :  { %8897 = vmatmul.mubr.bf16.gmra.mxu0 %v22660_v43  ;;  %8966 = vmatmul.mubr.bf16.gmra.mxu1 %v22660_v43  ;;  %v14279_v43 = vld [vmem:[%s22097_s3 + $0x574] ss:$12 sps:$4 sm:$0xff]  }
 0x571   :  { %12593 = vmatprep.mubr.msk.bf16.mxu0 %vm34_vm0, %v22661_v59  ;;  %12597 = vmatprep.mubr.msk.bf16.mxu1 %vm34_vm0, %v22661_v59 }
 0x572   :  { %9087 = vmatpush1.bf16.msra.mxu0 %v14277_v28  ;;  %9160 = vmatpush1.bf16.msra.mxu1 %v14278_v12  ;;  %v14289_v28 = vld [vmem:[%s22097_s3 + $0x678] ss:$12 sps:$4 sm:$0xff]   ;;  %v14290_v12 = vld [vmem:[%s22097_s3 + $0x680] ss:$12 sps:$4 sm:$0xff]  }
 0x573   :  { %9088 = vmatprep.subr.bf16.mxu0 %v14279_v43  ;;  %9161 = vmatprep.subr.bf16.mxu1 %v22273_v63  ;;  %v14291_v43 = vld [vmem:[%s22097_s3 + $0x664] ss:$12 sps:$4 sm:$0xff]  }
 0x575   :  { %v20610_v59 = vpop.f32.mrf.mxu0  ;;  %v20612_v61 = vpop.f32.mrf.mxu1 }
 0x576   :  { %9089 = vmatpush1.bf16.msra.mxu0 %v14280_v18  ;;  %9162 = vmatpush1.bf16.msra.mxu1 %v14281_v14 }
 0x577   :  { %9090 = vmatprep.subr.bf16.mxu0 %v14282_v60  ;;  %9163 = vmatprep.subr.bf16.mxu1 %v22273_v63  ;;  %v20624_v57 = vpop.f32.mrf.mxu0  ;;  %v8347_v62 = vpop.f32.mrf.mxu1 }
 0x578   :  { %8907 = vmatmul.mubr.bf16.gmra.mxu0 %v22662_v41  ;;  %8974 = vmatmul.mubr.bf16.gmra.mxu1 %v22662_v41  ;;  %v14285_v41 = vld [vmem:[%s22097_s3 + $0x544] ss:$12 sps:$4 sm:$0xff]   ;;  %v14292_v62 = vld [vmem:[%s22097_s3 + $0x660] ss:$12 sps:$4 sm:$0xff]  }
 0x579   :  { %12598 = vmatprep.mubr.msk.bf16.mxu0 %vm34_vm0, %v19024_v17  ;;  %12602 = vmatprep.mubr.msk.bf16.mxu1 %vm34_vm0, %v19024_v17  ;;  %v20632_v33 = vpop.f32.mrf.mxu0  ;;  %v20634_v52 = vpop.f32.mrf.mxu1 }
 0x57a   :  { %9091 = vmatpush1.bf16.msra.mxu0 %v14283_v45  ;;  %9164 = vmatpush1.bf16.msra.mxu1 %v14284_v16  ;;  %v14293_v45 = vld [vmem:[%s22097_s3 + $0x668] ss:$12 sps:$4 sm:$0xff]   ;;  %v14294_v16 = vld [vmem:[%s22097_s3 + $0x64c] ss:$12 sps:$4 sm:$0xff]  }
 0x57b   :  { %9092 = vmatprep.subr.bf16.mxu0 %v14285_v41  ;;  %9165 = vmatprep.subr.bf16.mxu1 %v22273_v63  ;;  %v8350_v17 = vpop.f32.mrf.mxu1  ;;  %v20646_v55 = vpop.f32.mrf.mxu0 }
 0x57d   :  { %v20648_v40 = vpop.f32.mrf.mxu1  ;;  %v20660_v0 = vpop.f32.mrf.mxu0 }
 0x57e   :  { %9093 = vmatpush1.bf16.msra.mxu0 %v14286_v58  ;;  %9166 = vmatpush1.bf16.msra.mxu1 %v14287_v1  ;;  %v14295_v1 = vld [vmem:[%s22097_s3 + $0x648] ss:$12 sps:$4 sm:$0xff]  }
 0x57f   :  { %9098 = vmatprep.subr.bf16.mxu0 %v14288_v38  ;;  %9171 = vmatprep.subr.bf16.mxu1 %v22273_v63  ;;  %v8355_v15 = vpop.f32.mrf.mxu1  ;;  %v20674_v14 = vpop.f32.mrf.mxu0  ;;  %v14296_v38 = vld [vmem:[%s22097_s3 + $0x650] ss:$12 sps:$4 sm:$0xff]  }
 0x580   :  { %v14297_v15 = vld [vmem:[%s22097_s3 + $0x634] ss:$12 sps:$4 sm:$0xff]  }
 0x581   :  { %v20662_v30 = vpop.f32.mrf.mxu1  ;;  %v20688_v17 = vpop.f32.mrf.mxu0 }
 0x582   :  { %9099 = vmatpush2.bf16.msra.mxu0 %v14289_v28  ;;  %9172 = vmatpush2.bf16.msra.mxu1 %v14290_v12 }
 0x583   :  { %9100 = vmatprep.subr.bf16.mxu0 %v14291_v43  ;;  %9173 = vmatprep.subr.bf16.mxu1 %v22273_v63  ;;  %v8358_v18 = vpop.f32.mrf.mxu1  ;;  %v20702_v12 = vpop.f32.mrf.mxu0 }
 0x584   :  { %v14298_v18 = vld [vmem:[%s22097_s3 + $0x630] ss:$12 sps:$4 sm:$0xff]  }
 0x585   :  { %v20676_v60 = vpop.f32.mrf.mxu1 }
 0x586   :  { %9101 = vmatpush2.bf16.msra.mxu0 %v14292_v62  ;;  %9174 = vmatpush2.bf16.msra.mxu1 %v14293_v45  ;;  %v14299_v62 = vld [vmem:[%s22097_s3 + $0x638] ss:$12 sps:$4 sm:$0xff]   ;;  %v14300_v45 = vld [vmem:[%s22097_s3 + $0x61c] ss:$12 sps:$4 sm:$0xff]  }
 0x587   :  { %9102 = vmatprep.subr.bf16.mxu0 %v14294_v16  ;;  %9175 = vmatprep.subr.bf16.mxu1 %v22273_v63  ;;  %v8363_v41 = vpop.f32.mrf.mxu1 }
 0x588   :  { %v20716_v41 = vpop.f32.mrf.mxu0 }
 0x589   :  { %v20690_v58 = vpop.f32.mrf.mxu1 }
 0x58a   :  { %9103 = vmatpush2.bf16.msra.mxu0 %v14295_v1  ;;  %9176 = vmatpush2.bf16.msra.mxu1 %v14296_v38  ;;  %v14301_v38 = vld [vmem:[%s22097_s3 + $0x618] ss:$12 sps:$4 sm:$0xff]  }
 0x58b   :  { %9104 = vmatprep.subr.bf16.mxu0 %v14297_v15  ;;  %9177 = vmatprep.subr.bf16.mxu1 %v22273_v63  ;;  %v8366_v28 = vpop.f32.mrf.mxu1  ;;  %v14302_v15 = vld [vmem:[%s22097_s3 + $0x620] ss:$12 sps:$4 sm:$0xff]  }
 0x58c   :  { %v14303_v28 = vld [vmem:[%s22097_s3 + $0x604] ss:$12 sps:$4 sm:$0xff]  }
 0x58d   :  { %v20704_v43 = vpop.f32.mrf.mxu1 }
 0x58e   :  { %9105 = vmatpush2.bf16.msra.mxu0 %v14298_v18  ;;  %9178 = vmatpush2.bf16.msra.mxu1 %v14299_v62  ;;  %v20730_v62 = vpop.f32.mrf.mxu0 }
 0x58f   :  { %9106 = vmatprep.subr.bf16.mxu0 %v14300_v45  ;;  %9179 = vmatprep.subr.bf16.mxu1 %v22273_v63  ;;  %v8371_v16 = vpop.f32.mrf.mxu1  ;;  %v14304_v45 = vld [vmem:[%s22097_s3 + $0x600] ss:$12 sps:$4 sm:$0xff]  }
 0x590   :  { %v14305_v16 = vld [vmem:[%s22097_s3 + $0x608] ss:$12 sps:$4 sm:$0xff]  }
 0x591   :  { %v20718_v1 = vpop.f32.mrf.mxu1 }
 0x592   :  { %9107 = vmatpush2.bf16.msra.mxu0 %v14301_v38  ;;  %9180 = vmatpush2.bf16.msra.mxu1 %v14302_v15  ;;  %v20738_v38 = vpop.f32.mrf.mxu0 }
 0x593   :  { %9108 = vmatprep.subr.bf16.mxu0 %v14303_v28  ;;  %9181 = vmatprep.subr.bf16.mxu1 %v22273_v63  ;;  %v8374_v18 = vpop.f32.mrf.mxu1 }
 0x594   :  { %v20746_v15 = vpop.f32.mrf.mxu0 }
 0x596   :  { %9109 = vmatpush2.bf16.msra.mxu0 %v14304_v45  ;;  %9182 = vmatpush2.bf16.msra.mxu1 %v14305_v16  ;;  %v20748_v28 = vpop.f32.mrf.mxu0 }
 0x599   :  { %9111 = vmatmul.mubr.bf16.vlgmr.msra.gmra.mxu0 %v19044_v4  ;;  %9184 = vmatmul.mubr.bf16.vlgmr.msra.gmra.mxu1 %v19044_v4  ;;  %v20756_v4 = vpop.f32.mrf.mxu0 }
 0x59a   :  { %12599 = vmatprep.mubr.msk.bf16.mxu0 %vm34_vm0, %v19091_v36  ;;  %12603 = vmatprep.mubr.msk.bf16.mxu1 %vm34_vm0, %v19091_v36 }
 0x59b   :  { %v20758_v18 = vpop.f32.mrf.mxu0 }
 0x59d   :  { %v20766_v36 = vpop.f32.mrf.mxu0 }
 0x5a1   :  { %9121 = vmatmul.mubr.bf16.gmra.mxu0 %v19097_v23  ;;  %9192 = vmatmul.mubr.bf16.gmra.mxu1 %v19097_v23 }
 0x5a2   :  { %12600 = vmatprep.mubr.msk.bf16.mxu0 %vm34_vm0, %v19149_v50  ;;  %12604 = vmatprep.mubr.msk.bf16.mxu1 %vm34_vm0, %v19149_v50 }
 0x5a9   :  { %9131 = vmatmul.mubr.bf16.gmra.mxu0 %v22671_v56  ;;  %9200 = vmatmul.mubr.bf16.gmra.mxu1 %v22671_v56 }
 0x5aa   :  { %12601 = vmatprep.mubr.msk.bf16.mxu0 %vm34_vm0, %v22672_v53  ;;  %12605 = vmatprep.mubr.msk.bf16.mxu1 %vm34_vm0, %v22672_v53 }
 0x5ae   :  { %v8410_v23 = vpop.f32.mrf.mxu0  ;;  %v8483_v45 = vpop.f32.mrf.mxu1 }
 0x5af   :  { %v8538_v16 = vrot.slane %v8410_v23, 1  ;;  %v8540_v50 = vrot.slane %v8483_v45, 1 }
 0x5b0   :  { %v8412_v63 = vpop.f32.mrf.mxu0  ;;  %v8485_v29 = vpop.f32.mrf.mxu1 }
 0x5b1   :  { %v20769_v35 = vadd.f32 %v8538_v16, %v20610_v59  ;;  %v20772_v20 = vadd.f32 %v8540_v50, %v20612_v61  ;;  %9141 = vmatmul.mubr.bf16.gmra.mxu0 %v19201_v47  ;;  %9208 = vmatmul.mubr.bf16.gmra.mxu1 %v19201_v47  ;;  %v8539_v56 = vrot.slane %v8412_v63, 1 }
 0x5b2   :  { %v8414_v53 = vpop.f32.mrf.mxu0  ;;  %v8486_v9 = vpop.f32.mrf.mxu1 }
 0x5b3   :  { %v20777_v31 = vadd.f32 %v8539_v56, %v20624_v57  ;;  %v8541_v23 = vrot.slane %v8414_v53, 1  ;;  %v8543_v45 = vrot.slane %v8486_v9, 1 }
 0x5b4   :  { %v8416_v21 = vpop.f32.mrf.mxu0  ;;  %v8488_v29 = vpop.f32.mrf.mxu1 }
 0x5b5   :  { %v20780_v59 = vadd.f32 %v8541_v23, %v20632_v33  ;;  %v20783_v61 = vadd.f32 %v8543_v45, %v20634_v52  ;;  %v8542_v16 = vrot.slane %v8416_v21, 1 }
 0x5b6   :  { %v8420_v50 = vpop.f32.mrf.mxu0  ;;  %v8491_v24 = vpop.f32.mrf.mxu1 }
 0x5b7   :  { %v20786_v63 = vadd.f32 %v8542_v16, %v20646_v55  ;;  %v8544_v47 = vrot.slane %v8420_v50, 1  ;;  %v8546_v48 = vrot.slane %v8491_v24, 1 }
 0x5b8   :  { %v8422_v57 = vpop.f32.mrf.mxu0  ;;  %v8493_v56 = vpop.f32.mrf.mxu1 }
 0x5b9   :  { %v20789_v9 = vadd.f32 %v8544_v47, %v20660_v0  ;;  %v20792_v53 = vadd.f32 %v8546_v48, %v20648_v40  ;;  %v8545_v33 = vrot.slane %v8422_v57, 1 }
 0x5ba   :  { %v8424_v23 = vpop.f32.mrf.mxu0  ;;  %v8494_v52 = vpop.f32.mrf.mxu1 }
 0x5bb   :  { %v20795_v21 = vadd.f32 %v8545_v33, %v20674_v14  ;;  %v8547_v45 = vrot.slane %v8424_v23, 1  ;;  %v8549_v29 = vrot.slane %v8494_v52, 1 }
 0x5bc   :  { %v8426_v55 = vpop.f32.mrf.mxu0  ;;  %v8496_v16 = vpop.f32.mrf.mxu1 }
 0x5bd   :  { %v20798_v24 = vadd.f32 %v8547_v45, %v20688_v17  ;;  %v20801_v50 = vadd.f32 %v8549_v29, %v20662_v30  ;;  %v8548_v0 = vrot.slane %v8426_v55, 1 }
 0x5be   :  { %v8430_v47 = vpop.f32.mrf.mxu0  ;;  %v8499_v48 = vpop.f32.mrf.mxu1 }
 0x5bf   :  { %v20804_v40 = vadd.f32 %v8548_v0, %v20702_v12  ;;  %v8550_v57 = vrot.slane %v8430_v47, 1  ;;  %v8552_v56 = vrot.slane %v8499_v48, 1 }
 0x5c0   :  { %v8432_v14 = vpop.f32.mrf.mxu0  ;;  %v8501_v33 = vpop.f32.mrf.mxu1 }
 0x5c1   :  { %v20807_v23 = vadd.f32 %v8550_v57, %v20716_v41  ;;  %v20810_v52 = vadd.f32 %v8552_v56, %v20676_v60  ;;  %v8551_v17 = vrot.slane %v8432_v14, 1 }
 0x5c2   :  { %v8434_v45 = vpop.f32.mrf.mxu0  ;;  %v8502_v30 = vpop.f32.mrf.mxu1 }
 0x5c3   :  { %v20813_v29 = vadd.f32 %v8551_v17, %v20730_v62  ;;  %v8553_v55 = vrot.slane %v8434_v45, 1  ;;  %v8555_v16 = vrot.slane %v8502_v30, 1 }
 0x5c4   :  { %v8436_v12 = vpop.f32.mrf.mxu0  ;;  %v8504_v0 = vpop.f32.mrf.mxu1 }
 0x5c5   :  { %22687 = vst [vmem:[#allocation73_spill] sm:$0xff] %v20813_v29  ;;  %v20816_v47 = vadd.f32 %v8553_v55, %v20738_v38  ;;  %v20819_v48 = vadd.f32 %v8555_v16, %v20690_v58  ;;  %v8554_v41 = vrot.slane %v8436_v12, 1 }
 0x5c6   :  { %v8440_v57 = vpop.f32.mrf.mxu0  ;;  %v8507_v60 = vpop.f32.mrf.mxu1 }
 0x5c7   :  { %v20822_v56 = vadd.f32 %v8554_v41, %v20746_v15  ;;  %v8556_v14 = vrot.slane %v8440_v57, 1  ;;  %v8558_v33 = vrot.slane %v8507_v60, 1 }
 0x5c8   :  { %v8442_v62 = vpop.f32.mrf.mxu0  ;;  %v8509_v17 = vpop.f32.mrf.mxu1 }
 0x5c9   :  { %22688 = vst [vmem:[#allocation31_spill] sm:$0xff] %v20822_v56  ;;  %v20825_v45 = vadd.f32 %v8556_v14, %v20748_v28  ;;  %v20828_v30 = vadd.f32 %v8558_v33, %v20704_v43  ;;  %v8557_v38 = vrot.slane %v8442_v62, 1 }
 0x5ca   :  { %v8444_v55 = vpop.f32.mrf.mxu0  ;;  %v8510_v58 = vpop.f32.mrf.mxu1 }
 0x5cb   :  { %v20831_v16 = vadd.f32 %v8557_v38, %v20756_v4  ;;  %v8559_v12 = vrot.slane %v8444_v55, 1  ;;  %v8561_v0 = vrot.slane %v8510_v58, 1 }
 0x5cc   :  { %v8446_v15 = vpop.f32.mrf.mxu0  ;;  %v8512_v41 = vpop.f32.mrf.mxu1 }
 0x5cd   :  { %22689 = vst [vmem:[#allocation33_spill] sm:$0xff] %v20831_v16  ;;  %v20834_v57 = vadd.f32 %v8559_v12, %v20758_v18  ;;  %v20837_v60 = vadd.f32 %v8561_v0, %v20718_v1  ;;  %v8560_v28 = vrot.slane %v8446_v15, 1 }
 0x5cf   :  { %v20840_v43 = vadd.f32 %v8560_v28, %v20766_v36 }
 0x5d1   :  { %22690 = vst [vmem:[#allocation75_spill] sm:$0xff] %v20840_v43 }
 0x5e7   :  { %v8644_v14 = vpop.f32.mrf.mxu0  ;;  %v8717_v33 = vpop.f32.mrf.mxu1 }
 0x5e8   :  { %v8772_v62 = vrot.slane %v8644_v14, 1  ;;  %v8774_v17 = vrot.slane %v8717_v33, 1 }
 0x5e9   :  { %v20842_v4 = vpop.f32.mrf.mxu0  ;;  %v8719_v38 = vpop.f32.mrf.mxu1 }
 0x5ea   :  { %v20845_v55 = vadd.f32 %v8772_v62, %v20769_v35  ;;  %v20848_v18 = vadd.f32 %v8774_v17, %v20772_v20 }
 0x5eb   :  { %v8648_v58 = vpop.f32.mrf.mxu0  ;;  %v8720_v1 = vpop.f32.mrf.mxu1 }
 0x5ec   :  { %v8775_v12 = vrot.slane %v8648_v58, 1  ;;  %v8777_v0 = vrot.slane %v8720_v1, 1 }
 0x5ed   :  { %v20850_v15 = vpop.f32.mrf.mxu0  ;;  %v8722_v36 = vpop.f32.mrf.mxu1 }
 0x5ee   :  { %v8823_v41 = vadd.f32 %v8775_v12, %v20780_v59  ;;  %v20854_v28 = vadd.f32 %v8777_v0, %v20783_v61 }
 0x5ef   :  { %v8654_v14 = vpop.f32.mrf.mxu0  ;;  %v8725_v33 = vpop.f32.mrf.mxu1 }
 0x5f0   :  { %v8778_v38 = vrot.slane %v8654_v14, 1  ;;  %v8780_v35 = vrot.slane %v8725_v33, 1 }
 0x5f1   :  { %v20856_v62 = vpop.f32.mrf.mxu0  ;;  %v8727_v20 = vpop.f32.mrf.mxu1 }
 0x5f2   :  { %v8826_v17 = vadd.f32 %v8778_v38, %v20789_v9  ;;  %v20860_v58 = vadd.f32 %v8780_v35, %v20792_v53 }
 0x5f3   :  { %v8658_v1 = vpop.f32.mrf.mxu0  ;;  %v8728_v43 = vpop.f32.mrf.mxu1 }
 0x5f4   :  { %v8781_v36 = vrot.slane %v8658_v1, 1  ;;  %v8783_v16 = vrot.slane %v8728_v43, 1 }
 0x5f5   :  { %v20862_v59 = vpop.f32.mrf.mxu0  ;;  %v8730_v61 = vpop.f32.mrf.mxu1 }
 0x5f6   :  { %v8829_v12 = vadd.f32 %v8781_v36, %v20798_v24  ;;  %v20866_v0 = vadd.f32 %v8783_v16, %v20801_v50 }
 0x5f7   :  { %v8664_v14 = vpop.f32.mrf.mxu0  ;;  %v8733_v33 = vpop.f32.mrf.mxu1 }
 0x5f8   :  { %v8784_v20 = vrot.slane %v8664_v14, 1  ;;  %v8786_v26 = vrot.slane %v8733_v33, 1 }
 0x5f9   :  { %v20868_v9 = vpop.f32.mrf.mxu0  ;;  %v8735_v53 = vpop.f32.mrf.mxu1 }
 0x5fa   :  { %v8832_v38 = vadd.f32 %v8784_v20, %v20807_v23  ;;  %v20872_v35 = vadd.f32 %v8786_v26, %v20810_v52 }
 0x5fb   :  { %v8668_v43 = vpop.f32.mrf.mxu0  ;;  %v8736_v1 = vpop.f32.mrf.mxu1 }
 0x5fc   :  { %22691 = vst [vmem:[#allocation3_spill] sm:$0xff] %v20872_v35  ;;  %v8787_v61 = vrot.slane %v8668_v43, 1  ;;  %v8789_v10 = vrot.slane %v8736_v1, 1 }
 0x5fd   :  { %v20874_v24 = vpop.f32.mrf.mxu0  ;;  %v8738_v50 = vpop.f32.mrf.mxu1 }
 0x5fe   :  { %22692 = vst [vmem:[#allocation4_spill] sm:$0xff] %v20874_v24  ;;  %v8835_v16 = vadd.f32 %v8787_v61, %v20816_v47  ;;  %v20878_v36 = vadd.f32 %v8789_v10, %v20819_v48 }
 0x5ff   :  { %v8674_v14 = vpop.f32.mrf.mxu0  ;;  %v8741_v33 = vpop.f32.mrf.mxu1 }
 0x600   :  { %22693 = vst [vmem:[#allocation40_spill] sm:$0xff] %v20878_v36  ;;  %v8790_v53 = vrot.slane %v8674_v14, 1  ;;  %v8792_v46 = vrot.slane %v8741_v33, 1 }
 0x601   :  { %v20880_v23 = vpop.f32.mrf.mxu0  ;;  %v8743_v26 = vpop.f32.mrf.mxu1 }
 0x602   :  { %22694 = vst [vmem:[#allocation29_spill] sm:$0xff] %v20880_v23  ;;  %v8838_v52 = vadd.f32 %v8790_v53, %v20825_v45  ;;  %v20884_v20 = vadd.f32 %v8792_v46, %v20828_v30 }
 0x603   :  { %v8678_v43 = vpop.f32.mrf.mxu0  ;;  %v8744_v1 = vpop.f32.mrf.mxu1 }
 0x604   :  { %22695 = vst [vmem:[#allocation6_spill] sm:$0xff] %v20884_v20  ;;  %v8793_v50 = vrot.slane %v8678_v43, 1  ;;  %v8795_v56 = vrot.slane %v8744_v1, 1 }
 0x605   :  { %v8746_v47 = vpop.f32.mrf.mxu1  ;;  %v20890_v61 = vpop.f32.mrf.mxu0 }
 0x606   :  { %v8841_v10 = vadd.f32 %v8793_v50, %v20834_v57  ;;  %v20888_v48 = vadd.f32 %v8795_v56, %v20837_v60  ;;  %22697 = vst [vmem:[#allocation30_spill] sm:$0xff] %v20890_v61 }
 0x608   :  { %22696 = vst [vmem:[#allocation50_spill] sm:$0xff] %v20888_v48 }
 0x620   :  { %v8878_v14 = vpop.f32.mrf.mxu0  ;;  %v20892_v33 = vpop.f32.mrf.mxu1 }
 0x621   :  { %v9006_v26 = vrot.slane %v8878_v14, 2 }
 0x622   :  { %v20894_v45 = vpop.f32.mrf.mxu0  ;;  %v8953_v46 = vpop.f32.mrf.mxu1 }
 0x623   :  { %v20897_v30 = vadd.f32 %v9006_v26, %v20845_v55 }
 0x624   :  { %v8882_v53 = vpop.f32.mrf.mxu0  ;;  %v20899_v43 = vpop.f32.mrf.mxu1 }
 0x625   :  { %v9009_v1 = vrot.slane %v8882_v53, 2 }
 0x626   :  { %v20901_v57 = vpop.f32.mrf.mxu0  ;;  %v8956_v56 = vpop.f32.mrf.mxu1 }
 0x627   :  { %v20903_v60 = vadd.f32 %v9009_v1, %v8823_v41 }
 0x628   :  { %v8888_v50 = vpop.f32.mrf.mxu0  ;;  %v20905_v47 = vpop.f32.mrf.mxu1 }
 0x629   :  { %v9012_v48 = vrot.slane %v8888_v50, 2 }
 0x62a   :  { %v20907_v14 = vpop.f32.mrf.mxu0  ;;  %v8961_v20 = vpop.f32.mrf.mxu1 }
 0x62b   :  { %v20909_v46 = vadd.f32 %v9012_v48, %v8826_v17 }
 0x62c   :  { %v8892_v55 = vpop.f32.mrf.mxu0  ;;  %v20911_v26 = vpop.f32.mrf.mxu1 }
 0x62d   :  { %v9015_v61 = vrot.slane %v8892_v55, 2 }
 0x62e   :  { %v20913_v36 = vpop.f32.mrf.mxu0  ;;  %v8964_v53 = vpop.f32.mrf.mxu1 }
 0x62f   :  { %v20915_v44 = vadd.f32 %v9015_v61, %v8829_v12 }
 0x630   :  { %v8898_v41 = vpop.f32.mrf.mxu0  ;;  %v20917_v1 = vpop.f32.mrf.mxu1 }
 0x631   :  { %v9018_v56 = vrot.slane %v8898_v41, 2 }
 0x632   :  { %v20919_v23 = vpop.f32.mrf.mxu0  ;;  %v8969_v50 = vpop.f32.mrf.mxu1 }
 0x633   :  { %v20921_v34 = vadd.f32 %v9018_v56, %v8832_v38 }
 0x634   :  { %v8902_v17 = vpop.f32.mrf.mxu0  ;;  %v20923_v20 = vpop.f32.mrf.mxu1 }
 0x635   :  { %22698 = vst [vmem:[#allocation51_spill] sm:$0xff] %v20921_v34  ;;  %v9021_v48 = vrot.slane %v8902_v17, 2 }
 0x636   :  { %v20925_v35 = vpop.f32.mrf.mxu0  ;;  %v8972_v55 = vpop.f32.mrf.mxu1 }
 0x637   :  { %22699 = vst [vmem:[#allocation43_spill] sm:$0xff] %v20925_v35  ;;  %v20927_v24 = vadd.f32 %v9021_v48, %v8835_v16  ;;  %v7140_v55 = vrot.slane %v19936_v39, 1  ;;  %v7146_v16 = vrot.slane %v19978_v6, 1  ;;  %v7152_v48 = vrot.slane %v20020_v54, 1 }
 0x638   :  { %v8908_v12 = vpop.f32.mrf.mxu0  ;;  %v20929_v61 = vpop.f32.mrf.mxu1  ;;  %v7655_v39 = vrot.slane %v20181_v19, 1  ;;  %v7661_v6 = vrot.slane %v20218_v3, 1  ;;  %v9011_v19 = vrot.slane %v20899_v43, 2 }
 0x639   :  { %22700 = vst [vmem:[#allocation8_spill] sm:$0xff] %v20927_v24  ;;  %22701 = vst [vmem:[#allocation10_spill] sm:$0xff] %v20929_v61  ;;  %v9024_v53 = vrot.slane %v8908_v12, 2  ;;  %v22705_v24 = vld [vmem:[#allocation44_spill] sm:$0xff]  ;;  %v22706_v12 = vld [vmem:[#allocation66_spill] sm:$0xff] }
 0x63a   :  { %v20931_v29 = vpop.f32.mrf.mxu0  ;;  %v8977_v41 = vpop.f32.mrf.mxu1  ;;  %v6673_v61 = vadd.f32 %v22706_v12, %v22705_v24  ;;  %v7158_v24 = vrot.slane %v20140_v7, 1 }
 0x63b   :  { %22702 = vst [vmem:[#allocation34_spill] sm:$0xff] %v20931_v29  ;;  %v20933_v2 = vadd.f32 %v9024_v53, %v8838_v52  ;;  %v22707_v29 = vld [vmem:[#allocation39_spill] sm:$0xff]  ;;  %v22708_v41 = vld [vmem:[#allocation64_spill] sm:$0xff]  ;;  %v22709_v53 = vld [vmem:[#allocation37_spill] sm:$0xff] }
 0x63c   :  { %v8912_v38 = vpop.f32.mrf.mxu0  ;;  %v20935_v56 = vpop.f32.mrf.mxu1  ;;  %v6679_v52 = vadd.f32 %v22708_v41, %v22707_v29  ;;  %v7667_v29 = vrot.slane %v20255_v27, 1  ;;  %v22723_v27 = vld [vmem:[#allocation69_spill] sm:$0xff] }
 0x63d   :  { %22703 = vst [vmem:[#allocation9_spill] sm:$0xff] %v20933_v2  ;;  %v9027_v50 = vrot.slane %v8912_v38, 2  ;;  %v22710_v2 = vld [vmem:[#allocation27_spill] sm:$0xff]  ;;  %v8773_v38 = vrot.slane %v20842_v4, 1  ;;  %v7673_v4 = vrot.slane %v20372_v37, 1 }
 0x63e   :  { %v8980_v34 = vpop.f32.mrf.mxu1  ;;  %v6685_v35 = vadd.f32 %v22710_v2, %v22709_v53  ;;  %v20952_v54 = vpop.f32.mrf.mxu0  ;;  %v9007_v2 = vrot.slane %v20894_v45, 2  ;;  %v13507_v45 = vld [vmem:[%s22099_s5 + $0x224] ss:$16 sps:$4 sm:$0xff]  }
 0x63f   :  { %v20937_v17 = vadd.f32 %v9027_v50, %v8841_v10  ;;  %v9008_v34 = vrot.slane %v20892_v33, 2  ;;  %v7188_v10 = vadd.f32 %v7140_v55, %v6673_v61  ;;  %v7194_v50 = vadd.f32 %v7146_v16, %v6679_v52  ;;  %9854 = vmatprep.subr.bf16.mxu0 %v13507_v45 }
 0x640   :  { %v8170_v33 = vrot.slane %v20413_v49, 2  ;;  %v8776_v61 = vrot.slane %v20850_v15, 1  ;;  %v8821_v16 = vadd.f32 %v8773_v38, %v20777_v31  ;;  %v8176_v49 = vrot.slane %v20450_v5, 2  ;;  %v13505_v31 = vld [vmem:[%s22099_s5 + $0x220] ss:$16 sps:$4 sm:$0xff]  }
 0x641   :  { %22704 = vst [vmem:[#allocation22_spill] sm:$0xff] %v20937_v17  ;;  %v20954_v17 = vadd.f32 %v7152_v48, %v6685_v35  ;;  %v9056_v35 = vadd.f32 %v9008_v34, %v20848_v18  ;;  %v7703_v41 = vadd.f32 %v7655_v39, %v7188_v10  ;;  %v20968_v52 = vadd.f32 %v7661_v6, %v7194_v50  ;;  %v13508_v10 = vld [vmem:[%s22099_s5 + $0x228] ss:$16 sps:$4 sm:$0xff]  }
 0x642   :  { %v9010_v15 = vrot.slane %v20901_v57, 2  ;;  %v9055_v18 = vadd.f32 %v9007_v2, %v8821_v16  ;;  %v13510_v57 = vld [vmem:[%s22099_s5 + $0x22c] ss:$16 sps:$4 sm:$0xff]   ;;  %v8824_v50 = vadd.f32 %v8776_v61, %v20786_v63  ;;  %v8779_v39 = vrot.slane %v20856_v62, 1  ;;  %9855 = vmatpush1.bf16.msra.mxu0 %v13505_v31 }
 0x643   :  { %v9059_v6 = vadd.f32 %v9011_v19, %v20854_v28  ;;  %9895 = vmatprep.subr.bf16.mxu1 %v13510_v57  ;;  %v8782_v45 = vrot.slane %v20862_v59, 1  ;;  %v9013_v63 = vrot.slane %v20907_v14, 2  ;;  %v13513_v59 = vld [vmem:[%s22099_s5 + $0x204] ss:$16 sps:$4 sm:$0xff]   ;;  %v13516_v14 = vld [vmem:[%s22099_s5 + $0x20c] ss:$16 sps:$4 sm:$0xff]  }
 0x644   :  { %9896 = vmatpush1.bf16.msra.mxu1 %v13508_v10  ;;  %v13514_v10 = vld [vmem:[%s22099_s5 + $0x208] ss:$16 sps:$4 sm:$0xff]   ;;  %9856 = vmatprep.subr.bf16.mxu0 %v13513_v59 }
 0x645   :  { %9897 = vmatprep.subr.bf16.mxu1 %v13516_v14 }
 0x648   :  { %9898 = vmatpush1.bf16.msra.mxu1 %v13514_v10 }
 0x659   :  { %v9112_v55 = vpop.f32.mrf.mxu0  ;;  %v9185_v3 = vpop.f32.mrf.mxu1 }
 0x65a   :  { %v9240_v48 = vrot.slane %v9112_v55, 2  ;;  %v9242_v12 = vrot.slane %v9185_v3, 2 }
 0x65b   :  { %v9114_v43 = vpop.f32.mrf.mxu0  ;;  %v9187_v53 = vpop.f32.mrf.mxu1 }
 0x65c   :  { %v20976_v38 = vadd.f32 %v9240_v48, %v20897_v30  ;;  %v9290_v34 = vadd.f32 %v9242_v12, %v9056_v35  ;;  %v9241_v55 = vrot.slane %v9114_v43, 2  ;;  %v9014_v30 = vrot.slane %v20905_v47, 2 }
 0x65d   :  { %v9116_v2 = vpop.f32.mrf.mxu0  ;;  %v9188_v3 = vpop.f32.mrf.mxu1  ;;  %v9058_v43 = vadd.f32 %v9010_v15, %v8824_v50  ;;  %v8218_v15 = vadd.f32 %v8170_v33, %v7703_v41  ;;  %v9016_v50 = vrot.slane %v20913_v36, 2  ;;  %v13522_v36 = vld [vmem:[%s22099_s5 + $0x1ec] ss:$16 sps:$4 sm:$0xff]  }
 0x65e   :  { %v9312_v16 = vmax.f32 %v20389_v42, %v20976_v38  ;;  %v9289_v35 = vadd.f32 %v9241_v55, %v9055_v18  ;;  %v9243_v48 = vrot.slane %v9116_v2, 2  ;;  %v9245_v12 = vrot.slane %v9188_v3, 2  ;;  %v13511_v55 = vld [vmem:[%s22099_s5 + $0x200] ss:$16 sps:$4 sm:$0xff]   ;;  %9899 = vmatprep.subr.bf16.mxu1 %v13522_v36 }
 0x65f   :  { %v9118_v62 = vpop.f32.mrf.mxu0  ;;  %v9190_v61 = vpop.f32.mrf.mxu1  ;;  %v9314_v28 = vmax.f32 %v20392_v11, %v9290_v34  ;;  %v8827_v11 = vadd.f32 %v8779_v39, %v20795_v21  ;;  %v9062_v18 = vadd.f32 %v9014_v30, %v20860_v58  ;;  %9857 = vmatpush1.bf16.msra.mxu0 %v13511_v55  ;;  %v22718_v36 = vld [vmem:[#allocation67_spill] sm:$0xff] }
 0x660   :  { %v20994_v47 = vadd.f32 %v9243_v48, %v20903_v60  ;;  %v9293_v19 = vadd.f32 %v9245_v12, %v9059_v6  ;;  %v9244_v53 = vrot.slane %v9118_v62, 2  ;;  %v20997_v31 = vmax.f32 %v20407_v32, %v9289_v35  ;;  %v13517_v61 = vld [vmem:[%s22099_s5 + $0x1e0] ss:$16 sps:$4 sm:$0xff]  }
 0x661   :  { %v9017_v60 = vrot.slane %v20911_v26, 2  ;;  %9354 = vrot.lane.b32.xlu1 %v9314_v28, %s14309_s14  ;;  %v9122_v32 = vpop.f32.mrf.mxu0  ;;  %v9193_v34 = vpop.f32.mrf.mxu1  ;;  %v8785_v26 = vrot.slane %v20868_v9, 1  ;;  %v9061_v57 = vadd.f32 %v9013_v63, %v8827_v11  ;;  %v13519_v9 = vld [vmem:[%s22099_s5 + $0x1e4] ss:$16 sps:$4 sm:$0xff]   ;;  %v13520_v28 = vld [vmem:[%s22099_s5 + $0x1e8] ss:$16 sps:$4 sm:$0xff]  }
 0x662   :  { %v9315_v21 = vmax.f32 %v20416_v25, %v20994_v47  ;;  %v9292_v33 = vadd.f32 %v9244_v53, %v9058_v43  ;;  %v9246_v58 = vrot.slane %v9122_v32, 2  ;;  %v9248_v41 = vrot.slane %v9193_v34, 2  ;;  %9352 = vrot.lane.b32.xlu0 %v20997_v31, %s14309_s14  ;;  %9858 = vmatprep.subr.bf16.mxu0 %v13519_v9  ;;  %v22712_v32 = vld [vmem:[#allocation73_spill] sm:$0xff]  ;;  %v22713_v34 = vld [vmem:[#allocation4_spill] sm:$0xff] }
 0x663   :  { %v9124_v39 = vpop.f32.mrf.mxu0  ;;  %v9195_v6 = vpop.f32.mrf.mxu1  ;;  %v9317_v30 = vmax.f32 %v20419_v8, %v9293_v19  ;;  %v8224_v8 = vadd.f32 %v8176_v49, %v20968_v52  ;;  %v9065_v12 = vadd.f32 %v9017_v60, %v20866_v0  ;;  %v9020_v43 = vrot.slane %v20917_v1, 2  ;;  %9859 = vmatpush1.bf16.msra.mxu0 %v13517_v61  ;;  %9900 = vmatpush1.bf16.msra.mxu1 %v13520_v28  ;;  %v13525_v28 = vld [vmem:[%s22099_s5 + $0x1c4] ss:$16 sps:$4 sm:$0xff]  }
 0x664   :  { %v21023_v2 = vadd.f32 %v9246_v58, %v20909_v46  ;;  %v9296_v3 = vadd.f32 %v9248_v41, %v9062_v18  ;;  %v9247_v35 = vrot.slane %v9124_v39, 2  ;;  %v21025_v48 = vmax.f32 %v8218_v15, %v9292_v33  ;;  %v22711_v18 = vld [vmem:[#allocation68_spill] sm:$0xff]  ;;  %9860 = vmatprep.subr.bf16.mxu0 %v13525_v28 }
 0x665   :  { %v8830_v46 = vadd.f32 %v8782_v45, %v20804_v40  ;;  %9358 = vrot.lane.b32.xlu1 %v9317_v30, %s14309_s14  ;;  %v9126_v63 = vpop.f32.mrf.mxu0  ;;  %v9196_v62 = vpop.f32.mrf.mxu1  ;;  %v8182_v1 = vrot.slane %v20487_v51, 2  ;;  %v9019_v45 = vrot.slane %v20919_v23, 2  ;;  %v8833_v51 = vadd.f32 %v8785_v26, %v22712_v32  ;;  %v22714_v23 = vld [vmem:[#allocation3_spill] sm:$0xff]  ;;  %v22716_v26 = vld [vmem:[#allocation29_spill] sm:$0xff] }
 0x666   :  { %v9318_v5 = vmax.f32 %v20432_v22, %v21023_v2  ;;  %v9295_v40 = vadd.f32 %v9247_v35, %v9061_v57  ;;  %v9249_v52 = vrot.slane %v9126_v63, 2  ;;  %v9251_v0 = vrot.slane %v9196_v62, 2  ;;  %9356 = vrot.lane.b32.xlu0 %v21025_v48, %s14309_s14 }
 0x667   :  { %v9064_v49 = vadd.f32 %v9016_v50, %v8830_v46  ;;  %v9128_v19 = vpop.f32.mrf.mxu0  ;;  %v9198_v53 = vpop.f32.mrf.mxu1  ;;  %v9320_v59 = vmax.f32 %v20435_v13, %v9296_v3  ;;  %v8788_v55 = vrot.slane %v22713_v34, 1  ;;  %v9068_v10 = vadd.f32 %v9020_v43, %v22714_v23  ;;  %v22717_v3 = vld [vmem:[#allocation43_spill] sm:$0xff]  ;;  %v22724_v23 = vld [vmem:[#allocation34_spill] sm:$0xff] }
 0x668   :  { %v21054_v14 = vadd.f32 %v9249_v52, %v20915_v44  ;;  %v9299_v15 = vadd.f32 %v9251_v0, %v9065_v12  ;;  %v9250_v11 = vrot.slane %v9128_v19, 2  ;;  %v21057_v60 = vmax.f32 %v22711_v18, %v9295_v40  ;;  %v22715_v44 = vld [vmem:[#allocation56_spill] sm:$0xff]  ;;  %v22719_v12 = vld [vmem:[#allocation51_spill] sm:$0xff]  ;;  %v22722_v53 = vld [vmem:[#allocation10_spill] sm:$0xff] }
 0x669   :  { %v9023_v33 = vrot.slane %v20923_v20, 2  ;;  %9362 = vrot.lane.b32.xlu1 %v9320_v59, %s14309_s14  ;;  %v9132_v13 = vpop.f32.mrf.mxu0  ;;  %v9201_v58 = vpop.f32.mrf.mxu1  ;;  %v8791_v6 = vrot.slane %v22716_v26, 1  ;;  %v9067_v30 = vadd.f32 %v9019_v45, %v8833_v51  ;;  %v9022_v35 = vrot.slane %v22717_v3, 2  ;;  %v13528_v40 = vld [vmem:[%s22099_s5 + $0x1cc] ss:$16 sps:$4 sm:$0xff]   ;;  %v22720_v0 = vld [vmem:[#allocation31_spill] sm:$0xff] }
 0x66a   :  { %v9321_v41 = vmax.f32 %v22715_v44, %v21054_v14  ;;  %v9298_v57 = vadd.f32 %v9250_v11, %v9064_v49  ;;  %v9252_v50 = vrot.slane %v9132_v13, 2  ;;  %v9254_v39 = vrot.slane %v9201_v58, 2  ;;  %9360 = vrot.lane.b32.xlu0 %v21057_v60, %s14309_s14  ;;  %v22721_v45 = vld [vmem:[#allocation40_spill] sm:$0xff]  ;;  %v13523_v11 = vld [vmem:[%s22099_s5 + $0x1c0] ss:$16 sps:$4 sm:$0xff]   ;;  %9901 = vmatprep.subr.bf16.mxu1 %v13528_v40  ;;  %v22727_v3 = vld [vmem:[#allocation70_spill] sm:$0xff] }
 0x66b   :  { %v9134_v9 = vpop.f32.mrf.mxu0  ;;  %v9203_v20 = vpop.f32.mrf.mxu1  ;;  %v9323_v46 = vmax.f32 %v22718_v36, %v9299_v15  ;;  %v7715_v52 = vadd.f32 %v7667_v29, %v20954_v17  ;;  %v8836_v49 = vadd.f32 %v8788_v55, %v22720_v0  ;;  %v9071_v19 = vadd.f32 %v9023_v33, %v22721_v45  ;;  %v13526_v18 = vld [vmem:[%s22099_s5 + $0x1c8] ss:$16 sps:$4 sm:$0xff]   ;;  %v22725_v58 = vld [vmem:[#allocation45_spill] sm:$0xff]  ;;  %9861 = vmatpush1.bf16.msra.mxu0 %v13523_v11 }
 0x66c   :  { %v21072_v43 = vadd.f32 %v9252_v50, %v22719_v12  ;;  %v9302_v63 = vadd.f32 %v9254_v39, %v9068_v10  ;;  %v9253_v62 = vrot.slane %v9134_v9, 2  ;;  %v21074_v61 = vmax.f32 %v8224_v8, %v9298_v57  ;;  %v22726_v50 = vld [vmem:[#allocation8_spill] sm:$0xff]  ;;  %9902 = vmatpush1.bf16.msra.mxu1 %v13526_v18  ;;  %v22728_v20 = vld [vmem:[#allocation33_spill] sm:$0xff]  ;;  %v22734_v11 = vld [vmem:[#allocation42_spill] sm:$0xff] }
 0x66d   :  { %v9026_v59 = vrot.slane %v22722_v53, 2  ;;  %9366 = vrot.lane.b32.xlu1 %v9323_v46, %s14309_s14  ;;  %v9136_v8 = vpop.f32.mrf.mxu0  ;;  %v9204_v15 = vpop.f32.mrf.mxu1  ;;  %v8230_v34 = vadd.f32 %v8182_v1, %v7715_v52  ;;  %v9070_v55 = vadd.f32 %v9022_v35, %v8836_v49  ;;  %v9025_v10 = vrot.slane %v22724_v23, 2  ;;  %v22729_v35 = vld [vmem:[#allocation30_spill] sm:$0xff]  ;;  %v22731_v40 = vld [vmem:[#allocation41_spill] sm:$0xff] }
 0x66e   :  { %v9324_v17 = vmax.f32 %v22723_v27, %v21072_v43  ;;  %v9301_v29 = vadd.f32 %v9253_v62, %v9067_v30  ;;  %v9255_v32 = vrot.slane %v9136_v8, 2  ;;  %v9257_v51 = vrot.slane %v9204_v15, 2  ;;  %9364 = vrot.lane.b32.xlu0 %v21074_v61, %s14309_s14  ;;  %v22730_v46 = vld [vmem:[#allocation6_spill] sm:$0xff] }
 0x66f   :  { %v9138_v33 = vpop.f32.mrf.mxu0  ;;  %v9206_v13 = vpop.f32.mrf.mxu1  ;;  %v9326_v57 = vmax.f32 %v22725_v58, %v9302_v63  ;;  %v8839_v1 = vadd.f32 %v8791_v6, %v22728_v20  ;;  %v8794_v36 = vrot.slane %v22729_v35, 1  ;;  %v9074_v12 = vadd.f32 %v9026_v59, %v22730_v46  ;;  %v22732_v6 = vld [vmem:[#allocation25_spill] sm:$0xff]  ;;  %v22739_v35 = vld [vmem:[#allocation71_spill] sm:$0xff] }
 0x670   :  { %v21102_v39 = vadd.f32 %v9255_v32, %v22726_v50  ;;  %v9305_v26 = vadd.f32 %v9257_v51, %v9071_v19  ;;  %v9256_v30 = vrot.slane %v9138_v33, 2  ;;  %v21105_v9 = vmax.f32 %v22727_v3, %v9301_v29  ;;  %v22733_v19 = vld [vmem:[#allocation65_spill] sm:$0xff]  ;;  %v13534_v32 = vld [vmem:[%s22099_s5 + $0x1ac] ss:$16 sps:$4 sm:$0xff]   ;;  %v13532_v13 = vld [vmem:[%s22099_s5 + $0x1a8] ss:$16 sps:$4 sm:$0xff]  }
 0x671   :  { %v9029_v62 = vrot.slane %v20935_v56, 2  ;;  %9370 = vrot.lane.b32.xlu1 %v9326_v57, %s14309_s14  ;;  %v9142_v63 = vpop.f32.mrf.mxu0  ;;  %v9209_v28 = vpop.f32.mrf.mxu1  ;;  %v6691_v53 = vadd.f32 %v22733_v19, %v22732_v6  ;;  %v9073_v8 = vadd.f32 %v9025_v10, %v8839_v1  ;;  %v9028_v59 = vrot.slane %v20952_v54, 2  ;;  %v13531_v29 = vld [vmem:[%s22099_s5 + $0x1a4] ss:$16 sps:$4 sm:$0xff]   ;;  %v13529_v54 = vld [vmem:[%s22099_s5 + $0x1a0] ss:$16 sps:$4 sm:$0xff]   ;;  %9903 = vmatprep.subr.bf16.mxu1 %v13534_v32 }
 0x672   :  { %v9327_v52 = vmax.f32 %v22731_v40, %v21102_v39  ;;  %v9304_v0 = vadd.f32 %v9256_v30, %v9070_v55  ;;  %v9258_v49 = vrot.slane %v9142_v63, 2  ;;  %v9260_v45 = vrot.slane %v9209_v28, 2  ;;  %9368 = vrot.lane.b32.xlu0 %v21105_v9, %s14309_s14  ;;  %v22735_v51 = vld [vmem:[#allocation9_spill] sm:$0xff]  ;;  %v22736_v57 = vld [vmem:[#allocation28_spill] sm:$0xff]  ;;  %v22738_v3 = vld [vmem:[#allocation50_spill] sm:$0xff]  ;;  %9862 = vmatprep.subr.bf16.mxu0 %v13531_v29 }
 0x673   :  { %v9144_v56 = vpop.f32.mrf.mxu0  ;;  %v9211_v15 = vpop.f32.mrf.mxu1  ;;  %v9329_v18 = vmax.f32 %v22734_v11, %v9305_v26  ;;  %v7206_v58 = vadd.f32 %v7158_v24, %v6691_v53  ;;  %v8188_v50 = vrot.slane %v22736_v57, 2  ;;  %v22737_v26 = vld [vmem:[#allocation75_spill] sm:$0xff]  ;;  %v9077_v20 = vadd.f32 %v9029_v62, %v22738_v3  ;;  %9863 = vmatpush1.bf16.msra.mxu0 %v13529_v54  ;;  %9904 = vmatpush1.bf16.msra.mxu1 %v13532_v13  ;;  %v13540_v6 = vld [vmem:[%s22099_s5 + $0x18c] ss:$16 sps:$4 sm:$0xff]   ;;  %v13544_v57 = vld [vmem:[%s22099_s5 + $0x168] ss:$16 sps:$4 sm:$0xff]  }
 0x674   :  { %v21127_v55 = vadd.f32 %v9258_v49, %v22735_v51  ;;  %v9308_v23 = vadd.f32 %v9260_v45, %v9074_v12  ;;  %v9259_v33 = vrot.slane %v9144_v56, 2  ;;  %v21129_v10 = vmax.f32 %v8230_v34, %v9304_v0  ;;  %v22740_v0 = vld [vmem:[#allocation72_spill] sm:$0xff]  ;;  %v13537_v45 = vld [vmem:[%s22099_s5 + $0x184] ss:$16 sps:$4 sm:$0xff]   ;;  %v22741_v19 = vld [vmem:[#allocation22_spill] sm:$0xff]  ;;  %9905 = vmatprep.subr.bf16.mxu1 %v13540_v6 }
 0x675   :  { %v8842_v30 = vadd.f32 %v8794_v36, %v22737_v26  ;;  %9374 = vrot.lane.b32.xlu1 %v9329_v18, %s14309_s14  ;;  %v9146_v34 = vpop.f32.mrf.mxu0  ;;  %v9212_v1 = vpop.f32.mrf.mxu1  ;;  %v7721_v7 = vadd.f32 %v7673_v4, %v7206_v58  ;;  %v13535_v56 = vld [vmem:[%s22099_s5 + $0x180] ss:$16 sps:$4 sm:$0xff]   ;;  %v13538_v15 = vld [vmem:[%s22099_s5 + $0x188] ss:$16 sps:$4 sm:$0xff]   ;;  %9864 = vmatprep.subr.bf16.mxu0 %v13537_v45  ;;  %v13546_v54 = vld [vmem:[%s22099_s5 + $0x16c] ss:$16 sps:$4 sm:$0xff]  }
 0x676   :  { %v9330_v46 = vmax.f32 %v22739_v35, %v21127_v55  ;;  %v9307_v12 = vadd.f32 %v9259_v33, %v9073_v8  ;;  %v9261_v63 = vrot.slane %v9146_v34, 2  ;;  %v9263_v28 = vrot.slane %v9212_v1, 2  ;;  %9372 = vrot.lane.b32.xlu0 %v21129_v10, %s14309_s14  ;;  %v22742_v8 = vld [vmem:[#allocation26_spill] sm:$0xff]  ;;  %v22744_v51 = vld [vmem:[#allocation32_spill] sm:$0xff]  ;;  %v13543_v33 = vld [vmem:[%s22099_s5 + $0x164] ss:$16 sps:$4 sm:$0xff]  }
 0x677   :  { %v9076_v24 = vadd.f32 %v9028_v59, %v8842_v30  ;;  %v9148_v36 = vpop.f32.mrf.mxu0  ;;  %v9214_v62 = vpop.f32.mrf.mxu1  ;;  %v9332_v49 = vmax.f32 %v22740_v0, %v9308_v23  ;;  %v8236_v11 = vadd.f32 %v8188_v50, %v7721_v7  ;;  %v22743_v18 = vld [vmem:[#allocation74_spill] sm:$0xff]  ;;  %9865 = vmatpush1.bf16.msra.mxu0 %v13535_v56  ;;  %9906 = vmatpush1.bf16.msra.mxu1 %v13538_v15  ;;  %v13541_v58 = vld [vmem:[%s22099_s5 + $0x160] ss:$16 sps:$4 sm:$0xff]   ;;  %v13549_v50 = vld [vmem:[%s22099_s5 + $0x144] ss:$16 sps:$4 sm:$0xff]  }
 0x678   :  { %v21157_v53 = vadd.f32 %v9261_v63, %v22741_v19  ;;  %v9311_v37 = vadd.f32 %v9263_v28, %v9077_v20  ;;  %v9262_v4 = vrot.slane %v9148_v36, 2  ;;  %v21160_v59 = vmax.f32 %v22742_v8, %v9307_v12  ;;  %9866 = vmatprep.subr.bf16.mxu0 %v13543_v33  ;;  %9907 = vmatprep.subr.bf16.mxu1 %v13546_v54  ;;  %v13552_v26 = vld [vmem:[%s22099_s5 + $0x14c] ss:$16 sps:$4 sm:$0xff]   ;;  %v13547_v30 = vld [vmem:[%s22099_s5 + $0x140] ss:$16 sps:$4 sm:$0xff]  }
 0x679   :  { %9378 = vrot.lane.b32.xlu1 %v9332_v49, %s14309_s14  ;;  %v13550_v3 = vld [vmem:[%s22099_s5 + $0x148] ss:$16 sps:$4 sm:$0xff]   ;;  %v13555_v20 = vld [vmem:[%s22099_s5 + $0x264] ss:$16 sps:$4 sm:$0xff]   ;;  %v13558_v34 = vld [vmem:[%s22099_s5 + $0x26c] ss:$16 sps:$4 sm:$0xff]  }
 0x67a   :  { %v9333_v29 = vmax.f32 %v22743_v18, %v21157_v53  ;;  %v9310_v32 = vadd.f32 %v9262_v4, %v9076_v24  ;;  %9376 = vrot.lane.b32.xlu0 %v21160_v59, %s14309_s14  ;;  %v9335_v23 = vmax.f32 %v22744_v51, %v9311_v37  ;;  %v13553_v1 = vld [vmem:[%s22099_s5 + $0x260] ss:$16 sps:$4 sm:$0xff]   ;;  %v13556_v12 = vld [vmem:[%s22099_s5 + $0x268] ss:$16 sps:$4 sm:$0xff]   ;;  %v13561_v28 = vld [vmem:[%s22099_s5 + $0x244] ss:$16 sps:$4 sm:$0xff]  }
 0x67b   :  { %9867 = vmatpush1.bf16.msra.mxu0 %v13541_v58  ;;  %9908 = vmatpush1.bf16.msra.mxu1 %v13544_v57  ;;  %v13559_v63 = vld [vmem:[%s22099_s5 + $0x240] ss:$16 sps:$4 sm:$0xff]   ;;  %v13562_v7 = vld [vmem:[%s22099_s5 + $0x248] ss:$16 sps:$4 sm:$0xff]   ;;  %v13564_v24 = vld [vmem:[%s22099_s5 + $0x24c] ss:$16 sps:$4 sm:$0xff]  }
 0x67c   :  { %v21180_v13 = vmax.f32 %v8236_v11, %v9310_v32  ;;  %9868 = vmatprep.subr.bf16.mxu0 %v13549_v50  ;;  %9909 = vmatprep.subr.bf16.mxu1 %v13552_v26  ;;  %v13567_v36 = vld [vmem:[%s22099_s5 + $0xe4] ss:$16 sps:$4 sm:$0xff]   ;;  %v13570_v62 = vld [vmem:[%s22099_s5 + $0xec] ss:$16 sps:$4 sm:$0xff]   ;;  %v9424_v0 = vld [vmem:[%s22100_s4] sm:$0x3] }
 0x67d   :  { %9382 = vrot.lane.b32.xlu1 %v9335_v23, %s14309_s14  ;;  %v22745_v45 = vld [vmem:[#allocation49_spill] sm:$0xff] }
 0x67e   :  { %9380 = vrot.lane.b32.xlu0 %v21180_v13, %s14309_s14  ;;  %v21237_v6 = vrot.slane %v9424_v0, %v22745_v45  ;;  %v22746_v37 = vld [vmem:[#allocation53_spill] sm:$0xff] }
 0x67f   :  { %9869 = vmatpush1.bf16.msra.mxu0 %v13547_v30  ;;  %9910 = vmatpush1.bf16.msra.mxu1 %v13550_v3  ;;  %v21241_v4 = vrot.slane %v9424_v0, %v22746_v37 }
 0x680   :  { %9882 = vmatprep.subr.bf16.mxu0 %v13555_v20  ;;  %9923 = vmatprep.subr.bf16.mxu1 %v13558_v34 }
 0x683   :  { %9883 = vmatpush2.bf16.msra.mxu0 %v13553_v1  ;;  %9924 = vmatpush2.bf16.msra.mxu1 %v13556_v12 }
 0x684   :  { %9884 = vmatprep.subr.bf16.mxu0 %v13561_v28  ;;  %9925 = vmatprep.subr.bf16.mxu1 %v13564_v24 }
 0x687   :  { %9885 = vmatpush2.bf16.msra.mxu0 %v13559_v63  ;;  %9926 = vmatpush2.bf16.msra.mxu1 %v13562_v7 }
 0x688   :  { %10170 = vmatprep.subr.bf16.mxu0 %v13567_v36  ;;  %10211 = vmatprep.subr.bf16.mxu1 %v13570_v62 }
 0x6d3   :  { %v9355_v49 = vpop.permute.xlu1 %9354 }
 0x6d4   :  { %v9409_v19 = vmax.f32 %v20997_v31, %v9355_v49  ;;  %v9353_v8 = vpop.permute.xlu0 %9352 }
 0x6d5   :  { %v9384_v56 = vsel %vm34_vm0, %v9353_v8, %v9355_v49 }
 0x6d6   :  { %v9408_v15 = vmax.f32 %v9312_v16, %v9384_v56  ;;  %v9437_v32 = vadd.f32 %v21237_v6, %v9409_v19 }
 0x6d7   :  { %v9359_v11 = vpop.permute.xlu1 %9358 }
 0x6d8   :  { %v9436_v51 = vadd.f32 %v21241_v4, %v9408_v15  ;;  %v9411_v23 = vmax.f32 %v21025_v48, %v9359_v11  ;;  %v9357_v33 = vpop.permute.xlu0 %9356  ;;  %v9453_v50 = vmax.f32 %v9437_v32, 0.0 }
 0x6d9   :  { %v9385_v31 = vsel %vm34_vm0, %v9357_v33, %v9359_v11 }
 0x6da   :  { %v9452_v54 = vmax.f32 %v9436_v51, 0.0  ;;  %v9410_v58 = vmax.f32 %v9315_v21, %v9385_v31  ;;  %v9439_v42 = vadd.f32 %v21237_v6, %v9411_v23  ;;  %v9485_v20 = vpack.c.bf16 %v9453_v50, %v9453_v50 }
 0x6db   :  { %v9363_v57 = vpop.permute.xlu1 %9362 }
 0x6dc   :  { %v9438_v38 = vadd.f32 %v21241_v4, %v9410_v58  ;;  %v9361_v16 = vpop.permute.xlu0 %9360  ;;  %v9484_v26 = vpack.c.bf16 %v9452_v54, %v9452_v54  ;;  %v9455_v34 = vmax.f32 %v9439_v42, 0.0  ;;  %v9413_v21 = vmax.f32 %v21057_v60, %v9363_v57 }
 0x6dd   :  { %v9386_v30 = vsel %vm34_vm0, %v9361_v16, %v9363_v57  ;;  %v21263_v24 = vunpack.c.l.b16 %v9485_v20 }
 0x6de   :  { %v9454_v3 = vmax.f32 %v9438_v38, 0.0  ;;  %v9412_v1 = vmax.f32 %v9318_v5, %v9386_v30  ;;  %v9597_v47 = vunpack.c.l.b16 %v9484_v26  ;;  %v9487_v36 = vpack.c.bf16 %v9455_v34, %v9455_v34 }
 0x6df   :  { %v9367_v48 = vpop.permute.xlu1 %9366  ;;  %v9441_v22 = vadd.f32 %v21237_v6, %v9413_v21  ;;  %v9634_v44 = vrot.slane %v21263_v24, 1  ;;  %v10668_v16 = vrot.slane %v21263_v24, 3 }
 0x6e0   :  { %v9365_v25 = vpop.permute.xlu0 %9364  ;;  %v9486_v12 = vpack.c.bf16 %v9454_v3, %v9454_v3  ;;  %v9440_v63 = vadd.f32 %v21241_v4, %v9412_v1  ;;  %v9613_v0 = vrot.slane %v9597_v47, 1  ;;  %v10293_v5 = vrot.slane %v9597_v47, 2 }
 0x6e1   :  { %v9387_v28 = vsel %vm34_vm0, %v9365_v25, %v9367_v48  ;;  %v10654_v19 = vrot.slane %v9597_v47, 3  ;;  %v9415_v60 = vmax.f32 %v21074_v61, %v9367_v48  ;;  %v11015_v23 = vrot.slane %v9597_v47, 4 }
 0x6e2   :  { %v9599_v49 = vunpack.c.l.b16 %v9486_v12  ;;  %v9456_v2 = vmax.f32 %v9440_v63, 0.0  ;;  %v9414_v8 = vmax.f32 %v9321_v41, %v9387_v28  ;;  %v21277_v41 = vunpack.c.l.b16 %v9487_v36 }
 0x6e3   :  { %v9371_v7 = vpop.permute.xlu1 %9370  ;;  %v9457_v38 = vmax.f32 %v9441_v22, 0.0  ;;  %v9443_v30 = vadd.f32 %v21237_v6, %v9415_v60 }
 0x6e4   :  { %v9369_v62 = vpop.permute.xlu0 %9368  ;;  %v9615_v56 = vsel %vm9614_vm3, %v9599_v49, %v9613_v0  ;;  %v9936_v15 = vrot.slane %v9599_v49, 7  ;;  %v10294_v11 = vrot.slane %v9599_v49, 1  ;;  %v10655_v32 = vrot.slane %v9599_v49, 2 }
 0x6e5   :  { %v11016_v33 = vrot.slane %v9599_v49, 3  ;;  %v9488_v31 = vpack.c.bf16 %v9456_v2, %v9456_v2  ;;  %v9417_v54 = vmax.f32 %v21105_v9, %v9371_v7  ;;  %v9442_v14 = vadd.f32 %v21241_v4, %v9414_v8 }
 0x6e6   :  { %v9937_v57 = vsel %vm9614_vm3, %v9936_v15, %v9597_v47  ;;  %v10295_v61 = vsel %vm9614_vm3, %v10294_v11, %v10293_v5  ;;  %v10656_v50 = vsel %vm9614_vm3, %v10655_v32, %v10654_v19  ;;  %v11029_v9 = vrot.slane %v21263_v24, 4 }
 0x6e7   :  { %v9375_v51 = vpop.permute.xlu1 %9374  ;;  %v11017_v42 = vsel %vm9614_vm3, %v11016_v33, %v11015_v23  ;;  %v9601_v26 = vunpack.c.l.b16 %v9488_v31  ;;  %v9458_v3 = vmax.f32 %v9442_v14, 0.0  ;;  %v9445_v48 = vadd.f32 %v21237_v6, %v9417_v54 }
 0x6e8   :  { %v9373_v58 = vpop.permute.xlu0 %9372  ;;  %v9388_v20 = vsel %vm34_vm0, %v9369_v62, %v9371_v7  ;;  %v9419_v34 = vmax.f32 %v21129_v10, %v9375_v51  ;;  %v21291_v63 = vsel %vm9614_vm3, %v21277_v41, %v9634_v44  ;;  %v9950_v28 = vrot.slane %v21277_v41, 7 }
 0x6e9   :  { %v9616_v25 = vrot.slane %v9601_v26, 7  ;;  %v9938_v47 = vrot.slane %v9601_v26, 6  ;;  %v21287_v21 = vsel %vm9617_vm4, %v9601_v26, %v10295_v61  ;;  %v10657_v12 = vrot.slane %v9601_v26, 1 }
 0x6ea   :  { %v9489_v36 = vpack.c.bf16 %v9457_v38, %v9457_v38  ;;  %v11018_v0 = vrot.slane %v9601_v26, 2  ;;  %v9459_v62 = vmax.f32 %v9443_v30, 0.0  ;;  %v9490_v2 = vpack.c.bf16 %v9458_v3, %v9458_v3 }
 0x6eb   :  { %v9379_v1 = vpop.permute.xlu1 %9378  ;;  %v9618_v7 = vsel %vm9617_vm4, %v9616_v25, %v9615_v56  ;;  %v21296_v10 = vsel %vm9617_vm4, %v9938_v47, %v9937_v57  ;;  %v10658_v22 = vsel %vm9617_vm4, %v10657_v12, %v10656_v50  ;;  %v9461_v5 = vmax.f32 %v9445_v48, 0.0 }
 0x6ec   :  { %v9377_v49 = vpop.permute.xlu0 %9376  ;;  %v11019_v19 = vsel %vm9617_vm4, %v11018_v0, %v11017_v42  ;;  %v9416_v60 = vmax.f32 %v9324_v17, %v9388_v20  ;;  %v9447_v8 = vadd.f32 %v21237_v6, %v9419_v34  ;;  %v9389_v15 = vsel %vm34_vm0, %v9373_v58, %v9375_v51 }
 0x6ed   :  { %v9421_v56 = vmax.f32 %v21160_v59, %v9379_v1  ;;  %v9390_v11 = vsel %vm34_vm0, %v9377_v49, %v9379_v1  ;;  %v21307_v32 = vunpack.c.l.b16 %v9489_v36  ;;  %v21309_v23 = vunpack.c.l.b16 %v9490_v2 }
 0x6ee   :  { %v9444_v33 = vadd.f32 %v21241_v4, %v9416_v60  ;;  %v9418_v31 = vmax.f32 %v9327_v52, %v9389_v15  ;;  %v9491_v27 = vpack.c.bf16 %v9459_v62, %v9459_v62  ;;  %v9463_v17 = vmax.f32 %v9447_v8, 0.0 }
 0x6ef   :  { %v9383_v43 = vpop.permute.xlu1 %9382  ;;  %v9449_v54 = vadd.f32 %v21237_v6, %v9421_v56  ;;  %v9420_v59 = vmax.f32 %v9330_v46, %v9390_v11  ;;  %v10669_v51 = vrot.slane %v21277_v41, 2  ;;  %v9619_v58 = vrot.slane %v21309_v23, 6 }
 0x6f0   :  { %v21323_v57 = vsel %vm9620_vm5, %v21309_v23, %v10658_v22  ;;  %v9493_v61 = vpack.c.bf16 %v9461_v5, %v9461_v5  ;;  %v11020_v39 = vrot.slane %v21309_v23, 1  ;;  %v9460_v40 = vmax.f32 %v9444_v33, 0.0  ;;  %v9381_v44 = vpop.permute.xlu0 %9380 }
 0x6f1   :  { %v9495_v52 = vpack.c.bf16 %v9463_v17, %v9463_v17  ;;  %v9423_v50 = vmax.f32 %v21180_v13, %v9383_v43  ;;  %v9621_v14 = vsel %vm9620_vm5, %v9619_v58, %v9618_v7  ;;  %v9446_v55 = vadd.f32 %v21241_v4, %v9418_v31 }
 0x6f2   :  { %v9465_v35 = vmax.f32 %v9449_v54, 0.0  ;;  %v9448_v46 = vadd.f32 %v21241_v4, %v9420_v59  ;;  %v11030_v42 = vrot.slane %v21277_v41, 3  ;;  %v9636_v38 = vrot.slane %v21307_v32, 7 }
 0x6f3   :  { %v9952_v26 = vrot.slane %v21307_v32, 6  ;;  %v21333_v30 = vunpack.c.l.b16 %v9491_v27  ;;  %v21335_v3 = vunpack.c.l.b16 %v9493_v61  ;;  %v11021_v13 = vsel %vm9620_vm5, %v11020_v39, %v11019_v19 }
 0x6f4   :  { %v9492_v48 = vpack.c.bf16 %v9460_v40, %v9460_v40  ;;  %v9462_v20 = vmax.f32 %v9446_v55, 0.0  ;;  %v21338_v34 = vunpack.c.l.b16 %v9495_v52  ;;  %v9464_v1 = vmax.f32 %v9448_v46, 0.0 }
 0x6f5   :  { %v9451_v25 = vadd.f32 %v21237_v6, %v9423_v50  ;;  %v9391_v47 = vsel %vm34_vm0, %v9381_v44, %v9383_v43  ;;  %v9497_v0 = vpack.c.bf16 %v9465_v35, %v9465_v35  ;;  %v10671_v7 = vrot.slane %v21307_v32, 1 }
 0x6f6   :  { %v21342_v12 = vunpack.c.l.b16 %v9492_v48  ;;  %v9494_v36 = vpack.c.bf16 %v9462_v20, %v9462_v20  ;;  %v9422_v49 = vmax.f32 %v9333_v29, %v9391_v47  ;;  %v11032_v62 = vrot.slane %v21307_v32, 2 }
 0x6f7   :  { %v9496_v22 = vpack.c.bf16 %v9464_v1, %v9464_v1  ;;  %v9467_v2 = vmax.f32 %v9451_v25, 0.0  ;;  %v9638_v6 = vrot.slane %v21333_v30, 6  ;;  %v9954_v5 = vrot.slane %v21333_v30, 5 }
 0x6f8   :  { %v9640_v19 = vrot.slane %v21335_v3, 5  ;;  %v9622_v60 = vrot.slane %v21342_v12, 5  ;;  %v21355_v8 = vsel %vm9623_vm6, %v21342_v12, %v11021_v13  ;;  %v21357_v53 = vunpack.c.l.b16 %v9494_v36 }
 0x6f9   :  { %v21359_v18 = vunpack.c.l.b16 %v9496_v22  ;;  %v9499_v29 = vpack.c.bf16 %v9467_v2, %v9467_v2  ;;  %v21362_v56 = vunpack.c.l.b16 %v9497_v0  ;;  %v9450_v11 = vadd.f32 %v21241_v4, %v9422_v49 }
 0x6fa   :  { %v9624_v15 = vsel %vm9623_vm6, %v9622_v60, %v9621_v14  ;;  %v9642_v33 = vrot.slane %v21338_v34, 4  ;;  %v11034_v31 = vrot.slane %v21333_v30, 1  ;;  %v9940_v43 = vrot.slane %v21309_v23, 5 }
 0x6fb   :  { %v9625_v27 = vrot.slane %v21357_v53, 4  ;;  %v9637_v17 = vsel %vm9617_vm4, %v9636_v38, %v21291_v63  ;;  %v9956_v54 = vrot.slane %v21335_v3, 4  ;;  %v9942_v59 = vrot.slane %v21342_v12, 4 }
 0x6fc   :  { %v9628_v58 = vrot.slane %v21359_v18, 3  ;;  %v9639_v61 = vsel %vm9620_vm5, %v9638_v6, %v9637_v17  ;;  %v9944_v4 = vrot.slane %v21357_v53, 3  ;;  %v21376_v39 = vunpack.c.l.b16 %v9499_v29 }
 0x6fd   :  { %v9466_v40 = vmax.f32 %v9450_v11, 0.0  ;;  %v9641_v52 = vsel %vm9623_vm6, %v9640_v19, %v9639_v61  ;;  %v9946_v50 = vrot.slane %v21359_v18, 2  ;;  %v9644_v63 = vrot.slane %v21362_v56, 3  ;;  %v13565_v11 = vld [vmem:[%s22099_s5 + $0xe0] ss:$16 sps:$4 sm:$0xff]  }
 0x6fe   :  { %v9643_v14 = vsel %vm9626_vm7, %v9642_v33, %v9641_v52  ;;  %v9627_v55 = vsel %vm9626_vm7, %v9625_v27, %v9624_v15  ;;  %v9646_v46 = vrot.slane %v21376_v39, 2  ;;  %v9951_v38 = vsel %vm9614_vm3, %v9950_v28, %v21263_v24  ;;  %v13568_v33 = vld [vmem:[%s22099_s5 + $0xe8] ss:$16 sps:$4 sm:$0xff]   ;;  %v13573_v61 = vld [vmem:[%s22099_s5 + $0xc4] ss:$16 sps:$4 sm:$0xff]  }
 0x6ff   :  { %v9498_v35 = vpack.c.bf16 %v9466_v40, %v9466_v40  ;;  %v9630_v44 = vsel %vm9629_vm8, %v9628_v58, %v9627_v55  ;;  %v9645_v13 = vsel %vm9629_vm8, %v9644_v63, %v9643_v14  ;;  %v9953_v48 = vsel %vm9617_vm4, %v9952_v26, %v9951_v38  ;;  %v13574_v38 = vld [vmem:[%s22099_s5 + $0xc8] ss:$16 sps:$4 sm:$0xff]  }
 0x700   :  { %v9958_v20 = vrot.slane %v21338_v34, 3  ;;  %v9960_v1 = vrot.slane %v21362_v56, 2  ;;  %v9647_v47 = vsel %vm9632_vm9, %v9646_v46, %v9645_v13  ;;  %v9955_v36 = vsel %vm9620_vm5, %v9954_v5, %v9953_v48  ;;  %v13582_v48 = vld [vmem:[%s22099_s5 + $0xac] ss:$16 sps:$4 sm:$0xff]  }
 0x701   :  { %v21393_v25 = vunpack.c.l.b16 %v9498_v35  ;;  %v9962_v0 = vrot.slane %v21376_v39, 1  ;;  %v10297_v49 = vrot.slane %v21309_v23, 7  ;;  %v9649_v22 = vpack.c.b16 %v9647_v47, %v9647_v47 }
 0x702   :  { %v9957_v28 = vsel %vm9623_vm6, %v9956_v54, %v9955_v36  ;;  %v9941_v26 = vsel %vm9620_vm5, %v9940_v43, %v21296_v10  ;;  %v10674_v5 = vrot.slane %v21335_v3, 7  ;;  %v10299_v29 = vrot.slane %v21342_v12, 6 }
 0x703   :  { %v9631_v2 = vrot.slane %v21393_v25, 2  ;;  %v9959_v6 = vsel %vm9626_vm7, %v9958_v20, %v9957_v28  ;;  %v9943_v19 = vsel %vm9623_vm6, %v9942_v59, %v9941_v26  ;;  %v9948_v60 = vrot.slane %v21393_v25, 1  ;;  %12686 = vmatprep.mubr.msk.bf16.mxu0 %vm5449_vm1, %v9649_v22  ;;  %12687 = vmatprep.mubr.msk.bf16.mxu1 %vm5449_vm1, %v9649_v22 }
 0x704   :  { %v9961_v23 = vsel %vm9629_vm8, %v9960_v1, %v9959_v6  ;;  %v9945_v10 = vsel %vm9626_vm7, %v9944_v4, %v9943_v19  ;;  %v10301_v15 = vrot.slane %v21357_v53, 5  ;;  %v10660_v54 = vrot.slane %v21342_v12, 7  ;;  %v13577_v6 = vld [vmem:[%s22099_s5 + $0xa0] ss:$16 sps:$4 sm:$0xff]  }
 0x705   :  { %v9633_v43 = vsel %vm9632_vm9, %v9631_v2, %v9630_v44  ;;  %v9963_v27 = vsel %vm9632_vm9, %v9962_v0, %v9961_v23  ;;  %v9947_v17 = vsel %vm9629_vm8, %v9946_v50, %v9945_v10  ;;  %v10303_v59 = vrot.slane %v21359_v18, 4  ;;  %v13576_v50 = vld [vmem:[%s22099_s5 + $0xcc] ss:$16 sps:$4 sm:$0xff]  }
 0x706   :  { %v9648_v58 = vpack.c.b16 %v9633_v43, %v9633_v43  ;;  %v21428_v4 = vsel %vm9632_vm9, %v9948_v60, %v9947_v17  ;;  %v10662_v40 = vrot.slane %v21357_v53, 6  ;;  %v10664_v52 = vrot.slane %v21359_v18, 5 }
 0x707   :  { %v10298_v12 = vsel %vm9620_vm5, %v10297_v49, %v21287_v21  ;;  %v10305_v14 = vrot.slane %v21393_v25, 3  ;;  %v9965_v63 = vpack.c.b16 %v9963_v27, %v9963_v27  ;;  %v10670_v35 = vsel %vm9614_vm3, %v10669_v51, %v10668_v16  ;;  %v13571_v21 = vld [vmem:[%s22099_s5 + $0xc0] ss:$16 sps:$4 sm:$0xff]  }
 0x708   :  { %9887 = vmatmul.mubr.bf16.vlgmr.msra.gmra.mxu0 %v9648_v58  ;;  %9928 = vmatmul.mubr.bf16.vlgmr.msra.gmra.mxu1 %v9648_v58  ;;  %v10300_v55 = vsel %vm9623_vm6, %v10299_v29, %v10298_v12  ;;  %v10676_v46 = vrot.slane %v21338_v34, 6  ;;  %v11023_v44 = vrot.slane %v21357_v53, 7  ;;  %v10672_v16 = vsel %vm9617_vm4, %v10671_v7, %v10670_v35  ;;  %v13579_v53 = vld [vmem:[%s22099_s5 + $0xa4] ss:$16 sps:$4 sm:$0xff]   ;;  %v13588_v29 = vld [vmem:[%s22099_s5 + $0x8c] ss:$16 sps:$4 sm:$0xff]  }
 0x709   :  { %10171 = vmatpush1.bf16.msra.mxu0 %v13565_v11  ;;  %10212 = vmatpush1.bf16.msra.mxu1 %v13568_v33  ;;  %v10302_v13 = vsel %vm9626_vm7, %v10301_v15, %v10300_v55  ;;  %v10678_v51 = vrot.slane %v21362_v56, 5  ;;  %v10673_v1 = vsel %vm9620_vm5, %v21333_v30, %v10672_v16  ;;  %v10680_v7 = vrot.slane %v21376_v39, 4  ;;  %v13600_v12 = vld [vmem:[%s22099_s5 + $0x4c] ss:$16 sps:$4 sm:$0xff]   ;;  %v13603_v55 = vld [vmem:[%s22099_s5 + $0x24] ss:$16 sps:$4 sm:$0xff]  }
 0x70a   :  { %12728 = vmatprep.mubr.msk.bf16.mxu0 %vm5449_vm1, %v9965_v63  ;;  %12729 = vmatprep.mubr.msk.bf16.mxu1 %vm5449_vm1, %v9965_v63  ;;  %v10304_v20 = vsel %vm9629_vm8, %v10303_v59, %v10302_v13  ;;  %v10661_v47 = vsel %vm9623_vm6, %v10660_v54, %v21323_v57  ;;  %v10675_v0 = vsel %vm9623_vm6, %v10674_v5, %v10673_v1  ;;  %v10666_v22 = vrot.slane %v21393_v25, 4  ;;  %v13586_v54 = vld [vmem:[%s22099_s5 + $0x88] ss:$16 sps:$4 sm:$0xff]   ;;  %v13606_v35 = vld [vmem:[%s22099_s5 + $0x2c] ss:$16 sps:$4 sm:$0xff]  }
 0x70b   :  { %10172 = vmatprep.subr.bf16.mxu0 %v13573_v61  ;;  %10213 = vmatprep.subr.bf16.mxu1 %v13576_v50  ;;  %v21472_v36 = vsel %vm9632_vm9, %v10305_v14, %v10304_v20  ;;  %v10663_v49 = vsel %vm9626_vm7, %v10662_v40, %v10661_v47  ;;  %v11025_v28 = vrot.slane %v21359_v18, 6  ;;  %v10677_v26 = vsel %vm9626_vm7, %v10676_v46, %v10675_v0  ;;  %v13580_v18 = vld [vmem:[%s22099_s5 + $0xa8] ss:$16 sps:$4 sm:$0xff]   ;;  %v13589_v40 = vld [vmem:[%s22099_s5 + $0x60] ss:$16 sps:$4 sm:$0xff]  }
 0x70c   :  { %v10665_v2 = vsel %vm9629_vm8, %v10664_v52, %v10663_v49  ;;  %v11031_v57 = vsel %vm9614_vm3, %v11030_v42, %v11029_v9  ;;  %v10679_v19 = vsel %vm9629_vm8, %v10678_v51, %v10677_v26  ;;  %v11037_v9 = vrot.slane %v21338_v34, 7  ;;  %v13585_v42 = vld [vmem:[%s22099_s5 + $0x84] ss:$16 sps:$4 sm:$0xff]   ;;  %v13592_v52 = vld [vmem:[%s22099_s5 + $0x68] ss:$16 sps:$4 sm:$0xff]  }
 0x70d   :  { %10173 = vmatpush1.bf16.msra.mxu0 %v13571_v21  ;;  %10214 = vmatpush1.bf16.msra.mxu1 %v13574_v38  ;;  %v21493_v60 = vsel %vm9632_vm9, %v10666_v22, %v10665_v2  ;;  %v11033_v5 = vsel %vm9617_vm4, %v11032_v62, %v11031_v57  ;;  %v21506_v23 = vsel %vm9632_vm9, %v10680_v7, %v10679_v19  ;;  %v11039_v62 = vrot.slane %v21362_v56, 6  ;;  %v13597_v50 = vld [vmem:[%s22099_s5 + $0x44] ss:$16 sps:$4 sm:$0xff]   ;;  %v13595_v14 = vld [vmem:[%s22099_s5 + $0x40] ss:$16 sps:$4 sm:$0xff]  }
 0x70e   :  { %10174 = vmatprep.subr.bf16.mxu0 %v13579_v53  ;;  %10215 = vmatprep.subr.bf16.mxu1 %v13582_v48  ;;  %v11035_v10 = vsel %vm9620_vm5, %v11034_v31, %v11033_v5  ;;  %v11041_v11 = vrot.slane %v21376_v39, 5  ;;  %v11024_v33 = vsel %vm9626_vm7, %v11023_v44, %v21355_v8  ;;  %v11027_v17 = vrot.slane %v21393_v25, 5  ;;  %v13583_v31 = vld [vmem:[%s22099_s5 + $0x80] ss:$16 sps:$4 sm:$0xff]   ;;  %v13591_v8 = vld [vmem:[%s22099_s5 + $0x64] ss:$16 sps:$4 sm:$0xff]  }
 0x70f   :  { %v11036_v15 = vsel %vm9623_vm6, %v21335_v3, %v11035_v10  ;;  %v11026_v27 = vsel %vm9629_vm8, %v11025_v28, %v11024_v33  ;;  %v13594_v25 = vld [vmem:[%s22099_s5 + $0x6c] ss:$16 sps:$4 sm:$0xff]   ;;  %v13598_v63 = vld [vmem:[%s22099_s5 + $0x48] ss:$16 sps:$4 sm:$0xff]   ;;  %v13601_v46 = vld [vmem:[%s22099_s5 + $0x20] ss:$16 sps:$4 sm:$0xff]   ;;  %v9964_v5 = vpack.c.b16 %v21428_v4, %v21428_v4 }
 0x710   :  { %v11038_v43 = vsel %vm9626_vm7, %v11037_v9, %v11036_v15  ;;  %v21537_v61 = vsel %vm9632_vm9, %v11027_v17, %v11026_v27  ;;  %v13604_v44 = vld [vmem:[%s22099_s5 + $0x28] ss:$16 sps:$4 sm:$0xff]   ;;  %v13609_v21 = vld [vmem:[%s22099_s5 + $0x4] ss:$16 sps:$4 sm:$0xff]   ;;  %v13612_v38 = vld [vmem:[%s22099_s5 + $0xc] ss:$16 sps:$4 sm:$0xff]  }
 0x711   :  { %10175 = vmatpush1.bf16.msra.mxu0 %v13577_v6  ;;  %10216 = vmatpush1.bf16.msra.mxu1 %v13580_v18  ;;  %v11040_v59 = vsel %vm9629_vm8, %v11039_v62, %v11038_v43  ;;  %v10308_v13 = vrot.slane %v21277_v41, 1  ;;  %v13607_v16 = vld [vmem:[%s22099_s5] ss:$16 sps:$4 sm:$0xff]   ;;  %v13610_v51 = vld [vmem:[%s22099_s5 + $0x8] ss:$16 sps:$4 sm:$0xff]   ;;  %v10307_v53 = vrot.slane %v21263_v24, 2 }
 0x712   :  { %10176 = vmatprep.subr.bf16.mxu0 %v13585_v42  ;;  %10217 = vmatprep.subr.bf16.mxu1 %v13588_v29  ;;  %v21534_v58 = vsel %vm9632_vm9, %v11041_v11, %v11040_v59  ;;  %v13615_v48 = vld [vmem:[%s22099_s5 + $0x124] ss:$16 sps:$4 sm:$0xff]   ;;  %v13618_v41 = vld [vmem:[%s22099_s5 + $0x12c] ss:$16 sps:$4 sm:$0xff]   ;;  %v10311_v1 = vrot.slane %v21333_v30, 7  ;;  %v10313_v7 = vrot.slane %v21335_v3, 6 }
 0x713   :  { %v10309_v20 = vsel %vm9614_vm3, %v10308_v13, %v10307_v53  ;;  %v13613_v24 = vld [vmem:[%s22099_s5 + $0x120] ss:$16 sps:$4 sm:$0xff]   ;;  %v13616_v47 = vld [vmem:[%s22099_s5 + $0x128] ss:$16 sps:$4 sm:$0xff]   ;;  %v13621_v0 = vld [vmem:[%s22099_s5 + $0x104] ss:$16 sps:$4 sm:$0xff]  }
 0x714   :  { %v13624_v30 = vld [vmem:[%s22099_s5 + $0x10c] ss:$16 sps:$4 sm:$0xff]   ;;  %v10315_v3 = vrot.slane %v21338_v34, 5  ;;  %v10310_v49 = vsel %vm9617_vm4, %v21307_v32, %v10309_v20  ;;  %v10317_v22 = vrot.slane %v21362_v56, 4  ;;  %v10319_v26 = vrot.slane %v21376_v39, 3 }
 0x715   :  { %10177 = vmatpush1.bf16.msra.mxu0 %v13583_v31  ;;  %10218 = vmatpush1.bf16.msra.mxu1 %v13586_v54  ;;  %v10312_v28 = vsel %vm9620_vm5, %v10311_v1, %v10310_v49  ;;  %v13619_v2 = vld [vmem:[%s22099_s5 + $0x100] ss:$16 sps:$4 sm:$0xff]   ;;  %v13622_v57 = vld [vmem:[%s22099_s5 + $0x108] ss:$16 sps:$4 sm:$0xff]   ;;  %v13627_v32 = vld [vmem:[%s22099_s5 + $0x364] ss:$16 sps:$4 sm:$0xff]  }
 0x716   :  { %10178 = vmatprep.subr.bf16.mxu0 %v13591_v8  ;;  %10219 = vmatprep.subr.bf16.mxu1 %v13594_v25  ;;  %v10314_v34 = vsel %vm9623_vm6, %v10313_v7, %v10312_v28  ;;  %v13630_v56 = vld [vmem:[%s22099_s5 + $0x36c] ss:$16 sps:$4 sm:$0xff]   ;;  %v13625_v19 = vld [vmem:[%s22099_s5 + $0x360] ss:$16 sps:$4 sm:$0xff]   ;;  %v13628_v9 = vld [vmem:[%s22099_s5 + $0x368] ss:$16 sps:$4 sm:$0xff]  }
 0x717   :  { %v10316_v39 = vsel %vm9626_vm7, %v10315_v3, %v10314_v34  ;;  %v13633_v29 = vld [vmem:[%s22099_s5 + $0x344] ss:$16 sps:$4 sm:$0xff]   ;;  %v13636_v10 = vld [vmem:[%s22099_s5 + $0x34c] ss:$16 sps:$4 sm:$0xff]   ;;  %v13631_v4 = vld [vmem:[%s22099_s5 + $0x340] ss:$16 sps:$4 sm:$0xff]  }
 0x718   :  { %v10318_v6 = vsel %vm9629_vm8, %v10317_v22, %v10316_v39  ;;  %v13634_v62 = vld [vmem:[%s22099_s5 + $0x348] ss:$16 sps:$4 sm:$0xff]   ;;  %v13639_v15 = vld [vmem:[%s22099_s5 + $0x324] ss:$16 sps:$4 sm:$0xff]   ;;  %v13642_v11 = vld [vmem:[%s22099_s5 + $0x32c] ss:$16 sps:$4 sm:$0xff]   ;;  %v10683_v22 = vpack.c.b16 %v21506_v23, %v21506_v23 }
 0x719   :  { %10179 = vmatpush1.bf16.msra.mxu0 %v13589_v40  ;;  %10220 = vmatpush1.bf16.msra.mxu1 %v13592_v52  ;;  %v10320_v18 = vsel %vm9632_vm9, %v10319_v26, %v10318_v6  ;;  %v13637_v33 = vld [vmem:[%s22099_s5 + $0x320] ss:$16 sps:$4 sm:$0xff]   ;;  %v13640_v43 = vld [vmem:[%s22099_s5 + $0x328] ss:$16 sps:$4 sm:$0xff]   ;;  %v13645_v27 = vld [vmem:[%s22099_s5 + $0x304] ss:$16 sps:$4 sm:$0xff]  }
 0x71a   :  { %10180 = vmatprep.subr.bf16.mxu0 %v13597_v50  ;;  %10221 = vmatprep.subr.bf16.mxu1 %v13600_v12  ;;  %v10322_v42 = vpack.c.b16 %v10320_v18, %v10320_v18  ;;  %v13648_v17 = vld [vmem:[%s22099_s5 + $0x30c] ss:$16 sps:$4 sm:$0xff]   ;;  %v13643_v31 = vld [vmem:[%s22099_s5 + $0x300] ss:$16 sps:$4 sm:$0xff]   ;;  %v13646_v54 = vld [vmem:[%s22099_s5 + $0x308] ss:$16 sps:$4 sm:$0xff]  }
 0x71b   :  { %v13651_v59 = vld [vmem:[%s22099_s5 + $0x2e4] ss:$16 sps:$4 sm:$0xff]   ;;  %v13654_v8 = vld [vmem:[%s22099_s5 + $0x2ec] ss:$16 sps:$4 sm:$0xff]   ;;  %v13649_v25 = vld [vmem:[%s22099_s5 + $0x2e0] ss:$16 sps:$4 sm:$0xff]  }
 0x71c   :  { %v13652_v40 = vld [vmem:[%s22099_s5 + $0x2e8] ss:$16 sps:$4 sm:$0xff]   ;;  %v13657_v52 = vld [vmem:[%s22099_s5 + $0x2c4] ss:$16 sps:$4 sm:$0xff]   ;;  %v13660_v50 = vld [vmem:[%s22099_s5 + $0x2cc] ss:$16 sps:$4 sm:$0xff]  }
 0x71d   :  { %10181 = vmatpush1.bf16.msra.mxu0 %v13595_v14  ;;  %10222 = vmatpush1.bf16.msra.mxu1 %v13598_v63  ;;  %v13655_v12 = vld [vmem:[%s22099_s5 + $0x2c0] ss:$16 sps:$4 sm:$0xff]   ;;  %v13658_v14 = vld [vmem:[%s22099_s5 + $0x2c8] ss:$16 sps:$4 sm:$0xff]   ;;  %v13663_v63 = vld [vmem:[%s22099_s5 + $0x2a4] ss:$16 sps:$4 sm:$0xff]  }
 0x71e   :  { %10182 = vmatprep.subr.bf16.mxu0 %v13603_v55  ;;  %10223 = vmatprep.subr.bf16.mxu1 %v13606_v35  ;;  %v13666_v55 = vld [vmem:[%s22099_s5 + $0x2ac] ss:$16 sps:$4 sm:$0xff]   ;;  %v13661_v35 = vld [vmem:[%s22099_s5 + $0x2a0] ss:$16 sps:$4 sm:$0xff]   ;;  %v13670_v13 = vld [vmem:[%s22099_s5 + $0x288] ss:$16 sps:$4 sm:$0xff]  }
 0x71f   :  { %v13673_v53 = vld [vmem:[%s22099_s5 + $0x3a0] ss:$16 sps:$4 sm:$0xff]   ;;  %v13684_v20 = vld [vmem:[%s22099_s5 + $0x38c] ss:$16 sps:$4 sm:$0xff]   ;;  %v13682_v7 = vld [vmem:[%s22099_s5 + $0x388] ss:$16 sps:$4 sm:$0xff]  }
 0x720   :  { %v13679_v1 = vld [vmem:[%s22099_s5 + $0x380] ss:$16 sps:$4 sm:$0xff]   ;;  %v13688_v3 = vld [vmem:[%s22099_s5 + $0x4a8] ss:$16 sps:$4 sm:$0xff]   ;;  %v13693_v49 = vld [vmem:[%s22099_s5 + $0x484] ss:$16 sps:$4 sm:$0xff]  }
 0x721   :  { %10183 = vmatpush1.bf16.msra.mxu0 %v13601_v46  ;;  %10224 = vmatpush1.bf16.msra.mxu1 %v13604_v44  ;;  %v13664_v46 = vld [vmem:[%s22099_s5 + $0x2a8] ss:$16 sps:$4 sm:$0xff]   ;;  %v13669_v44 = vld [vmem:[%s22099_s5 + $0x284] ss:$16 sps:$4 sm:$0xff]   ;;  %v13696_v28 = vld [vmem:[%s22099_s5 + $0x48c] ss:$16 sps:$4 sm:$0xff]  }
 0x722   :  { %10184 = vmatprep.subr.bf16.mxu0 %v13609_v21  ;;  %10225 = vmatprep.subr.bf16.mxu1 %v13612_v38  ;;  %v13672_v21 = vld [vmem:[%s22099_s5 + $0x28c] ss:$16 sps:$4 sm:$0xff]   ;;  %v13667_v38 = vld [vmem:[%s22099_s5 + $0x280] ss:$16 sps:$4 sm:$0xff]   ;;  %v13694_v26 = vld [vmem:[%s22099_s5 + $0x488] ss:$16 sps:$4 sm:$0xff]  }
 0x723   :  { %v13699_v23 = vld [vmem:[%s22099_s5 + $0x464] ss:$16 sps:$4 sm:$0xff]   ;;  %v13700_v34 = vld [vmem:[%s22099_s5 + $0x468] ss:$16 sps:$4 sm:$0xff]   ;;  %v13703_v39 = vld [vmem:[%s22099_s5 + $0x440] ss:$16 sps:$4 sm:$0xff]  }
 0x724   :  { %v13706_v6 = vld [vmem:[%s22099_s5 + $0x448] ss:$16 sps:$4 sm:$0xff]   ;;  %v13711_v18 = vld [vmem:[%s22099_s5 + $0x424] ss:$16 sps:$4 sm:$0xff]  }
 0x725   :  { %10185 = vmatpush1.bf16.msra.mxu0 %v13607_v16  ;;  %10226 = vmatpush1.bf16.msra.mxu1 %v13610_v51  ;;  %v13675_v16 = vld [vmem:[%s22099_s5 + $0x3a4] ss:$16 sps:$4 sm:$0xff]   ;;  %v13678_v51 = vld [vmem:[%s22099_s5 + $0x3ac] ss:$16 sps:$4 sm:$0xff]  }
 0x726   :  { %10198 = vmatprep.subr.bf16.mxu0 %v13615_v48  ;;  %10239 = vmatprep.subr.bf16.mxu1 %v13618_v41  ;;  %v13676_v48 = vld [vmem:[%s22099_s5 + $0x3a8] ss:$16 sps:$4 sm:$0xff]   ;;  %v13681_v41 = vld [vmem:[%s22099_s5 + $0x384] ss:$16 sps:$4 sm:$0xff]  }
 0x729   :  { %10199 = vmatpush2.bf16.msra.mxu0 %v13613_v24  ;;  %10240 = vmatpush2.bf16.msra.mxu1 %v13616_v47  ;;  %v13687_v24 = vld [vmem:[%s22099_s5 + $0x4a4] ss:$16 sps:$4 sm:$0xff]   ;;  %v13690_v47 = vld [vmem:[%s22099_s5 + $0x4ac] ss:$16 sps:$4 sm:$0xff]  }
 0x72a   :  { %10200 = vmatprep.subr.bf16.mxu0 %v13621_v0  ;;  %10241 = vmatprep.subr.bf16.mxu1 %v13624_v30  ;;  %v13685_v0 = vld [vmem:[%s22099_s5 + $0x4a0] ss:$16 sps:$4 sm:$0xff]   ;;  %v10321_v30 = vpack.c.b16 %v21472_v36, %v21472_v36 }
 0x72b   :  { %v13691_v36 = vld [vmem:[%s22099_s5 + $0x480] ss:$16 sps:$4 sm:$0xff]  }
 0x72d   :  { %10201 = vmatpush2.bf16.msra.mxu0 %v13619_v2  ;;  %10242 = vmatpush2.bf16.msra.mxu1 %v13622_v57  ;;  %v13702_v2 = vld [vmem:[%s22099_s5 + $0x46c] ss:$16 sps:$4 sm:$0xff]   ;;  %v13697_v57 = vld [vmem:[%s22099_s5 + $0x460] ss:$16 sps:$4 sm:$0xff]  }
 0x72e   :  { %10527 = vmatprep.subr.bf16.mxu0 %v13627_v32  ;;  %10568 = vmatprep.subr.bf16.mxu1 %v13630_v56  ;;  %v13705_v32 = vld [vmem:[%s22099_s5 + $0x444] ss:$16 sps:$4 sm:$0xff]   ;;  %v13708_v56 = vld [vmem:[%s22099_s5 + $0x44c] ss:$16 sps:$4 sm:$0xff]  }
 0x730   :  { %10203 = vmatmul.mubr.bf16.vlgmr.msra.gmra.mxu0 %v9964_v5  ;;  %10244 = vmatmul.mubr.bf16.vlgmr.msra.gmra.mxu1 %v9964_v5  ;;  %v13709_v5 = vld [vmem:[%s22099_s5 + $0x420] ss:$16 sps:$4 sm:$0xff]  }
 0x731   :  { %10528 = vmatpush1.bf16.msra.mxu0 %v13625_v19  ;;  %12810 = vmatprep.mubr.msk.bf16.mxu0 %vm5449_vm1, %v10322_v42  ;;  %v13714_v19 = vld [vmem:[%s22099_s5 + $0x42c] ss:$16 sps:$4 sm:$0xff]  }
 0x732   :  { %10569 = vmatpush1.bf16.msra.mxu1 %v13628_v9  ;;  %12811 = vmatprep.mubr.msk.bf16.mxu1 %vm5449_vm1, %v10322_v42  ;;  %v13712_v9 = vld [vmem:[%s22099_s5 + $0x428] ss:$16 sps:$4 sm:$0xff]   ;;  %v13717_v42 = vld [vmem:[%s22099_s5 + $0x404] ss:$16 sps:$4 sm:$0xff]  }
 0x733   :  { %10529 = vmatprep.subr.bf16.mxu0 %v13633_v29  ;;  %10570 = vmatprep.subr.bf16.mxu1 %v13636_v10  ;;  %v13720_v29 = vld [vmem:[%s22099_s5 + $0x40c] ss:$16 sps:$4 sm:$0xff]   ;;  %v13715_v10 = vld [vmem:[%s22099_s5 + $0x400] ss:$16 sps:$4 sm:$0xff]  }
 0x735   :  { %10530 = vmatpush1.bf16.msra.mxu0 %v13631_v4  ;;  %v13718_v4 = vld [vmem:[%s22099_s5 + $0x408] ss:$16 sps:$4 sm:$0xff]  }
 0x736   :  { %10571 = vmatpush1.bf16.msra.mxu1 %v13634_v62  ;;  %10531 = vmatprep.subr.bf16.mxu0 %v13639_v15  ;;  %v13723_v62 = vld [vmem:[%s22099_s5 + $0x3e4] ss:$16 sps:$4 sm:$0xff]   ;;  %v13726_v15 = vld [vmem:[%s22099_s5 + $0x3ec] ss:$16 sps:$4 sm:$0xff]  }
 0x737   :  { %10572 = vmatprep.subr.bf16.mxu1 %v13642_v11  ;;  %v13721_v11 = vld [vmem:[%s22099_s5 + $0x3e0] ss:$16 sps:$4 sm:$0xff]  }
 0x739   :  { %10532 = vmatpush1.bf16.msra.mxu0 %v13637_v33  ;;  %v13724_v33 = vld [vmem:[%s22099_s5 + $0x3e8] ss:$16 sps:$4 sm:$0xff]  }
 0x73a   :  { %10573 = vmatpush1.bf16.msra.mxu1 %v13640_v43  ;;  %10533 = vmatprep.subr.bf16.mxu0 %v13645_v27  ;;  %v13729_v43 = vld [vmem:[%s22099_s5 + $0x3c4] ss:$16 sps:$4 sm:$0xff]   ;;  %v13732_v27 = vld [vmem:[%s22099_s5 + $0x3cc] ss:$16 sps:$4 sm:$0xff]  }
 0x73b   :  { %10574 = vmatprep.subr.bf16.mxu1 %v13648_v17  ;;  %v13727_v17 = vld [vmem:[%s22099_s5 + $0x3c0] ss:$16 sps:$4 sm:$0xff]  }
 0x73d   :  { %10534 = vmatpush1.bf16.msra.mxu0 %v13643_v31  ;;  %v13730_v31 = vld [vmem:[%s22099_s5 + $0x3c8] ss:$16 sps:$4 sm:$0xff]  }
 0x73e   :  { %10575 = vmatpush1.bf16.msra.mxu1 %v13646_v54  ;;  %10535 = vmatprep.subr.bf16.mxu0 %v13651_v59  ;;  %v13735_v54 = vld [vmem:[%s22099_s5 + $0x4e4] ss:$16 sps:$4 sm:$0xff]   ;;  %v13738_v59 = vld [vmem:[%s22099_s5 + $0x4ec] ss:$16 sps:$4 sm:$0xff]  }
 0x73f   :  { %10576 = vmatprep.subr.bf16.mxu1 %v13654_v8  ;;  %v13733_v8 = vld [vmem:[%s22099_s5 + $0x4e0] ss:$16 sps:$4 sm:$0xff]  }
 0x741   :  { %10536 = vmatpush1.bf16.msra.mxu0 %v13649_v25  ;;  %v13736_v25 = vld [vmem:[%s22099_s5 + $0x4e8] ss:$16 sps:$4 sm:$0xff]  }
 0x742   :  { %10577 = vmatpush1.bf16.msra.mxu1 %v13652_v40  ;;  %10537 = vmatprep.subr.bf16.mxu0 %v13657_v52  ;;  %v13741_v40 = vld [vmem:[%s22099_s5 + $0x4c4] ss:$16 sps:$4 sm:$0xff]   ;;  %v13744_v52 = vld [vmem:[%s22099_s5 + $0x4cc] ss:$16 sps:$4 sm:$0xff]  }
 0x743   :  { %10578 = vmatprep.subr.bf16.mxu1 %v13660_v50  ;;  %v13739_v50 = vld [vmem:[%s22099_s5 + $0x4c0] ss:$16 sps:$4 sm:$0xff]  }
 0x745   :  { %10538 = vmatpush1.bf16.msra.mxu0 %v13655_v12  ;;  %v13742_v12 = vld [vmem:[%s22099_s5 + $0x4c8] ss:$16 sps:$4 sm:$0xff]  }
 0x746   :  { %10579 = vmatpush1.bf16.msra.mxu1 %v13658_v14  ;;  %10539 = vmatprep.subr.bf16.mxu0 %v13663_v63  ;;  %v13747_v14 = vld [vmem:[%s22099_s5 + $0x5e4] ss:$16 sps:$4 sm:$0xff]   ;;  %v13750_v63 = vld [vmem:[%s22099_s5 + $0x5ec] ss:$16 sps:$4 sm:$0xff]  }
 0x747   :  { %10580 = vmatprep.subr.bf16.mxu1 %v13666_v55  ;;  %v13745_v55 = vld [vmem:[%s22099_s5 + $0x5e0] ss:$16 sps:$4 sm:$0xff]  }
 0x749   :  { %10540 = vmatpush1.bf16.msra.mxu0 %v13661_v35  ;;  %v10682_v35 = vpack.c.b16 %v21493_v60, %v21493_v60  ;;  %v13751_v60 = vld [vmem:[%s22099_s5 + $0x5c0] ss:$16 sps:$4 sm:$0xff]  }
 0x74a   :  { %10581 = vmatpush1.bf16.msra.mxu1 %v13664_v46  ;;  %10541 = vmatprep.subr.bf16.mxu0 %v13669_v44  ;;  %v13748_v46 = vld [vmem:[%s22099_s5 + $0x5e8] ss:$16 sps:$4 sm:$0xff]   ;;  %v13753_v44 = vld [vmem:[%s22099_s5 + $0x5c4] ss:$16 sps:$4 sm:$0xff]  }
 0x74b   :  { %10582 = vmatprep.subr.bf16.mxu1 %v13672_v21  ;;  %v11044_v21 = vpack.c.b16 %v21534_v58, %v21534_v58  ;;  %v13759_v58 = vld [vmem:[%s22099_s5 + $0x5a4] ss:$16 sps:$4 sm:$0xff]  }
 0x74d   :  { %10542 = vmatpush1.bf16.msra.mxu0 %v13667_v38  ;;  %v13756_v38 = vld [vmem:[%s22099_s5 + $0x5cc] ss:$16 sps:$4 sm:$0xff]  }
 0x74e   :  { %10583 = vmatpush1.bf16.msra.mxu1 %v13670_v13  ;;  %10555 = vmatprep.subr.bf16.mxu0 %v13675_v16  ;;  %v13754_v13 = vld [vmem:[%s22099_s5 + $0x5c8] ss:$16 sps:$4 sm:$0xff]   ;;  %v13762_v16 = vld [vmem:[%s22099_s5 + $0x5ac] ss:$16 sps:$4 sm:$0xff]  }
 0x74f   :  { %10596 = vmatprep.subr.bf16.mxu1 %v13678_v51  ;;  %v13757_v51 = vld [vmem:[%s22099_s5 + $0x5a0] ss:$16 sps:$4 sm:$0xff]  }
 0x751   :  { %10556 = vmatpush2.bf16.msra.mxu0 %v13673_v53  ;;  %v13760_v53 = vld [vmem:[%s22099_s5 + $0x5a8] ss:$16 sps:$4 sm:$0xff]  }
 0x752   :  { %10597 = vmatpush2.bf16.msra.mxu1 %v13676_v48  ;;  %10557 = vmatprep.subr.bf16.mxu0 %v13681_v41  ;;  %v13765_v48 = vld [vmem:[%s22099_s5 + $0x584] ss:$16 sps:$4 sm:$0xff]   ;;  %v13768_v41 = vld [vmem:[%s22099_s5 + $0x58c] ss:$16 sps:$4 sm:$0xff]  }
 0x753   :  { %10598 = vmatprep.subr.bf16.mxu1 %v13684_v20  ;;  %v13763_v20 = vld [vmem:[%s22099_s5 + $0x580] ss:$16 sps:$4 sm:$0xff]  }
 0x755   :  { %10558 = vmatpush2.bf16.msra.mxu0 %v13679_v1  ;;  %v13766_v1 = vld [vmem:[%s22099_s5 + $0x588] ss:$16 sps:$4 sm:$0xff]  }
 0x756   :  { %10599 = vmatpush2.bf16.msra.mxu1 %v13682_v7  ;;  %10888 = vmatprep.subr.bf16.mxu0 %v13687_v24  ;;  %v13771_v7 = vld [vmem:[%s22099_s5 + $0x564] ss:$16 sps:$4 sm:$0xff]   ;;  %v13774_v24 = vld [vmem:[%s22099_s5 + $0x56c] ss:$16 sps:$4 sm:$0xff]  }
 0x757   :  { %10929 = vmatprep.subr.bf16.mxu1 %v13690_v47  ;;  %v13769_v47 = vld [vmem:[%s22099_s5 + $0x560] ss:$16 sps:$4 sm:$0xff]  }
 0x758   :  { %10560 = vmatmul.mubr.bf16.vlgmr.msra.gmra.mxu0 %v10321_v30 }
 0x759   :  { %10601 = vmatmul.mubr.bf16.vlgmr.msra.gmra.mxu1 %v10321_v30  ;;  %10889 = vmatpush1.bf16.msra.mxu0 %v13685_v0  ;;  %v13772_v0 = vld [vmem:[%s22099_s5 + $0x568] ss:$16 sps:$4 sm:$0xff]   ;;  %v13777_v30 = vld [vmem:[%s22099_s5 + $0x544] ss:$16 sps:$4 sm:$0xff]  }
 0x75a   :  { %12892 = vmatprep.mubr.msk.bf16.mxu0 %vm5449_vm1, %v10683_v22  ;;  %10930 = vmatpush1.bf16.msra.mxu1 %v13688_v3  ;;  %v13780_v3 = vld [vmem:[%s22099_s5 + $0x54c] ss:$16 sps:$4 sm:$0xff]  }
 0x75b   :  { %12893 = vmatprep.mubr.msk.bf16.mxu1 %vm5449_vm1, %v10683_v22  ;;  %10890 = vmatprep.subr.bf16.mxu0 %v13693_v49  ;;  %v13775_v49 = vld [vmem:[%s22099_s5 + $0x540] ss:$16 sps:$4 sm:$0xff]   ;;  %v13778_v22 = vld [vmem:[%s22099_s5 + $0x548] ss:$16 sps:$4 sm:$0xff]  }
 0x75c   :  { %10931 = vmatprep.subr.bf16.mxu1 %v13696_v28  ;;  %v13783_v28 = vld [vmem:[%s22099_s5 + $0x524] ss:$16 sps:$4 sm:$0xff]  }
 0x75d   :  { %10891 = vmatpush1.bf16.msra.mxu0 %v13691_v36  ;;  %v13786_v36 = vld [vmem:[%s22099_s5 + $0x52c] ss:$16 sps:$4 sm:$0xff]  }
 0x75e   :  { %10932 = vmatpush1.bf16.msra.mxu1 %v13694_v26  ;;  %10892 = vmatprep.subr.bf16.mxu0 %v13699_v23  ;;  %v13781_v26 = vld [vmem:[%s22099_s5 + $0x520] ss:$16 sps:$4 sm:$0xff]   ;;  %v13784_v23 = vld [vmem:[%s22099_s5 + $0x528] ss:$16 sps:$4 sm:$0xff]  }
 0x75f   :  { %10933 = vmatprep.subr.bf16.mxu1 %v13702_v2  ;;  %v13789_v2 = vld [vmem:[%s22099_s5 + $0x504] ss:$16 sps:$4 sm:$0xff]  }
 0x761   :  { %10893 = vmatpush1.bf16.msra.mxu0 %v13697_v57  ;;  %v13792_v57 = vld [vmem:[%s22099_s5 + $0x50c] ss:$16 sps:$4 sm:$0xff]  }
 0x762   :  { %10934 = vmatpush1.bf16.msra.mxu1 %v13700_v34  ;;  %10894 = vmatprep.subr.bf16.mxu0 %v13705_v32  ;;  %v13787_v34 = vld [vmem:[%s22099_s5 + $0x500] ss:$16 sps:$4 sm:$0xff]   ;;  %v13790_v32 = vld [vmem:[%s22099_s5 + $0x508] ss:$16 sps:$4 sm:$0xff]  }
 0x763   :  { %10935 = vmatprep.subr.bf16.mxu1 %v13708_v56  ;;  %v13795_v56 = vld [vmem:[%s22099_s5 + $0x624] ss:$16 sps:$4 sm:$0xff]  }
 0x765   :  { %10895 = vmatpush1.bf16.msra.mxu0 %v13703_v39  ;;  %v13798_v39 = vld [vmem:[%s22099_s5 + $0x62c] ss:$16 sps:$4 sm:$0xff]  }
 0x766   :  { %10936 = vmatpush1.bf16.msra.mxu1 %v13706_v6  ;;  %10896 = vmatprep.subr.bf16.mxu0 %v13711_v18  ;;  %v13793_v6 = vld [vmem:[%s22099_s5 + $0x620] ss:$16 sps:$4 sm:$0xff]   ;;  %v13796_v18 = vld [vmem:[%s22099_s5 + $0x628] ss:$16 sps:$4 sm:$0xff]  }
 0x767   :  { %10937 = vmatprep.subr.bf16.mxu1 %v13714_v19  ;;  %v13801_v19 = vld [vmem:[%s22099_s5 + $0x604] ss:$16 sps:$4 sm:$0xff]  }
 0x769   :  { %10897 = vmatpush1.bf16.msra.mxu0 %v13709_v5  ;;  %v13804_v5 = vld [vmem:[%s22099_s5 + $0x60c] ss:$16 sps:$4 sm:$0xff]  }
 0x76a   :  { %10938 = vmatpush1.bf16.msra.mxu1 %v13712_v9  ;;  %10898 = vmatprep.subr.bf16.mxu0 %v13717_v42  ;;  %v13799_v9 = vld [vmem:[%s22099_s5 + $0x600] ss:$16 sps:$4 sm:$0xff]   ;;  %v13802_v42 = vld [vmem:[%s22099_s5 + $0x608] ss:$16 sps:$4 sm:$0xff]  }
 0x76b   :  { %10939 = vmatprep.subr.bf16.mxu1 %v13720_v29  ;;  %v11043_v29 = vpack.c.b16 %v21537_v61, %v21537_v61  ;;  %v13807_v61 = vld [vmem:[%s22101_s7 + $0x38] sm:$0xff]  }
 0x76d   :  { %10899 = vmatpush1.bf16.msra.mxu0 %v13715_v10  ;;  %v22747_v10 = vmov 0  }
 0x76e   :  { %10940 = vmatpush1.bf16.msra.mxu1 %v13718_v4  ;;  %10900 = vmatprep.subr.bf16.mxu0 %v13723_v62 }
 0x76f   :  { %10941 = vmatprep.subr.bf16.mxu1 %v13726_v15  ;;  %v13805_v15 = vld [vmem:[%s22101_s7 + $0xb8] sm:$0xff]  }
 0x771   :  { %10901 = vmatpush1.bf16.msra.mxu0 %v13721_v11  ;;  %v13806_v11 = vld [vmem:[%s22101_s7 + $0x78] sm:$0xff]  }
 0x772   :  { %10942 = vmatpush1.bf16.msra.mxu1 %v13724_v33  ;;  %10902 = vmatprep.subr.bf16.mxu0 %v13729_v43 }
 0x773   :  { %10943 = vmatprep.subr.bf16.mxu1 %v13732_v27  ;;  %v13808_v27 = vld [vmem:[%s22101_s7 + $0xb0] sm:$0xff]  }
 0x775   :  { %10903 = vmatpush1.bf16.msra.mxu0 %v13727_v17 }
 0x776   :  { %10944 = vmatpush1.bf16.msra.mxu1 %v13730_v31  ;;  %10916 = vmatprep.subr.bf16.mxu0 %v13735_v54  ;;  %v13809_v54 = vld [vmem:[%s22101_s7 + $0x70] sm:$0xff]  }
 0x777   :  { %10957 = vmatprep.subr.bf16.mxu1 %v13738_v59  ;;  %v13810_v59 = vld [vmem:[%s22101_s7 + $0x30] sm:$0xff]  }
 0x779   :  { %10917 = vmatpush2.bf16.msra.mxu0 %v13733_v8 }
 0x77a   :  { %10958 = vmatpush2.bf16.msra.mxu1 %v13736_v25  ;;  %10918 = vmatprep.subr.bf16.mxu0 %v13741_v40  ;;  %v13811_v40 = vld [vmem:[%s22101_s7 + $0xa8] sm:$0xff]  }
 0x77b   :  { %10959 = vmatprep.subr.bf16.mxu1 %v13744_v52  ;;  %v13812_v52 = vld [vmem:[%s22101_s7 + $0x68] sm:$0xff]  }
 0x77d   :  { %10919 = vmatpush2.bf16.msra.mxu0 %v13739_v50  ;;  %v13813_v50 = vld [vmem:[%s22101_s7 + $0x28] sm:$0xff]  }
 0x77e   :  { %10960 = vmatpush2.bf16.msra.mxu1 %v13742_v12  ;;  %11249 = vmatprep.subr.bf16.mxu0 %v13747_v14  ;;  %v13814_v12 = vld [vmem:[%s22101_s7 + $0xa0] sm:$0xff]  }
 0x77f   :  { %11290 = vmatprep.subr.bf16.mxu1 %v13750_v63  ;;  %v13815_v14 = vld [vmem:[%s22101_s7 + $0x60] sm:$0xff]  }
 0x780   :  { %10921 = vmatmul.mubr.bf16.vlgmr.msra.gmra.mxu0 %v10682_v35  ;;  %v13816_v63 = vld [vmem:[%s22101_s7 + $0x20] sm:$0xff]  }
 0x781   :  { %10962 = vmatmul.mubr.bf16.vlgmr.msra.gmra.mxu1 %v10682_v35  ;;  %11250 = vmatpush1.bf16.msra.mxu0 %v13745_v55  ;;  %v13818_v55 = vld [vmem:[%s22101_s7 + $0x58] sm:$0xff]  }
 0x782   :  { %12974 = vmatprep.mubr.msk.bf16.mxu0 %vm5449_vm1, %v11044_v21  ;;  %11291 = vmatpush1.bf16.msra.mxu1 %v13748_v46  ;;  %v13817_v35 = vld [vmem:[%s22101_s7 + $0x98] sm:$0xff]  }
 0x783   :  { %12975 = vmatprep.mubr.msk.bf16.mxu1 %vm5449_vm1, %v11044_v21  ;;  %11251 = vmatprep.subr.bf16.mxu0 %v13753_v44  ;;  %v13819_v46 = vld [vmem:[%s22101_s7 + $0x18] sm:$0xff]   ;;  %v13820_v44 = vld [vmem:[%s22101_s7 + $0x90] sm:$0xff]  }
 0x784   :  { %11292 = vmatprep.subr.bf16.mxu1 %v13756_v38 }
 0x785   :  { %11252 = vmatpush1.bf16.msra.mxu0 %v13751_v60  ;;  %v13821_v60 = vld [vmem:[%s22101_s7 + $0x50] sm:$0xff]  }
 0x786   :  { %11293 = vmatpush1.bf16.msra.mxu1 %v13754_v13  ;;  %11253 = vmatprep.subr.bf16.mxu0 %v13759_v58  ;;  %v13822_v13 = vld [vmem:[%s22101_s7 + $0x10] sm:$0xff]   ;;  %v13823_v58 = vld [vmem:[%s22101_s7 + $0x88] sm:$0xff]  }
 0x787   :  { %11294 = vmatprep.subr.bf16.mxu1 %v13762_v16 }
 0x789   :  { %11254 = vmatpush1.bf16.msra.mxu0 %v13757_v51 }
 0x78a   :  { %11295 = vmatpush1.bf16.msra.mxu1 %v13760_v53  ;;  %11255 = vmatprep.subr.bf16.mxu0 %v13765_v48 }
 0x78b   :  { %11296 = vmatprep.subr.bf16.mxu1 %v13768_v41  ;;  %v13824_v41 = vld [vmem:[%s22101_s7 + $0x48] sm:$0xff]  }
 0x78d   :  { %11256 = vmatpush1.bf16.msra.mxu0 %v13763_v20  ;;  %v13826_v20 = vld [vmem:[%s22101_s7 + $0x80] sm:$0xff]  }
 0x78e   :  { %11297 = vmatpush1.bf16.msra.mxu1 %v13766_v1  ;;  %11257 = vmatprep.subr.bf16.mxu0 %v13771_v7 }
 0x78f   :  { %11298 = vmatprep.subr.bf16.mxu1 %v13774_v24  ;;  %v13825_v24 = vld [vmem:[%s22101_s7 + $0x8] sm:$0xff]  }
 0x791   :  { %11258 = vmatpush1.bf16.msra.mxu0 %v13769_v47 }
 0x792   :  { %11299 = vmatpush1.bf16.msra.mxu1 %v13772_v0  ;;  %11259 = vmatprep.subr.bf16.mxu0 %v13777_v30  ;;  %v13827_v30 = vld [vmem:[%s22101_s7 + $0x40] sm:$0xff]  }
 0x793   :  { %11300 = vmatprep.subr.bf16.mxu1 %v13780_v3 }
 0x795   :  { %11260 = vmatpush1.bf16.msra.mxu0 %v13775_v49 }
 0x796   :  { %11301 = vmatpush1.bf16.msra.mxu1 %v13778_v22  ;;  %11261 = vmatprep.subr.bf16.mxu0 %v13783_v28  ;;  %v13829_v22 = vld [vmem:[%s22101_s7 + $0xc0] sm:$0xff]  }
 0x797   :  { %11302 = vmatprep.subr.bf16.mxu1 %v13786_v36  ;;  %v13828_v28 = vld [vmem:[%s22101_s7] sm:$0xff]  }
 0x799   :  { %11262 = vmatpush1.bf16.msra.mxu0 %v13781_v26 }
 0x79a   :  { %11303 = vmatpush1.bf16.msra.mxu1 %v13784_v23  ;;  %11263 = vmatprep.subr.bf16.mxu0 %v13789_v2 }
 0x79b   :  { %11304 = vmatprep.subr.bf16.mxu1 %v13792_v57 }
 0x79d   :  { %11264 = vmatpush1.bf16.msra.mxu0 %v13787_v34 }
 0x79e   :  { %11305 = vmatpush1.bf16.msra.mxu1 %v13790_v32  ;;  %11277 = vmatprep.subr.bf16.mxu0 %v13795_v56 }
 0x79f   :  { %11318 = vmatprep.subr.bf16.mxu1 %v13798_v39 }
 0x7a1   :  { %11278 = vmatpush2.bf16.msra.mxu0 %v13793_v6 }
 0x7a2   :  { %11319 = vmatpush2.bf16.msra.mxu1 %v13796_v18  ;;  %11279 = vmatprep.subr.bf16.mxu0 %v13801_v19 }
 0x7a3   :  { %11320 = vmatprep.subr.bf16.mxu1 %v13804_v5 }
 0x7a5   :  { %11280 = vmatpush2.bf16.msra.mxu0 %v13799_v9 }
 0x7a6   :  { %11321 = vmatpush2.bf16.msra.mxu1 %v13802_v42  ;;  %13003 = vmatprep.subr.bf16.mxu0 %v13806_v11  ;;  %v11335_v11 = vld [vmem:[%s22102_s6] sm:$0xf] }
 0x7a7   :  { %11620 = vmatprep.subr.bf16.mxu1 %v22747_v10 }
 0x7a8   :  { %11282 = vmatmul.mubr.bf16.vlgmr.msra.gmra.mxu0 %v11043_v29 }
 0x7a9   :  { %11323 = vmatmul.mubr.bf16.vlgmr.msra.gmra.mxu1 %v11043_v29  ;;  %13004 = vmatpush3.bf16.msra.mxu0 %v13807_v61 }
 0x7aa   :  { %11621 = vmatpush1.bf16.msra.mxu1 %v13805_v15  ;;  %13005 = vmatprep.subr.bf16.mxu0 %v13809_v54 }
 0x7ab   :  { %11622 = vmatprep.subr.bf16.mxu1 %v22747_v10 }
 0x7ad   :  { %13006 = vmatpush3.bf16.msra.mxu0 %v13810_v59 }
 0x7ae   :  { %11623 = vmatpush1.bf16.msra.mxu1 %v13808_v27  ;;  %13007 = vmatprep.subr.bf16.mxu0 %v13812_v52  ;;  %v11344_v52 = vrot.slane %v11335_v11, %v22745_v45 }
 0x7af   :  { %11624 = vmatprep.subr.bf16.mxu1 %v22747_v10 }
 0x7b1   :  { %13008 = vmatpush3.bf16.msra.mxu0 %v13813_v50 }
 0x7b2   :  { %11625 = vmatpush1.bf16.msra.mxu1 %v13811_v40  ;;  %13009 = vmatprep.subr.bf16.mxu0 %v13815_v14 }
 0x7b3   :  { %11626 = vmatprep.subr.bf16.mxu1 %v22747_v10 }
 0x7b5   :  { %13010 = vmatpush3.bf16.msra.mxu0 %v13816_v63 }
 0x7b6   :  { %11627 = vmatpush1.bf16.msra.mxu1 %v13814_v12  ;;  %13011 = vmatprep.subr.bf16.mxu0 %v13818_v55 }
 0x7b7   :  { %11628 = vmatprep.subr.bf16.mxu1 %v22747_v10 }
 0x7b9   :  { %13012 = vmatpush3.bf16.msra.mxu0 %v13819_v46 }
 0x7ba   :  { %11629 = vmatpush1.bf16.msra.mxu1 %v13817_v35  ;;  %13013 = vmatprep.subr.bf16.mxu0 %v13821_v60 }
 0x7bb   :  { %11630 = vmatprep.subr.bf16.mxu1 %v22747_v10 }
 0x7bd   :  { %13014 = vmatpush3.bf16.msra.mxu0 %v13822_v13 }
 0x7be   :  { %11631 = vmatpush1.bf16.msra.mxu1 %v13820_v44  ;;  %13015 = vmatprep.subr.bf16.mxu0 %v13824_v41 }
 0x7bf   :  { %11632 = vmatprep.subr.bf16.mxu1 %v22747_v10 }
 0x7c1   :  { %13016 = vmatpush3.bf16.msra.mxu0 %v13825_v24 }
 0x7c2   :  { %11633 = vmatpush1.bf16.msra.mxu1 %v13823_v58  ;;  %13017 = vmatprep.subr.bf16.mxu0 %v13827_v30 }
 0x7c3   :  { %11634 = vmatprep.subr.bf16.mxu1 %v22747_v10 }
 0x7c5   :  { %13018 = vmatpush3.bf16.msra.mxu0 %v13828_v28 }
 0x7c6   :  { %11635 = vmatpush1.bf16.msra.mxu1 %v13826_v20 }
 0x7c7   :  { %11650 = vmatprep.subr.bf16.mxu1 %v22747_v10 }
 0x7c8   :  { %v9888_v4 = vpop.f32.mrf.mxu0  ;;  %v9929_v62 = vpop.f32.mrf.mxu1 }
 0x7ca   :  { %v9890_v33 = vpop.f32.mrf.mxu0  ;;  %v9931_v43 = vpop.f32.mrf.mxu1  ;;  %11651 = vmatpush2.bf16.msra.mxu1 %v13829_v22 }
 0x7cc   :  { %v9892_v17 = vpop.f32.mrf.mxu0  ;;  %v9933_v31 = vpop.f32.mrf.mxu1 }
 0x7cd   :  { %v11340_v17 = vrot.slane %v11335_v11, %v22746_v37 }
 0x7ce   :  { %v9893_v8 = vpop.f32.mrf.mxu0  ;;  %v9934_v25 = vpop.f32.mrf.mxu1 }
 0x7f0   :  { %v10204_v21 = vpop.f32.mrf.mxu0  ;;  %v10245_v38 = vpop.f32.mrf.mxu1 }
 0x7f1   :  { %v10205_v16 = vadd.f32 %v10204_v21, %v9888_v4  ;;  %v10246_v51 = vadd.f32 %v10245_v38, %v9929_v62 }
 0x7f2   :  { %v10206_v53 = vpop.f32.mrf.mxu0  ;;  %v10247_v48 = vpop.f32.mrf.mxu1 }
 0x7f3   :  { %v10207_v1 = vadd.f32 %v10206_v53, %v9890_v33  ;;  %v10248_v7 = vadd.f32 %v10247_v48, %v9931_v43  ;;  %v22748_v33 = vld [vmem:[#allocation48_spill] sm:$0xff] }
 0x7f4   :  { %v10208_v47 = vpop.f32.mrf.mxu0  ;;  %v10249_v0 = vpop.f32.mrf.mxu1  ;;  %v11347_v43 = vsub.s32 2, %v22748_v33  ;;  %v11351_v61 = vsub.s32 3, %v22748_v33 }
 0x7f5   :  { %v12976_v0 = vld [vmem:[%s22103_s8] ss:$0 sm:$0xff] }
 0x7f6   :  { %v10209_v3 = vpop.f32.mrf.mxu0  ;;  %v10250_v49 = vpop.f32.mrf.mxu1  ;;  %v11348_v59 = vrot.slane %v11335_v11, %v11347_v43  ;;  %v11352_v63 = vrot.slane %v11335_v11, %v11351_v61 }
 0x818   :  { %v10561_v36 = vpop.f32.mrf.mxu0 }
 0x819   :  { %v10609_v26 = vadd.f32 %v10561_v36, %v10205_v16  ;;  %v10602_v23 = vpop.f32.mrf.mxu1 }
 0x81a   :  { %v10611_v2 = vadd.f32 %v10602_v23, %v10246_v51  ;;  %v10563_v57 = vpop.f32.mrf.mxu0 }
 0x81b   :  { %v10610_v34 = vadd.f32 %v10563_v57, %v10207_v1  ;;  %v10604_v32 = vpop.f32.mrf.mxu1 }
 0x81c   :  { %v10612_v56 = vadd.f32 %v10604_v32, %v10248_v7  ;;  %v10565_v39 = vpop.f32.mrf.mxu0 }
 0x81d   :  { %v10606_v6 = vpop.f32.mrf.mxu1 }
 0x81e   :  { %v10566_v18 = vpop.f32.mrf.mxu0 }
 0x81f   :  { %v10607_v19 = vpop.f32.mrf.mxu1 }
 0x840   :  { %v10922_v5 = vpop.f32.mrf.mxu0 }
 0x841   :  { %v10963_v9 = vpop.f32.mrf.mxu1  ;;  %v10970_v27 = vadd.f32 %v10922_v5, %v10609_v26 }
 0x842   :  { %v10924_v42 = vpop.f32.mrf.mxu0  ;;  %v10972_v31 = vadd.f32 %v10963_v9, %v10611_v2 }
 0x843   :  { %v10965_v29 = vpop.f32.mrf.mxu1  ;;  %v10971_v8 = vadd.f32 %v10924_v42, %v10610_v34 }
 0x844   :  { %v10926_v10 = vpop.f32.mrf.mxu0  ;;  %v10973_v50 = vadd.f32 %v10965_v29, %v10612_v56 }
 0x845   :  { %v10967_v4 = vpop.f32.mrf.mxu1 }
 0x846   :  { %v10927_v62 = vpop.f32.mrf.mxu0 }
 0x847   :  { %v10968_v15 = vpop.f32.mrf.mxu1 }
 0x868   :  { %v11283_v54 = vpop.f32.mrf.mxu0 }
 0x869   :  { %v11331_v25 = vadd.f32 %v11283_v54, %v10970_v27  ;;  %v11324_v40 = vpop.f32.mrf.mxu1 }
 0x86a   :  { %v11333_v12 = vadd.f32 %v11324_v40, %v10972_v31  ;;  %v11285_v14 = vpop.f32.mrf.mxu0 }
 0x86b   :  { %v11357_v55 = vadd.f32 %v11340_v17, %v11331_v25  ;;  %v11332_v35 = vadd.f32 %v11285_v14, %v10971_v8  ;;  %v11326_v46 = vpop.f32.mrf.mxu1 }
 0x86c   :  { %v11359_v44 = vadd.f32 %v11348_v59, %v11333_v12  ;;  %v11334_v21 = vadd.f32 %v11326_v46, %v10973_v50  ;;  %v11287_v38 = vpop.f32.mrf.mxu0 }
 0x86d   :  { %v11358_v60 = vadd.f32 %v11344_v52, %v11332_v35  ;;  %v11328_v37 = vpop.f32.mrf.mxu1  ;;  %v11361_v13 = vmax.f32 %v11357_v55, 0.0 }
 0x86e   :  { %v11360_v58 = vadd.f32 %v11352_v63, %v11334_v21  ;;  %v11288_v16 = vpop.f32.mrf.mxu0  ;;  %v11363_v51 = vmax.f32 %v11359_v44, 0.0 }
 0x86f   :  { %v11362_v53 = vmax.f32 %v11358_v60, 0.0  ;;  %v11329_v48 = vpop.f32.mrf.mxu1  ;;  %v11365_v20 = vpack.c.bf16 %v11361_v13, %v11361_v13 }
 0x870   :  { %v11364_v41 = vmax.f32 %v11360_v58, 0.0  ;;  %v11367_v7 = vpack.c.bf16 %v11363_v51, %v11363_v51 }
 0x871   :  { %v11366_v45 = vpack.c.bf16 %v11362_v53, %v11362_v53 }
 0x872   :  { %v11368_v1 = vpack.c.bf16 %v11364_v41, %v11364_v41 }
 0x873   :  { %11612 = vmatprep.mubr.bf16.mxu0 %v11366_v45 }
 0x874   :  { %13002 = vmatprep.mubr.msk.bf16.mxu1 %vm11576_vm10, %v11368_v1  ;;  %11613 = vmatmul.mubr.bf16.vlgmr.msra.gmra.mxu0 %v11365_v20 }
 0x875   :  { %11653 = vmatmul.mubr.bf16.vlgmr.msra.gmra.mxu1 %v11367_v7 }
 0x934   :  { %v13019_v24 = vpop.f32.mrf.mxu0 }
 0x935   :  { %v11654_v47 = vpop.f32.mrf.mxu1 }
 0x936   :  { %v13020_v30 = vpop.f32.mrf.mxu0 }
 0x937   :  { %v13021_v3 = vadd.f32 %v13020_v30, %v13019_v24  ;;  %v11656_v49 = vpop.f32.mrf.mxu1 }
 0x938   :  { %v13022_v22 = vpop.f32.mrf.mxu0 }
 0x939   :  { %v11615_v28 = vadd.f32 %v13021_v3, %v12976_v0  ;;  %v11657_v36 = vpop.f32.mrf.mxu1 }
 0x93a   :  { %v13023_v26 = vpop.f32.mrf.mxu0 }
 0x93b   :  { %v11658_v23 = vpop.f32.mrf.mxu1  ;;  %v11655_v2 = vadd.f32 %v11654_v47, %v11615_v28 }
 0x93d   :  { %11660 = vmax.xlane.f32.xlu0 %v11655_v2 }
 0x9c6   :  { %v11661_v57 = vpop.xlane.xlu0 %11660 }
 0x9c7   :  { %v11662_v34 = vsub.f32 %v11655_v2, %v11661_v57 }
 0x9c9   :  { %v11663_v32 = vmul.f32 1.442695, %v11662_v34 }
 0x9cb   :  { %13830 = vpow2.f32 %v11663_v32 }
 0x9d8   :  { %v13831_v56 = vpop.eup %13830 }
 0x9d9   :  { %11665 = vadd.xlane.f32.xlu1 %v13831_v56 }
 0xa62   :  { %v11666_v39 = vpop.xlane.xlu1 %11665 }
 0xa63   :  { %13832 = vlog2.f32 %v11666_v39 }
 0xa70   :  { %v13833_v6 = vpop.eup %13832 }
 0xa71   :  { %v11668_v18 = vmul.f32 0.6931472, %v13833_v6 }
 0xa73   :  { %v11669_v19 = vadd.f32 %v11668_v18, %v11661_v57 }
 0xa75   :  { %v11670_v5 = vsub.f32 %v11655_v2, %v11669_v19 }
 0xa77   :  { %11671 = vst [vmem:[%s22104_s9] sm:$0xff] %v11670_v5 }

</bundles_post_ra>
